<compile_context>
chip_gen: v6e
topology: v6e:2x2x1
jax: 0.10.0
libtpu: 0.0.40
codegen_flags: <defaults>
</compile_context>

<pallas_src>
import jax
import jax.numpy as jnp
from jax import lax
from jax.experimental import pallas as pl
from jax.experimental.pallas import tpu as pltpu

EPS = 1e-5
LANE = 128
OFF = 16            # interior column offset inside the pad scratch (bf16-tile aligned)


def _round_up(v, m):
    return (v + m - 1) // m * m


def _vmem_limit_bytes():
    cap = 64 * 1024 * 1024
    try:
        info = pltpu.get_tpu_info()
        cap = int(getattr(info, "vmem_capacity_bytes", cap))
    except Exception:
        pass
    return max(32 * 1024 * 1024, min(96 * 1024 * 1024, cap // 2))


def _largest_divisor_block(n, per_item_bytes, budget=8 * 1024 * 1024):
    best = 1
    for d in range(1, n + 1):
        if n % d == 0 and d * per_item_bytes <= budget:
            best = d
    return best


# --------------------------------------------------------------------------
# In-kernel helpers
# --------------------------------------------------------------------------
def _pad_into_scratch(pad_scr, a, H, W):
    """Write activation `a` (H, W, C) bf16 into pad_scr with a zero 1-px halo.

    Interior lives at rows [1, H+1), cols [OFF, OFF+W): the store is
    sublane-aligned.  Halo zeroing uses 8-wide bands (cheap, every step)."""
    C = a.shape[-1]
    zb = jnp.zeros((1, W + 16, C), jnp.bfloat16)
    zc = jnp.zeros((H, 8, C), jnp.bfloat16)
    pad_scr[0:1, OFF - 8:OFF + W + 8, :] = zb
    pad_scr[H + 1:H + 2, OFF - 8:OFF + W + 8, :] = zb
    pad_scr[1:H + 1, OFF - 8:OFF, :] = zc
    pad_scr[1:H + 1, OFF + W:OFF + W + 8, :] = zc
    pad_scr[1:H + 1, OFF:OFF + W, :] = a


def _conv_from_padded(pad_scr, patches_ref, w_ref, H, W, Cin):
    """3x3 conv: write 9 taps once into the patch scratch, then one MXU dot."""
    for idx in range(9):
        kh, kw = idx // 3, idx % 3
        tap = pad_scr[kh:kh + H, OFF - 1 + kw:OFF - 1 + kw + W, :]
        patches_ref[:, idx * Cin:(idx + 1) * Cin] = tap.reshape(H * W, Cin)
    return jnp.dot(patches_ref[...], w_ref[...],
                   preferred_element_type=jnp.float32)          # (H*W, Pp) f32


def _store_stats(stats_ref, y, count):
    """Per-image BN partials from the f32 accumulator: row0 = sum, row1 = M2."""
    s = jnp.sum(y, axis=0, keepdims=True)                       # (1, Pp)
    mu = s / count
    m2 = jnp.sum((y - mu) ** 2, axis=0, keepdims=True)
    stats_ref[0, 0:1, :] = s
    stats_ref[0, 1:2, :] = m2


# --------------------------------------------------------------------------
# Kernels
# --------------------------------------------------------------------------
def _conv1_kernel(x_ref, w_ref, y_ref, stats_ref, pad_scr, patches_ref):
    # x_ref: (1,H,W,Cp) f32   w_ref: (9*Cp, Pp) bf16
    # y_ref: (1,H,W,Pp) bf16  stats_ref: (1,2,Pp) f32
    _, H, W, Pp = y_ref.shape
    Cp = x_ref.shape[-1]
    a = x_ref[0].astype(jnp.bfloat16)                           # (H,W,Cp)
    _pad_into_scratch(pad_scr, a, H, W)
    y = _conv_from_padded(pad_scr, patches_ref, w_ref, H, W, Cp)
    _store_stats(stats_ref, y, float(H * W))
    y_ref[...] = y.reshape(1, H, W, Pp).astype(jnp.bfloat16)


def _bn_relu_conv2_kernel(y1_ref, scale_ref, shift_ref, w_ref,
                          y2_ref, stats_ref, pad_scr, patches_ref):
    # y1_ref: (1,H,W,Pp) bf16   scale/shift: (1,Pp) f32   w_ref: (9*Pp,Pp) bf16
    _, H, W, Pp = y2_ref.shape
    sc = scale_ref[...].reshape(1, 1, Pp)
    sh = shift_ref[...].reshape(1, 1, Pp)
    a = jnp.maximum(y1_ref[0].astype(jnp.float32) * sc + sh,
                    0.0).astype(jnp.bfloat16)                   # (H,W,Pp)
    _pad_into_scratch(pad_scr, a, H, W)
    y = _conv_from_padded(pad_scr, patches_ref, w_ref, H, W, Pp)
    _store_stats(stats_ref, y, float(H * W))
    y2_ref[...] = y.reshape(1, H, W, Pp).astype(jnp.bfloat16)


def _bn_add_relu_kernel(y2_ref, xres_ref, scale_ref, shift_ref, out_ref):
    # out = relu(bn2(conv2_out) + identity); pure bandwidth pass.
    Pp = out_ref.shape[-1]
    sc = scale_ref[...].reshape(1, 1, 1, Pp)
    sh = shift_ref[...].reshape(1, 1, 1, Pp)
    out_ref[...] = jnp.maximum(
        y2_ref[...].astype(jnp.float32) * sc + sh + xres_ref[...], 0.0)


# --------------------------------------------------------------------------
# Host-side wrapper
# --------------------------------------------------------------------------
def _fold_bn(stats, gamma, beta, tile_count):
    """Chan-combine per-image [sum, M2] partials into BN scale/shift."""
    sums = stats[:, 0, :]                                       # (T, Pp)
    m2s = stats[:, 1, :]
    total = stats.shape[0] * tile_count
    mean = jnp.sum(sums, axis=0) / total
    mean_i = sums / tile_count
    m2 = jnp.sum(m2s, axis=0) + tile_count * jnp.sum((mean_i - mean[None, :]) ** 2,
                                                     axis=0)
    var = jnp.maximum(m2 / total, 0.0)
    scale = gamma * lax.rsqrt(var + EPS)
    shift = beta - mean * scale
    return scale.reshape(1, -1), shift.reshape(1, -1)


def basic_block(x_nchw, w1, g1, b1, w2, g2, b2):
    """x_nchw: (N,C,H,W) f32. w1/w2 in HWIO, g*/b* of shape (planes,)."""
    N, C, H, W = x_nchw.shape
    P = w1.shape[-1]
    assert C == P, "no-downsample BasicBlock requires in_planes == planes"

    Cp = _round_up(C, LANE)
    Pp = _round_up(P, LANE)

    # Single channel-padded NHWC f32 array: conv1 input AND stage-3 residual.
    x_p = jnp.pad(jnp.transpose(x_nchw, (0, 2, 3, 1)).astype(jnp.float32),
                  ((0, 0), (0, 0), (0, 0), (0, Cp - C)))

    # 3x3 taps folded into the contraction dim: (3,3,Cin,P) -> (9*Cin_p, Pp) bf16.
    w1f = jnp.pad(w1, ((0, 0), (0, 0), (0, Cp - C), (0, Pp - P))
                  ).reshape(9 * Cp, Pp).astype(jnp.bfloat16)
    w2f = jnp.pad(w2, ((0, 0), (0, 0), (0, Pp - P), (0, Pp - P))
                  ).reshape(9 * Pp, Pp).astype(jnp.bfloat16)

    g1p = jnp.pad(g1.astype(jnp.float32), (0, Pp - P))
    b1p = jnp.pad(b1.astype(jnp.float32), (0, Pp - P))
    g2p = jnp.pad(g2.astype(jnp.float32), (0, Pp - P))
    b2p = jnp.pad(b2.astype(jnp.float32), (0, Pp - P))

    cparams = pltpu.CompilerParams(
        dimension_semantics=("parallel",),
        vmem_limit_bytes=_vmem_limit_bytes())

    cnt = float(H * W)
    Wp = W + 24                       # pad-scratch width (interior at col OFF=16)

    # --- stage 1: conv1 + per-image BN partials ----------------------------
    y1, st1 = pl.pallas_call(
        _conv1_kernel,
        grid=(N,),
        in_specs=[pl.BlockSpec((1, H, W, Cp), lambda n: (n, 0, 0, 0)),
                  pl.BlockSpec((9 * Cp, Pp), lambda n: (0, 0))],
        out_specs=[pl.BlockSpec((1, H, W, Pp), lambda n: (n, 0, 0, 0)),
                   pl.BlockSpec((1, 2, Pp), lambda n: (n, 0, 0))],
        out_shape=[jax.ShapeDtypeStruct((N, H, W, Pp), jnp.bfloat16),
                   jax.ShapeDtypeStruct((N, 2, Pp), jnp.float32)],
        scratch_shapes=[pltpu.VMEM((H + 2, Wp, Cp), jnp.bfloat16),
                        pltpu.VMEM((H * W, 9 * Cp), jnp.bfloat16)],
        compiler_params=cparams,
    )(x_p, w1f)

    scale1, shift1 = _fold_bn(st1, g1p, b1p, cnt)

    # --- stage 2: bn1 + relu + conv2 + per-image BN partials ----------------
    y2, st2 = pl.pallas_call(
        _bn_relu_conv2_kernel,
        grid=(N,),
        in_specs=[pl.BlockSpec((1, H, W, Pp), lambda n: (n, 0, 0, 0)),
                  pl.BlockSpec((1, Pp), lambda n: (0, 0)),
                  pl.BlockSpec((1, Pp), lambda n: (0, 0)),
                  pl.BlockSpec((9 * Pp, Pp), lambda n: (0, 0))],
        out_specs=[pl.BlockSpec((1, H, W, Pp), lambda n: (n, 0, 0, 0)),
                   pl.BlockSpec((1, 2, Pp), lambda n: (n, 0, 0))],
        out_shape=[jax.ShapeDtypeStruct((N, H, W, Pp), jnp.bfloat16),
                   jax.ShapeDtypeStruct((N, 2, Pp), jnp.float32)],
        scratch_shapes=[pltpu.VMEM((H + 2, Wp, Pp), jnp.bfloat16),
                        pltpu.VMEM((H * W, 9 * Pp), jnp.bfloat16)],
        compiler_params=cparams,
    )(y1, scale1, shift1, w2f)

    scale2, shift2 = _fold_bn(st2, g2p, b2p, cnt)

    # --- stage 3: bn2 + residual add + relu (pure bandwidth) ---------------
    bn_blk = _largest_divisor_block(N, H * W * Pp * 20)
    out = pl.pallas_call(
        _bn_add_relu_kernel,
        grid=(N // bn_blk,),
        in_specs=[pl.BlockSpec((bn_blk, H, W, Pp), lambda n: (n, 0, 0, 0)),
                  pl.BlockSpec((bn_blk, H, W, Cp), lambda n: (n, 0, 0, 0)),
                  pl.BlockSpec((1, Pp), lambda n: (0, 0)),
                  pl.BlockSpec((1, Pp), lambda n: (0, 0))],
        out_specs=pl.BlockSpec((bn_blk, H, W, Pp), lambda n: (n, 0, 0, 0)),
        out_shape=jax.ShapeDtypeStruct((N, H, W, Pp), jnp.float32),
        input_output_aliases={1: 0},            # reuse the residual's HBM buffer
        compiler_params=cparams,
    )(y2, x_p, scale2, shift2)

    return jnp.transpose(out[..., :P], (0, 3, 1, 2))   # back to NCHW


# --------------------------------------------------------------------------
# Pure-JAX reference (NCHW convs + training-mode BN)
# --------------------------------------------------------------------------
def _conv_ref(x, w_hwio, dtype):
    w_oihw = jnp.transpose(w_hwio, (3, 2, 0, 1)).astype(dtype)
    return lax.conv_general_dilated(
        x.astype(dtype), w_oihw, window_strides=(1, 1),
        padding=((1, 1), (1, 1)),
        dimension_numbers=("NCHW", "OIHW", "NCHW"),
        preferred_element_type=jnp.float32)


def _bn_fold_ref(y, g, b):
    mean = jnp.mean(y, axis=(0, 2, 3))
    var = jnp.mean((y - mean.reshape(1, -1, 1, 1)) ** 2, axis=(0, 2, 3))
    scale = g * lax.rsqrt(var + EPS)
    shift = b - mean * scale
    return scale.reshape(1, -1, 1, 1), shift.reshape(1, -1, 1, 1)


def _reference(x, w1, g1, b1, w2, g2, b2, matmul_dtype=jnp.float32,
               bf16_intermediates=False):
    cast = (lambda t: t.astype(jnp.bfloat16).astype(jnp.float32)) \
        if bf16_intermediates else (lambda t: t)
    y1 = _conv_ref(x, w1, matmul_dtype)
    s1, h1 = _bn_fold_ref(y1, g1, b1)
    a1 = jnp.maximum(cast(y1) * s1 + h1, 0.0)
    y2 = _conv_ref(a1, w2, matmul_dtype)
    s2, h2 = _bn_fold_ref(y2, g2, b2)
    return jnp.maximum(cast(y2) * s2 + h2 + x, 0.0)


if __name__ == "__main__":
    key = jax.random.PRNGKey(0)
    N, C, H, W = 2, 4, 16, 16          # in_planes == planes (stride=1, no downsample)
    P = C
    k = jax.random.split(key, 7)
    x = jax.random.normal(k[0], (N, C, H, W), jnp.float32)
    w1 = jax.random.normal(k[1], (3, 3, C, P), jnp.float32) * 0.1   # HWIO
    w2 = jax.random.normal(k[2], (3, 3, P, P), jnp.float32) * 0.1   # HWIO
    g1 = 1.0 + 0.1 * jax.random.normal(k[3], (P,), jnp.float32)
    b1 = 0.1 * jax.random.normal(k[4], (P,), jnp.float32)
    g2 = 1.0 + 0.1 * jax.random.normal(k[5], (P,), jnp.float32)
    b2 = 0.1 * jax.random.normal(k[6], (P,), jnp.float32)

    fwd = jax.jit(basic_block)
    out = jax.block_until_ready(fwd(x, w1, g1, b1, w2, g2, b2))
    assert out.shape == (N, P, H, W)

    # Kernel uses bf16 MXU inputs + bf16 inter-stage activations with f32
    # accumulation and exact (f32) batch statistics.  Compare tightly against
    # a reference with matching numerics, and loosely against full f32.
    ref_match = _reference(x, w1, g1, b1, w2, g2, b2,
                           matmul_dtype=jnp.bfloat16, bf16_intermediates=True)
    ref_f32 = _reference(x, w1, g1, b1, w2, g2, b2)
    err_m = float(jnp.max(jnp.abs(out - ref_match)))
    err_f = float(jnp.max(jnp.abs(out - ref_f32)))
    assert err_m < 2e-2, f"mismatch vs bf16-matched reference: {err_m}"
    assert err_f < 1e-1, f"mismatch vs f32 reference: {err_f}"

    print("KERNEL_OK")
</pallas_src>

<mosaic_0001>
module attributes {stable_mosaic.version = 11 : i64} {
  func.func @_conv1_kernel(%arg0: i32, %arg1: memref<1x16x16x128xf32, #tpu.memory_space<vmem>>, %arg2: memref<1152x128xbf16, #tpu.memory_space<vmem>>, %arg3: memref<1x16x16x128xbf16, #tpu.memory_space<vmem>>, %arg4: memref<1x2x128xf32, #tpu.memory_space<vmem>>, %arg5: memref<18x40x128xbf16, #tpu.memory_space<vmem>>, %arg6: memref<256x1152xbf16, #tpu.memory_space<vmem>>) attributes {dimension_semantics = [#tpu.dimension_semantics<parallel>], iteration_bounds = array<i64: 2>, scalar_prefetch = 0 : i64, scratch_operands = 2 : i64, tpu.core_type = #tpu.core_type<tc>, window_params = [{transform_indices = @transform_0, window_bounds = array<i64: 1, 16, 16, 128>}, {pipeline_mode = #tpu.pipeline_mode<synchronous>, transform_indices = @transform_1, window_bounds = array<i64: 1152, 128>}, {transform_indices = @transform_2, window_bounds = array<i64: 1, 16, 16, 128>}, {transform_indices = @transform_3, window_bounds = array<i64: 1, 2, 128>}]} {
    %c0 = arith.constant 0 : index
    %c0_0 = arith.constant 0 : index
    %c0_1 = arith.constant 0 : index
    %c0_2 = arith.constant 0 : index
    %0 = vector.load %arg1[%c0, %c0_0, %c0_1, %c0_2] : memref<1x16x16x128xf32, #tpu.memory_space<vmem>>, vector<1x16x16x128xf32>
    %1 = vector.shape_cast %0 : vector<1x16x16x128xf32> to vector<16x16x128xf32>
    %2 = arith.truncf %1 : vector<16x16x128xf32> to vector<16x16x128xbf16>
    %cst = arith.constant 0.000000e+00 : bf16
    %3 = vector.broadcast %cst : bf16 to vector<1x32x128xbf16>
    %cst_3 = arith.constant 0.000000e+00 : bf16
    %4 = vector.broadcast %cst_3 : bf16 to vector<16x8x128xbf16>
    %c0_4 = arith.constant 0 : index
    %c8 = arith.constant 8 : index
    %c0_5 = arith.constant 0 : index
    %5 = vector.load %arg5[%c0_4, %c8, %c0_5] : memref<18x40x128xbf16, #tpu.memory_space<vmem>>, vector<1x32x128xbf16>
    tpu.vector_store %arg5[%c0_4, %c8, %c0_5], %3 {strides = array<i32>} : memref<18x40x128xbf16, #tpu.memory_space<vmem>>, vector<1x32x128xbf16>,
    %c17 = arith.constant 17 : index
    %c8_6 = arith.constant 8 : index
    %c0_7 = arith.constant 0 : index
    %6 = vector.load %arg5[%c17, %c8_6, %c0_7] : memref<18x40x128xbf16, #tpu.memory_space<vmem>>, vector<1x32x128xbf16>
    tpu.vector_store %arg5[%c17, %c8_6, %c0_7], %3 {strides = array<i32>} : memref<18x40x128xbf16, #tpu.memory_space<vmem>>, vector<1x32x128xbf16>,
    %c1 = arith.constant 1 : index
    %c8_8 = arith.constant 8 : index
    %c0_9 = arith.constant 0 : index
    %7 = vector.load %arg5[%c1, %c8_8, %c0_9] : memref<18x40x128xbf16, #tpu.memory_space<vmem>>, vector<16x8x128xbf16>
    tpu.vector_store %arg5[%c1, %c8_8, %c0_9], %4 {strides = array<i32>} : memref<18x40x128xbf16, #tpu.memory_space<vmem>>, vector<16x8x128xbf16>,
    %c1_10 = arith.constant 1 : index
    %c32 = arith.constant 32 : index
    %c0_11 = arith.constant 0 : index
    %8 = vector.load %arg5[%c1_10, %c32, %c0_11] : memref<18x40x128xbf16, #tpu.memory_space<vmem>>, vector<16x8x128xbf16>
    tpu.vector_store %arg5[%c1_10, %c32, %c0_11], %4 {strides = array<i32>} : memref<18x40x128xbf16, #tpu.memory_space<vmem>>, vector<16x8x128xbf16>,
    %c1_12 = arith.constant 1 : index
    %c16 = arith.constant 16 : index
    %c0_13 = arith.constant 0 : index
    %9 = vector.load %arg5[%c1_12, %c16, %c0_13] : memref<18x40x128xbf16, #tpu.memory_space<vmem>>, vector<16x16x128xbf16>
    tpu.vector_store %arg5[%c1_12, %c16, %c0_13], %2 {strides = array<i32>} : memref<18x40x128xbf16, #tpu.memory_space<vmem>>, vector<16x16x128xbf16>,
    %c0_14 = arith.constant 0 : index
    %c15 = arith.constant 15 : index
    %c0_15 = arith.constant 0 : index
    %10 = vector.load %arg5[%c0_14, %c15, %c0_15] : memref<18x40x128xbf16, #tpu.memory_space<vmem>>, vector<16x16x128xbf16>
    %11 = vector.shape_cast %10 : vector<16x16x128xbf16> to vector<256x128xbf16>
    %c0_16 = arith.constant 0 : index
    %c0_17 = arith.constant 0 : index
    %12 = vector.load %arg6[%c0_16, %c0_17] : memref<256x1152xbf16, #tpu.memory_space<vmem>>, vector<256x128xbf16>
    tpu.vector_store %arg6[%c0_16, %c0_17], %11 {strides = array<i32>} : memref<256x1152xbf16, #tpu.memory_space<vmem>>, vector<256x128xbf16>,
    %c0_18 = arith.constant 0 : index
    %c16_19 = arith.constant 16 : index
    %c0_20 = arith.constant 0 : index
    %13 = vector.load %arg5[%c0_18, %c16_19, %c0_20] : memref<18x40x128xbf16, #tpu.memory_space<vmem>>, vector<16x16x128xbf16>
    %14 = vector.shape_cast %13 : vector<16x16x128xbf16> to vector<256x128xbf16>
    %c0_21 = arith.constant 0 : index
    %c128 = arith.constant 128 : index
    %15 = vector.load %arg6[%c0_21, %c128] : memref<256x1152xbf16, #tpu.memory_space<vmem>>, vector<256x128xbf16>
    tpu.vector_store %arg6[%c0_21, %c128], %14 {strides = array<i32>} : memref<256x1152xbf16, #tpu.memory_space<vmem>>, vector<256x128xbf16>,
    %c0_22 = arith.constant 0 : index
    %c17_23 = arith.constant 17 : index
    %c0_24 = arith.constant 0 : index
    %16 = vector.load %arg5[%c0_22, %c17_23, %c0_24] : memref<18x40x128xbf16, #tpu.memory_space<vmem>>, vector<16x16x128xbf16>
    %17 = vector.shape_cast %16 : vector<16x16x128xbf16> to vector<256x128xbf16>
    %c0_25 = arith.constant 0 : index
    %c256 = arith.constant 256 : index
    %18 = vector.load %arg6[%c0_25, %c256] : memref<256x1152xbf16, #tpu.memory_space<vmem>>, vector<256x128xbf16>
    tpu.vector_store %arg6[%c0_25, %c256], %17 {strides = array<i32>} : memref<256x1152xbf16, #tpu.memory_space<vmem>>, vector<256x128xbf16>,
    %c1_26 = arith.constant 1 : index
    %c15_27 = arith.constant 15 : index
    %c0_28 = arith.constant 0 : index
    %19 = vector.load %arg5[%c1_26, %c15_27, %c0_28] : memref<18x40x128xbf16, #tpu.memory_space<vmem>>, vector<16x16x128xbf16>
    %20 = vector.shape_cast %19 : vector<16x16x128xbf16> to vector<256x128xbf16>
    %c0_29 = arith.constant 0 : index
    %c384 = arith.constant 384 : index
    %21 = vector.load %arg6[%c0_29, %c384] : memref<256x1152xbf16, #tpu.memory_space<vmem>>, vector<256x128xbf16>
    tpu.vector_store %arg6[%c0_29, %c384], %20 {strides = array<i32>} : memref<256x1152xbf16, #tpu.memory_space<vmem>>, vector<256x128xbf16>,
    %c1_30 = arith.constant 1 : index
    %c16_31 = arith.constant 16 : index
    %c0_32 = arith.constant 0 : index
    %22 = vector.load %arg5[%c1_30, %c16_31, %c0_32] : memref<18x40x128xbf16, #tpu.memory_space<vmem>>, vector<16x16x128xbf16>
    %23 = vector.shape_cast %22 : vector<16x16x128xbf16> to vector<256x128xbf16>
    %c0_33 = arith.constant 0 : index
    %c512 = arith.constant 512 : index
    %24 = vector.load %arg6[%c0_33, %c512] : memref<256x1152xbf16, #tpu.memory_space<vmem>>, vector<256x128xbf16>
    tpu.vector_store %arg6[%c0_33, %c512], %23 {strides = array<i32>} : memref<256x1152xbf16, #tpu.memory_space<vmem>>, vector<256x128xbf16>,
    %c1_34 = arith.constant 1 : index
    %c17_35 = arith.constant 17 : index
    %c0_36 = arith.constant 0 : index
    %25 = vector.load %arg5[%c1_34, %c17_35, %c0_36] : memref<18x40x128xbf16, #tpu.memory_space<vmem>>, vector<16x16x128xbf16>
    %26 = vector.shape_cast %25 : vector<16x16x128xbf16> to vector<256x128xbf16>
    %c0_37 = arith.constant 0 : index
    %c640 = arith.constant 640 : index
    %27 = vector.load %arg6[%c0_37, %c640] : memref<256x1152xbf16, #tpu.memory_space<vmem>>, vector<256x128xbf16>
    tpu.vector_store %arg6[%c0_37, %c640], %26 {strides = array<i32>} : memref<256x1152xbf16, #tpu.memory_space<vmem>>, vector<256x128xbf16>,
    %c2 = arith.constant 2 : index
    %c15_38 = arith.constant 15 : index
    %c0_39 = arith.constant 0 : index
    %28 = vector.load %arg5[%c2, %c15_38, %c0_39] : memref<18x40x128xbf16, #tpu.memory_space<vmem>>, vector<16x16x128xbf16>
    %29 = vector.shape_cast %28 : vector<16x16x128xbf16> to vector<256x128xbf16>
    %c0_40 = arith.constant 0 : index
    %c768 = arith.constant 768 : index
    %30 = vector.load %arg6[%c0_40, %c768] : memref<256x1152xbf16, #tpu.memory_space<vmem>>, vector<256x128xbf16>
    tpu.vector_store %arg6[%c0_40, %c768], %29 {strides = array<i32>} : memref<256x1152xbf16, #tpu.memory_space<vmem>>, vector<256x128xbf16>,
    %c2_41 = arith.constant 2 : index
    %c16_42 = arith.constant 16 : index
    %c0_43 = arith.constant 0 : index
    %31 = vector.load %arg5[%c2_41, %c16_42, %c0_43] : memref<18x40x128xbf16, #tpu.memory_space<vmem>>, vector<16x16x128xbf16>
    %32 = vector.shape_cast %31 : vector<16x16x128xbf16> to vector<256x128xbf16>
    %c0_44 = arith.constant 0 : index
    %c896 = arith.constant 896 : index
    %33 = vector.load %arg6[%c0_44, %c896] : memref<256x1152xbf16, #tpu.memory_space<vmem>>, vector<256x128xbf16>
    tpu.vector_store %arg6[%c0_44, %c896], %32 {strides = array<i32>} : memref<256x1152xbf16, #tpu.memory_space<vmem>>, vector<256x128xbf16>,
    %c2_45 = arith.constant 2 : index
    %c17_46 = arith.constant 17 : index
    %c0_47 = arith.constant 0 : index
    %34 = vector.load %arg5[%c2_45, %c17_46, %c0_47] : memref<18x40x128xbf16, #tpu.memory_space<vmem>>, vector<16x16x128xbf16>
    %35 = vector.shape_cast %34 : vector<16x16x128xbf16> to vector<256x128xbf16>
    %c0_48 = arith.constant 0 : index
    %c1024 = arith.constant 1024 : index
    %36 = vector.load %arg6[%c0_48, %c1024] : memref<256x1152xbf16, #tpu.memory_space<vmem>>, vector<256x128xbf16>
    tpu.vector_store %arg6[%c0_48, %c1024], %35 {strides = array<i32>} : memref<256x1152xbf16, #tpu.memory_space<vmem>>, vector<256x128xbf16>,
    %c0_49 = arith.constant 0 : index
    %c0_50 = arith.constant 0 : index
    %37 = vector.load %arg6[%c0_49, %c0_50] : memref<256x1152xbf16, #tpu.memory_space<vmem>>, vector<256x1152xbf16>
    %c0_51 = arith.constant 0 : index
    %c0_52 = arith.constant 0 : index
    %38 = vector.load %arg2[%c0_51, %c0_52] : memref<1152x128xbf16, #tpu.memory_space<vmem>>, vector<1152x128xbf16>
    %cst_53 = arith.constant dense<0.000000e+00> : vector<256x128xf32>
    %39 = tpu.matmul %37, %38, %cst_53 {dimension_numbers = #tpu.dot_dimension_numbers<[1], [0], [0], [1], [0, 0, 1, 1], [], []>} : vector<256x1152xbf16>, vector<1152x128xbf16>, vector<256x128xf32> -> vector<256x128xf32>
    %cst_54 = arith.constant dense<0.000000e+00> : vector<128xf32>
    %40 = vector.multi_reduction <add>, %39, %cst_54 [0] : vector<256x128xf32> to vector<128xf32>
    %41 = vector.shape_cast %40 : vector<128xf32> to vector<1x128xf32>
    %cst_55 = arith.constant 2.560000e+02 : f32
    %42 = vector.broadcast %cst_55 : f32 to vector<1x128xf32>
    %43 = arith.divf %41, %42 : vector<1x128xf32>
    %44 = vector.broadcast %43 : vector<1x128xf32> to vector<256x128xf32>
    %45 = arith.subf %39, %44 : vector<256x128xf32>
    %46 = arith.mulf %45, %45 : vector<256x128xf32>
    %cst_56 = arith.constant dense<0.000000e+00> : vector<128xf32>
    %47 = vector.multi_reduction <add>, %46, %cst_56 [0] : vector<256x128xf32> to vector<128xf32>
    %48 = vector.shape_cast %47 : vector<128xf32> to vector<1x128xf32>
    %c0_57 = arith.constant 0 : index
    %c0_58 = arith.constant 0 : index
    %c0_59 = arith.constant 0 : index
    %49 = vector.load %arg4[%c0_57, %c0_58, %c0_59] : memref<1x2x128xf32, #tpu.memory_space<vmem>>, vector<1x1x128xf32>
    %50 = vector.shape_cast %49 : vector<1x1x128xf32> to vector<1x128xf32>
    %51 = vector.shape_cast %41 : vector<1x128xf32> to vector<1x1x128xf32>
    tpu.vector_store %arg4[%c0_57, %c0_58, %c0_59], %51 {strides = array<i32>} : memref<1x2x128xf32, #tpu.memory_space<vmem>>, vector<1x1x128xf32>,
    %c0_60 = arith.constant 0 : index
    %c1_61 = arith.constant 1 : index
    %c0_62 = arith.constant 0 : index
    %52 = vector.load %arg4[%c0_60, %c1_61, %c0_62] : memref<1x2x128xf32, #tpu.memory_space<vmem>>, vector<1x1x128xf32>
    %53 = vector.shape_cast %52 : vector<1x1x128xf32> to vector<1x128xf32>
    %54 = vector.shape_cast %48 : vector<1x128xf32> to vector<1x1x128xf32>
    tpu.vector_store %arg4[%c0_60, %c1_61, %c0_62], %54 {strides = array<i32>} : memref<1x2x128xf32, #tpu.memory_space<vmem>>, vector<1x1x128xf32>,
    %55 = vector.shape_cast %39 : vector<256x128xf32> to vector<1x16x16x128xf32>
    %56 = arith.truncf %55 : vector<1x16x16x128xf32> to vector<1x16x16x128xbf16>
    %c0_63 = arith.constant 0 : index
    %c0_64 = arith.constant 0 : index
    %c0_65 = arith.constant 0 : index
    %c0_66 = arith.constant 0 : index
    %57 = vector.load %arg3[%c0_63, %c0_64, %c0_65, %c0_66] : memref<1x16x16x128xbf16, #tpu.memory_space<vmem>>, vector<1x16x16x128xbf16>
    tpu.vector_store %arg3[%c0_63, %c0_64, %c0_65, %c0_66], %56 {strides = array<i32>} : memref<1x16x16x128xbf16, #tpu.memory_space<vmem>>, vector<1x16x16x128xbf16>,
    return
  }
  func.func @transform_0(%arg0: i32) -> (i32, i32, i32, i32) {
    %c0_i32 = arith.constant 0 : i32
    %c0_i32_0 = arith.constant 0 : i32
    %c0_i32_1 = arith.constant 0 : i32
    %c0_i32_2 = arith.constant 0 : i32
    return %arg0, %c0_i32, %c0_i32_0, %c0_i32_1 : i32, i32, i32, i32
  }
  func.func @transform_1(%arg0: i32) -> (i32, i32) {
    %c0_i32 = arith.constant 0 : i32
    %c0_i32_0 = arith.constant 0 : i32
    %c0_i32_1 = arith.constant 0 : i32
    return %c0_i32, %c0_i32_0 : i32, i32
  }
  func.func @transform_2(%arg0: i32) -> (i32, i32, i32, i32) {
    %c0_i32 = arith.constant 0 : i32
    %c0_i32_0 = arith.constant 0 : i32
    %c0_i32_1 = arith.constant 0 : i32
    %c0_i32_2 = arith.constant 0 : i32
    return %arg0, %c0_i32, %c0_i32_0, %c0_i32_1 : i32, i32, i32, i32
  }
  func.func @transform_3(%arg0: i32) -> (i32, i32, i32) {
    %c0_i32 = arith.constant 0 : i32
    %c0_i32_0 = arith.constant 0 : i32
    %c0_i32_1 = arith.constant 0 : i32
    return %arg0, %c0_i32, %c0_i32_0 : i32, i32, i32
  }
}

module attributes {stable_mosaic.version = 11 : i64} {
  func.func @_bn_add_relu_kernel(%arg0: i32, %arg1: memref<2x16x16x128xbf16, #tpu.memory_space<vmem>>, %arg2: memref<2x16x16x128xf32, #tpu.memory_space<vmem>>, %arg3: memref<1x128xf32, #tpu.memory_space<vmem>>, %arg4: memref<1x128xf32, #tpu.memory_space<vmem>>, %arg5: memref<2x16x16x128xf32, #tpu.memory_space<vmem>>) attributes {dimension_semantics = [#tpu.dimension_semantics<parallel>], iteration_bounds = array<i64: 1>, scalar_prefetch = 0 : i64, scratch_operands = 0 : i64, tpu.core_type = #tpu.core_type<tc>, window_params = [{transform_indices = @transform_0, window_bounds = array<i64: 2, 16, 16, 128>}, {transform_indices = @transform_1, window_bounds = array<i64: 2, 16, 16, 128>}, {pipeline_mode = #tpu.pipeline_mode<synchronous>, transform_indices = @transform_2, window_bounds = array<i64: 1, 128>}, {pipeline_mode = #tpu.pipeline_mode<synchronous>, transform_indices = @transform_3, window_bounds = array<i64: 1, 128>}, {transform_indices = @transform_4, window_bounds = array<i64: 2, 16, 16, 128>}]} {
    %c0 = arith.constant 0 : index
    %c0_0 = arith.constant 0 : index
    %0 = vector.load %arg3[%c0, %c0_0] : memref<1x128xf32, #tpu.memory_space<vmem>>, vector<1x128xf32>
    %1 = vector.shape_cast %0 : vector<1x128xf32> to vector<1x1x1x128xf32>
    %c0_1 = arith.constant 0 : index
    %c0_2 = arith.constant 0 : index
    %2 = vector.load %arg4[%c0_1, %c0_2] : memref<1x128xf32, #tpu.memory_space<vmem>>, vector<1x128xf32>
    %3 = vector.shape_cast %2 : vector<1x128xf32> to vector<1x1x1x128xf32>
    %c0_3 = arith.constant 0 : index
    %c0_4 = arith.constant 0 : index
    %c0_5 = arith.constant 0 : index
    %c0_6 = arith.constant 0 : index
    %4 = vector.load %arg1[%c0_3, %c0_4, %c0_5, %c0_6] : memref<2x16x16x128xbf16, #tpu.memory_space<vmem>>, vector<2x16x16x128xbf16>
    %5 = arith.extf %4 : vector<2x16x16x128xbf16> to vector<2x16x16x128xf32>
    %6 = vector.broadcast %1 : vector<1x1x1x128xf32> to vector<2x16x16x128xf32>
    %7 = arith.mulf %5, %6 : vector<2x16x16x128xf32>
    %8 = vector.broadcast %3 : vector<1x1x1x128xf32> to vector<2x16x16x128xf32>
    %9 = arith.addf %7, %8 : vector<2x16x16x128xf32>
    %c0_7 = arith.constant 0 : index
    %c0_8 = arith.constant 0 : index
    %c0_9 = arith.constant 0 : index
    %c0_10 = arith.constant 0 : index
    %10 = vector.load %arg2[%c0_7, %c0_8, %c0_9, %c0_10] : memref<2x16x16x128xf32, #tpu.memory_space<vmem>>, vector<2x16x16x128xf32>
    %11 = arith.addf %9, %10 : vector<2x16x16x128xf32>
    %cst = arith.constant 0.000000e+00 : f32
    %12 = vector.broadcast %cst : f32 to vector<2x16x16x128xf32>
    %13 = arith.maximumf %11, %12 : vector<2x16x16x128xf32>
    %c0_11 = arith.constant 0 : index
    %c0_12 = arith.constant 0 : index
    %c0_13 = arith.constant 0 : index
    %c0_14 = arith.constant 0 : index
    %14 = vector.load %arg5[%c0_11, %c0_12, %c0_13, %c0_14] : memref<2x16x16x128xf32, #tpu.memory_space<vmem>>, vector<2x16x16x128xf32>
    tpu.vector_store %arg5[%c0_11, %c0_12, %c0_13, %c0_14], %13 {strides = array<i32>} : memref<2x16x16x128xf32, #tpu.memory_space<vmem>>, vector<2x16x16x128xf32>,
    return
  }
  func.func @transform_0(%arg0: i32) -> (i32, i32, i32, i32) {
    %c0_i32 = arith.constant 0 : i32
    %c0_i32_0 = arith.constant 0 : i32
    %c0_i32_1 = arith.constant 0 : i32
    %c0_i32_2 = arith.constant 0 : i32
    return %arg0, %c0_i32, %c0_i32_0, %c0_i32_1 : i32, i32, i32, i32
  }
  func.func @transform_1(%arg0: i32) -> (i32, i32, i32, i32) {
    %c0_i32 = arith.constant 0 : i32
    %c0_i32_0 = arith.constant 0 : i32
    %c0_i32_1 = arith.constant 0 : i32
    %c0_i32_2 = arith.constant 0 : i32
    return %arg0, %c0_i32, %c0_i32_0, %c0_i32_1 : i32, i32, i32, i32
  }
  func.func @transform_2(%arg0: i32) -> (i32, i32) {
    %c0_i32 = arith.constant 0 : i32
    %c0_i32_0 = arith.constant 0 : i32
    %c0_i32_1 = arith.constant 0 : i32
    return %c0_i32, %c0_i32_0 : i32, i32
  }
  func.func @transform_3(%arg0: i32) -> (i32, i32) {
    %c0_i32 = arith.constant 0 : i32
    %c0_i32_0 = arith.constant 0 : i32
    %c0_i32_1 = arith.constant 0 : i32
    return %c0_i32, %c0_i32_0 : i32, i32
  }
  func.func @transform_4(%arg0: i32) -> (i32, i32, i32, i32) {
    %c0_i32 = arith.constant 0 : i32
    %c0_i32_0 = arith.constant 0 : i32
    %c0_i32_1 = arith.constant 0 : i32
    %c0_i32_2 = arith.constant 0 : i32
    return %arg0, %c0_i32, %c0_i32_0, %c0_i32_1 : i32, i32, i32, i32
  }
}

module attributes {stable_mosaic.version = 11 : i64} {
  func.func @_bn_relu_conv2_kernel(%arg0: i32, %arg1: memref<1x16x16x128xbf16, #tpu.memory_space<vmem>>, %arg2: memref<1x128xf32, #tpu.memory_space<vmem>>, %arg3: memref<1x128xf32, #tpu.memory_space<vmem>>, %arg4: memref<1152x128xbf16, #tpu.memory_space<vmem>>, %arg5: memref<1x16x16x128xbf16, #tpu.memory_space<vmem>>, %arg6: memref<1x2x128xf32, #tpu.memory_space<vmem>>, %arg7: memref<18x40x128xbf16, #tpu.memory_space<vmem>>, %arg8: memref<256x1152xbf16, #tpu.memory_space<vmem>>) attributes {dimension_semantics = [#tpu.dimension_semantics<parallel>], iteration_bounds = array<i64: 2>, scalar_prefetch = 0 : i64, scratch_operands = 2 : i64, tpu.core_type = #tpu.core_type<tc>, window_params = [{transform_indices = @transform_0, window_bounds = array<i64: 1, 16, 16, 128>}, {pipeline_mode = #tpu.pipeline_mode<synchronous>, transform_indices = @transform_1, window_bounds = array<i64: 1, 128>}, {pipeline_mode = #tpu.pipeline_mode<synchronous>, transform_indices = @transform_2, window_bounds = array<i64: 1, 128>}, {pipeline_mode = #tpu.pipeline_mode<synchronous>, transform_indices = @transform_3, window_bounds = array<i64: 1152, 128>}, {transform_indices = @transform_4, window_bounds = array<i64: 1, 16, 16, 128>}, {transform_indices = @transform_5, window_bounds = array<i64: 1, 2, 128>}]} {
    %c0 = arith.constant 0 : index
    %c0_0 = arith.constant 0 : index
    %0 = vector.load %arg2[%c0, %c0_0] : memref<1x128xf32, #tpu.memory_space<vmem>>, vector<1x128xf32>
    %1 = vector.shape_cast %0 : vector<1x128xf32> to vector<1x1x128xf32>
    %c0_1 = arith.constant 0 : index
    %c0_2 = arith.constant 0 : index
    %2 = vector.load %arg3[%c0_1, %c0_2] : memref<1x128xf32, #tpu.memory_space<vmem>>, vector<1x128xf32>
    %3 = vector.shape_cast %2 : vector<1x128xf32> to vector<1x1x128xf32>
    %c0_3 = arith.constant 0 : index
    %c0_4 = arith.constant 0 : index
    %c0_5 = arith.constant 0 : index
    %c0_6 = arith.constant 0 : index
    %4 = vector.load %arg1[%c0_3, %c0_4, %c0_5, %c0_6] : memref<1x16x16x128xbf16, #tpu.memory_space<vmem>>, vector<1x16x16x128xbf16>
    %5 = vector.shape_cast %4 : vector<1x16x16x128xbf16> to vector<16x16x128xbf16>
    %6 = arith.extf %5 : vector<16x16x128xbf16> to vector<16x16x128xf32>
    %7 = vector.broadcast %1 : vector<1x1x128xf32> to vector<16x16x128xf32>
    %8 = arith.mulf %6, %7 : vector<16x16x128xf32>
    %9 = vector.broadcast %3 : vector<1x1x128xf32> to vector<16x16x128xf32>
    %10 = arith.addf %8, %9 : vector<16x16x128xf32>
    %cst = arith.constant 0.000000e+00 : f32
    %11 = vector.broadcast %cst : f32 to vector<16x16x128xf32>
    %12 = arith.maximumf %10, %11 : vector<16x16x128xf32>
    %13 = arith.truncf %12 : vector<16x16x128xf32> to vector<16x16x128xbf16>
    %cst_7 = arith.constant 0.000000e+00 : bf16
    %14 = vector.broadcast %cst_7 : bf16 to vector<1x32x128xbf16>
    %cst_8 = arith.constant 0.000000e+00 : bf16
    %15 = vector.broadcast %cst_8 : bf16 to vector<16x8x128xbf16>
    %c0_9 = arith.constant 0 : index
    %c8 = arith.constant 8 : index
    %c0_10 = arith.constant 0 : index
    %16 = vector.load %arg7[%c0_9, %c8, %c0_10] : memref<18x40x128xbf16, #tpu.memory_space<vmem>>, vector<1x32x128xbf16>
    tpu.vector_store %arg7[%c0_9, %c8, %c0_10], %14 {strides = array<i32>} : memref<18x40x128xbf16, #tpu.memory_space<vmem>>, vector<1x32x128xbf16>,
    %c17 = arith.constant 17 : index
    %c8_11 = arith.constant 8 : index
    %c0_12 = arith.constant 0 : index
    %17 = vector.load %arg7[%c17, %c8_11, %c0_12] : memref<18x40x128xbf16, #tpu.memory_space<vmem>>, vector<1x32x128xbf16>
    tpu.vector_store %arg7[%c17, %c8_11, %c0_12], %14 {strides = array<i32>} : memref<18x40x128xbf16, #tpu.memory_space<vmem>>, vector<1x32x128xbf16>,
    %c1 = arith.constant 1 : index
    %c8_13 = arith.constant 8 : index
    %c0_14 = arith.constant 0 : index
    %18 = vector.load %arg7[%c1, %c8_13, %c0_14] : memref<18x40x128xbf16, #tpu.memory_space<vmem>>, vector<16x8x128xbf16>
    tpu.vector_store %arg7[%c1, %c8_13, %c0_14], %15 {strides = array<i32>} : memref<18x40x128xbf16, #tpu.memory_space<vmem>>, vector<16x8x128xbf16>,
    %c1_15 = arith.constant 1 : index
    %c32 = arith.constant 32 : index
    %c0_16 = arith.constant 0 : index
    %19 = vector.load %arg7[%c1_15, %c32, %c0_16] : memref<18x40x128xbf16, #tpu.memory_space<vmem>>, vector<16x8x128xbf16>
    tpu.vector_store %arg7[%c1_15, %c32, %c0_16], %15 {strides = array<i32>} : memref<18x40x128xbf16, #tpu.memory_space<vmem>>, vector<16x8x128xbf16>,
    %c1_17 = arith.constant 1 : index
    %c16 = arith.constant 16 : index
    %c0_18 = arith.constant 0 : index
    %20 = vector.load %arg7[%c1_17, %c16, %c0_18] : memref<18x40x128xbf16, #tpu.memory_space<vmem>>, vector<16x16x128xbf16>
    tpu.vector_store %arg7[%c1_17, %c16, %c0_18], %13 {strides = array<i32>} : memref<18x40x128xbf16, #tpu.memory_space<vmem>>, vector<16x16x128xbf16>,
    %c0_19 = arith.constant 0 : index
    %c15 = arith.constant 15 : index
    %c0_20 = arith.constant 0 : index
    %21 = vector.load %arg7[%c0_19, %c15, %c0_20] : memref<18x40x128xbf16, #tpu.memory_space<vmem>>, vector<16x16x128xbf16>
    %22 = vector.shape_cast %21 : vector<16x16x128xbf16> to vector<256x128xbf16>
    %c0_21 = arith.constant 0 : index
    %c0_22 = arith.constant 0 : index
    %23 = vector.load %arg8[%c0_21, %c0_22] : memref<256x1152xbf16, #tpu.memory_space<vmem>>, vector<256x128xbf16>
    tpu.vector_store %arg8[%c0_21, %c0_22], %22 {strides = array<i32>} : memref<256x1152xbf16, #tpu.memory_space<vmem>>, vector<256x128xbf16>,
    %c0_23 = arith.constant 0 : index
    %c16_24 = arith.constant 16 : index
    %c0_25 = arith.constant 0 : index
    %24 = vector.load %arg7[%c0_23, %c16_24, %c0_25] : memref<18x40x128xbf16, #tpu.memory_space<vmem>>, vector<16x16x128xbf16>
    %25 = vector.shape_cast %24 : vector<16x16x128xbf16> to vector<256x128xbf16>
    %c0_26 = arith.constant 0 : index
    %c128 = arith.constant 128 : index
    %26 = vector.load %arg8[%c0_26, %c128] : memref<256x1152xbf16, #tpu.memory_space<vmem>>, vector<256x128xbf16>
    tpu.vector_store %arg8[%c0_26, %c128], %25 {strides = array<i32>} : memref<256x1152xbf16, #tpu.memory_space<vmem>>, vector<256x128xbf16>,
    %c0_27 = arith.constant 0 : index
    %c17_28 = arith.constant 17 : index
    %c0_29 = arith.constant 0 : index
    %27 = vector.load %arg7[%c0_27, %c17_28, %c0_29] : memref<18x40x128xbf16, #tpu.memory_space<vmem>>, vector<16x16x128xbf16>
    %28 = vector.shape_cast %27 : vector<16x16x128xbf16> to vector<256x128xbf16>
    %c0_30 = arith.constant 0 : index
    %c256 = arith.constant 256 : index
    %29 = vector.load %arg8[%c0_30, %c256] : memref<256x1152xbf16, #tpu.memory_space<vmem>>, vector<256x128xbf16>
    tpu.vector_store %arg8[%c0_30, %c256], %28 {strides = array<i32>} : memref<256x1152xbf16, #tpu.memory_space<vmem>>, vector<256x128xbf16>,
    %c1_31 = arith.constant 1 : index
    %c15_32 = arith.constant 15 : index
    %c0_33 = arith.constant 0 : index
    %30 = vector.load %arg7[%c1_31, %c15_32, %c0_33] : memref<18x40x128xbf16, #tpu.memory_space<vmem>>, vector<16x16x128xbf16>
    %31 = vector.shape_cast %30 : vector<16x16x128xbf16> to vector<256x128xbf16>
    %c0_34 = arith.constant 0 : index
    %c384 = arith.constant 384 : index
    %32 = vector.load %arg8[%c0_34, %c384] : memref<256x1152xbf16, #tpu.memory_space<vmem>>, vector<256x128xbf16>
    tpu.vector_store %arg8[%c0_34, %c384], %31 {strides = array<i32>} : memref<256x1152xbf16, #tpu.memory_space<vmem>>, vector<256x128xbf16>,
    %c1_35 = arith.constant 1 : index
    %c16_36 = arith.constant 16 : index
    %c0_37 = arith.constant 0 : index
    %33 = vector.load %arg7[%c1_35, %c16_36, %c0_37] : memref<18x40x128xbf16, #tpu.memory_space<vmem>>, vector<16x16x128xbf16>
    %34 = vector.shape_cast %33 : vector<16x16x128xbf16> to vector<256x128xbf16>
    %c0_38 = arith.constant 0 : index
    %c512 = arith.constant 512 : index
    %35 = vector.load %arg8[%c0_38, %c512] : memref<256x1152xbf16, #tpu.memory_space<vmem>>, vector<256x128xbf16>
    tpu.vector_store %arg8[%c0_38, %c512], %34 {strides = array<i32>} : memref<256x1152xbf16, #tpu.memory_space<vmem>>, vector<256x128xbf16>,
    %c1_39 = arith.constant 1 : index
    %c17_40 = arith.constant 17 : index
    %c0_41 = arith.constant 0 : index
    %36 = vector.load %arg7[%c1_39, %c17_40, %c0_41] : memref<18x40x128xbf16, #tpu.memory_space<vmem>>, vector<16x16x128xbf16>
    %37 = vector.shape_cast %36 : vector<16x16x128xbf16> to vector<256x128xbf16>
    %c0_42 = arith.constant 0 : index
    %c640 = arith.constant 640 : index
    %38 = vector.load %arg8[%c0_42, %c640] : memref<256x1152xbf16, #tpu.memory_space<vmem>>, vector<256x128xbf16>
    tpu.vector_store %arg8[%c0_42, %c640], %37 {strides = array<i32>} : memref<256x1152xbf16, #tpu.memory_space<vmem>>, vector<256x128xbf16>,
    %c2 = arith.constant 2 : index
    %c15_43 = arith.constant 15 : index
    %c0_44 = arith.constant 0 : index
    %39 = vector.load %arg7[%c2, %c15_43, %c0_44] : memref<18x40x128xbf16, #tpu.memory_space<vmem>>, vector<16x16x128xbf16>
    %40 = vector.shape_cast %39 : vector<16x16x128xbf16> to vector<256x128xbf16>
    %c0_45 = arith.constant 0 : index
    %c768 = arith.constant 768 : index
    %41 = vector.load %arg8[%c0_45, %c768] : memref<256x1152xbf16, #tpu.memory_space<vmem>>, vector<256x128xbf16>
    tpu.vector_store %arg8[%c0_45, %c768], %40 {strides = array<i32>} : memref<256x1152xbf16, #tpu.memory_space<vmem>>, vector<256x128xbf16>,
    %c2_46 = arith.constant 2 : index
    %c16_47 = arith.constant 16 : index
    %c0_48 = arith.constant 0 : index
    %42 = vector.load %arg7[%c2_46, %c16_47, %c0_48] : memref<18x40x128xbf16, #tpu.memory_space<vmem>>, vector<16x16x128xbf16>
    %43 = vector.shape_cast %42 : vector<16x16x128xbf16> to vector<256x128xbf16>
    %c0_49 = arith.constant 0 : index
    %c896 = arith.constant 896 : index
    %44 = vector.load %arg8[%c0_49, %c896] : memref<256x1152xbf16, #tpu.memory_space<vmem>>, vector<256x128xbf16>
    tpu.vector_store %arg8[%c0_49, %c896], %43 {strides = array<i32>} : memref<256x1152xbf16, #tpu.memory_space<vmem>>, vector<256x128xbf16>,
    %c2_50 = arith.constant 2 : index
    %c17_51 = arith.constant 17 : index
    %c0_52 = arith.constant 0 : index
    %45 = vector.load %arg7[%c2_50, %c17_51, %c0_52] : memref<18x40x128xbf16, #tpu.memory_space<vmem>>, vector<16x16x128xbf16>
    %46 = vector.shape_cast %45 : vector<16x16x128xbf16> to vector<256x128xbf16>
    %c0_53 = arith.constant 0 : index
    %c1024 = arith.constant 1024 : index
    %47 = vector.load %arg8[%c0_53, %c1024] : memref<256x1152xbf16, #tpu.memory_space<vmem>>, vector<256x128xbf16>
    tpu.vector_store %arg8[%c0_53, %c1024], %46 {strides = array<i32>} : memref<256x1152xbf16, #tpu.memory_space<vmem>>, vector<256x128xbf16>,
    %c0_54 = arith.constant 0 : index
    %c0_55 = arith.constant 0 : index
    %48 = vector.load %arg8[%c0_54, %c0_55] : memref<256x1152xbf16, #tpu.memory_space<vmem>>, vector<256x1152xbf16>
    %c0_56 = arith.constant 0 : index
    %c0_57 = arith.constant 0 : index
    %49 = vector.load %arg4[%c0_56, %c0_57] : memref<1152x128xbf16, #tpu.memory_space<vmem>>, vector<1152x128xbf16>
    %cst_58 = arith.constant dense<0.000000e+00> : vector<256x128xf32>
    %50 = tpu.matmul %48, %49, %cst_58 {dimension_numbers = #tpu.dot_dimension_numbers<[1], [0], [0], [1], [0, 0, 1, 1], [], []>} : vector<256x1152xbf16>, vector<1152x128xbf16>, vector<256x128xf32> -> vector<256x128xf32>
    %cst_59 = arith.constant dense<0.000000e+00> : vector<128xf32>
    %51 = vector.multi_reduction <add>, %50, %cst_59 [0] : vector<256x128xf32> to vector<128xf32>
    %52 = vector.shape_cast %51 : vector<128xf32> to vector<1x128xf32>
    %cst_60 = arith.constant 2.560000e+02 : f32
    %53 = vector.broadcast %cst_60 : f32 to vector<1x128xf32>
    %54 = arith.divf %52, %53 : vector<1x128xf32>
    %55 = vector.broadcast %54 : vector<1x128xf32> to vector<256x128xf32>
    %56 = arith.subf %50, %55 : vector<256x128xf32>
    %57 = arith.mulf %56, %56 : vector<256x128xf32>
    %cst_61 = arith.constant dense<0.000000e+00> : vector<128xf32>
    %58 = vector.multi_reduction <add>, %57, %cst_61 [0] : vector<256x128xf32> to vector<128xf32>
    %59 = vector.shape_cast %58 : vector<128xf32> to vector<1x128xf32>
    %c0_62 = arith.constant 0 : index
    %c0_63 = arith.constant 0 : index
    %c0_64 = arith.constant 0 : index
    %60 = vector.load %arg6[%c0_62, %c0_63, %c0_64] : memref<1x2x128xf32, #tpu.memory_space<vmem>>, vector<1x1x128xf32>
    %61 = vector.shape_cast %60 : vector<1x1x128xf32> to vector<1x128xf32>
    %62 = vector.shape_cast %52 : vector<1x128xf32> to vector<1x1x128xf32>
    tpu.vector_store %arg6[%c0_62, %c0_63, %c0_64], %62 {strides = array<i32>} : memref<1x2x128xf32, #tpu.memory_space<vmem>>, vector<1x1x128xf32>,
    %c0_65 = arith.constant 0 : index
    %c1_66 = arith.constant 1 : index
    %c0_67 = arith.constant 0 : index
    %63 = vector.load %arg6[%c0_65, %c1_66, %c0_67] : memref<1x2x128xf32, #tpu.memory_space<vmem>>, vector<1x1x128xf32>
    %64 = vector.shape_cast %63 : vector<1x1x128xf32> to vector<1x128xf32>
    %65 = vector.shape_cast %59 : vector<1x128xf32> to vector<1x1x128xf32>
    tpu.vector_store %arg6[%c0_65, %c1_66, %c0_67], %65 {strides = array<i32>} : memref<1x2x128xf32, #tpu.memory_space<vmem>>, vector<1x1x128xf32>,
    %66 = vector.shape_cast %50 : vector<256x128xf32> to vector<1x16x16x128xf32>
    %67 = arith.truncf %66 : vector<1x16x16x128xf32> to vector<1x16x16x128xbf16>
    %c0_68 = arith.constant 0 : index
    %c0_69 = arith.constant 0 : index
    %c0_70 = arith.constant 0 : index
    %c0_71 = arith.constant 0 : index
    %68 = vector.load %arg5[%c0_68, %c0_69, %c0_70, %c0_71] : memref<1x16x16x128xbf16, #tpu.memory_space<vmem>>, vector<1x16x16x128xbf16>
    tpu.vector_store %arg5[%c0_68, %c0_69, %c0_70, %c0_71], %67 {strides = array<i32>} : memref<1x16x16x128xbf16, #tpu.memory_space<vmem>>, vector<1x16x16x128xbf16>,
    return
  }
  func.func @transform_0(%arg0: i32) -> (i32, i32, i32, i32) {
    %c0_i32 = arith.constant 0 : i32
    %c0_i32_0 = arith.constant 0 : i32
    %c0_i32_1 = arith.constant 0 : i32
    %c0_i32_2 = arith.constant 0 : i32
    return %arg0, %c0_i32, %c0_i32_0, %c0_i32_1 : i32, i32, i32, i32
  }
  func.func @transform_1(%arg0: i32) -> (i32, i32) {
    %c0_i32 = arith.constant 0 : i32
    %c0_i32_0 = arith.constant 0 : i32
    %c0_i32_1 = arith.constant 0 : i32
    return %c0_i32, %c0_i32_0 : i32, i32
  }
  func.func @transform_2(%arg0: i32) -> (i32, i32) {
    %c0_i32 = arith.constant 0 : i32
    %c0_i32_0 = arith.constant 0 : i32
    %c0_i32_1 = arith.constant 0 : i32
    return %c0_i32, %c0_i32_0 : i32, i32
  }
  func.func @transform_3(%arg0: i32) -> (i32, i32) {
    %c0_i32 = arith.constant 0 : i32
    %c0_i32_0 = arith.constant 0 : i32
    %c0_i32_1 = arith.constant 0 : i32
    return %c0_i32, %c0_i32_0 : i32, i32
  }
  func.func @transform_4(%arg0: i32) -> (i32, i32, i32, i32) {
    %c0_i32 = arith.constant 0 : i32
    %c0_i32_0 = arith.constant 0 : i32
    %c0_i32_1 = arith.constant 0 : i32
    %c0_i32_2 = arith.constant 0 : i32
    return %arg0, %c0_i32, %c0_i32_0, %c0_i32_1 : i32, i32, i32, i32
  }
  func.func @transform_5(%arg0: i32) -> (i32, i32, i32) {
    %c0_i32 = arith.constant 0 : i32
    %c0_i32_0 = arith.constant 0 : i32
    %c0_i32_1 = arith.constant 0 : i32
    return %arg0, %c0_i32, %c0_i32_0 : i32, i32, i32
  }
}

</mosaic_0001>

<bundles_post_ra>
// kernel: basic_block.5
= control target key start
LH: loop header
LB: loop body
LE: loop exit
PB: predicated region body
PF: predicated region fallthrough
CT: control target
= control target key end

     0   :  { %s1351_s0 = inlined_call_operand.vmem [shape: bf16[2,16,16,128], index: 0, kind: input, shape index: {}]   ;;  %s1352_s2 = inlined_call_operand.vmem [shape: f32[1,128], index: 2, kind: input, shape index: {}]   ;;  %s1353_s3 = inlined_call_operand.vmem [shape: f32[1,128], index: 3, kind: input, shape index: {}]   ;;  %s1354_s1 = inlined_call_operand.vmem [shape: f32[2,16,16,128], index: 1, kind: input, shape index: {}, may-alias: {1,4}]   ;;  %s1355_s4 = inlined_call_operand.vmem [shape: f32[2,16,16,128], index: 4, kind: output, shape index: {}, may-alias: {1,4}]  }
   0x1   :  { %v736_v0 = vld [vmem:[%s1352_s2] ss:$0 sm:$0xff]  ;;  %v677_v4 = vld [vmem:[%s1351_s0 + $0x8] sm:$0xff]   ;;  %v678_v8 = vld [vmem:[%s1351_s0 + $0x10] sm:$0xff]  }
   0x2   :  { %v550_v1 = vld [vmem:[%s1351_s0] sm:$0xff]   ;;  %v555_v6 = vunpack.c.l.bf16 %v677_v4  ;;  %v556_v7 = vunpack.c.h.bf16 %v677_v4  ;;  %v559_v11 = vunpack.c.l.bf16 %v678_v8  ;;  %v560_v12 = vunpack.c.h.bf16 %v678_v8  ;;  %v679_v13 = vld [vmem:[%s1351_s0 + $0x18] sm:$0xff]   ;;  %v288_v15 = vld [vmem:[%s1354_s1 + $0x8] sm:$0xff] }
   0x3   :  { %v551_v2 = vunpack.c.l.bf16 %v550_v1  ;;  %v552_v3 = vunpack.c.h.bf16 %v550_v1  ;;  %v747_v5 = vld [vmem:[%s1353_s3] ss:$0 sm:$0xff]  ;;  %v563_v18 = vunpack.c.l.bf16 %v679_v13  ;;  %v564_v19 = vunpack.c.h.bf16 %v679_v13  ;;  %v289_v22 = vld [vmem:[%s1354_s1 + $0x10] sm:$0xff]  ;;  %v290_v23 = vld [vmem:[%s1354_s1 + $0x18] sm:$0xff] }
   0x4   :  { %v287_v14 = vld [vmem:[%s1354_s1] sm:$0xff]  ;;  %v155_v16 = vmul.f32 %v555_v6, %v736_v0  ;;  %v156_v17 = vmul.f32 %v556_v7, %v736_v0  ;;  %v157_v24 = vmul.f32 %v559_v11, %v736_v0  ;;  %v158_v25 = vmul.f32 %v560_v12, %v736_v0  ;;  %v292_v29 = vld [vmem:[%s1354_s1 + $0x28] sm:$0xff]  ;;  %v293_v36 = vld [vmem:[%s1354_s1 + $0x30] sm:$0xff] }
   0x5   :  { %v153_v9 = vmul.f32 %v551_v2, %v736_v0  ;;  %v154_v10 = vmul.f32 %v552_v3, %v736_v0  ;;  %v291_v28 = vld [vmem:[%s1354_s1 + $0x20] sm:$0xff]  ;;  %v159_v30 = vmul.f32 %v563_v18, %v736_v0  ;;  %v160_v31 = vmul.f32 %v564_v19, %v736_v0  ;;  %v294_v37 = vld [vmem:[%s1354_s1 + $0x38] sm:$0xff]  ;;  %v681_v47 = vld [vmem:[%s1351_s0 + $0x28] sm:$0xff]  }
   0x6   :  { %v225_v26 = vadd.f32 %v747_v5, %v155_v16  ;;  %v226_v27 = vadd.f32 %v747_v5, %v156_v17  ;;  %v227_v34 = vadd.f32 %v747_v5, %v157_v24  ;;  %v228_v35 = vadd.f32 %v747_v5, %v158_v25  ;;  %v680_v42 = vld [vmem:[%s1351_s0 + $0x20] sm:$0xff]   ;;  %v682_v52 = vld [vmem:[%s1351_s0 + $0x30] sm:$0xff]   ;;  %v683_v57 = vld [vmem:[%s1351_s0 + $0x38] sm:$0xff]  }
   0x7   :  { %v223_v20 = vadd.f32 %v747_v5, %v153_v9  ;;  %v224_v21 = vadd.f32 %v747_v5, %v154_v10  ;;  %v229_v40 = vadd.f32 %v747_v5, %v159_v30  ;;  %v230_v41 = vadd.f32 %v747_v5, %v160_v31 }
   0x8   :  { %v353_v38 = vadd.f32 %v289_v22, %v225_v26  ;;  %v354_v39 = vadd.f32 %v290_v23, %v226_v27  ;;  %v355_v45 = vadd.f32 %v291_v28, %v227_v34  ;;  %v356_v46 = vadd.f32 %v292_v29, %v228_v35 }
   0x9   :  { %v351_v32 = vadd.f32 %v287_v14, %v223_v20  ;;  %v352_v33 = vadd.f32 %v288_v15, %v224_v21  ;;  %v357_v50 = vadd.f32 %v293_v36, %v229_v40  ;;  %v358_v51 = vadd.f32 %v294_v37, %v230_v41  ;;  %v685_v37 = vld [vmem:[%s1351_s0 + $0x48] sm:$0xff]  }
   0xa   :  { %v417_v48 = vmax.f32 %v353_v38, 0.0  ;;  %v418_v49 = vmax.f32 %v354_v39, 0.0  ;;  %v419_v53 = vmax.f32 %v355_v45, 0.0  ;;  %v420_v54 = vmax.f32 %v356_v46, 0.0 }
   0xb   :  { %v415_v43 = vmax.f32 %v351_v32, 0.0  ;;  %v416_v44 = vmax.f32 %v352_v33, 0.0  ;;  %v567_v55 = vunpack.c.l.bf16 %v680_v42  ;;  %v568_v56 = vunpack.c.h.bf16 %v680_v42  ;;  %v684_v32 = vld [vmem:[%s1351_s0 + $0x40] sm:$0xff]   ;;  %v686_v42 = vld [vmem:[%s1351_s0 + $0x50] sm:$0xff]  }
   0xc   :  { %481 = vst [vmem:[%s1355_s4 + $0x10] sm:$0xff] %v417_v48  ;;  %482 = vst [vmem:[%s1355_s4 + $0x18] sm:$0xff] %v418_v49  ;;  %v421_v58 = vmax.f32 %v357_v50, 0.0  ;;  %v422_v59 = vmax.f32 %v358_v51, 0.0  ;;  %v571_v60 = vunpack.c.l.bf16 %v681_v47  ;;  %v572_v61 = vunpack.c.h.bf16 %v681_v47  ;;  %v687_v47 = vld [vmem:[%s1351_s0 + $0x58] sm:$0xff]  }
   0xd   :  { %479 = vst [vmem:[%s1355_s4] sm:$0xff] %v415_v43  ;;  %480 = vst [vmem:[%s1355_s4 + $0x8] sm:$0xff] %v416_v44  ;;  %v161_v62 = vmul.f32 %v567_v55, %v736_v0  ;;  %v162_v63 = vmul.f32 %v568_v56, %v736_v0  ;;  %v575_v1 = vunpack.c.l.bf16 %v682_v52  ;;  %v576_v2 = vunpack.c.h.bf16 %v682_v52 }
   0xe   :  { %483 = vst [vmem:[%s1355_s4 + $0x20] sm:$0xff] %v419_v53  ;;  %484 = vst [vmem:[%s1355_s4 + $0x28] sm:$0xff] %v420_v54  ;;  %v163_v6 = vmul.f32 %v571_v60, %v736_v0  ;;  %v164_v7 = vmul.f32 %v572_v61, %v736_v0  ;;  %v579_v8 = vunpack.c.l.bf16 %v683_v57  ;;  %v580_v9 = vunpack.c.h.bf16 %v683_v57 }
   0xf   :  { %485 = vst [vmem:[%s1355_s4 + $0x30] sm:$0xff] %v421_v58  ;;  %486 = vst [vmem:[%s1355_s4 + $0x38] sm:$0xff] %v422_v59  ;;  %v231_v10 = vadd.f32 %v747_v5, %v161_v62  ;;  %v232_v11 = vadd.f32 %v747_v5, %v162_v63  ;;  %v165_v14 = vmul.f32 %v575_v1, %v736_v0  ;;  %v583_v45 = vunpack.c.l.bf16 %v684_v32 }
  0x10   :  { %v166_v15 = vmul.f32 %v576_v2, %v736_v0  ;;  %v233_v16 = vadd.f32 %v747_v5, %v163_v6  ;;  %v234_v17 = vadd.f32 %v747_v5, %v164_v7  ;;  %v167_v20 = vmul.f32 %v579_v8, %v736_v0 }
  0x11   :  { %v168_v21 = vmul.f32 %v580_v9, %v736_v0  ;;  %v235_v24 = vadd.f32 %v747_v5, %v165_v14  ;;  %v584_v46 = vunpack.c.h.bf16 %v684_v32  ;;  %v587_v50 = vunpack.c.l.bf16 %v685_v37  ;;  %v690_v32 = vld [vmem:[%s1351_s0 + $0x70] sm:$0xff]  }
  0x12   :  { %v236_v25 = vadd.f32 %v747_v5, %v166_v15  ;;  %v237_v30 = vadd.f32 %v747_v5, %v167_v20  ;;  %v588_v51 = vunpack.c.h.bf16 %v685_v37  ;;  %v169_v52 = vmul.f32 %v583_v45, %v736_v0  ;;  %v691_v37 = vld [vmem:[%s1351_s0 + $0x78] sm:$0xff]  }
  0x13   :  { %v238_v31 = vadd.f32 %v747_v5, %v168_v21  ;;  %v170_v53 = vmul.f32 %v584_v46, %v736_v0  ;;  %v591_v54 = vunpack.c.l.bf16 %v686_v42  ;;  %v592_v55 = vunpack.c.h.bf16 %v686_v42 }
  0x14   :  { %v171_v58 = vmul.f32 %v587_v50, %v736_v0  ;;  %v172_v59 = vmul.f32 %v588_v51, %v736_v0  ;;  %v595_v60 = vunpack.c.l.bf16 %v687_v47  ;;  %v596_v61 = vunpack.c.h.bf16 %v687_v47 }
  0x15   :  { %v239_v62 = vadd.f32 %v747_v5, %v169_v52  ;;  %v240_v63 = vadd.f32 %v747_v5, %v170_v53  ;;  %v608_v45 = vunpack.c.h.bf16 %v690_v32  ;;  %v611_v50 = vunpack.c.l.bf16 %v691_v37 }
  0x16   :  { %v295_v3 = vld [vmem:[%s1354_s1 + $0x40] sm:$0xff]  ;;  %v296_v4 = vld [vmem:[%s1354_s1 + $0x48] sm:$0xff]  ;;  %v297_v12 = vld [vmem:[%s1354_s1 + $0x50] sm:$0xff]  ;;  %v241_v6 = vadd.f32 %v747_v5, %v171_v58  ;;  %v242_v7 = vadd.f32 %v747_v5, %v172_v59  ;;  %v612_v51 = vunpack.c.h.bf16 %v691_v37 }
  0x17   :  { %v298_v13 = vld [vmem:[%s1354_s1 + $0x58] sm:$0xff]  ;;  %v299_v18 = vld [vmem:[%s1354_s1 + $0x60] sm:$0xff]  ;;  %v300_v19 = vld [vmem:[%s1354_s1 + $0x68] sm:$0xff]  ;;  %v359_v22 = vadd.f32 %v295_v3, %v231_v10  ;;  %v360_v23 = vadd.f32 %v296_v4, %v232_v11  ;;  %v361_v28 = vadd.f32 %v297_v12, %v233_v16  ;;  %v173_v3 = vmul.f32 %v591_v54, %v736_v0 }
  0x18   :  { %v301_v26 = vld [vmem:[%s1354_s1 + $0x70] sm:$0xff]  ;;  %v302_v27 = vld [vmem:[%s1354_s1 + $0x78] sm:$0xff]  ;;  %v362_v29 = vadd.f32 %v298_v13, %v234_v17  ;;  %v363_v35 = vadd.f32 %v299_v18, %v235_v24  ;;  %v364_v36 = vadd.f32 %v300_v19, %v236_v25  ;;  %v174_v4 = vmul.f32 %v592_v55, %v736_v0 }
  0x19   :  { %v423_v33 = vmax.f32 %v359_v22, 0.0  ;;  %v424_v34 = vmax.f32 %v360_v23, 0.0  ;;  %v425_v38 = vmax.f32 %v361_v28, 0.0  ;;  %v365_v40 = vadd.f32 %v301_v26, %v237_v30  ;;  %v688_v22 = vld [vmem:[%s1351_s0 + $0x60] sm:$0xff]  }
  0x1a   :  { %v426_v39 = vmax.f32 %v362_v29, 0.0  ;;  %v366_v41 = vadd.f32 %v302_v27, %v238_v31  ;;  %v427_v43 = vmax.f32 %v363_v35, 0.0  ;;  %v428_v44 = vmax.f32 %v364_v36, 0.0  ;;  %v689_v27 = vld [vmem:[%s1351_s0 + $0x68] sm:$0xff]  }
  0x1b   :  { %487 = vst [vmem:[%s1355_s4 + $0x40] sm:$0xff] %v423_v33  ;;  %488 = vst [vmem:[%s1355_s4 + $0x48] sm:$0xff] %v424_v34  ;;  %v429_v48 = vmax.f32 %v365_v40, 0.0  ;;  %v175_v10 = vmul.f32 %v595_v60, %v736_v0  ;;  %v176_v11 = vmul.f32 %v596_v61, %v736_v0  ;;  %v243_v14 = vadd.f32 %v747_v5, %v173_v3 }
  0x1c   :  { %489 = vst [vmem:[%s1355_s4 + $0x50] sm:$0xff] %v425_v38  ;;  %490 = vst [vmem:[%s1355_s4 + $0x58] sm:$0xff] %v426_v39  ;;  %v430_v49 = vmax.f32 %v366_v41, 0.0  ;;  %v244_v15 = vadd.f32 %v747_v5, %v174_v4  ;;  %v599_v35 = vunpack.c.l.bf16 %v688_v22  ;;  %v600_v36 = vunpack.c.h.bf16 %v688_v22  ;;  %v694_v22 = vld [vmem:[%s1351_s0 + $0x90] sm:$0xff]  }
  0x1d   :  { %491 = vst [vmem:[%s1355_s4 + $0x60] sm:$0xff] %v427_v43  ;;  %492 = vst [vmem:[%s1355_s4 + $0x68] sm:$0xff] %v428_v44  ;;  %v245_v20 = vadd.f32 %v747_v5, %v175_v10  ;;  %v246_v21 = vadd.f32 %v747_v5, %v176_v11  ;;  %v603_v40 = vunpack.c.l.bf16 %v689_v27  ;;  %v604_v41 = vunpack.c.h.bf16 %v689_v27  ;;  %v695_v27 = vld [vmem:[%s1351_s0 + $0x98] sm:$0xff]  }
  0x1e   :  { %493 = vst [vmem:[%s1355_s4 + $0x70] sm:$0xff] %v429_v48  ;;  %494 = vst [vmem:[%s1355_s4 + $0x78] sm:$0xff] %v430_v49  ;;  %v177_v42 = vmul.f32 %v599_v35, %v736_v0  ;;  %v178_v43 = vmul.f32 %v600_v36, %v736_v0  ;;  %v607_v44 = vunpack.c.l.bf16 %v690_v32  ;;  %v624_v35 = vunpack.c.h.bf16 %v694_v22 }
  0x1f   :  { %v179_v48 = vmul.f32 %v603_v40, %v736_v0  ;;  %v180_v49 = vmul.f32 %v604_v41, %v736_v0  ;;  %v627_v40 = vunpack.c.l.bf16 %v695_v27  ;;  %v628_v41 = vunpack.c.h.bf16 %v695_v27 }
  0x20   :  { %v247_v52 = vadd.f32 %v747_v5, %v177_v42  ;;  %v248_v53 = vadd.f32 %v747_v5, %v178_v43 }
  0x21   :  { %v249_v58 = vadd.f32 %v747_v5, %v179_v48  ;;  %v250_v59 = vadd.f32 %v747_v5, %v180_v49 }
  0x25   :  { %v303_v56 = vld [vmem:[%s1354_s1 + $0x80] sm:$0xff]  ;;  %v304_v57 = vld [vmem:[%s1354_s1 + $0x88] sm:$0xff]  ;;  %v305_v1 = vld [vmem:[%s1354_s1 + $0x90] sm:$0xff] }
  0x26   :  { %v306_v2 = vld [vmem:[%s1354_s1 + $0x98] sm:$0xff]  ;;  %v307_v8 = vld [vmem:[%s1354_s1 + $0xa0] sm:$0xff]  ;;  %v308_v9 = vld [vmem:[%s1354_s1 + $0xa8] sm:$0xff]  ;;  %v367_v12 = vadd.f32 %v303_v56, %v239_v62  ;;  %v368_v13 = vadd.f32 %v304_v57, %v240_v63  ;;  %v369_v18 = vadd.f32 %v305_v1, %v241_v6  ;;  %v181_v56 = vmul.f32 %v607_v44, %v736_v0 }
  0x27   :  { %v309_v16 = vld [vmem:[%s1354_s1 + $0xb0] sm:$0xff]  ;;  %v310_v17 = vld [vmem:[%s1354_s1 + $0xb8] sm:$0xff]  ;;  %v370_v19 = vadd.f32 %v306_v2, %v242_v7  ;;  %v371_v25 = vadd.f32 %v307_v8, %v243_v14  ;;  %v372_v26 = vadd.f32 %v308_v9, %v244_v15  ;;  %v182_v57 = vmul.f32 %v608_v45, %v736_v0 }
  0x28   :  { %v431_v23 = vmax.f32 %v367_v12, 0.0  ;;  %v432_v24 = vmax.f32 %v368_v13, 0.0  ;;  %v433_v28 = vmax.f32 %v369_v18, 0.0  ;;  %v373_v30 = vadd.f32 %v309_v16, %v245_v20  ;;  %v692_v12 = vld [vmem:[%s1351_s0 + $0x80] sm:$0xff]  }
  0x29   :  { %v434_v29 = vmax.f32 %v370_v19, 0.0  ;;  %v374_v31 = vadd.f32 %v310_v17, %v246_v21  ;;  %v435_v33 = vmax.f32 %v371_v25, 0.0  ;;  %v436_v34 = vmax.f32 %v372_v26, 0.0  ;;  %v693_v17 = vld [vmem:[%s1351_s0 + $0x88] sm:$0xff]  }
  0x2a   :  { %495 = vst [vmem:[%s1355_s4 + $0x80] sm:$0xff] %v431_v23  ;;  %496 = vst [vmem:[%s1355_s4 + $0x88] sm:$0xff] %v432_v24  ;;  %v437_v38 = vmax.f32 %v373_v30, 0.0  ;;  %v183_v62 = vmul.f32 %v611_v50, %v736_v0  ;;  %v184_v63 = vmul.f32 %v612_v51, %v736_v0  ;;  %v251_v3 = vadd.f32 %v747_v5, %v181_v56 }
  0x2b   :  { %497 = vst [vmem:[%s1355_s4 + $0x90] sm:$0xff] %v433_v28  ;;  %498 = vst [vmem:[%s1355_s4 + $0x98] sm:$0xff] %v434_v29  ;;  %v438_v39 = vmax.f32 %v374_v31, 0.0  ;;  %v252_v4 = vadd.f32 %v747_v5, %v182_v57  ;;  %v615_v25 = vunpack.c.l.bf16 %v692_v12  ;;  %v616_v26 = vunpack.c.h.bf16 %v692_v12  ;;  %v698_v12 = vld [vmem:[%s1351_s0 + $0xb0] sm:$0xff]  }
  0x2c   :  { %499 = vst [vmem:[%s1355_s4 + $0xa0] sm:$0xff] %v435_v33  ;;  %500 = vst [vmem:[%s1355_s4 + $0xa8] sm:$0xff] %v436_v34  ;;  %v253_v10 = vadd.f32 %v747_v5, %v183_v62  ;;  %v254_v11 = vadd.f32 %v747_v5, %v184_v63  ;;  %v619_v30 = vunpack.c.l.bf16 %v693_v17  ;;  %v620_v31 = vunpack.c.h.bf16 %v693_v17  ;;  %v699_v17 = vld [vmem:[%s1351_s0 + $0xb8] sm:$0xff]  }
  0x2d   :  { %501 = vst [vmem:[%s1355_s4 + $0xb0] sm:$0xff] %v437_v38  ;;  %502 = vst [vmem:[%s1355_s4 + $0xb8] sm:$0xff] %v438_v39  ;;  %v185_v32 = vmul.f32 %v615_v25, %v736_v0  ;;  %v186_v33 = vmul.f32 %v616_v26, %v736_v0  ;;  %v623_v34 = vunpack.c.l.bf16 %v694_v22  ;;  %v640_v25 = vunpack.c.h.bf16 %v698_v12 }
  0x2e   :  { %v187_v38 = vmul.f32 %v619_v30, %v736_v0  ;;  %v188_v39 = vmul.f32 %v620_v31, %v736_v0  ;;  %v643_v30 = vunpack.c.l.bf16 %v699_v17  ;;  %v644_v31 = vunpack.c.h.bf16 %v699_v17 }
  0x2f   :  { %v255_v42 = vadd.f32 %v747_v5, %v185_v32  ;;  %v256_v43 = vadd.f32 %v747_v5, %v186_v33 }
  0x30   :  { %v257_v48 = vadd.f32 %v747_v5, %v187_v38  ;;  %v258_v49 = vadd.f32 %v747_v5, %v188_v39 }
  0x34   :  { %v311_v46 = vld [vmem:[%s1354_s1 + $0xc0] sm:$0xff]  ;;  %v312_v47 = vld [vmem:[%s1354_s1 + $0xc8] sm:$0xff]  ;;  %v313_v54 = vld [vmem:[%s1354_s1 + $0xd0] sm:$0xff] }
  0x35   :  { %v314_v55 = vld [vmem:[%s1354_s1 + $0xd8] sm:$0xff]  ;;  %v315_v60 = vld [vmem:[%s1354_s1 + $0xe0] sm:$0xff]  ;;  %v316_v61 = vld [vmem:[%s1354_s1 + $0xe8] sm:$0xff]  ;;  %v375_v1 = vadd.f32 %v311_v46, %v247_v52  ;;  %v376_v2 = vadd.f32 %v312_v47, %v248_v53  ;;  %v377_v8 = vadd.f32 %v313_v54, %v249_v58  ;;  %v189_v46 = vmul.f32 %v623_v34, %v736_v0 }
  0x36   :  { %v317_v6 = vld [vmem:[%s1354_s1 + $0xf0] sm:$0xff]  ;;  %v318_v7 = vld [vmem:[%s1354_s1 + $0xf8] sm:$0xff]  ;;  %v378_v9 = vadd.f32 %v314_v55, %v250_v59  ;;  %v379_v15 = vadd.f32 %v315_v60, %v251_v3  ;;  %v380_v16 = vadd.f32 %v316_v61, %v252_v4  ;;  %v190_v47 = vmul.f32 %v624_v35, %v736_v0 }
  0x37   :  { %v439_v13 = vmax.f32 %v375_v1, 0.0  ;;  %v440_v14 = vmax.f32 %v376_v2, 0.0  ;;  %v441_v18 = vmax.f32 %v377_v8, 0.0  ;;  %v381_v20 = vadd.f32 %v317_v6, %v253_v10  ;;  %v696_v1 = vld [vmem:[%s1351_s0 + $0xa0] sm:$0xff]  }
  0x38   :  { %v442_v19 = vmax.f32 %v378_v9, 0.0  ;;  %v382_v21 = vadd.f32 %v318_v7, %v254_v11  ;;  %v443_v23 = vmax.f32 %v379_v15, 0.0  ;;  %v444_v24 = vmax.f32 %v380_v16, 0.0  ;;  %v697_v7 = vld [vmem:[%s1351_s0 + $0xa8] sm:$0xff]  }
  0x39   :  { %503 = vst [vmem:[%s1355_s4 + $0xc0] sm:$0xff] %v439_v13  ;;  %504 = vst [vmem:[%s1355_s4 + $0xc8] sm:$0xff] %v440_v14  ;;  %v445_v28 = vmax.f32 %v381_v20, 0.0  ;;  %v191_v52 = vmul.f32 %v627_v40, %v736_v0  ;;  %v192_v53 = vmul.f32 %v628_v41, %v736_v0  ;;  %v259_v56 = vadd.f32 %v747_v5, %v189_v46 }
  0x3a   :  { %505 = vst [vmem:[%s1355_s4 + $0xd0] sm:$0xff] %v441_v18  ;;  %506 = vst [vmem:[%s1355_s4 + $0xd8] sm:$0xff] %v442_v19  ;;  %v446_v29 = vmax.f32 %v382_v21, 0.0  ;;  %v260_v57 = vadd.f32 %v747_v5, %v190_v47  ;;  %v631_v15 = vunpack.c.l.bf16 %v696_v1  ;;  %v632_v16 = vunpack.c.h.bf16 %v696_v1  ;;  %v702_v1 = vld [vmem:[%s1351_s0 + $0xd0] sm:$0xff]  }
  0x3b   :  { %507 = vst [vmem:[%s1355_s4 + $0xe0] sm:$0xff] %v443_v23  ;;  %508 = vst [vmem:[%s1355_s4 + $0xe8] sm:$0xff] %v444_v24  ;;  %v261_v62 = vadd.f32 %v747_v5, %v191_v52  ;;  %v262_v63 = vadd.f32 %v747_v5, %v192_v53  ;;  %v635_v20 = vunpack.c.l.bf16 %v697_v7  ;;  %v636_v21 = vunpack.c.h.bf16 %v697_v7  ;;  %v703_v7 = vld [vmem:[%s1351_s0 + $0xd8] sm:$0xff]  }
  0x3c   :  { %509 = vst [vmem:[%s1355_s4 + $0xf0] sm:$0xff] %v445_v28  ;;  %510 = vst [vmem:[%s1355_s4 + $0xf8] sm:$0xff] %v446_v29  ;;  %v193_v22 = vmul.f32 %v631_v15, %v736_v0  ;;  %v194_v23 = vmul.f32 %v632_v16, %v736_v0  ;;  %v639_v24 = vunpack.c.l.bf16 %v698_v12  ;;  %v656_v15 = vunpack.c.h.bf16 %v702_v1 }
  0x3d   :  { %v195_v28 = vmul.f32 %v635_v20, %v736_v0  ;;  %v196_v29 = vmul.f32 %v636_v21, %v736_v0  ;;  %v659_v20 = vunpack.c.l.bf16 %v703_v7  ;;  %v660_v21 = vunpack.c.h.bf16 %v703_v7 }
  0x3e   :  { %v263_v32 = vadd.f32 %v747_v5, %v193_v22  ;;  %v264_v33 = vadd.f32 %v747_v5, %v194_v23 }
  0x3f   :  { %v265_v38 = vadd.f32 %v747_v5, %v195_v28  ;;  %v266_v39 = vadd.f32 %v747_v5, %v196_v29 }
  0x43   :  { %v319_v36 = vld [vmem:[%s1354_s1 + $0x100] sm:$0xff]  ;;  %v320_v37 = vld [vmem:[%s1354_s1 + $0x108] sm:$0xff]  ;;  %v321_v44 = vld [vmem:[%s1354_s1 + $0x110] sm:$0xff] }
  0x44   :  { %v322_v45 = vld [vmem:[%s1354_s1 + $0x118] sm:$0xff]  ;;  %v323_v50 = vld [vmem:[%s1354_s1 + $0x120] sm:$0xff]  ;;  %v324_v51 = vld [vmem:[%s1354_s1 + $0x128] sm:$0xff]  ;;  %v383_v54 = vadd.f32 %v319_v36, %v255_v42  ;;  %v384_v55 = vadd.f32 %v320_v37, %v256_v43  ;;  %v385_v60 = vadd.f32 %v321_v44, %v257_v48  ;;  %v197_v36 = vmul.f32 %v639_v24, %v736_v0 }
  0x45   :  { %v325_v58 = vld [vmem:[%s1354_s1 + $0x130] sm:$0xff]  ;;  %v326_v59 = vld [vmem:[%s1354_s1 + $0x138] sm:$0xff]  ;;  %v386_v61 = vadd.f32 %v322_v45, %v258_v49  ;;  %v387_v4 = vadd.f32 %v323_v50, %v259_v56  ;;  %v388_v6 = vadd.f32 %v324_v51, %v260_v57  ;;  %v198_v37 = vmul.f32 %v640_v25, %v736_v0 }
  0x46   :  { %v447_v2 = vmax.f32 %v383_v54, 0.0  ;;  %v448_v3 = vmax.f32 %v384_v55, 0.0  ;;  %v449_v8 = vmax.f32 %v385_v60, 0.0  ;;  %v389_v10 = vadd.f32 %v325_v58, %v261_v62  ;;  %v700_v54 = vld [vmem:[%s1351_s0 + $0xc0] sm:$0xff]  }
  0x47   :  { %v450_v9 = vmax.f32 %v386_v61, 0.0  ;;  %v390_v11 = vadd.f32 %v326_v59, %v262_v63  ;;  %v451_v13 = vmax.f32 %v387_v4, 0.0  ;;  %v452_v14 = vmax.f32 %v388_v6, 0.0  ;;  %v701_v59 = vld [vmem:[%s1351_s0 + $0xc8] sm:$0xff]  }
  0x48   :  { %511 = vst [vmem:[%s1355_s4 + $0x100] sm:$0xff] %v447_v2  ;;  %512 = vst [vmem:[%s1355_s4 + $0x108] sm:$0xff] %v448_v3  ;;  %v453_v18 = vmax.f32 %v389_v10, 0.0  ;;  %v199_v42 = vmul.f32 %v643_v30, %v736_v0  ;;  %v200_v43 = vmul.f32 %v644_v31, %v736_v0  ;;  %v267_v46 = vadd.f32 %v747_v5, %v197_v36 }
  0x49   :  { %513 = vst [vmem:[%s1355_s4 + $0x110] sm:$0xff] %v449_v8  ;;  %514 = vst [vmem:[%s1355_s4 + $0x118] sm:$0xff] %v450_v9  ;;  %v454_v19 = vmax.f32 %v390_v11, 0.0  ;;  %v268_v47 = vadd.f32 %v747_v5, %v198_v37  ;;  %v647_v4 = vunpack.c.l.bf16 %v700_v54  ;;  %v648_v6 = vunpack.c.h.bf16 %v700_v54  ;;  %v706_v54 = vld [vmem:[%s1351_s0 + $0xf0] sm:$0xff]  }
  0x4a   :  { %515 = vst [vmem:[%s1355_s4 + $0x120] sm:$0xff] %v451_v13  ;;  %516 = vst [vmem:[%s1355_s4 + $0x128] sm:$0xff] %v452_v14  ;;  %v269_v52 = vadd.f32 %v747_v5, %v199_v42  ;;  %v270_v53 = vadd.f32 %v747_v5, %v200_v43  ;;  %v651_v10 = vunpack.c.l.bf16 %v701_v59  ;;  %v652_v11 = vunpack.c.h.bf16 %v701_v59  ;;  %v707_v59 = vld [vmem:[%s1351_s0 + $0xf8] sm:$0xff]  }
  0x4b   :  { %517 = vst [vmem:[%s1355_s4 + $0x130] sm:$0xff] %v453_v18  ;;  %518 = vst [vmem:[%s1355_s4 + $0x138] sm:$0xff] %v454_v19  ;;  %v201_v12 = vmul.f32 %v647_v4, %v736_v0  ;;  %v202_v13 = vmul.f32 %v648_v6, %v736_v0  ;;  %v655_v14 = vunpack.c.l.bf16 %v702_v1  ;;  %v672_v4 = vunpack.c.h.bf16 %v706_v54 }
  0x4c   :  { %v203_v18 = vmul.f32 %v651_v10, %v736_v0  ;;  %v204_v19 = vmul.f32 %v652_v11, %v736_v0  ;;  %v675_v10 = vunpack.c.l.bf16 %v707_v59  ;;  %v676_v11 = vunpack.c.h.bf16 %v707_v59 }
  0x4d   :  { %v271_v22 = vadd.f32 %v747_v5, %v201_v12  ;;  %v272_v23 = vadd.f32 %v747_v5, %v202_v13 }
  0x4e   :  { %v273_v28 = vadd.f32 %v747_v5, %v203_v18  ;;  %v274_v29 = vadd.f32 %v747_v5, %v204_v19 }
  0x52   :  { %v327_v26 = vld [vmem:[%s1354_s1 + $0x140] sm:$0xff]  ;;  %v328_v27 = vld [vmem:[%s1354_s1 + $0x148] sm:$0xff]  ;;  %v329_v34 = vld [vmem:[%s1354_s1 + $0x150] sm:$0xff] }
  0x53   :  { %v330_v35 = vld [vmem:[%s1354_s1 + $0x158] sm:$0xff]  ;;  %v331_v40 = vld [vmem:[%s1354_s1 + $0x160] sm:$0xff]  ;;  %v332_v41 = vld [vmem:[%s1354_s1 + $0x168] sm:$0xff]  ;;  %v391_v44 = vadd.f32 %v327_v26, %v263_v32  ;;  %v392_v45 = vadd.f32 %v328_v27, %v264_v33  ;;  %v393_v50 = vadd.f32 %v329_v34, %v265_v38  ;;  %v205_v26 = vmul.f32 %v655_v14, %v736_v0 }
  0x54   :  { %v333_v48 = vld [vmem:[%s1354_s1 + $0x170] sm:$0xff]  ;;  %v334_v49 = vld [vmem:[%s1354_s1 + $0x178] sm:$0xff]  ;;  %v394_v51 = vadd.f32 %v330_v35, %v266_v39  ;;  %v395_v57 = vadd.f32 %v331_v40, %v267_v46  ;;  %v396_v58 = vadd.f32 %v332_v41, %v268_v47  ;;  %v206_v27 = vmul.f32 %v656_v15, %v736_v0 }
  0x55   :  { %v455_v55 = vmax.f32 %v391_v44, 0.0  ;;  %v456_v56 = vmax.f32 %v392_v45, 0.0  ;;  %v457_v60 = vmax.f32 %v393_v50, 0.0  ;;  %v397_v62 = vadd.f32 %v333_v48, %v269_v52  ;;  %v704_v44 = vld [vmem:[%s1351_s0 + $0xe0] sm:$0xff]  }
  0x56   :  { %v458_v61 = vmax.f32 %v394_v51, 0.0  ;;  %v398_v63 = vadd.f32 %v334_v49, %v270_v53  ;;  %v459_v2 = vmax.f32 %v395_v57, 0.0  ;;  %v460_v3 = vmax.f32 %v396_v58, 0.0  ;;  %v705_v49 = vld [vmem:[%s1351_s0 + $0xe8] sm:$0xff]  }
  0x57   :  { %519 = vst [vmem:[%s1355_s4 + $0x140] sm:$0xff] %v455_v55  ;;  %520 = vst [vmem:[%s1355_s4 + $0x148] sm:$0xff] %v456_v56  ;;  %v461_v8 = vmax.f32 %v397_v62, 0.0  ;;  %v207_v32 = vmul.f32 %v659_v20, %v736_v0  ;;  %v208_v33 = vmul.f32 %v660_v21, %v736_v0  ;;  %v275_v36 = vadd.f32 %v747_v5, %v205_v26 }
  0x58   :  { %521 = vst [vmem:[%s1355_s4 + $0x150] sm:$0xff] %v457_v60  ;;  %522 = vst [vmem:[%s1355_s4 + $0x158] sm:$0xff] %v458_v61  ;;  %v462_v9 = vmax.f32 %v398_v63, 0.0  ;;  %v276_v37 = vadd.f32 %v747_v5, %v206_v27  ;;  %v663_v57 = vunpack.c.l.bf16 %v704_v44  ;;  %v664_v58 = vunpack.c.h.bf16 %v704_v44 }
  0x59   :  { %523 = vst [vmem:[%s1355_s4 + $0x160] sm:$0xff] %v459_v2  ;;  %524 = vst [vmem:[%s1355_s4 + $0x168] sm:$0xff] %v460_v3  ;;  %v277_v42 = vadd.f32 %v747_v5, %v207_v32  ;;  %v278_v43 = vadd.f32 %v747_v5, %v208_v33  ;;  %v667_v62 = vunpack.c.l.bf16 %v705_v49  ;;  %v668_v63 = vunpack.c.h.bf16 %v705_v49 }
  0x5a   :  { %525 = vst [vmem:[%s1355_s4 + $0x170] sm:$0xff] %v461_v8  ;;  %526 = vst [vmem:[%s1355_s4 + $0x178] sm:$0xff] %v462_v9  ;;  %v209_v1 = vmul.f32 %v663_v57, %v736_v0  ;;  %v210_v2 = vmul.f32 %v664_v58, %v736_v0  ;;  %v671_v3 = vunpack.c.l.bf16 %v706_v54 }
  0x5b   :  { %v211_v8 = vmul.f32 %v667_v62, %v736_v0  ;;  %v212_v9 = vmul.f32 %v668_v63, %v736_v0 }
  0x5c   :  { %v279_v12 = vadd.f32 %v747_v5, %v209_v1  ;;  %v280_v13 = vadd.f32 %v747_v5, %v210_v2 }
  0x5d   :  { %v281_v18 = vadd.f32 %v747_v5, %v211_v8  ;;  %v282_v19 = vadd.f32 %v747_v5, %v212_v9 }
  0x61   :  { %v335_v16 = vld [vmem:[%s1354_s1 + $0x180] sm:$0xff]  ;;  %v336_v17 = vld [vmem:[%s1354_s1 + $0x188] sm:$0xff]  ;;  %v337_v24 = vld [vmem:[%s1354_s1 + $0x190] sm:$0xff] }
  0x62   :  { %v338_v25 = vld [vmem:[%s1354_s1 + $0x198] sm:$0xff]  ;;  %v339_v30 = vld [vmem:[%s1354_s1 + $0x1a0] sm:$0xff]  ;;  %v340_v31 = vld [vmem:[%s1354_s1 + $0x1a8] sm:$0xff]  ;;  %v399_v34 = vadd.f32 %v335_v16, %v271_v22  ;;  %v400_v35 = vadd.f32 %v336_v17, %v272_v23  ;;  %v401_v40 = vadd.f32 %v337_v24, %v273_v28  ;;  %v213_v16 = vmul.f32 %v671_v3, %v736_v0 }
  0x63   :  { %v341_v38 = vld [vmem:[%s1354_s1 + $0x1b0] sm:$0xff]  ;;  %v342_v39 = vld [vmem:[%s1354_s1 + $0x1b8] sm:$0xff]  ;;  %v402_v41 = vadd.f32 %v338_v25, %v274_v29  ;;  %v403_v47 = vadd.f32 %v339_v30, %v275_v36  ;;  %v404_v48 = vadd.f32 %v340_v31, %v276_v37  ;;  %v214_v17 = vmul.f32 %v672_v4, %v736_v0 }
  0x64   :  { %v463_v45 = vmax.f32 %v399_v34, 0.0  ;;  %v464_v46 = vmax.f32 %v400_v35, 0.0  ;;  %v465_v50 = vmax.f32 %v401_v40, 0.0  ;;  %v405_v52 = vadd.f32 %v341_v38, %v277_v42 }
  0x65   :  { %v466_v51 = vmax.f32 %v402_v41, 0.0  ;;  %v406_v53 = vadd.f32 %v342_v39, %v278_v43  ;;  %v467_v55 = vmax.f32 %v403_v47, 0.0  ;;  %v468_v56 = vmax.f32 %v404_v48, 0.0 }
  0x66   :  { %527 = vst [vmem:[%s1355_s4 + $0x180] sm:$0xff] %v463_v45  ;;  %528 = vst [vmem:[%s1355_s4 + $0x188] sm:$0xff] %v464_v46  ;;  %v469_v60 = vmax.f32 %v405_v52, 0.0  ;;  %v215_v22 = vmul.f32 %v675_v10, %v736_v0  ;;  %v216_v23 = vmul.f32 %v676_v11, %v736_v0  ;;  %v283_v26 = vadd.f32 %v747_v5, %v213_v16 }
  0x67   :  { %529 = vst [vmem:[%s1355_s4 + $0x190] sm:$0xff] %v465_v50  ;;  %530 = vst [vmem:[%s1355_s4 + $0x198] sm:$0xff] %v466_v51  ;;  %v470_v61 = vmax.f32 %v406_v53, 0.0  ;;  %v284_v27 = vadd.f32 %v747_v5, %v214_v17 }
  0x68   :  { %531 = vst [vmem:[%s1355_s4 + $0x1a0] sm:$0xff] %v467_v55  ;;  %532 = vst [vmem:[%s1355_s4 + $0x1a8] sm:$0xff] %v468_v56  ;;  %v285_v32 = vadd.f32 %v747_v5, %v215_v22  ;;  %v286_v0 = vadd.f32 %v747_v5, %v216_v23 }
  0x69   :  { %533 = vst [vmem:[%s1355_s4 + $0x1b0] sm:$0xff] %v469_v60  ;;  %534 = vst [vmem:[%s1355_s4 + $0x1b8] sm:$0xff] %v470_v61 }
  0x70   :  { %v343_v6 = vld [vmem:[%s1354_s1 + $0x1c0] sm:$0xff]  ;;  %v344_v7 = vld [vmem:[%s1354_s1 + $0x1c8] sm:$0xff]  ;;  %v345_v14 = vld [vmem:[%s1354_s1 + $0x1d0] sm:$0xff] }
  0x71   :  { %v346_v15 = vld [vmem:[%s1354_s1 + $0x1d8] sm:$0xff]  ;;  %v347_v20 = vld [vmem:[%s1354_s1 + $0x1e0] sm:$0xff]  ;;  %v348_v21 = vld [vmem:[%s1354_s1 + $0x1e8] sm:$0xff]  ;;  %v407_v24 = vadd.f32 %v343_v6, %v279_v12  ;;  %v408_v25 = vadd.f32 %v344_v7, %v280_v13  ;;  %v409_v30 = vadd.f32 %v345_v14, %v281_v18 }
  0x72   :  { %v349_v28 = vld [vmem:[%s1354_s1 + $0x1f0] sm:$0xff]  ;;  %v350_v29 = vld [vmem:[%s1354_s1 + $0x1f8] sm:$0xff]  ;;  %v410_v31 = vadd.f32 %v346_v15, %v282_v19  ;;  %v411_v35 = vadd.f32 %v347_v20, %v283_v26  ;;  %v412_v36 = vadd.f32 %v348_v21, %v284_v27 }
  0x73   :  { %v471_v33 = vmax.f32 %v407_v24, 0.0  ;;  %v472_v34 = vmax.f32 %v408_v25, 0.0  ;;  %v473_v37 = vmax.f32 %v409_v30, 0.0  ;;  %v413_v39 = vadd.f32 %v349_v28, %v285_v32 }
  0x74   :  { %v474_v38 = vmax.f32 %v410_v31, 0.0  ;;  %v414_v40 = vadd.f32 %v350_v29, %v286_v0  ;;  %v475_v41 = vmax.f32 %v411_v35, 0.0  ;;  %v476_v42 = vmax.f32 %v412_v36, 0.0 }
  0x75   :  { %535 = vst [vmem:[%s1355_s4 + $0x1c0] sm:$0xff] %v471_v33  ;;  %536 = vst [vmem:[%s1355_s4 + $0x1c8] sm:$0xff] %v472_v34  ;;  %v477_v5 = vmax.f32 %v413_v39, 0.0 }
  0x76   :  { %537 = vst [vmem:[%s1355_s4 + $0x1d0] sm:$0xff] %v473_v37  ;;  %538 = vst [vmem:[%s1355_s4 + $0x1d8] sm:$0xff] %v474_v38  ;;  %v478_v43 = vmax.f32 %v414_v40, 0.0 }
  0x77   :  { %539 = vst [vmem:[%s1355_s4 + $0x1e0] sm:$0xff] %v475_v41  ;;  %540 = vst [vmem:[%s1355_s4 + $0x1e8] sm:$0xff] %v476_v42 }
  0x78   :  { %541 = vst [vmem:[%s1355_s4 + $0x1f0] sm:$0xff] %v477_v5  ;;  %542 = vst [vmem:[%s1355_s4 + $0x1f8] sm:$0xff] %v478_v43 }

// kernel: basic_block.3
= control target key start
LH: loop header
LB: loop body
LE: loop exit
PB: predicated region body
PF: predicated region fallthrough
CT: control target
= control target key end

     0   :  { %s7564_s12 = smov 0   ;;  %s9018_s0 = inlined_call_operand.vmem [shape: f32[2,16,16,128], index: 0, kind: input, shape index: {}]   ;;  %s9019_s1 = inlined_call_operand.vmem [shape: bf16[1152,128], index: 1, kind: input, shape index: {}]   ;;  %s9020_s2 = inlined_call_operand.vmem [shape: bf16[2,16,16,128], index: 2, kind: output, shape index: {0}]   ;;  %s9021_s3 = inlined_call_operand.vmem [shape: f32[2,2,128], index: 3, kind: output, shape index: {1}]  }
   0x1 LB: > { %s6161_s13 = sadd.s32 4294967295, %s7541_s12   ;;  %p6165_p0 = scmp.ge.s32.totalorder %s7541_s12, 1  ;;  %s7541_s12 = sphi %s7564_s12, %s14_s12  }
   0x2   : > { %p140_p1 = scmp.lt.s32.totalorder %s7541_s12, 3 }
   0x4   : > { %p141_p2 = pnand %p6165_p0, %p140_p1 }
   0x6   : > { %144 = sbr.rel (%p141_p2) target bundleno = 821 (0x335), region = 28 }
   0xb   : > { %v7255_v0 = vld [vmem:[%s9019_s1 + $0x78] sm:$0xff]   ;;  %v7543_v2 = vmov 0   ;;  %v7257_v3 = vld [vmem:[%s9019_s1 + $0x70] sm:$0xff]   ;;  %v7259_v5 = vld [vmem:[%s9019_s1 + $0x68] sm:$0xff]   ;;  %p168_p3 = scmp.lt.s32.totalorder %s6161_s13, 1 }
   0xc   : > { %v7256_v1 = vld [vmem:[%s9019_s1 + $0x38] sm:$0xff]   ;;  %231 = vst [vmem:[#allocation2 + $0x4] sm:$0xf] %v7543_v2  ;;  %232 = vst [vmem:[#allocation2 + $0x8] sm:$0xf] %v7543_v2  ;;  %6710 = vmatprep.subr.bf16.mxu0 %v7255_v0  ;;  %7230 = vmatprep.subr.bf16.mxu1 %v7255_v0  ;;  %v7258_v4 = vld [vmem:[%s9019_s1 + $0x30] sm:$0xff]  }
   0xd   : > { %233 = vst [vmem:[#allocation2 + $0xc] sm:$0xf] %v7543_v2  ;;  %234 = vst [vmem:[#allocation2 + $0x10] sm:$0xf] %v7543_v2  ;;  %6711 = vmatpush3.bf16.msra.mxu0 %v7256_v1  ;;  %7238 = vmatpush3.bf16.msra.mxu1 %v7256_v1  ;;  %v7260_v6 = vld [vmem:[%s9019_s1 + $0x28] sm:$0xff]   ;;  %v7261_v7 = vld [vmem:[%s9019_s1 + $0x60] sm:$0xff]  }
   0xe   : > { %236 = vst [vmem:[#allocation2 + $0x158] sm:$0xf] %v7543_v2  ;;  %237 = vst [vmem:[#allocation2 + $0x15c] sm:$0xf] %v7543_v2  ;;  %6712 = vmatprep.subr.bf16.mxu0 %v7257_v3  ;;  %7231 = vmatprep.subr.bf16.mxu1 %v7257_v3  ;;  %s9071_s13 = smov (!%p168_p3, %s6161_s13), 1  ;;  %v7262_v8 = vld [vmem:[%s9019_s1 + $0x20] sm:$0xff]  }
   0xf   : > { %238 = vst [vmem:[#allocation2 + $0x160] sm:$0xf] %v7543_v2  ;;  %239 = vst [vmem:[#allocation2 + $0x164] sm:$0xf] %v7543_v2  ;;  %v7263_v9 = vld [vmem:[%s9019_s1 + $0x58] sm:$0xff]   ;;  %s6501_s5 = sshll.u32 %s9071_s13, 8 }
  0x10   : > { %241 = vst [vmem:[#allocation2 + $0x18] sm:$0xf] %v7543_v2  ;;  %242 = vst [vmem:[#allocation2 + $0x2c] sm:$0xf] %v7543_v2  ;;  %v7264_v10 = vld [vmem:[%s9019_s1 + $0x18] sm:$0xff]   ;;  %v7265_v11 = vld [vmem:[%s9019_s1 + $0x50] sm:$0xff]   ;;  %s7615_s14 = scalar_lea.vmem %s9018_s0, %s6501_s5 }
  0x11   : > { %243 = vst [vmem:[#allocation2 + $0x40] sm:$0xf] %v7543_v2  ;;  %244 = vst [vmem:[#allocation2 + $0x54] sm:$0xf] %v7543_v2  ;;  %6713 = vmatpush3.bf16.msra.mxu0 %v7258_v4  ;;  %7239 = vmatpush3.bf16.msra.mxu1 %v7258_v4  ;;  %v7266_v15 = vld [vmem:[%s9019_s1 + $0x10] sm:$0xff]   ;;  %v7267_v23 = vld [vmem:[%s9019_s1 + $0x48] sm:$0xff]  }
  0x12   : > { %245 = vst [vmem:[#allocation2 + $0x68] sm:$0xf] %v7543_v2  ;;  %246 = vst [vmem:[#allocation2 + $0x7c] sm:$0xf] %v7543_v2  ;;  %6714 = vmatprep.subr.bf16.mxu0 %v7259_v5  ;;  %7232 = vmatprep.subr.bf16.mxu1 %v7259_v5  ;;  %vm465_vm0 = vsmask.f32 256 }
  0x13   : > { %247 = vst [vmem:[#allocation2 + $0x90] sm:$0xf] %v7543_v2  ;;  %248 = vst [vmem:[#allocation2 + $0xa4] sm:$0xf] %v7543_v2  ;;  %v417_v12 = vld [vmem:[#allocation2 + $0x4] sm:$0x8] }
  0x14   : > { %249 = vst [vmem:[#allocation2 + $0xb8] sm:$0xf] %v7543_v2  ;;  %250 = vst [vmem:[#allocation2 + $0xcc] sm:$0xf] %v7543_v2  ;;  %v418_v13 = vld [vmem:[#allocation2 + $0x8] sm:$0xf] }
  0x15   : > { %251 = vst [vmem:[#allocation2 + $0xe0] sm:$0xf] %v7543_v2  ;;  %252 = vst [vmem:[#allocation2 + $0xf4] sm:$0xf] %v7543_v2  ;;  %6715 = vmatpush3.bf16.msra.mxu0 %v7260_v6  ;;  %7240 = vmatpush3.bf16.msra.mxu1 %v7260_v6  ;;  %v419_v14 = vld [vmem:[#allocation2 + $0xc] sm:$0xf] }
  0x16   : > { %253 = vst [vmem:[#allocation2 + $0x108] sm:$0xf] %v7543_v2  ;;  %254 = vst [vmem:[#allocation2 + $0x11c] sm:$0xf] %v7543_v2  ;;  %6716 = vmatprep.subr.bf16.mxu0 %v7261_v7  ;;  %7233 = vmatprep.subr.bf16.mxu1 %v7261_v7  ;;  %vm466_vm1 = vsmask.f32 4368 }
  0x17   : > { %255 = vst [vmem:[#allocation2 + $0x130] sm:$0xf] %v7543_v2  ;;  %256 = vst [vmem:[#allocation2 + $0x144] sm:$0xf] %v7543_v2  ;;  %v469_v16 = vshrl.u32 %v417_v12, 16  ;;  %v474_v17 = vshrl.u32 %v418_v13, 16 }
  0x18   : > { %257 = vst [vmem:[#allocation2 + $0x24] sm:$0xf] %v7543_v2  ;;  %258 = vst [vmem:[#allocation2 + $0x38] sm:$0xf] %v7543_v2  ;;  %v477_v18 = vshll.u32 %v418_v13, 16  ;;  %v483_v19 = vshrl.u32 %v419_v14, 16 }
  0x19   : > { %259 = vst [vmem:[#allocation2 + $0x4c] sm:$0xf] %v7543_v2  ;;  %260 = vst [vmem:[#allocation2 + $0x60] sm:$0xf] %v7543_v2  ;;  %6717 = vmatpush3.bf16.msra.mxu0 %v7262_v8  ;;  %7241 = vmatpush3.bf16.msra.mxu1 %v7262_v8  ;;  %v486_v20 = vshll.u32 %v419_v14, 16  ;;  %v205_v22 = vld [vmem:[%s7615_s14 + $0xb0] sm:$0xff] }
  0x1a   : > { %261 = vst [vmem:[#allocation2 + $0x74] sm:$0xf] %v7543_v2  ;;  %262 = vst [vmem:[#allocation2 + $0x88] sm:$0xf] %v7543_v2  ;;  %6718 = vmatprep.subr.bf16.mxu0 %v7263_v9  ;;  %7234 = vmatprep.subr.bf16.mxu1 %v7263_v9  ;;  %v884_v21 = vld [vmem:[#allocation2 + $0x8] sm:$0xf] }
  0x1b   : > { %263 = vst [vmem:[#allocation2 + $0x9c] sm:$0xf] %v7543_v2  ;;  %264 = vst [vmem:[#allocation2 + $0xb0] sm:$0xf] %v7543_v2  ;;  %v6203_v24 = vrot.slane %v469_v16, 11  ;;  %v476_v25 = vrot.slane %v474_v17, 7 }
  0x1c   : > { %265 = vst [vmem:[#allocation2 + $0xc4] sm:$0xf] %v7543_v2  ;;  %266 = vst [vmem:[#allocation2 + $0xd8] sm:$0xf] %v7543_v2  ;;  %v885_v26 = vld [vmem:[#allocation2 + $0xc] sm:$0xf] }
  0x1d   : > { %267 = vst [vmem:[#allocation2 + $0xec] sm:$0xf] %v7543_v2  ;;  %268 = vst [vmem:[#allocation2 + $0x100] sm:$0xf] %v7543_v2  ;;  %6719 = vmatpush3.bf16.msra.mxu0 %v7264_v10  ;;  %7242 = vmatpush3.bf16.msra.mxu1 %v7264_v10  ;;  %v206_v27 = vld [vmem:[%s7615_s14 + $0xb8] sm:$0xff]  ;;  %v485_v29 = vrot.slane %v483_v19, 7  ;;  %v479_v32 = vor.u32 %v477_v18, %v476_v25 }
  0x1e   : > { %269 = vst [vmem:[#allocation2 + $0x114] sm:$0xf] %v7543_v2  ;;  %270 = vst [vmem:[#allocation2 + $0x128] sm:$0xf] %v7543_v2  ;;  %6720 = vmatprep.subr.bf16.mxu0 %v7265_v11  ;;  %7235 = vmatprep.subr.bf16.mxu1 %v7265_v11  ;;  %v6595_v30 = vpack.c.bf16 %v206_v27, %v205_v22  ;;  %v453_v31 = vld [vmem:[#allocation2 + $0xf4] sm:$0x8] }
  0x1f   : > { %271 = vst [vmem:[#allocation2 + $0x13c] sm:$0xf] %v7543_v2  ;;  %272 = vst [vmem:[#allocation2 + $0x150] sm:$0xf] %v7543_v2  ;;  %v481_v33 = vrot.slane %v476_v25, 4  ;;  %v488_v34 = vor.u32 %v486_v20, %v485_v29  ;;  %v7268_v35 = vld [vmem:[%s9019_s1 + $0x8] sm:$0xff]  }
  0x20   : > { %916 = vst [vmem:[#allocation3 + $0x4] sm:$0xf] %v884_v21  ;;  %vm7627_vm2 = vmor %vm465_vm0, %vm466_vm1  ;;  %v7269_v37 = vld [vmem:[%s9019_s1 + $0x40] sm:$0xff]   ;;  %v733_v39 = vshrl.u32 %v453_v31, 16  ;;  %v7277_v41 = vld [vmem:[%s9019_s1 + $0xf8] sm:$0xff]   ;;  %s6502_s16 = sshll.u32 %s9071_s13, 7 }
  0x21   : > { %917 = vst [vmem:[#allocation3 + $0x28] sm:$0xf] %v885_v26  ;;  %6692 = vst [vmem:[#allocation2 + $0xf8] sm:$0xff] %v6595_v30   ;;  %6721 = vmatpush3.bf16.msra.mxu0 %v7266_v15  ;;  %7243 = vmatpush3.bf16.msra.mxu1 %v7266_v15  ;;  %v480_v36 = vsel %vm7627_vm2, %v6203_v24, %v479_v32  ;;  %v489_v38 = vsel %vm7627_vm2, %v481_v33, %v488_v34  ;;  %v7270_v40 = vld [vmem:[%s9019_s1] sm:$0xff]   ;;  %v184_v43 = vld [vmem:[%s7615_s14 + $0x8] sm:$0xff]  ;;  %s8728_s19 = scalar_lea.vmem %s9020_s2, %s6502_s16  ;;  %s6170_s20 = sshll.u32 %s9071_s13, 1 }
  0x22   : > { %6722 = vmatprep.subr.bf16.mxu0 %v7267_v23  ;;  %7236 = vmatprep.subr.bf16.mxu1 %v7267_v23  ;;  %852 = vst [vmem:[#allocation3] sm:$0xf] %v480_v36  ;;  %853 = vst [vmem:[#allocation3 + $0x24] sm:$0xf] %v489_v38  ;;  %v183_v42 = vld [vmem:[%s7615_s14] sm:$0xff]  ;;  %v6504_v45 = vpack.c.bf16 %v184_v43, %v184_v43  ;;  %v208_v48 = vld [vmem:[%s7615_s14 + $0xc8] sm:$0xff]  ;;  %s8927_s23 = scalar_lea.vmem %s9021_s3, %s6170_s20 }
  0x23   : > { %v6503_v44 = vpack.c.bf16 %v183_v42, %v183_v42  ;;  %v420_v46 = vld [vmem:[#allocation2 + $0x18] sm:$0x8]  ;;  %v207_v47 = vld [vmem:[%s7615_s14 + $0xc0] sm:$0xff]  ;;  %v6215_v49 = vrot.slane %v733_v39, 11  ;;  %v6528_v52 = vpack.c.bf16 %v208_v48, %v208_v48  ;;  %v456_v53 = vld [vmem:[#allocation2 + $0x108] sm:$0x8] }
  0x24   : > { %v7278_v50 = vld [vmem:[%s9019_s1 + $0x178] sm:$0xff]   ;;  %v6527_v51 = vpack.c.bf16 %v207_v47, %v207_v47  ;;  %386 = vst [vmem:[#allocation2 + $0x20] sm:$0xf] %v6504_v45  ;;  %v491_v61 = vshrl.u32 %v420_v46, 16  ;;  %v755_v0 = vshrl.u32 %v456_v53, 16  ;;  %v7292_v10 = vld [vmem:[%s9019_s1 + $0x170] sm:$0xff]  }
  0x25   : > { %6723 = vmatpush3.bf16.msra.mxu0 %v7268_v35  ;;  %7244 = vmatpush3.bf16.msra.mxu1 %v7268_v35  ;;  %385 = vst [vmem:[#allocation2 + $0x1c] sm:$0xf] %v6503_v44  ;;  %410 = vst [vmem:[#allocation2 + $0x110] sm:$0xf] %v6528_v52  ;;  %v7280_v63 = vld [vmem:[%s9019_s1 + $0x138] sm:$0xff]   ;;  %v7294_v23 = vld [vmem:[%s9019_s1 + $0x130] sm:$0xff]  }
  0x26   : > { %6724 = vmatprep.subr.bf16.mxu0 %v7269_v37  ;;  %7237 = vmatprep.subr.bf16.mxu1 %v7269_v37  ;;  %409 = vst [vmem:[#allocation2 + $0x10c] sm:$0xf] %v6527_v51  ;;  %v6204_v7 = vrot.slane %v491_v61, 11  ;;  %v6216_v9 = vrot.slane %v755_v0, 11  ;;  %v185_v38 = vld [vmem:[%s7615_s14 + $0x10] sm:$0xff]  ;;  %v186_v39 = vld [vmem:[%s7615_s14 + $0x18] sm:$0xff] }
  0x27   : > { %v209_v45 = vld [vmem:[%s7615_s14 + $0xd0] sm:$0xff]  ;;  %v210_v46 = vld [vmem:[%s7615_s14 + $0xd8] sm:$0xff]  ;;  %v6570_v48 = vpack.c.bf16 %v186_v39, %v185_v38  ;;  %v188_v61 = vld [vmem:[%s7615_s14 + $0x28] sm:$0xff]  ;;  %vm996_vm3 = vsmask.f32 3328 }
  0x28   : > { %v454_v54 = vld [vmem:[#allocation2 + $0xf8] sm:$0xf]  ;;  %v455_v55 = vld [vmem:[#allocation2 + $0xfc] sm:$0xf]  ;;  %v7273_v2 = vld [vmem:[#allocation3 + $0x4] ss:$36 sps:$4 sm:$0xff]  }
  0x29   : > { %v908_v56 = vld [vmem:[#allocation2 + $0xf8] sm:$0xf]  ;;  %v738_v57 = vshrl.u32 %v454_v54, 16  ;;  %v741_v58 = vshll.u32 %v454_v54, 16  ;;  %v747_v59 = vshrl.u32 %v455_v55, 16  ;;  %6725 = vmatpush3.bf16.msra.mxu0 %v7270_v40  ;;  %7245 = vmatpush3.bf16.msra.mxu1 %v7270_v40  ;;  %v750_v62 = vshll.u32 %v455_v55, 16 }
  0x2a   : > { %v909_v60 = vld [vmem:[#allocation2 + $0xfc] sm:$0xf]  ;;  %940 = vst [vmem:[#allocation3 + $0x364] sm:$0xf] %v908_v56  ;;  %v7271_v1 = vld [vmem:[#allocation3] ss:$36 sps:$4 sm:$0xff]   ;;  %6822 = vmatprep.subr.bf16.mxu1 %v7277_v41  ;;  %6934 = vmatprep.subr.bf16.mxu0 %v7278_v50  ;;  %v6600_v50 = vpack.c.bf16 %v210_v46, %v209_v45 }
  0x2b   : > { %941 = vst [vmem:[#allocation3 + $0x388] sm:$0xf] %v909_v60  ;;  %v740_v3 = vrot.slane %v738_v57, 7  ;;  %v749_v4 = vrot.slane %v747_v59, 7  ;;  %5000 = vmatprep.mubr.bf16.mxu0 %v7273_v2  ;;  %v422_v13 = vld [vmem:[#allocation2 + $0x20] sm:$0xf] }
  0x2c   : > { %5001 = vmatmul.mubr.bf16.vlgmr.msra.gmra.mxu0 %v7271_v1  ;;  %v421_v12 = vld [vmem:[#allocation2 + $0x1c] sm:$0xf]  ;;  %v505_v18 = vshrl.u32 %v422_v13, 16  ;;  %v887_v19 = vld [vmem:[#allocation2 + $0x20] sm:$0xf]  ;;  %v508_v20 = vshll.u32 %v422_v13, 16 }
  0x2d   : > { %v743_v5 = vor.u32 %v741_v58, %v740_v3  ;;  %v745_v6 = vrot.slane %v740_v3, 4  ;;  %v752_v8 = vor.u32 %v750_v62, %v749_v4  ;;  %6935 = vmatpush3.bf16.msra.mxu0 %v7280_v63  ;;  %v886_v14 = vld [vmem:[#allocation2 + $0x1c] sm:$0xf]  ;;  %v496_v16 = vshrl.u32 %v421_v12, 16  ;;  %919 = vst [vmem:[#allocation3 + $0x70] sm:$0xf] %v887_v19 }
  0x2e   : > { %v499_v17 = vshll.u32 %v421_v12, 16  ;;  %918 = vst [vmem:[#allocation3 + $0x4c] sm:$0xf] %v886_v14  ;;  %6936 = vmatprep.subr.bf16.mxu0 %v7292_v10  ;;  %v457_v21 = vld [vmem:[#allocation2 + $0x10c] sm:$0xf]  ;;  %v507_v25 = vrot.slane %v505_v18, 7  ;;  %v6508_v3 = vpack.c.bf16 %v188_v61, %v188_v61 }
  0x2f   : > { %v744_v11 = vsel %vm7627_vm2, %v6215_v49, %v743_v5  ;;  %v753_v15 = vsel %vm7627_vm2, %v745_v6, %v752_v8  ;;  %v458_v22 = vld [vmem:[#allocation2 + $0x110] sm:$0xf]  ;;  %v498_v24 = vrot.slane %v496_v16, 7  ;;  %v760_v26 = vshrl.u32 %v457_v21, 16  ;;  %v910_v29 = vld [vmem:[#allocation2 + $0x10c] sm:$0xf] }
  0x30   : > { %876 = vst [vmem:[#allocation3 + $0x360] sm:$0xf] %v744_v11  ;;  %877 = vst [vmem:[#allocation3 + $0x384] sm:$0xf] %v753_v15  ;;  %v763_v27 = vshll.u32 %v457_v21, 16  ;;  %v769_v30 = vshrl.u32 %v458_v22, 16  ;;  %v510_v35 = vor.u32 %v508_v20, %v507_v25 }
  0x31   : > { %v772_v31 = vshll.u32 %v458_v22, 16  ;;  %v911_v32 = vld [vmem:[#allocation2 + $0x110] sm:$0xf]  ;;  %942 = vst [vmem:[#allocation3 + $0x3ac] sm:$0xf] %v910_v29  ;;  %6937 = vmatpush3.bf16.msra.mxu0 %v7294_v23  ;;  %v501_v33 = vor.u32 %v499_v17, %v498_v24  ;;  %v503_v34 = vrot.slane %v498_v24, 4 }
  0x32   : > { %v762_v36 = vrot.slane %v760_v26, 7  ;;  %943 = vst [vmem:[#allocation3 + $0x3d0] sm:$0xf] %v911_v32  ;;  %v771_v37 = vrot.slane %v769_v30, 7  ;;  %v7279_v40 = vld [vmem:[%s9019_s1 + $0xb8] sm:$0xff]   ;;  %v7281_v54 = vld [vmem:[%s9019_s1 + $0xf0] sm:$0xff]  }
  0x33   : > { %v502_v41 = vsel %vm7627_vm2, %v6204_v7, %v501_v33  ;;  %v511_v42 = vsel %vm7627_vm2, %v503_v34, %v510_v35  ;;  %v423_v49 = vld [vmem:[#allocation2 + $0x2c] sm:$0x8]  ;;  %6687 = vst [vmem:[#allocation2 + $0x30] sm:$0xff] %v6570_v48   ;;  %6693 = vst [vmem:[#allocation2 + $0x120] sm:$0xff] %v6600_v50   ;;  %v7282_v56 = vld [vmem:[%s9019_s1 + $0xb0] sm:$0xff]  }
  0x34   : > { %v765_v43 = vor.u32 %v763_v27, %v762_v36  ;;  %v767_v44 = vrot.slane %v762_v36, 4  ;;  %854 = vst [vmem:[#allocation3 + $0x48] sm:$0xf] %v502_v41  ;;  %855 = vst [vmem:[#allocation3 + $0x6c] sm:$0xf] %v511_v42  ;;  %v774_v47 = vor.u32 %v772_v31, %v771_v37  ;;  %v513_v57 = vshrl.u32 %v423_v49, 16 }
  0x35   : > { %v7276_v52 = vld [vmem:[#allocation3 + $0x364] ss:$36 sps:$4 sm:$0xff]   ;;  %v459_v58 = vld [vmem:[#allocation2 + $0x11c] sm:$0x8]  ;;  %v187_v60 = vld [vmem:[%s7615_s14 + $0x20] sm:$0xff] }
  0x36   : > { %v766_v53 = vsel %vm7627_vm2, %v6216_v9, %v765_v43  ;;  %v775_v55 = vsel %vm7627_vm2, %v767_v44, %v774_v47  ;;  %5096 = vmatprep.mubr.bf16.mxu1 %v7276_v52  ;;  %v7289_v59 = vld [vmem:[%s9019_s1 + $0xe8] sm:$0xff]   ;;  %v6507_v62 = vpack.c.bf16 %v187_v60, %v187_v60  ;;  %v426_v63 = vld [vmem:[#allocation2 + $0x40] sm:$0x8]  ;;  %v7283_v1 = vld [vmem:[#allocation3 + $0x4c] ss:$36 sps:$4 sm:$0xff]   ;;  %v777_v2 = vshrl.u32 %v459_v58, 16 }
  0x37   : > { %v7274_v51 = vld [vmem:[#allocation3 + $0x360] ss:$36 sps:$4 sm:$0xff]   ;;  %878 = vst [vmem:[#allocation3 + $0x3a8] sm:$0xf] %v766_v53  ;;  %879 = vst [vmem:[#allocation3 + $0x3cc] sm:$0xf] %v775_v55  ;;  %5008 = vmatprep.mubr.bf16.mxu0 %v7283_v1 }
  0x38   : > { %5097 = vmatmul.mubr.bf16.vlgmr.msra.gmra.mxu1 %v7274_v51  ;;  %v211_v0 = vld [vmem:[%s7615_s14 + $0xe0] sm:$0xff]  ;;  %v7290_v6 = vld [vmem:[%s9019_s1 + $0xa8] sm:$0xff]   ;;  %v7697_v7 = vrot.slane %v513_v57, 11  ;;  %389 = vst [vmem:[#allocation2 + $0x44] sm:$0xf] %v6507_v62  ;;  %v535_v13 = vshrl.u32 %v426_v63, 16 }
  0x39   : > { %6823 = vmatpush3.bf16.msra.mxu1 %v7279_v40  ;;  %v6531_v4 = vpack.c.bf16 %v211_v0, %v211_v0  ;;  %v212_v8 = vld [vmem:[%s7615_s14 + $0xe8] sm:$0xff]  ;;  %v462_v9 = vld [vmem:[#allocation2 + $0x130] sm:$0x8]  ;;  %v7291_v10 = vld [vmem:[%s9019_s1 + $0xe0] sm:$0xff]   ;;  %390 = vst [vmem:[#allocation2 + $0x48] sm:$0xf] %v6508_v3 }
  0x3a   : > { %6824 = vmatprep.subr.bf16.mxu1 %v7281_v54  ;;  %v424_v11 = vld [vmem:[#allocation2 + $0x30] sm:$0xf]  ;;  %v425_v12 = vld [vmem:[#allocation2 + $0x34] sm:$0xf]  ;;  %v6532_v14 = vpack.c.bf16 %v212_v8, %v212_v8  ;;  %v799_v22 = vshrl.u32 %v462_v9, 16  ;;  %v7293_v23 = vld [vmem:[%s9019_s1 + $0xa0] sm:$0xff]  }
  0x3b   : > { %v7287_v5 = vld [vmem:[#allocation3 + $0x48] ss:$36 sps:$4 sm:$0xff]   ;;  %413 = vst [vmem:[#allocation2 + $0x134] sm:$0xf] %v6531_v4  ;;  %v518_v17 = vshrl.u32 %v424_v11, 16  ;;  %v521_v18 = vshll.u32 %v424_v11, 16 }
  0x3c   : > { %v7285_v15 = vld [vmem:[#allocation3 + $0x3ac] ss:$36 sps:$4 sm:$0xff]   ;;  %5009 = vmatmul.mubr.bf16.gmra.mxu0 %v7287_v5  ;;  %v527_v19 = vshrl.u32 %v425_v12, 16  ;;  %v530_v20 = vshll.u32 %v425_v12, 16  ;;  %v888_v21 = vld [vmem:[#allocation2 + $0x30] sm:$0xf] }
  0x3d   : > { %6825 = vmatpush3.bf16.msra.mxu1 %v7282_v56  ;;  %414 = vst [vmem:[#allocation2 + $0x138] sm:$0xf] %v6532_v14  ;;  %5104 = vmatprep.mubr.bf16.mxu1 %v7285_v15  ;;  %v520_v24 = vrot.slane %v518_v17, 7  ;;  %v889_v25 = vld [vmem:[#allocation2 + $0x34] sm:$0xf]  ;;  %v6217_v27 = vrot.slane %v777_v2, 11 }
  0x3e   : > { %v7288_v16 = vld [vmem:[#allocation3 + $0x3a8] ss:$36 sps:$4 sm:$0xff]   ;;  %6826 = vmatprep.subr.bf16.mxu1 %v7289_v59  ;;  %920 = vst [vmem:[#allocation3 + $0x94] sm:$0xf] %v888_v21  ;;  %v460_v26 = vld [vmem:[#allocation2 + $0x120] sm:$0xf] }
  0x3f   : > { %v529_v29 = vrot.slane %v527_v19, 7  ;;  %921 = vst [vmem:[#allocation3 + $0xb8] sm:$0xf] %v889_v25  ;;  %v461_v30 = vld [vmem:[#allocation2 + $0x124] sm:$0xf]  ;;  %v782_v31 = vshrl.u32 %v460_v26, 16  ;;  %v523_v35 = vor.u32 %v521_v18, %v520_v24 }
  0x40   : > { %5105 = vmatmul.mubr.bf16.gmra.mxu1 %v7288_v16  ;;  %v785_v32 = vshll.u32 %v460_v26, 16  ;;  %v7301_v33 = vld [vmem:[%s9019_s1 + $0xd8] sm:$0xff]   ;;  %v7709_v34 = vrot.slane %v535_v13, 11  ;;  %v525_v36 = vrot.slane %v520_v24, 4  ;;  %v791_v37 = vshrl.u32 %v461_v30, 16  ;;  %v7312_v40 = vld [vmem:[%s9019_s1 + $0x168] sm:$0xff]  }
  0x41   : > { %6827 = vmatpush3.bf16.msra.mxu1 %v7290_v6  ;;  %v794_v38 = vshll.u32 %v461_v30, 16  ;;  %v912_v39 = vld [vmem:[#allocation2 + $0x120] sm:$0xf]  ;;  %v532_v41 = vor.u32 %v530_v20, %v529_v29  ;;  %v784_v42 = vrot.slane %v782_v31, 7  ;;  %v913_v43 = vld [vmem:[#allocation2 + $0x124] sm:$0xf]  ;;  %v524_v46 = vsel %vm7627_vm2, %v7697_v7, %v523_v35  ;;  %6938 = vmatprep.subr.bf16.mxu0 %v7312_v40 }
  0x42   : > { %6828 = vmatprep.subr.bf16.mxu1 %v7291_v10  ;;  %944 = vst [vmem:[#allocation3 + $0x3f4] sm:$0xf] %v912_v39  ;;  %v427_v44 = vld [vmem:[#allocation2 + $0x44] sm:$0xf]  ;;  %v7714_v45 = vrot.slane %v799_v22, 11  ;;  %v793_v47 = vrot.slane %v791_v37, 7 }
  0x43   : > { %945 = vst [vmem:[#allocation3 + $0x418] sm:$0xf] %v913_v43  ;;  %v7302_v48 = vld [vmem:[%s9019_s1 + $0x98] sm:$0xff]   ;;  %v428_v49 = vld [vmem:[#allocation2 + $0x48] sm:$0xf]  ;;  %v540_v50 = vshrl.u32 %v427_v44, 16  ;;  %v533_v53 = vsel %vm7627_vm2, %v525_v36, %v532_v41  ;;  %v787_v54 = vor.u32 %v785_v32, %v784_v42 }
  0x44   : > { %v543_v51 = vshll.u32 %v427_v44, 16  ;;  %v7314_v52 = vld [vmem:[%s9019_s1 + $0x128] sm:$0xff]   ;;  %856 = vst [vmem:[#allocation3 + $0x90] sm:$0xf] %v524_v46  ;;  %v789_v55 = vrot.slane %v784_v42, 4  ;;  %v549_v56 = vshrl.u32 %v428_v49, 16  ;;  %v796_v59 = vor.u32 %v794_v38, %v793_v47 }
  0x45   : > { %v890_v57 = vld [vmem:[#allocation2 + $0x44] sm:$0xf]  ;;  %v891_v58 = vld [vmem:[#allocation2 + $0x48] sm:$0xf]  ;;  %6829 = vmatpush3.bf16.msra.mxu1 %v7293_v23  ;;  %857 = vst [vmem:[#allocation3 + $0xb4] sm:$0xf] %v533_v53  ;;  %6939 = vmatpush3.bf16.msra.mxu0 %v7314_v52  ;;  %v788_v0 = vsel %vm7627_vm2, %v6217_v27, %v787_v54 }
  0x46   : > { %v542_v60 = vrot.slane %v540_v50, 7  ;;  %v552_v61 = vshll.u32 %v428_v49, 16  ;;  %922 = vst [vmem:[#allocation3 + $0xdc] sm:$0xf] %v890_v57  ;;  %923 = vst [vmem:[#allocation3 + $0x100] sm:$0xf] %v891_v58  ;;  %6830 = vmatprep.subr.bf16.mxu1 %v7301_v33  ;;  %v797_v6 = vsel %vm7627_vm2, %v789_v55, %v796_v59 }
  0x47   : > { %v463_v62 = vld [vmem:[#allocation2 + $0x134] sm:$0xf]  ;;  %v464_v63 = vld [vmem:[#allocation2 + $0x138] sm:$0xf]  ;;  %v551_v2 = vrot.slane %v549_v56, 7  ;;  %v7311_v17 = vld [vmem:[%s9019_s1 + $0xc8] sm:$0xff]  }
  0x48   : > { %v7303_v1 = vld [vmem:[%s9019_s1 + $0xd0] sm:$0xff]   ;;  %v804_v3 = vshrl.u32 %v463_v62, 16  ;;  %v807_v4 = vshll.u32 %v463_v62, 16  ;;  %880 = vst [vmem:[#allocation3 + $0x3f0] sm:$0xf] %v788_v0  ;;  %v545_v8 = vor.u32 %v543_v51, %v542_v60  ;;  %v547_v9 = vrot.slane %v542_v60, 4 }
  0x49   : > { %v914_v5 = vld [vmem:[#allocation2 + $0x134] sm:$0xf]  ;;  %v813_v10 = vshrl.u32 %v464_v63, 16  ;;  %v915_v11 = vld [vmem:[#allocation2 + $0x138] sm:$0xf]  ;;  %v554_v12 = vor.u32 %v552_v61, %v551_v2  ;;  %v816_v14 = vshll.u32 %v464_v63, 16  ;;  %6831 = vmatpush3.bf16.msra.mxu1 %v7302_v48 }
  0x4a   : > { %v7304_v7 = vld [vmem:[%s9019_s1 + $0x90] sm:$0xff]   ;;  %946 = vst [vmem:[#allocation3 + $0x43c] sm:$0xf] %v914_v5  ;;  %881 = vst [vmem:[#allocation3 + $0x414] sm:$0xf] %v797_v6  ;;  %v806_v13 = vrot.slane %v804_v3, 7  ;;  %v546_v15 = vsel %vm7627_vm2, %v7709_v34, %v545_v8  ;;  %6832 = vmatprep.subr.bf16.mxu1 %v7303_v1 }
  0x4b   : > { %947 = vst [vmem:[#allocation3 + $0x460] sm:$0xf] %v915_v11  ;;  %v815_v16 = vrot.slane %v813_v10, 7  ;;  %v555_v18 = vsel %vm7627_vm2, %v547_v9, %v554_v12  ;;  %858 = vst [vmem:[#allocation3 + $0xd8] sm:$0xf] %v546_v15  ;;  %v189_v21 = vld [vmem:[%s7615_s14 + $0x30] sm:$0xff] }
  0x4c   : > { %v809_v19 = vor.u32 %v807_v4, %v806_v13  ;;  %v811_v20 = vrot.slane %v806_v13, 4  ;;  %859 = vst [vmem:[#allocation3 + $0xfc] sm:$0xf] %v555_v18  ;;  %v7313_v23 = vld [vmem:[%s9019_s1 + $0x88] sm:$0xff]   ;;  %v7295_v24 = vld [vmem:[#allocation3 + $0x94] ss:$36 sps:$4 sm:$0xff]  }
  0x4d   : > { %v818_v22 = vor.u32 %v816_v14, %v815_v16  ;;  %v7299_v25 = vld [vmem:[#allocation3 + $0x90] ss:$36 sps:$4 sm:$0xff]   ;;  %v7315_v27 = vld [vmem:[%s9019_s1 + $0xc0] sm:$0xff]   ;;  %6833 = vmatpush3.bf16.msra.mxu1 %v7304_v7  ;;  %5016 = vmatprep.mubr.bf16.mxu0 %v7295_v24  ;;  %v429_v31 = vld [vmem:[#allocation2 + $0x54] sm:$0x8] }
  0x4e   : > { %v810_v26 = vsel %vm7627_vm2, %v7714_v45, %v809_v19  ;;  %6834 = vmatprep.subr.bf16.mxu1 %v7311_v17  ;;  %v190_v30 = vld [vmem:[%s7615_s14 + $0x38] sm:$0xff]  ;;  %vm997_vm4 = vsmask.f32 7440  ;;  %5017 = vmatmul.mubr.bf16.gmra.mxu0 %v7299_v25  ;;  %v7316_v34 = vld [vmem:[%s9019_s1 + $0x80] sm:$0xff]   ;;  %v557_v36 = vshrl.u32 %v429_v31, 16  ;;  %v192_v25 = vld [vmem:[%s7615_s14 + $0x48] sm:$0xff] }
  0x4f   : > { %v819_v29 = vsel %vm7627_vm2, %v811_v20, %v818_v22  ;;  %882 = vst [vmem:[#allocation3 + $0x438] sm:$0xf] %v810_v26  ;;  %v7297_v32 = vld [vmem:[#allocation3 + $0x3f4] ss:$36 sps:$4 sm:$0xff]   ;;  %v6575_v35 = vpack.c.bf16 %v190_v30, %v189_v21  ;;  %v948_v37 = vld [vmem:[#allocation2 + $0x8] sm:$0xf]  ;;  %vm7768_vm5 = vmor %vm996_vm3, %vm997_vm4 }
  0x50   : > { %883 = vst [vmem:[#allocation3 + $0x45c] sm:$0xf] %v819_v29  ;;  %v949_v38 = vld [vmem:[#allocation2 + $0xc] sm:$0xf]  ;;  %v950_v39 = vld [vmem:[#allocation2 + $0x10] sm:$0x1]  ;;  %5112 = vmatprep.mubr.bf16.mxu1 %v7297_v32 }
  0x51   : > { %v7300_v33 = vld [vmem:[#allocation3 + $0x3f0] ss:$36 sps:$4 sm:$0xff]   ;;  %6835 = vmatpush3.bf16.msra.mxu1 %v7313_v23  ;;  %6688 = vst [vmem:[#allocation2 + $0x58] sm:$0xff] %v6575_v35   ;;  %v7761_v40 = vrot.slane %v557_v36, 11  ;;  %v1000_v41 = vshrl.u32 %v948_v37, 16  ;;  %v1003_v42 = vshll.u32 %v948_v37, 16 }
  0x52   : > { %v1009_v43 = vshll.u32 %v949_v38, 16  ;;  %v7323_v44 = vld [vmem:[%s9019_s1 + $0x1f8] sm:$0xff]   ;;  %5113 = vmatmul.mubr.bf16.gmra.mxu1 %v7300_v33  ;;  %v7305_v45 = vld [vmem:[#allocation3 + $0xdc] ss:$36 sps:$4 sm:$0xff]   ;;  %6836 = vmatprep.subr.bf16.mxu1 %v7315_v27  ;;  %v1013_v47 = vshrl.u32 %v949_v38, 16  ;;  %v1019_v51 = vshll.u32 %v950_v39, 16  ;;  %v6512_v33 = vpack.c.bf16 %v192_v25, %v192_v25 }
  0x53   : > { %v7309_v46 = vld [vmem:[#allocation3 + $0xd8] ss:$36 sps:$4 sm:$0xff]   ;;  %v1002_v48 = vrot.slane %v1000_v41, 4  ;;  %v1005_v49 = vrot.slane %v1003_v42, 5  ;;  %v1447_v52 = vld [vmem:[#allocation2 + $0x18] sm:$0x8]  ;;  %5024 = vmatprep.mubr.bf16.mxu0 %v7305_v45 }
  0x54   : > { %v1011_v50 = vrot.slane %v1009_v43, 5  ;;  %v1015_v53 = vrot.slane %v1013_v47, 4  ;;  %v1448_v54 = vld [vmem:[#allocation2 + $0x1c] sm:$0xf]  ;;  %v1449_v55 = vld [vmem:[#allocation2 + $0x20] sm:$0xf] }
  0x55   : > { %v7307_v56 = vld [vmem:[#allocation3 + $0x43c] ss:$36 sps:$4 sm:$0xff]   ;;  %6837 = vmatpush3.bf16.msra.mxu1 %v7316_v34  ;;  %v1006_v58 = vor.u32 %v1005_v49, %v1002_v48  ;;  %v1021_v59 = vrot.slane %v1019_v51, 5  ;;  %v1496_v61 = vshrl.u32 %v1447_v52, 16  ;;  %v1501_v62 = vshrl.u32 %v1448_v54, 16  ;;  %v193_v48 = vld [vmem:[%s7615_s14 + $0x50] sm:$0xff] }
  0x56   : > { %v1016_v60 = vor.u32 %v1015_v53, %v1011_v50  ;;  %v1504_v63 = vshll.u32 %v1448_v54, 16  ;;  %7046 = vmatprep.subr.bf16.mxu1 %v7323_v44  ;;  %5120 = vmatprep.mubr.bf16.mxu1 %v7307_v56  ;;  %v1510_v2 = vshrl.u32 %v1449_v55, 16  ;;  %v1513_v3 = vshll.u32 %v1449_v55, 16  ;;  %v7325_v4 = vld [vmem:[%s9019_s1 + $0x160] sm:$0xff]   ;;  %v432_v34 = vld [vmem:[#allocation2 + $0x68] sm:$0x8] }
  0x57   : > { %v7310_v57 = vld [vmem:[#allocation3 + $0x438] ss:$36 sps:$4 sm:$0xff]   ;;  %5025 = vmatmul.mubr.bf16.gmra.mxu0 %v7309_v46  ;;  %v1007_v1 = vrot.slane %v1006_v58, 4  ;;  %6940 = vmatprep.subr.bf16.mxu0 %v7325_v4  ;;  %v6219_v15 = vrot.slane %v1496_v61, 11  ;;  %v1503_v16 = vrot.slane %v1501_v62, 7  ;;  %v579_v41 = vshrl.u32 %v432_v34, 16 }
  0x58   : > { %v430_v5 = vld [vmem:[#allocation2 + $0x58] sm:$0xf]  ;;  %v431_v6 = vld [vmem:[#allocation2 + $0x5c] sm:$0xf]  ;;  %v1017_v14 = vrot.slane %v1016_v60, 4  ;;  %v7326_v17 = vld [vmem:[%s9019_s1 + $0x120] sm:$0xff]  }
  0x59   : > { %v892_v7 = vld [vmem:[#allocation2 + $0x58] sm:$0xf]  ;;  %v562_v8 = vshrl.u32 %v430_v5, 16  ;;  %v565_v9 = vshll.u32 %v430_v5, 16  ;;  %v571_v10 = vshrl.u32 %v431_v6, 16  ;;  %v574_v11 = vshll.u32 %v431_v6, 16  ;;  %6941 = vmatpush3.bf16.msra.mxu0 %v7326_v17 }
  0x5a   : > { %v893_v12 = vld [vmem:[#allocation2 + $0x5c] sm:$0xf]  ;;  %924 = vst [vmem:[#allocation3 + $0x124] sm:$0xf] %v892_v7  ;;  %5121 = vmatmul.mubr.bf16.gmra.mxu1 %v7310_v57  ;;  %v1012_v13 = vsel %vm7768_vm5, %v1007_v1, %v1011_v50  ;;  %v1512_v20 = vrot.slane %v1510_v2, 7  ;;  %v191_v21 = vld [vmem:[%s7615_s14 + $0x40] sm:$0xff]  ;;  %v1022_v22 = vsel %vm7768_vm5, %v1017_v14, %v1021_v59  ;;  %v1506_v23 = vor.u32 %v1504_v63, %v1503_v16 }
  0x5b   : > { %925 = vst [vmem:[#allocation3 + $0x148] sm:$0xf] %v893_v12  ;;  %v564_v18 = vrot.slane %v562_v8, 7  ;;  %v573_v19 = vrot.slane %v571_v10, 7  ;;  %1415 = vst [vmem:[#allocation3 + $0x8] sm:$0xf] %v1012_v13  ;;  %v6511_v26 = vpack.c.bf16 %v191_v21, %v191_v21 }
  0x5c   : > { %v1508_v24 = vrot.slane %v1503_v16, 4  ;;  %1416 = vst [vmem:[#allocation3 + $0x2c] sm:$0xf] %v1022_v22  ;;  %v1515_v31 = vor.u32 %v1513_v3, %v1512_v20  ;;  %v1507_v32 = vsel %vm7627_vm2, %v6219_v15, %v1506_v23  ;;  %v951_v35 = vld [vmem:[#allocation2 + $0x1c] sm:$0xf]  ;;  %v7795_v50 = vrot.slane %v579_v41, 11 }
  0x5d   : > { %v567_v27 = vor.u32 %v565_v9, %v564_v18  ;;  %v569_v29 = vrot.slane %v564_v18, 4  ;;  %v576_v30 = vor.u32 %v574_v11, %v573_v19  ;;  %393 = vst [vmem:[#allocation2 + $0x6c] sm:$0xf] %v6511_v26  ;;  %v952_v36 = vld [vmem:[#allocation2 + $0x20] sm:$0xf]  ;;  %v1024_v44 = vshrl.u32 %v951_v35, 16 }
  0x5e   : > { %v1516_v39 = vsel %vm7627_vm2, %v1508_v24, %v1515_v31  ;;  %1879 = vst [vmem:[#allocation3 + $0xc] sm:$0xf] %v1507_v32  ;;  %v953_v42 = vld [vmem:[#allocation2 + $0x24] sm:$0x1]  ;;  %v1450_v43 = vld [vmem:[#allocation2 + $0x2c] sm:$0x8] }
  0x5f   : > { %v568_v37 = vsel %vm7627_vm2, %v7761_v40, %v567_v27  ;;  %v577_v38 = vsel %vm7627_vm2, %v569_v29, %v576_v30  ;;  %1880 = vst [vmem:[#allocation3 + $0x30] sm:$0xf] %v1516_v39  ;;  %394 = vst [vmem:[#allocation2 + $0x70] sm:$0xf] %v6512_v33  ;;  %v1027_v45 = vshll.u32 %v951_v35, 16  ;;  %v1033_v46 = vshll.u32 %v952_v36, 16 }
  0x60   : > { %860 = vst [vmem:[#allocation3 + $0x120] sm:$0xf] %v568_v37  ;;  %861 = vst [vmem:[#allocation3 + $0x144] sm:$0xf] %v577_v38  ;;  %v1037_v40 = vshrl.u32 %v952_v36, 16  ;;  %v194_v49 = vld [vmem:[%s7615_s14 + $0x58] sm:$0xff] }
  0x61   : > { %v1451_v47 = vld [vmem:[#allocation2 + $0x30] sm:$0xf]  ;;  %v1043_v51 = vshll.u32 %v953_v42, 16  ;;  %v1452_v52 = vld [vmem:[#allocation2 + $0x34] sm:$0xf]  ;;  %v1518_v53 = vshrl.u32 %v1450_v43, 16  ;;  %v6580_v9 = vpack.c.bf16 %v194_v49, %v193_v48 }
  0x62   : > { %v1523_v54 = vshrl.u32 %v1451_v47, 16  ;;  %v1026_v55 = vrot.slane %v1024_v44, 4  ;;  %v1029_v56 = vrot.slane %v1027_v45, 5  ;;  %v1035_v57 = vrot.slane %v1033_v46, 5  ;;  %v435_v59 = vld [vmem:[#allocation2 + $0x7c] sm:$0x8] }
  0x63   : > { %v1039_v58 = vrot.slane %v1037_v40, 4  ;;  %v1045_v60 = vrot.slane %v1043_v51, 5  ;;  %v6220_v61 = vrot.slane %v1518_v53, 11  ;;  %v1526_v63 = vshll.u32 %v1451_v47, 16  ;;  %v7324_v11 = vld [vmem:[%s9019_s1 + $0x1b8] sm:$0xff]   ;;  %6689 = vst [vmem:[#allocation2 + $0x80] sm:$0xff] %v6580_v9  }
  0x64   : > { %v1525_v62 = vrot.slane %v1523_v54, 7  ;;  %v1030_v1 = vor.u32 %v1029_v56, %v1026_v55  ;;  %v1532_v3 = vshrl.u32 %v1452_v52, 16  ;;  %v1535_v4 = vshll.u32 %v1452_v52, 16  ;;  %v433_v5 = vld [vmem:[#allocation2 + $0x6c] sm:$0xf]  ;;  %v7339_v18 = vld [vmem:[%s9019_s1 + $0x158] sm:$0xff]  }
  0x65   : > { %v1040_v2 = vor.u32 %v1039_v58, %v1035_v57  ;;  %v894_v6 = vld [vmem:[#allocation2 + $0x6c] sm:$0xf]  ;;  %v601_v10 = vshrl.u32 %v435_v59, 16  ;;  %v584_v12 = vshrl.u32 %v433_v5, 16  ;;  %v587_v13 = vshll.u32 %v433_v5, 16  ;;  %6942 = vmatprep.subr.bf16.mxu0 %v7339_v18  ;;  %v7340_v39 = vld [vmem:[%s9019_s1 + $0x1f0] sm:$0xff]  }
  0x66   : > { %v1528_v7 = vor.u32 %v1526_v63, %v1525_v62  ;;  %v1530_v8 = vrot.slane %v1525_v62, 4  ;;  %926 = vst [vmem:[#allocation3 + $0x16c] sm:$0xf] %v894_v6  ;;  %v1031_v14 = vrot.slane %v1030_v1, 4  ;;  %v954_v16 = vld [vmem:[#allocation2 + $0x30] sm:$0xf] }
  0x67   : > { %v1041_v15 = vrot.slane %v1040_v2, 4  ;;  %v7800_v17 = vld [vmem:[#allocation2 + $0x34] sm:$0xf]  ;;  %v7317_v19 = vld [vmem:[#allocation3 + $0x124] ss:$36 sps:$4 sm:$0xff]   ;;  %v1534_v21 = vrot.slane %v1532_v3, 7 }
  0x68   : > { %v1529_v20 = vsel %vm7627_vm2, %v6220_v61, %v1528_v7  ;;  %v7807_v22 = vrot.slane %v601_v10, 11  ;;  %v956_v23 = vld [vmem:[#allocation2 + $0x38] sm:$0x1]  ;;  %v7319_v24 = vld [vmem:[#allocation3 + $0x8] ss:$36 sps:$4 sm:$0xff]   ;;  %v586_v26 = vrot.slane %v584_v12, 7  ;;  %v1036_v27 = vsel %vm7768_vm5, %v1031_v14, %v1035_v57  ;;  %5032 = vmatprep.mubr.bf16.mxu0 %v7317_v19 }
  0x69   : > { %v7321_v25 = vld [vmem:[#allocation3 + $0xc] ss:$36 sps:$4 sm:$0xff]   ;;  %v1046_v29 = vsel %vm7768_vm5, %v1041_v15, %v1045_v60  ;;  %1881 = vst [vmem:[#allocation3 + $0x54] sm:$0xf] %v1529_v20  ;;  %v7322_v30 = vld [vmem:[#allocation3 + $0x120] ss:$36 sps:$4 sm:$0xff]   ;;  %v1537_v33 = vor.u32 %v1535_v4, %v1534_v21 }
  0x6a   : > { %v434_v31 = vld [vmem:[#allocation2 + $0x70] sm:$0xf]  ;;  %1417 = vst [vmem:[#allocation3 + $0x50] sm:$0xf] %v1036_v27  ;;  %1418 = vst [vmem:[#allocation3 + $0x74] sm:$0xf] %v1046_v29  ;;  %5161 = vmatprep.mubr.bf16.mxu1 %v7321_v25  ;;  %v589_v34 = vor.u32 %v587_v13, %v586_v26  ;;  %5033 = vmatmul.mubr.bf16.gmra.mxu0 %v7322_v30 }
  0x6b   : > { %v895_v32 = vld [vmem:[#allocation2 + $0x70] sm:$0xf]  ;;  %v591_v35 = vrot.slane %v586_v26, 4  ;;  %v593_v36 = vshrl.u32 %v434_v31, 16  ;;  %v596_v37 = vshll.u32 %v434_v31, 16  ;;  %5162 = vmatmul.mubr.bf16.vlgmr.msra.gmra.mxu1 %v7319_v24  ;;  %v1538_v41 = vsel %vm7627_vm2, %v1530_v8, %v1537_v33  ;;  %v7341_v45 = vld [vmem:[%s9019_s1 + $0x118] sm:$0xff]  }
  0x6c   : > { %927 = vst [vmem:[#allocation3 + $0x190] sm:$0xf] %v895_v32  ;;  %v1453_v38 = vld [vmem:[#allocation2 + $0x40] sm:$0x8]  ;;  %v1048_v42 = vshrl.u32 %v954_v16, 16  ;;  %v1051_v43 = vshll.u32 %v954_v16, 16  ;;  %7047 = vmatpush3.bf16.msra.mxu1 %v7324_v11  ;;  %v590_v46 = vsel %vm7627_vm2, %v7795_v50, %v589_v34  ;;  %6943 = vmatpush3.bf16.msra.mxu0 %v7341_v45 }
  0x6d   : > { %v1057_v44 = vshll.u32 %v7800_v17, 16  ;;  %v595_v40 = vrot.slane %v593_v36, 7  ;;  %1882 = vst [vmem:[#allocation3 + $0x78] sm:$0xf] %v1538_v41  ;;  %v1061_v47 = vshrl.u32 %v7800_v17, 16  ;;  %v1067_v48 = vshll.u32 %v956_v23, 16  ;;  %7048 = vmatprep.subr.bf16.mxu1 %v7340_v39 }
  0x6e   : > { %v1454_v49 = vld [vmem:[#allocation2 + $0x44] sm:$0xf]  ;;  %v7342_v51 = vld [vmem:[%s9019_s1 + $0x1b0] sm:$0xff]   ;;  %862 = vst [vmem:[#allocation3 + $0x168] sm:$0xf] %v590_v46  ;;  %v1050_v52 = vrot.slane %v1048_v42, 4 }
  0x6f   : > { %v1053_v53 = vrot.slane %v1051_v43, 5  ;;  %v1059_v54 = vrot.slane %v1057_v44, 5  ;;  %v1455_v55 = vld [vmem:[#allocation2 + $0x48] sm:$0xf]  ;;  %v1540_v56 = vshrl.u32 %v1453_v38, 16  ;;  %v598_v57 = vor.u32 %v596_v37, %v595_v40  ;;  %v195_v6 = vld [vmem:[%s7615_s14 + $0x60] sm:$0xff] }
  0x70   : > { %v436_v50 = vld [vmem:[#allocation2 + $0x80] sm:$0xf]  ;;  %v437_v58 = vld [vmem:[#allocation2 + $0x84] sm:$0xf]  ;;  %v1063_v4 = vrot.slane %v1061_v47, 4  ;;  %v1069_v5 = vrot.slane %v1067_v48, 5  ;;  %7049 = vmatpush3.bf16.msra.mxu1 %v7342_v51  ;;  %v6515_v21 = vpack.c.bf16 %v195_v6, %v195_v6 }
  0x71   : > { %v896_v59 = vld [vmem:[#allocation2 + $0x80] sm:$0xf]  ;;  %v606_v60 = vshrl.u32 %v436_v50, 16  ;;  %v609_v61 = vshll.u32 %v436_v50, 16  ;;  %v615_v62 = vshrl.u32 %v437_v58, 16  ;;  %v618_v63 = vshll.u32 %v437_v58, 16 }
  0x72   : > { %v897_v1 = vld [vmem:[#allocation2 + $0x84] sm:$0xf]  ;;  %928 = vst [vmem:[#allocation3 + $0x1b4] sm:$0xf] %v896_v59  ;;  %v599_v2 = vsel %vm7627_vm2, %v591_v35, %v598_v57  ;;  %v1054_v3 = vor.u32 %v1053_v53, %v1050_v52  ;;  %v6221_v9 = vrot.slane %v1540_v56, 11  ;;  %v1545_v10 = vshrl.u32 %v1454_v49, 16 }
  0x73   : > { %929 = vst [vmem:[#allocation3 + $0x1d8] sm:$0xf] %v897_v1  ;;  %863 = vst [vmem:[#allocation3 + $0x18c] sm:$0xf] %v599_v2  ;;  %v608_v7 = vrot.slane %v606_v60, 7  ;;  %v617_v8 = vrot.slane %v615_v62, 7  ;;  %v1064_v12 = vor.u32 %v1063_v4, %v1059_v54 }
  0x74   : > { %v1055_v11 = vrot.slane %v1054_v3, 4  ;;  %v1548_v13 = vshll.u32 %v1454_v49, 16  ;;  %v1554_v14 = vshrl.u32 %v1455_v55, 16  ;;  %v196_v15 = vld [vmem:[%s7615_s14 + $0x68] sm:$0xff]  ;;  %v7329_v16 = vld [vmem:[#allocation3 + $0x54] ss:$36 sps:$4 sm:$0xff]  }
  0x75   : > { %v7332_v17 = vld [vmem:[#allocation3 + $0x50] ss:$36 sps:$4 sm:$0xff]   ;;  %v611_v18 = vor.u32 %v609_v61, %v608_v7  ;;  %v613_v19 = vrot.slane %v608_v7, 4  ;;  %v620_v20 = vor.u32 %v618_v63, %v617_v8  ;;  %v1065_v24 = vrot.slane %v1064_v12, 4  ;;  %5169 = vmatprep.mubr.bf16.mxu1 %v7329_v16  ;;  %397 = vst [vmem:[#allocation2 + $0x94] sm:$0xf] %v6515_v21 }
  0x76   : > { %v1060_v23 = vsel %vm7768_vm5, %v1055_v11, %v1059_v54  ;;  %v1547_v25 = vrot.slane %v1545_v10, 7  ;;  %v1556_v26 = vrot.slane %v1554_v14, 7  ;;  %v1557_v30 = vshll.u32 %v1455_v55, 16  ;;  %v7349_v32 = vld [vmem:[%s9019_s1 + $0x150] sm:$0xff]   ;;  %5170 = vmatmul.mubr.bf16.gmra.mxu1 %v7332_v17  ;;  %v957_v39 = vld [vmem:[#allocation2 + $0x44] sm:$0xf] }
  0x77   : > { %v612_v27 = vsel %vm7627_vm2, %v7807_v22, %v611_v18  ;;  %v621_v29 = vsel %vm7627_vm2, %v613_v19, %v620_v20  ;;  %1419 = vst [vmem:[#allocation3 + $0x98] sm:$0xf] %v1060_v23  ;;  %v6516_v31 = vpack.c.bf16 %v196_v15, %v196_v15  ;;  %v1070_v33 = vsel %vm7768_vm5, %v1065_v24, %v1069_v5  ;;  %v438_v35 = vld [vmem:[#allocation2 + $0x90] sm:$0x8]  ;;  %v958_v41 = vld [vmem:[#allocation2 + $0x48] sm:$0xf] }
  0x78   : > { %864 = vst [vmem:[#allocation3 + $0x1b0] sm:$0xf] %v612_v27  ;;  %865 = vst [vmem:[#allocation3 + $0x1d4] sm:$0xf] %v621_v29  ;;  %v1550_v34 = vor.u32 %v1548_v13, %v1547_v25  ;;  %v1552_v22 = vrot.slane %v1547_v25, 4  ;;  %v7350_v36 = vld [vmem:[%s9019_s1 + $0x110] sm:$0xff]   ;;  %v1559_v37 = vor.u32 %v1557_v30, %v1556_v26  ;;  %6944 = vmatprep.subr.bf16.mxu0 %v7349_v32 }
  0x79   : > { %1420 = vst [vmem:[#allocation3 + $0xbc] sm:$0xf] %v1070_v33  ;;  %398 = vst [vmem:[#allocation2 + $0x98] sm:$0xf] %v6516_v31  ;;  %v623_v38 = vshrl.u32 %v438_v35, 16  ;;  %v197_v42 = vld [vmem:[%s7615_s14 + $0x70] sm:$0xff]  ;;  %6945 = vmatpush3.bf16.msra.mxu0 %v7350_v36 }
  0x7a   : > { %v7327_v43 = vld [vmem:[#allocation3 + $0x16c] ss:$36 sps:$4 sm:$0xff]   ;;  %v1551_v45 = vsel %vm7627_vm2, %v6221_v9, %v1550_v34  ;;  %v1072_v46 = vshrl.u32 %v957_v39, 16  ;;  %v1560_v40 = vsel %vm7627_vm2, %v1552_v22, %v1559_v37  ;;  %v959_v48 = vld [vmem:[#allocation2 + $0x4c] sm:$0x1]  ;;  %v1075_v49 = vshll.u32 %v957_v39, 16 }
  0x7b   : > { %v7331_v44 = vld [vmem:[#allocation3 + $0x168] ss:$36 sps:$4 sm:$0xff]   ;;  %1883 = vst [vmem:[#allocation3 + $0x9c] sm:$0xf] %v1551_v45  ;;  %v7853_v47 = vrot.slane %v623_v38, 11  ;;  %v1081_v51 = vshll.u32 %v958_v41, 16  ;;  %5040 = vmatprep.mubr.bf16.mxu0 %v7327_v43 }
  0x7c   : > { %v198_v52 = vld [vmem:[%s7615_s14 + $0x78] sm:$0xff]  ;;  %1884 = vst [vmem:[#allocation3 + $0xc0] sm:$0xf] %v1560_v40  ;;  %v1074_v53 = vrot.slane %v1072_v46, 4  ;;  %v1085_v54 = vshrl.u32 %v958_v41, 16  ;;  %v1091_v55 = vshll.u32 %v959_v48, 16  ;;  %5041 = vmatmul.mubr.bf16.gmra.mxu0 %v7331_v44 }
  0x7d   : > { %v6585_v56 = vpack.c.bf16 %v198_v52, %v197_v42  ;;  %v7357_v57 = vld [vmem:[%s9019_s1 + $0x1e8] sm:$0xff]   ;;  %v1077_v50 = vrot.slane %v1075_v49, 5  ;;  %v1083_v58 = vrot.slane %v1081_v51, 5  ;;  %v1456_v59 = vld [vmem:[#allocation2 + $0x54] sm:$0x8]  ;;  %v199_v31 = vld [vmem:[%s7615_s14 + $0x80] sm:$0xff] }
  0x7e   : > { %v1457_v60 = vld [vmem:[#allocation2 + $0x58] sm:$0xf]  ;;  %v439_v61 = vld [vmem:[#allocation2 + $0x94] sm:$0xf]  ;;  %v1087_v63 = vrot.slane %v1085_v54, 4  ;;  %v1093_v1 = vrot.slane %v1091_v55, 5  ;;  %7050 = vmatprep.subr.bf16.mxu1 %v7357_v57  ;;  %v6519_v22 = vpack.c.bf16 %v199_v31, %v199_v31 }
  0x7f   : > { %v898_v62 = vld [vmem:[#allocation2 + $0x94] sm:$0xf]  ;;  %6690 = vst [vmem:[#allocation2 + $0xa8] sm:$0xff] %v6585_v56   ;;  %v7333_v2 = vld [vmem:[#allocation3 + $0x1b4] ss:$36 sps:$4 sm:$0xff]   ;;  %v628_v3 = vshrl.u32 %v439_v61, 16  ;;  %v1078_v5 = vor.u32 %v1077_v50, %v1074_v53 }
  0x80   : > { %v631_v4 = vshll.u32 %v439_v61, 16  ;;  %930 = vst [vmem:[#allocation3 + $0x1fc] sm:$0xf] %v898_v62  ;;  %v7337_v6 = vld [vmem:[#allocation3 + $0x1b0] ss:$36 sps:$4 sm:$0xff]   ;;  %v1088_v9 = vor.u32 %v1087_v63, %v1083_v58  ;;  %5048 = vmatprep.mubr.bf16.mxu0 %v7333_v2  ;;  %v1562_v16 = vshrl.u32 %v1456_v59, 16 }
  0x81   : > { %v440_v7 = vld [vmem:[#allocation2 + $0x98] sm:$0xf]  ;;  %v1458_v10 = vld [vmem:[#allocation2 + $0x5c] sm:$0xf]  ;;  %v630_v11 = vrot.slane %v628_v3, 7  ;;  %v1079_v14 = vrot.slane %v1078_v5, 4 }
  0x82   : > { %v899_v8 = vld [vmem:[#allocation2 + $0x98] sm:$0xf]  ;;  %v637_v12 = vshrl.u32 %v440_v7, 16  ;;  %v640_v13 = vshll.u32 %v440_v7, 16  ;;  %v1089_v15 = vrot.slane %v1088_v9, 4  ;;  %v1567_v17 = vshrl.u32 %v1457_v60, 16 }
  0x83   : > { %931 = vst [vmem:[#allocation3 + $0x220] sm:$0xf] %v899_v8  ;;  %v1570_v18 = vshll.u32 %v1457_v60, 16  ;;  %v7358_v19 = vld [vmem:[%s9019_s1 + $0x1a8] sm:$0xff]   ;;  %v7338_v21 = vld [vmem:[#allocation3 + $0x98] ss:$36 sps:$4 sm:$0xff]   ;;  %v633_v23 = vor.u32 %v631_v4, %v630_v11  ;;  %v1084_v25 = vsel %vm7768_vm5, %v1079_v14, %v1083_v58 }
  0x84   : > { %v7335_v20 = vld [vmem:[#allocation3 + $0x9c] ss:$36 sps:$4 sm:$0xff]   ;;  %v635_v24 = vrot.slane %v630_v11, 4  ;;  %v639_v26 = vrot.slane %v637_v12, 7  ;;  %v1094_v27 = vsel %vm7768_vm5, %v1089_v15, %v1093_v1  ;;  %1421 = vst [vmem:[#allocation3 + $0xe0] sm:$0xf] %v1084_v25  ;;  %7051 = vmatpush3.bf16.msra.mxu1 %v7358_v19  ;;  %5049 = vmatmul.mubr.bf16.gmra.mxu0 %v7337_v6 }
  0x85   : > { %v6222_v29 = vrot.slane %v1562_v16, 11  ;;  %v1569_v30 = vrot.slane %v1567_v17, 7  ;;  %5177 = vmatprep.mubr.bf16.mxu1 %v7335_v20  ;;  %v634_v32 = vsel %vm7627_vm2, %v7853_v47, %v633_v23  ;;  %1422 = vst [vmem:[#allocation3 + $0x104] sm:$0xf] %v1094_v27  ;;  %v1576_v33 = vshrl.u32 %v1458_v10, 16  ;;  %v200_v41 = vld [vmem:[%s7615_s14 + $0x88] sm:$0xff] }
  0x86   : > { %v1579_v34 = vshll.u32 %v1458_v10, 16  ;;  %5178 = vmatmul.mubr.bf16.gmra.mxu1 %v7338_v21  ;;  %v642_v35 = vor.u32 %v640_v13, %v639_v26  ;;  %866 = vst [vmem:[#allocation3 + $0x1f8] sm:$0xf] %v634_v32  ;;  %v441_v38 = vld [vmem:[#allocation2 + $0xa4] sm:$0x8]  ;;  %v6520_v50 = vpack.c.bf16 %v200_v41, %v200_v41  ;;  %v7365_v11 = vld [vmem:[%s9019_s1 + $0x148] sm:$0xff]  }
  0x87   : > { %v1572_v36 = vor.u32 %v1570_v18, %v1569_v30  ;;  %v1574_v37 = vrot.slane %v1569_v30, 4  ;;  %v442_v39 = vld [vmem:[#allocation2 + $0xa8] sm:$0xf]  ;;  %v1578_v42 = vrot.slane %v1576_v33, 7  ;;  %v443_v43 = vld [vmem:[#allocation2 + $0xac] sm:$0xf]  ;;  %6946 = vmatprep.subr.bf16.mxu0 %v7365_v11 }
  0x88   : > { %v645_v44 = vshrl.u32 %v441_v38, 16  ;;  %v650_v45 = vshrl.u32 %v442_v39, 16  ;;  %v653_v46 = vshll.u32 %v442_v39, 16  ;;  %401 = vst [vmem:[#allocation2 + $0xbc] sm:$0xf] %v6519_v22  ;;  %v643_v40 = vsel %vm7627_vm2, %v635_v24, %v642_v35  ;;  %v7366_v25 = vld [vmem:[%s9019_s1 + $0x108] sm:$0xff]  }
  0x89   : > { %v1573_v47 = vsel %vm7627_vm2, %v6222_v29, %v1572_v36  ;;  %v659_v48 = vshrl.u32 %v443_v43, 16  ;;  %v662_v49 = vshll.u32 %v443_v43, 16  ;;  %v900_v51 = vld [vmem:[#allocation2 + $0xa8] sm:$0xf]  ;;  %v901_v52 = vld [vmem:[#allocation2 + $0xac] sm:$0xf]  ;;  %v1581_v53 = vor.u32 %v1579_v34, %v1578_v42  ;;  %6947 = vmatpush3.bf16.msra.mxu0 %v7366_v25 }
  0x8a   : > { %867 = vst [vmem:[#allocation3 + $0x21c] sm:$0xf] %v643_v40  ;;  %1885 = vst [vmem:[#allocation3 + $0xe4] sm:$0xf] %v1573_v47  ;;  %v6211_v54 = vrot.slane %v645_v44, 11  ;;  %v652_v55 = vrot.slane %v650_v45, 7 }
  0x8b   : > { %932 = vst [vmem:[#allocation3 + $0x244] sm:$0xf] %v900_v51  ;;  %933 = vst [vmem:[#allocation3 + $0x268] sm:$0xf] %v901_v52  ;;  %v960_v56 = vld [vmem:[#allocation2 + $0x58] sm:$0xf]  ;;  %v1582_v63 = vsel %vm7627_vm2, %v1574_v37, %v1581_v53 }
  0x8c   : > { %v961_v57 = vld [vmem:[#allocation2 + $0x5c] sm:$0xf]  ;;  %v661_v58 = vrot.slane %v659_v48, 7  ;;  %v962_v59 = vld [vmem:[#allocation2 + $0x60] sm:$0x1]  ;;  %v1096_v60 = vshrl.u32 %v960_v56, 16  ;;  %v655_v1 = vor.u32 %v653_v46, %v652_v55 }
  0x8d   : > { %v1099_v61 = vshll.u32 %v960_v56, 16  ;;  %v1105_v62 = vshll.u32 %v961_v57, 16  ;;  %v657_v2 = vrot.slane %v652_v55, 4  ;;  %v1109_v3 = vshrl.u32 %v961_v57, 16  ;;  %v1459_v4 = vld [vmem:[#allocation2 + $0x68] sm:$0x8] }
  0x8e   : > { %v1460_v5 = vld [vmem:[#allocation2 + $0x6c] sm:$0xf]  ;;  %402 = vst [vmem:[#allocation2 + $0xc0] sm:$0xf] %v6520_v50  ;;  %1886 = vst [vmem:[#allocation3 + $0x108] sm:$0xf] %v1582_v63  ;;  %v664_v6 = vor.u32 %v662_v49, %v661_v58  ;;  %v656_v12 = vsel %vm7627_vm2, %v6211_v54, %v655_v1 }
  0x8f   : > { %v1098_v7 = vrot.slane %v1096_v60, 4  ;;  %v1101_v8 = vrot.slane %v1099_v61, 5  ;;  %v1107_v9 = vrot.slane %v1105_v62, 5  ;;  %v1461_v10 = vld [vmem:[#allocation2 + $0x70] sm:$0xf]  ;;  %v1111_v13 = vrot.slane %v1109_v3, 4 }
  0x90   : > { %v1115_v14 = vshll.u32 %v962_v59, 16  ;;  %v1584_v15 = vshrl.u32 %v1459_v4, 16  ;;  %v665_v16 = vsel %vm7627_vm2, %v657_v2, %v664_v6  ;;  %868 = vst [vmem:[#allocation3 + $0x240] sm:$0xf] %v656_v12  ;;  %v1589_v18 = vshrl.u32 %v1460_v5, 16  ;;  %v201_v34 = vld [vmem:[%s7615_s14 + $0x90] sm:$0xff] }
  0x91   : > { %v1102_v17 = vor.u32 %v1101_v8, %v1098_v7  ;;  %v1592_v19 = vshll.u32 %v1460_v5, 16  ;;  %869 = vst [vmem:[#allocation3 + $0x264] sm:$0xf] %v665_v16  ;;  %v1112_v20 = vor.u32 %v1111_v13, %v1107_v9  ;;  %v1598_v24 = vshrl.u32 %v1461_v10, 16  ;;  %v7343_v26 = vld [vmem:[#allocation3 + $0x1fc] ss:$36 sps:$4 sm:$0xff]  }
  0x92   : > { %v1117_v21 = vrot.slane %v1115_v14, 5  ;;  %v6223_v23 = vrot.slane %v1584_v15, 11  ;;  %v1591_v29 = vrot.slane %v1589_v18, 7  ;;  %v7347_v30 = vld [vmem:[#allocation3 + $0x1f8] ss:$36 sps:$4 sm:$0xff]   ;;  %v1601_v33 = vshll.u32 %v1461_v10, 16  ;;  %5056 = vmatprep.mubr.bf16.mxu0 %v7343_v26 }
  0x93   : > { %v1103_v27 = vrot.slane %v1102_v17, 4  ;;  %v1113_v31 = vrot.slane %v1112_v20, 4  ;;  %v1600_v32 = vrot.slane %v1598_v24, 7  ;;  %v444_v37 = vld [vmem:[#allocation2 + $0xb8] sm:$0x8]  ;;  %5057 = vmatmul.mubr.bf16.gmra.mxu0 %v7347_v30  ;;  %v7373_v62 = vld [vmem:[%s9019_s1 + $0x1e0] sm:$0xff]  }
  0x94   : > { %v1594_v35 = vor.u32 %v1592_v19, %v1591_v29  ;;  %v1596_v36 = vrot.slane %v1591_v29, 4  ;;  %v445_v38 = vld [vmem:[#allocation2 + $0xbc] sm:$0xf]  ;;  %v7348_v42 = vld [vmem:[#allocation3 + $0xe0] ss:$36 sps:$4 sm:$0xff]   ;;  %v667_v45 = vshrl.u32 %v444_v37, 16  ;;  %7052 = vmatprep.subr.bf16.mxu1 %v7373_v62 }
  0x95   : > { %v1108_v22 = vsel %vm7768_vm5, %v1103_v27, %v1107_v9  ;;  %v202_v39 = vld [vmem:[%s7615_s14 + $0x98] sm:$0xff]  ;;  %v7345_v41 = vld [vmem:[#allocation3 + $0xe4] ss:$36 sps:$4 sm:$0xff]   ;;  %v1118_v43 = vsel %vm7768_vm5, %v1113_v31, %v1117_v21  ;;  %v1603_v44 = vor.u32 %v1601_v33, %v1600_v32  ;;  %v446_v47 = vld [vmem:[#allocation2 + $0xc0] sm:$0xf]  ;;  %v672_v48 = vshrl.u32 %v445_v38, 16 }
  0x96   : > { %1423 = vst [vmem:[#allocation3 + $0x128] sm:$0xf] %v1108_v22  ;;  %v6590_v46 = vpack.c.bf16 %v202_v39, %v201_v34  ;;  %1424 = vst [vmem:[#allocation3 + $0x14c] sm:$0xf] %v1118_v43  ;;  %v1595_v40 = vsel %vm7627_vm2, %v6223_v23, %v1594_v35  ;;  %v675_v49 = vshll.u32 %v445_v38, 16  ;;  %5185 = vmatprep.mubr.bf16.mxu1 %v7345_v41  ;;  %v6212_v53 = vrot.slane %v667_v45, 11 }
  0x97   : > { %v902_v51 = vld [vmem:[#allocation2 + $0xbc] sm:$0xf]  ;;  %v1604_v52 = vsel %vm7627_vm2, %v1596_v36, %v1603_v44  ;;  %1887 = vst [vmem:[#allocation3 + $0x12c] sm:$0xf] %v1595_v40  ;;  %v681_v54 = vshrl.u32 %v446_v47, 16  ;;  %v684_v55 = vshll.u32 %v446_v47, 16  ;;  %5186 = vmatmul.mubr.bf16.gmra.mxu1 %v7348_v42 }
  0x98   : > { %v903_v56 = vld [vmem:[#allocation2 + $0xc0] sm:$0xf]  ;;  %934 = vst [vmem:[#allocation3 + $0x28c] sm:$0xf] %v902_v51  ;;  %6691 = vst [vmem:[#allocation2 + $0xd0] sm:$0xff] %v6590_v46   ;;  %v674_v58 = vrot.slane %v672_v48, 7 }
  0x99   : > { %v7351_v57 = vld [vmem:[#allocation3 + $0x244] ss:$36 sps:$4 sm:$0xff]   ;;  %1888 = vst [vmem:[#allocation3 + $0x150] sm:$0xf] %v1604_v52  ;;  %935 = vst [vmem:[#allocation3 + $0x2b0] sm:$0xf] %v903_v56 }
  0x9a   : > { %v7355_v50 = vld [vmem:[#allocation3 + $0x240] ss:$36 sps:$4 sm:$0xff]   ;;  %v683_v59 = vrot.slane %v681_v54, 7  ;;  %v964_v61 = vld [vmem:[#allocation2 + $0x70] sm:$0xf]  ;;  %5064 = vmatprep.mubr.bf16.mxu0 %v7351_v57  ;;  %v677_v63 = vor.u32 %v675_v49, %v674_v58  ;;  %v679_v1 = vrot.slane %v674_v58, 4 }
  0x9b   : > { %v963_v60 = vld [vmem:[#allocation2 + $0x6c] sm:$0xf]  ;;  %v965_v2 = vld [vmem:[#allocation2 + $0x74] sm:$0x1]  ;;  %v7374_v5 = vld [vmem:[%s9019_s1 + $0x1a0] sm:$0xff]   ;;  %v1129_v7 = vshll.u32 %v964_v61, 16  ;;  %5065 = vmatmul.mubr.bf16.gmra.mxu0 %v7355_v50 }
  0x9c   : > { %v1120_v3 = vshrl.u32 %v963_v60, 16  ;;  %v1123_v4 = vshll.u32 %v963_v60, 16  ;;  %v686_v6 = vor.u32 %v684_v55, %v683_v59  ;;  %v1133_v8 = vshrl.u32 %v964_v61, 16  ;;  %v1462_v10 = vld [vmem:[#allocation2 + $0x7c] sm:$0x8]  ;;  %v7375_v11 = vld [vmem:[%s9019_s1 + $0x140] sm:$0xff]   ;;  %7053 = vmatpush3.bf16.msra.mxu1 %v7374_v5 }
  0x9d   : > { %v1139_v9 = vshll.u32 %v965_v2, 16  ;;  %v678_v12 = vsel %vm7627_vm2, %v6212_v53, %v677_v63  ;;  %v1463_v15 = vld [vmem:[#allocation2 + $0x80] sm:$0xf]  ;;  %v1464_v16 = vld [vmem:[#allocation2 + $0x84] sm:$0xf]  ;;  %v1131_v18 = vrot.slane %v1129_v7, 5  ;;  %6948 = vmatprep.subr.bf16.mxu0 %v7375_v11 }
  0x9e   : > { %v1122_v13 = vrot.slane %v1120_v3, 4  ;;  %v1125_v14 = vrot.slane %v1123_v4, 5  ;;  %v687_v17 = vsel %vm7627_vm2, %v679_v1, %v686_v6  ;;  %870 = vst [vmem:[#allocation3 + $0x288] sm:$0xf] %v678_v12  ;;  %v1135_v19 = vrot.slane %v1133_v8, 4  ;;  %v7376_v21 = vld [vmem:[%s9019_s1 + $0x100] sm:$0xff]  }
  0x9f   : > { %v1141_v20 = vrot.slane %v1139_v9, 5  ;;  %871 = vst [vmem:[#allocation3 + $0x2ac] sm:$0xf] %v687_v17  ;;  %v1606_v24 = vshrl.u32 %v1462_v10, 16  ;;  %v1611_v25 = vshrl.u32 %v1463_v15, 16  ;;  %v1614_v26 = vshll.u32 %v1463_v15, 16  ;;  %6949 = vmatpush3.bf16.msra.mxu0 %v7376_v21 }
  0xa0   : > { %v1126_v23 = vor.u32 %v1125_v14, %v1122_v13  ;;  %v7353_v27 = vld [vmem:[#allocation3 + $0x12c] ss:$36 sps:$4 sm:$0xff]   ;;  %v1136_v30 = vor.u32 %v1135_v19, %v1131_v18  ;;  %v1620_v31 = vshrl.u32 %v1464_v16, 16  ;;  %v1623_v22 = vshll.u32 %v1464_v16, 16  ;;  %v447_v37 = vld [vmem:[#allocation2 + $0xcc] sm:$0x8] }
  0xa1   : > { %v7356_v29 = vld [vmem:[#allocation3 + $0x128] ss:$36 sps:$4 sm:$0xff]   ;;  %v6224_v33 = vrot.slane %v1606_v24, 11  ;;  %v1613_v34 = vrot.slane %v1611_v25, 7  ;;  %5193 = vmatprep.mubr.bf16.mxu1 %v7353_v27  ;;  %v689_v44 = vshrl.u32 %v447_v37, 16  ;;  %v203_v5 = vld [vmem:[%s7615_s14 + $0xa0] sm:$0xff] }
  0xa2   : > { %v1127_v32 = vrot.slane %v1126_v23, 4  ;;  %v1137_v35 = vrot.slane %v1136_v30, 4  ;;  %v1622_v36 = vrot.slane %v1620_v31, 7  ;;  %5194 = vmatmul.mubr.bf16.gmra.mxu1 %v7356_v29  ;;  %v448_v42 = vld [vmem:[#allocation2 + $0xd0] sm:$0xf]  ;;  %v204_v11 = vld [vmem:[%s7615_s14 + $0xa8] sm:$0xff] }
  0xa3   : > { %v1616_v39 = vor.u32 %v1614_v26, %v1613_v34  ;;  %v1618_v41 = vrot.slane %v1613_v34, 4  ;;  %v449_v43 = vld [vmem:[#allocation2 + $0xd4] sm:$0xf]  ;;  %v694_v40 = vshrl.u32 %v448_v42, 16  ;;  %v697_v47 = vshll.u32 %v448_v42, 16  ;;  %v7389_v17 = vld [vmem:[%s9019_s1 + $0x1d8] sm:$0xff]  }
  0xa4   : > { %v1132_v38 = vsel %vm7768_vm5, %v1127_v32, %v1131_v18  ;;  %v1142_v45 = vsel %vm7768_vm5, %v1137_v35, %v1141_v20  ;;  %v1625_v46 = vor.u32 %v1623_v22, %v1622_v36  ;;  %v904_v48 = vld [vmem:[#allocation2 + $0xd0] sm:$0xf]  ;;  %v905_v49 = vld [vmem:[#allocation2 + $0xd4] sm:$0xf]  ;;  %v6213_v52 = vrot.slane %v689_v44, 11  ;;  %v7933_v23 = vld [vmem:[%s9019_s1 + $0x238] sm:$0xff]   ;;  %7054 = vmatprep.subr.bf16.mxu1 %v7389_v17 }
  0xa5   : > { %1425 = vst [vmem:[#allocation3 + $0x170] sm:$0xf] %v1132_v38  ;;  %1426 = vst [vmem:[#allocation3 + $0x194] sm:$0xf] %v1142_v45  ;;  %v1617_v51 = vsel %vm7627_vm2, %v6224_v33, %v1616_v39  ;;  %v703_v53 = vshrl.u32 %v449_v43, 16  ;;  %v706_v54 = vshll.u32 %v449_v43, 16  ;;  %v6523_v33 = vpack.c.bf16 %v203_v5, %v203_v5  ;;  %7182 = vmatprep.subr.bf16.mxu0 %v7933_v23 }
  0xa6   : > { %936 = vst [vmem:[#allocation3 + $0x2d4] sm:$0xf] %v904_v48  ;;  %937 = vst [vmem:[#allocation3 + $0x2f8] sm:$0xf] %v905_v49  ;;  %v966_v55 = vld [vmem:[#allocation2 + $0x80] sm:$0xf]  ;;  %v1626_v57 = vsel %vm7627_vm2, %v1618_v41, %v1625_v46  ;;  %v6524_v37 = vpack.c.bf16 %v204_v11, %v204_v11 }
  0xa7   : > { %v7359_v56 = vld [vmem:[#allocation3 + $0x28c] ss:$36 sps:$4 sm:$0xff]   ;;  %1889 = vst [vmem:[#allocation3 + $0x174] sm:$0xf] %v1617_v51  ;;  %v696_v58 = vrot.slane %v694_v40, 7  ;;  %v705_v59 = vrot.slane %v703_v53, 7 }
  0xa8   : > { %v7363_v50 = vld [vmem:[#allocation3 + $0x288] ss:$36 sps:$4 sm:$0xff]   ;;  %1890 = vst [vmem:[#allocation3 + $0x198] sm:$0xf] %v1626_v57  ;;  %v967_v60 = vld [vmem:[#allocation2 + $0x84] sm:$0xf]  ;;  %5072 = vmatprep.mubr.bf16.mxu0 %v7359_v56 }
  0xa9   : > { %v968_v61 = vld [vmem:[#allocation2 + $0x88] sm:$0x1]  ;;  %v1144_v62 = vshrl.u32 %v966_v55, 16  ;;  %v699_v63 = vor.u32 %v697_v47, %v696_v58  ;;  %v701_v1 = vrot.slane %v696_v58, 4  ;;  %v1147_v2 = vshll.u32 %v966_v55, 16  ;;  %5073 = vmatmul.mubr.bf16.gmra.mxu0 %v7363_v50  ;;  %v7391_v29 = vld [vmem:[%s9019_s1 + $0x198] sm:$0xff]  }
  0xaa   : > { %v1153_v3 = vshll.u32 %v967_v60, 16  ;;  %v1465_v4 = vld [vmem:[#allocation2 + $0x90] sm:$0x8]  ;;  %v708_v6 = vor.u32 %v706_v54, %v705_v59  ;;  %v1157_v8 = vshrl.u32 %v967_v60, 16  ;;  %v1163_v9 = vshll.u32 %v968_v61, 16  ;;  %7055 = vmatpush3.bf16.msra.mxu1 %v7391_v29 }
  0xab   : > { %v1146_v7 = vrot.slane %v1144_v62, 4  ;;  %v1466_v10 = vld [vmem:[#allocation2 + $0x94] sm:$0xf]  ;;  %v700_v12 = vsel %vm7627_vm2, %v6213_v52, %v699_v63  ;;  %v1149_v13 = vrot.slane %v1147_v2, 5  ;;  %v1467_v15 = vld [vmem:[#allocation2 + $0x98] sm:$0xf] }
  0xac   : > { %v1155_v14 = vrot.slane %v1153_v3, 5  ;;  %v1628_v16 = vshrl.u32 %v1465_v4, 16  ;;  %v709_v18 = vsel %vm7627_vm2, %v701_v1, %v708_v6  ;;  %872 = vst [vmem:[#allocation3 + $0x2d0] sm:$0xf] %v700_v12  ;;  %v1159_v19 = vrot.slane %v1157_v8, 4  ;;  %v7404_v34 = vld [vmem:[%s9019_s1 + $0x1d0] sm:$0xff]  }
  0xad   : > { %v1165_v20 = vrot.slane %v1163_v9, 5  ;;  %v1633_v21 = vshrl.u32 %v1466_v10, 16  ;;  %873 = vst [vmem:[#allocation3 + $0x2f4] sm:$0xf] %v709_v18  ;;  %v1150_v24 = vor.u32 %v1149_v13, %v1146_v7  ;;  %v1636_v26 = vshll.u32 %v1466_v10, 16  ;;  %7056 = vmatprep.subr.bf16.mxu1 %v7404_v34  ;;  %v7406_v13 = vld [vmem:[%s9019_s1 + $0x190] sm:$0xff]  }
  0xae   : > { %v6225_v25 = vrot.slane %v1628_v16, 11  ;;  %v1642_v27 = vshrl.u32 %v1467_v15, 16  ;;  %v1160_v30 = vor.u32 %v1159_v19, %v1155_v14  ;;  %v1645_v32 = vshll.u32 %v1467_v15, 16  ;;  %v7364_v35 = vld [vmem:[#allocation3 + $0x170] ss:$36 sps:$4 sm:$0xff]   ;;  %v7419_v18 = vld [vmem:[%s9019_s1 + $0x1c8] sm:$0xff]   ;;  %7057 = vmatpush3.bf16.msra.mxu1 %v7406_v13 }
  0xaf   : > { %v1635_v31 = vrot.slane %v1633_v21, 7  ;;  %v7361_v22 = vld [vmem:[#allocation3 + $0x174] ss:$36 sps:$4 sm:$0xff]   ;;  %v1151_v36 = vrot.slane %v1150_v24, 4  ;;  %405 = vst [vmem:[#allocation2 + $0xe4] sm:$0xf] %v6523_v33  ;;  %7058 = vmatprep.subr.bf16.mxu1 %v7419_v18 }
  0xb0   : > { %v1161_v38 = vrot.slane %v1160_v30, 4  ;;  %v1644_v42 = vrot.slane %v1642_v27, 7  ;;  %5201 = vmatprep.mubr.bf16.mxu1 %v7361_v22  ;;  %406 = vst [vmem:[#allocation2 + $0xe8] sm:$0xf] %v6524_v37  ;;  %v450_v40 = vld [vmem:[#allocation2 + $0xe0] sm:$0x8] }
  0xb1   : > { %v1638_v39 = vor.u32 %v1636_v26, %v1635_v31  ;;  %v1640_v41 = vrot.slane %v1635_v31, 4  ;;  %v1156_v43 = vsel %vm7768_vm5, %v1151_v36, %v1155_v14  ;;  %5202 = vmatmul.mubr.bf16.gmra.mxu1 %v7364_v35  ;;  %v969_v47 = vld [vmem:[#allocation2 + $0x94] sm:$0xf]  ;;  %v711_v48 = vshrl.u32 %v450_v40, 16  ;;  %v970_v49 = vld [vmem:[#allocation2 + $0x98] sm:$0xf] }
  0xb2   : > { %v1166_v44 = vsel %vm7768_vm5, %v1161_v38, %v1165_v20  ;;  %1427 = vst [vmem:[#allocation3 + $0x1b8] sm:$0xf] %v1156_v43  ;;  %v1647_v46 = vor.u32 %v1645_v32, %v1644_v42  ;;  %v971_v51 = vld [vmem:[#allocation2 + $0x9c] sm:$0x1]  ;;  %v1168_v55 = vshrl.u32 %v969_v47, 16  ;;  %v1171_v57 = vshll.u32 %v969_v47, 16 }
  0xb3   : > { %v1639_v45 = vsel %vm7627_vm2, %v6225_v25, %v1638_v39  ;;  %1428 = vst [vmem:[#allocation3 + $0x1dc] sm:$0xf] %v1166_v44  ;;  %v7367_v52 = vld [vmem:[#allocation3 + $0x2d4] ss:$36 sps:$4 sm:$0xff]   ;;  %v6214_v56 = vrot.slane %v711_v48, 11  ;;  %v1177_v50 = vshll.u32 %v970_v49, 16 }
  0xb4   : > { %1891 = vst [vmem:[#allocation3 + $0x1bc] sm:$0xf] %v1639_v45  ;;  %v1648_v53 = vsel %vm7627_vm2, %v1640_v41, %v1647_v46  ;;  %v7371_v54 = vld [vmem:[#allocation3 + $0x2d0] ss:$36 sps:$4 sm:$0xff]   ;;  %v1181_v58 = vshrl.u32 %v970_v49, 16  ;;  %5080 = vmatprep.mubr.bf16.mxu0 %v7367_v52  ;;  %v1170_v59 = vrot.slane %v1168_v55, 4 }
  0xb5   : > { %1892 = vst [vmem:[#allocation3 + $0x1e0] sm:$0xf] %v1648_v53  ;;  %v1187_v60 = vshll.u32 %v971_v51, 16  ;;  %v1468_v61 = vld [vmem:[#allocation2 + $0xa4] sm:$0x8]  ;;  %5081 = vmatmul.mubr.bf16.gmra.mxu0 %v7371_v54  ;;  %v1173_v2 = vrot.slane %v1171_v57, 5 }
  0xb6   : > { %v1469_v62 = vld [vmem:[#allocation2 + $0xa8] sm:$0xf]  ;;  %v451_v63 = vld [vmem:[#allocation2 + $0xe4] sm:$0xf]  ;;  %v1179_v3 = vrot.slane %v1177_v50, 5  ;;  %v1183_v11 = vrot.slane %v1181_v58, 4 }
  0xb7   : > { %v906_v1 = vld [vmem:[#allocation2 + $0xe4] sm:$0xf]  ;;  %v452_v4 = vld [vmem:[#allocation2 + $0xe8] sm:$0xf]  ;;  %v716_v5 = vshrl.u32 %v451_v63, 16  ;;  %v719_v6 = vshll.u32 %v451_v63, 16  ;;  %v1174_v10 = vor.u32 %v1173_v2, %v1170_v59 }
  0xb8   : > { %v907_v7 = vld [vmem:[#allocation2 + $0xe8] sm:$0xf]  ;;  %938 = vst [vmem:[#allocation3 + $0x31c] sm:$0xf] %v906_v1  ;;  %v725_v8 = vshrl.u32 %v452_v4, 16  ;;  %v728_v9 = vshll.u32 %v452_v4, 16  ;;  %v1184_v21 = vor.u32 %v1183_v11, %v1179_v3 }
  0xb9   : > { %939 = vst [vmem:[#allocation3 + $0x340] sm:$0xf] %v907_v7  ;;  %v1470_v12 = vld [vmem:[#allocation2 + $0xac] sm:$0xf]  ;;  %v718_v14 = vrot.slane %v716_v5, 7  ;;  %v1189_v15 = vrot.slane %v1187_v60, 5 }
  0xba   : > { %v1650_v16 = vshrl.u32 %v1468_v61, 16  ;;  %v1655_v17 = vshrl.u32 %v1469_v62, 16  ;;  %v727_v19 = vrot.slane %v725_v8, 7  ;;  %v1175_v20 = vrot.slane %v1174_v10, 4  ;;  %v972_v25 = vld [vmem:[#allocation2 + $0xa8] sm:$0xf] }
  0xbb   : > { %v1658_v24 = vshll.u32 %v1469_v62, 16  ;;  %v7372_v27 = vld [vmem:[#allocation3 + $0x1b8] ss:$36 sps:$4 sm:$0xff]   ;;  %v721_v29 = vor.u32 %v719_v6, %v718_v14  ;;  %v723_v30 = vrot.slane %v718_v14, 4  ;;  %v1185_v33 = vrot.slane %v1184_v21, 4  ;;  %v7421_v42 = vld [vmem:[%s9019_s1 + $0x188] sm:$0xff]  }
  0xbc   : > { %v7369_v26 = vld [vmem:[#allocation3 + $0x1bc] ss:$36 sps:$4 sm:$0xff]   ;;  %v730_v31 = vor.u32 %v728_v9, %v727_v19  ;;  %v1180_v32 = vsel %vm7768_vm5, %v1175_v20, %v1179_v3  ;;  %v6226_v34 = vrot.slane %v1650_v16, 11  ;;  %v973_v22 = vld [vmem:[#allocation2 + $0xac] sm:$0xf]  ;;  %v1657_v37 = vrot.slane %v1655_v17, 7  ;;  %7059 = vmatpush3.bf16.msra.mxu1 %v7421_v42 }
  0xbd   : > { %v974_v35 = vld [vmem:[#allocation2 + $0xb0] sm:$0x1]  ;;  %5209 = vmatprep.mubr.bf16.mxu1 %v7369_v26  ;;  %v722_v36 = vsel %vm7627_vm2, %v6214_v56, %v721_v29  ;;  %1429 = vst [vmem:[#allocation3 + $0x200] sm:$0xf] %v1180_v32  ;;  %v1664_v38 = vshrl.u32 %v1470_v12, 16  ;;  %v1667_v39 = vshll.u32 %v1470_v12, 16  ;;  %v1190_v44 = vsel %vm7768_vm5, %v1185_v33, %v1189_v15 }
  0xbe   : > { %v1471_v41 = vld [vmem:[#allocation2 + $0xb8] sm:$0x8]  ;;  %5210 = vmatmul.mubr.bf16.gmra.mxu1 %v7372_v27  ;;  %v731_v43 = vsel %vm7627_vm2, %v723_v30, %v730_v31  ;;  %874 = vst [vmem:[#allocation3 + $0x318] sm:$0xf] %v722_v36  ;;  %v1192_v45 = vshrl.u32 %v972_v25, 16  ;;  %v1195_v46 = vshll.u32 %v972_v25, 16  ;;  %v1660_v48 = vor.u32 %v1658_v24, %v1657_v37 }
  0xbf   : > { %v1472_v40 = vld [vmem:[#allocation2 + $0xbc] sm:$0xf]  ;;  %875 = vst [vmem:[#allocation3 + $0x33c] sm:$0xf] %v731_v43  ;;  %1430 = vst [vmem:[#allocation3 + $0x224] sm:$0xf] %v1190_v44 }
  0xc0   : > { %v1911_v47 = vld [vmem:[#allocation2 + $0x1c] sm:$0xf]  ;;  %v1662_v49 = vrot.slane %v1657_v37, 4  ;;  %v1666_v51 = vrot.slane %v1664_v38, 7  ;;  %v1201_v52 = vshll.u32 %v973_v22, 16  ;;  %v7434_v54 = vld [vmem:[%s9019_s1 + $0x1c0] sm:$0xff]   ;;  %v1661_v59 = vsel %vm7627_vm2, %v6226_v34, %v1660_v48 }
  0xc1   : > { %v1912_v53 = vld [vmem:[#allocation2 + $0x20] sm:$0xf]  ;;  %1943 = vst [vmem:[#allocation3 + $0x10] sm:$0xf] %v1911_v47  ;;  %v1194_v55 = vrot.slane %v1192_v45, 4  ;;  %v1197_v56 = vrot.slane %v1195_v46, 5  ;;  %7060 = vmatprep.subr.bf16.mxu1 %v7434_v54 }
  0xc2   : > { %v1205_v57 = vshrl.u32 %v973_v22, 16  ;;  %v1211_v50 = vshll.u32 %v974_v35, 16  ;;  %v1473_v58 = vld [vmem:[#allocation2 + $0xc0] sm:$0xf]  ;;  %1944 = vst [vmem:[#allocation3 + $0x34] sm:$0xf] %v1912_v53  ;;  %v1669_v60 = vor.u32 %v1667_v39, %v1666_v51 }
  0xc3   : > { %v1203_v61 = vrot.slane %v1201_v52, 5  ;;  %v1672_v62 = vshrl.u32 %v1471_v41, 16  ;;  %v1975_v63 = vld [vmem:[#allocation2 + $0x1c] sm:$0xf]  ;;  %v1976_v1 = vld [vmem:[#allocation2 + $0x20] sm:$0xf]  ;;  %v1198_v2 = vor.u32 %v1197_v56, %v1194_v55 }
  0xc4   : > { %1893 = vst [vmem:[#allocation3 + $0x204] sm:$0xf] %v1661_v59  ;;  %v1207_v3 = vrot.slane %v1205_v57, 4  ;;  %v1213_v4 = vrot.slane %v1211_v50, 5  ;;  %v1677_v5 = vshrl.u32 %v1472_v40, 16  ;;  %v1670_v6 = vsel %vm7627_vm2, %v1662_v49, %v1669_v60  ;;  %v7436_v10 = vld [vmem:[%s9019_s1 + $0x180] sm:$0xff]  }
  0xc5   : > { %v6227_v7 = vrot.slane %v1672_v62, 11  ;;  %v1680_v8 = vshll.u32 %v1472_v40, 16  ;;  %v1686_v9 = vshrl.u32 %v1473_v58, 16  ;;  %1894 = vst [vmem:[#allocation3 + $0x228] sm:$0xf] %v1670_v6  ;;  %v1199_v11 = vrot.slane %v1198_v2, 4  ;;  %7061 = vmatpush3.bf16.msra.mxu1 %v7436_v10 }
  0xc6   : > { %v1208_v12 = vor.u32 %v1207_v3, %v1203_v61  ;;  %v1679_v13 = vrot.slane %v1677_v5, 7  ;;  %v1689_v14 = vshll.u32 %v1473_v58, 16  ;;  %v1977_v15 = vld [vmem:[#allocation2 + $0x24] sm:$0x1]  ;;  %v213_v16 = vld [vmem:[%s7615_s14 + $0xf0] sm:$0xff]  ;;  %v2024_v18 = vshrl.u32 %v1975_v63, 16 }
  0xc7   : > { %v1688_v17 = vrot.slane %v1686_v9, 7  ;;  %v2027_v19 = vshll.u32 %v1975_v63, 16  ;;  %v2033_v20 = vshll.u32 %v1976_v1, 16  ;;  %v214_v21 = vld [vmem:[%s7615_s14 + $0xf8] sm:$0xff]  ;;  %v7377_v24 = vld [vmem:[#allocation3 + $0x31c] ss:$36 sps:$4 sm:$0xff]   ;;  %v1204_v26 = vsel %vm7768_vm5, %v1199_v11, %v1203_v61 }
  0xc8   : > { %v7381_v25 = vld [vmem:[#allocation3 + $0x318] ss:$36 sps:$4 sm:$0xff]   ;;  %v1209_v27 = vrot.slane %v1208_v12, 4  ;;  %v1682_v29 = vor.u32 %v1680_v8, %v1679_v13  ;;  %v6605_v30 = vpack.c.bf16 %v214_v21, %v213_v16  ;;  %1431 = vst [vmem:[#allocation3 + $0x248] sm:$0xf] %v1204_v26  ;;  %v1684_v31 = vrot.slane %v1679_v13, 4  ;;  %5088 = vmatprep.mubr.bf16.mxu0 %v7377_v24 }
  0xc9   : > { %v1691_v32 = vor.u32 %v1689_v14, %v1688_v17  ;;  %v2026_v33 = vrot.slane %v2024_v18, 4  ;;  %v2029_v34 = vrot.slane %v2027_v19, 5  ;;  %v2035_v36 = vrot.slane %v2033_v20, 5  ;;  %5089 = vmatmul.mubr.bf16.gmra.mxu0 %v7381_v25  ;;  %v975_v42 = vld [vmem:[#allocation2 + $0xbc] sm:$0xf] }
  0xca   : > { %v1214_v22 = vsel %vm7768_vm5, %v1209_v27, %v1213_v4  ;;  %v1683_v35 = vsel %vm7627_vm2, %v6227_v7, %v1682_v29  ;;  %v2037_v37 = vshrl.u32 %v1976_v1, 16  ;;  %6694 = vst [vmem:[#allocation2 + $0x148] sm:$0xff] %v6605_v30   ;;  %v2043_v41 = vshll.u32 %v1977_v15, 16  ;;  %v976_v43 = vld [vmem:[#allocation2 + $0xc0] sm:$0xf] }
  0xcb   : > { %1432 = vst [vmem:[#allocation3 + $0x26c] sm:$0xf] %v1214_v22  ;;  %v1692_v38 = vsel %vm7627_vm2, %v1684_v31, %v1691_v32  ;;  %1895 = vst [vmem:[#allocation3 + $0x24c] sm:$0xf] %v1683_v35  ;;  %v2030_v39 = vor.u32 %v2029_v34, %v2026_v33  ;;  %v977_v45 = vld [vmem:[#allocation2 + $0xc4] sm:$0x1] }
  0xcc   : > { %1896 = vst [vmem:[#allocation3 + $0x270] sm:$0xf] %v1692_v38  ;;  %v2039_v44 = vrot.slane %v2037_v37, 4  ;;  %v1216_v46 = vshrl.u32 %v975_v42, 16  ;;  %v1219_v40 = vshll.u32 %v975_v42, 16  ;;  %v1225_v47 = vshll.u32 %v976_v43, 16 }
  0xcd   : > { %v7379_v48 = vld [vmem:[#allocation3 + $0x204] ss:$36 sps:$4 sm:$0xff]   ;;  %v2031_v51 = vrot.slane %v2030_v39, 4  ;;  %v2045_v53 = vrot.slane %v2043_v41, 5  ;;  %v1229_v58 = vshrl.u32 %v976_v43, 16  ;;  %v1235_v59 = vshll.u32 %v977_v45, 16 }
  0xce   : > { %v7382_v49 = vld [vmem:[#allocation3 + $0x200] ss:$36 sps:$4 sm:$0xff]   ;;  %v2040_v52 = vor.u32 %v2039_v44, %v2035_v36  ;;  %v1218_v54 = vrot.slane %v1216_v46, 4  ;;  %v1221_v55 = vrot.slane %v1219_v40, 5  ;;  %5217 = vmatprep.mubr.bf16.mxu1 %v7379_v48  ;;  %v1227_v50 = vrot.slane %v1225_v47, 5 }
  0xcf   : > { %v1474_v56 = vld [vmem:[#allocation2 + $0xcc] sm:$0x8]  ;;  %v2036_v57 = vsel %vm7768_vm5, %v2031_v51, %v2035_v36  ;;  %v1475_v60 = vld [vmem:[#allocation2 + $0xd0] sm:$0xf]  ;;  %5218 = vmatmul.mubr.bf16.gmra.mxu1 %v7382_v49  ;;  %v1476_v63 = vld [vmem:[#allocation2 + $0xd4] sm:$0xf] }
  0xd0   : > { %v2041_v61 = vrot.slane %v2040_v52, 4  ;;  %2439 = vst [vmem:[#allocation3 + $0x14] sm:$0xf] %v2036_v57  ;;  %v1222_v62 = vor.u32 %v1221_v55, %v1218_v54  ;;  %v1694_v1 = vshrl.u32 %v1474_v56, 16  ;;  %v1699_v2 = vshrl.u32 %v1475_v60, 16  ;;  %v7405_v52 = vld [vmem:[%s9019_s1 + $0x230] sm:$0xff]  }
  0xd1   : > { %v1231_v3 = vrot.slane %v1229_v58, 4  ;;  %v1237_v4 = vrot.slane %v1235_v59, 5  ;;  %v1702_v5 = vshll.u32 %v1475_v60, 16  ;;  %v1708_v6 = vshrl.u32 %v1476_v63, 16  ;;  %v1913_v7 = vld [vmem:[#allocation2 + $0x30] sm:$0xf] }
  0xd2   : > { %v2046_v8 = vsel %vm7768_vm5, %v2041_v61, %v2045_v53  ;;  %v1223_v9 = vrot.slane %v1222_v62, 4  ;;  %v6228_v10 = vrot.slane %v1694_v1, 11  ;;  %v1701_v11 = vrot.slane %v1699_v2, 7  ;;  %v1914_v12 = vld [vmem:[#allocation2 + $0x34] sm:$0xf] }
  0xd3   : > { %1945 = vst [vmem:[#allocation3 + $0x58] sm:$0xf] %v1913_v7  ;;  %v7383_v13 = vld [vmem:[#allocation3 + $0x24c] ss:$36 sps:$4 sm:$0xff]   ;;  %2440 = vst [vmem:[#allocation3 + $0x38] sm:$0xf] %v2046_v8  ;;  %v1232_v15 = vor.u32 %v1231_v3, %v1227_v50 }
  0xd4   : > { %v7388_v14 = vld [vmem:[#allocation3 + $0x248] ss:$36 sps:$4 sm:$0xff]   ;;  %v1710_v16 = vrot.slane %v1708_v6, 7  ;;  %1946 = vst [vmem:[#allocation3 + $0x7c] sm:$0xf] %v1914_v12  ;;  %v1228_v17 = vsel %vm7768_vm5, %v1223_v9, %v1227_v50  ;;  %v1704_v18 = vor.u32 %v1702_v5, %v1701_v11  ;;  %v1706_v19 = vrot.slane %v1701_v11, 4  ;;  %5225 = vmatprep.mubr.bf16.mxu1 %v7383_v13 }
  0xd5   : > { %v1711_v20 = vshll.u32 %v1476_v63, 16  ;;  %v1978_v21 = vld [vmem:[#allocation2 + $0x30] sm:$0xf]  ;;  %v1979_v24 = vld [vmem:[#allocation2 + $0x34] sm:$0xf]  ;;  %v1233_v25 = vrot.slane %v1232_v15, 4 }
  0xd6   : > { %1433 = vst [vmem:[#allocation3 + $0x290] sm:$0xf] %v1228_v17  ;;  %v1980_v26 = vld [vmem:[#allocation2 + $0x38] sm:$0x1]  ;;  %v2048_v27 = vshrl.u32 %v1978_v21, 16  ;;  %v2051_v29 = vshll.u32 %v1978_v21, 16  ;;  %v1705_v31 = vsel %vm7627_vm2, %v6228_v10, %v1704_v18 }
  0xd7   : > { %v2057_v30 = vshll.u32 %v1979_v24, 16  ;;  %v1713_v32 = vor.u32 %v1711_v20, %v1710_v16  ;;  %v2061_v33 = vshrl.u32 %v1979_v24, 16  ;;  %v2067_v34 = vshll.u32 %v1980_v26, 16  ;;  %v978_v22 = vld [vmem:[#allocation2 + $0xd0] sm:$0xf]  ;;  %5226 = vmatmul.mubr.bf16.gmra.mxu1 %v7388_v14  ;;  %v7420_v9 = vld [vmem:[%s9019_s1 + $0x228] sm:$0xff]  }
  0xd8   : > { %v979_v35 = vld [vmem:[#allocation2 + $0xd4] sm:$0xf]  ;;  %v1238_v36 = vsel %vm7768_vm5, %v1233_v25, %v1237_v4  ;;  %1897 = vst [vmem:[#allocation3 + $0x294] sm:$0xf] %v1705_v31  ;;  %v2050_v37 = vrot.slane %v2048_v27, 4  ;;  %v2053_v38 = vrot.slane %v2051_v29, 5 }
  0xd9   : > { %v2059_v39 = vrot.slane %v2057_v30, 5  ;;  %v980_v41 = vld [vmem:[#allocation2 + $0xd8] sm:$0x1]  ;;  %1434 = vst [vmem:[#allocation3 + $0x2b4] sm:$0xf] %v1238_v36  ;;  %v1714_v42 = vsel %vm7627_vm2, %v1706_v19, %v1713_v32  ;;  %v2063_v43 = vrot.slane %v2061_v33, 4 }
  0xda   : > { %v2069_v44 = vrot.slane %v2067_v34, 5  ;;  %v1240_v45 = vshrl.u32 %v978_v22, 16  ;;  %v1477_v46 = vld [vmem:[#allocation2 + $0xe0] sm:$0x8]  ;;  %1898 = vst [vmem:[#allocation3 + $0x2b8] sm:$0xf] %v1714_v42  ;;  %v2054_v40 = vor.u32 %v2053_v38, %v2050_v37 }
  0xdb   : > { %v1243_v47 = vshll.u32 %v978_v22, 16  ;;  %v1249_v48 = vshll.u32 %v979_v35, 16  ;;  %v1253_v49 = vshrl.u32 %v979_v35, 16  ;;  %v1478_v51 = vld [vmem:[#allocation2 + $0xe4] sm:$0xf]  ;;  %v2064_v55 = vor.u32 %v2063_v43, %v2059_v39 }
  0xdc   : > { %v7385_v53 = vld [vmem:[#allocation3 + $0x10] ss:$36 sps:$4 sm:$0xff]   ;;  %v1242_v56 = vrot.slane %v1240_v45, 4  ;;  %v2055_v57 = vrot.slane %v2054_v40, 4  ;;  %v1479_v60 = vld [vmem:[#allocation2 + $0xe8] sm:$0xf] }
  0xdd   : > { %v7387_v54 = vld [vmem:[#allocation3 + $0x14] ss:$36 sps:$4 sm:$0xff]   ;;  %v1245_v50 = vrot.slane %v1243_v47, 5  ;;  %v1251_v58 = vrot.slane %v1249_v48, 5  ;;  %v1255_v59 = vrot.slane %v1253_v49, 4  ;;  %v2065_v61 = vrot.slane %v2064_v55, 4 }
  0xde   : > { %5322 = vmatprep.mubr.bf16.mxu0 %v7387_v54  ;;  %v1259_v62 = vshll.u32 %v980_v41, 16  ;;  %v1716_v63 = vshrl.u32 %v1477_v46, 16  ;;  %v1721_v1 = vshrl.u32 %v1478_v51, 16  ;;  %v1915_v2 = vld [vmem:[#allocation2 + $0x44] sm:$0xf]  ;;  %v2060_v3 = vsel %vm7768_vm5, %v2055_v57, %v2059_v39  ;;  %v7449_v54 = vld [vmem:[%s9019_s1 + $0x218] sm:$0xff]  }
  0xdf   : > { %5323 = vmatmul.mubr.bf16.vlgmr.msra.gmra.mxu0 %v7385_v53  ;;  %v1246_v4 = vor.u32 %v1245_v50, %v1242_v56  ;;  %v1256_v5 = vor.u32 %v1255_v59, %v1251_v58  ;;  %v1724_v6 = vshll.u32 %v1478_v51, 16  ;;  %v1916_v7 = vld [vmem:[#allocation2 + $0x48] sm:$0xf]  ;;  %1947 = vst [vmem:[#allocation3 + $0xa0] sm:$0xf] %v1915_v2  ;;  %v2070_v10 = vsel %vm7768_vm5, %v2065_v61, %v2069_v44  ;;  %v7435_v34 = vld [vmem:[%s9019_s1 + $0x220] sm:$0xff]  }
  0xe0   : > { %v1981_v8 = vld [vmem:[#allocation2 + $0x44] sm:$0xf]  ;;  %7183 = vmatpush3.bf16.msra.mxu0 %v7933_v23  ;;  %2441 = vst [vmem:[#allocation3 + $0x5c] sm:$0xf] %v2060_v3  ;;  %v1261_v11 = vrot.slane %v1259_v62, 5  ;;  %v6229_v12 = vrot.slane %v1716_v63, 11 }
  0xe1   : > { %v1723_v13 = vrot.slane %v1721_v1, 7  ;;  %1948 = vst [vmem:[#allocation3 + $0xc4] sm:$0xf] %v1916_v7  ;;  %v1982_v14 = vld [vmem:[#allocation2 + $0x48] sm:$0xf]  ;;  %v1247_v15 = vrot.slane %v1246_v4, 4  ;;  %7184 = vmatprep.subr.bf16.mxu0 %v7405_v52 }
  0xe2   : > { %2442 = vst [vmem:[#allocation3 + $0x80] sm:$0xf] %v2070_v10  ;;  %v1257_v16 = vrot.slane %v1256_v5, 4  ;;  %v1730_v17 = vshrl.u32 %v1479_v60, 16  ;;  %v1733_v18 = vshll.u32 %v1479_v60, 16  ;;  %v2072_v29 = vshrl.u32 %v1981_v8, 16 }
  0xe3   : > { %v1983_v19 = vld [vmem:[#allocation2 + $0x4c] sm:$0x1]  ;;  %v7392_v20 = vld [vmem:[#allocation3 + $0x294] ss:$36 sps:$4 sm:$0xff]   ;;  %v1726_v24 = vor.u32 %v1724_v6, %v1723_v13  ;;  %v1728_v23 = vrot.slane %v1723_v13, 4  ;;  %v1252_v25 = vsel %vm7768_vm5, %v1247_v15, %v1251_v58  ;;  %v2075_v31 = vshll.u32 %v1981_v8, 16 }
  0xe4   : > { %v7396_v21 = vld [vmem:[#allocation3 + $0x290] ss:$36 sps:$4 sm:$0xff]   ;;  %v1262_v26 = vsel %vm7768_vm5, %v1257_v16, %v1261_v11  ;;  %v1732_v27 = vrot.slane %v1730_v17, 7  ;;  %5233 = vmatprep.mubr.bf16.mxu1 %v7392_v20  ;;  %1435 = vst [vmem:[#allocation3 + $0x2d8] sm:$0xf] %v1252_v25  ;;  %v2081_v32 = vshll.u32 %v1982_v14, 16  ;;  %7185 = vmatpush3.bf16.msra.mxu0 %v7405_v52 }
  0xe5   : > { %1436 = vst [vmem:[#allocation3 + $0x2fc] sm:$0xf] %v1262_v26  ;;  %v1727_v30 = vsel %vm7627_vm2, %v6229_v12, %v1726_v24  ;;  %v2085_v33 = vshrl.u32 %v1982_v14, 16  ;;  %5234 = vmatmul.mubr.bf16.gmra.mxu1 %v7396_v21  ;;  %v2074_v35 = vrot.slane %v2072_v29, 4  ;;  %v2091_v36 = vshll.u32 %v1983_v19, 16  ;;  %7186 = vmatprep.subr.bf16.mxu0 %v7420_v9  ;;  %v7462_v5 = vld [vmem:[%s9019_s1 + $0x210] sm:$0xff]  }
  0xe6   : > { %v1735_v22 = vor.u32 %v1733_v18, %v1732_v27  ;;  %1899 = vst [vmem:[#allocation3 + $0x2dc] sm:$0xf] %v1727_v30  ;;  %v2077_v37 = vrot.slane %v2075_v31, 5  ;;  %v2083_v38 = vrot.slane %v2081_v32, 5  ;;  %v981_v43 = vld [vmem:[#allocation2 + $0xe4] sm:$0xf] }
  0xe7   : > { %v2087_v39 = vrot.slane %v2085_v33, 4  ;;  %v2093_v42 = vrot.slane %v2091_v36, 5  ;;  %v982_v44 = vld [vmem:[#allocation2 + $0xe8] sm:$0xf]  ;;  %v7397_v46 = vld [vmem:[#allocation3 + $0x58] ss:$36 sps:$4 sm:$0xff]  }
  0xe8   : > { %v1736_v41 = vsel %vm7627_vm2, %v1728_v23, %v1735_v22  ;;  %v2078_v40 = vor.u32 %v2077_v37, %v2074_v35  ;;  %v1264_v48 = vshrl.u32 %v981_v43, 16  ;;  %7187 = vmatpush3.bf16.msra.mxu0 %v7420_v9  ;;  %v983_v49 = vld [vmem:[#allocation2 + $0xec] sm:$0x1]  ;;  %v1267_v51 = vshll.u32 %v981_v43, 16  ;;  %v1480_v58 = vld [vmem:[#allocation2 + $0xf4] sm:$0x8] }
  0xe9   : > { %v7394_v45 = vld [vmem:[#allocation3 + $0x5c] ss:$36 sps:$4 sm:$0xff]   ;;  %1900 = vst [vmem:[#allocation3 + $0x300] sm:$0xf] %v1736_v41  ;;  %v2088_v47 = vor.u32 %v2087_v39, %v2083_v38  ;;  %v1273_v52 = vshll.u32 %v982_v44, 16  ;;  %v1277_v53 = vshrl.u32 %v982_v44, 16  ;;  %7188 = vmatprep.subr.bf16.mxu0 %v7435_v34 }
  0xea   : > { %5330 = vmatprep.mubr.bf16.mxu0 %v7394_v45  ;;  %v2079_v55 = vrot.slane %v2078_v40, 4  ;;  %v1266_v57 = vrot.slane %v1264_v48, 4  ;;  %v1283_v50 = vshll.u32 %v983_v49, 16  ;;  %v1269_v59 = vrot.slane %v1267_v51, 5  ;;  %v1481_v62 = vld [vmem:[#allocation2 + $0xf8] sm:$0xf] }
  0xeb   : > { %v2089_v56 = vrot.slane %v2088_v47, 4  ;;  %5331 = vmatmul.mubr.bf16.gmra.mxu0 %v7397_v46  ;;  %v1275_v60 = vrot.slane %v1273_v52, 5  ;;  %v1279_v61 = vrot.slane %v1277_v53, 4  ;;  %v1738_v63 = vshrl.u32 %v1480_v58, 16  ;;  %v1482_v3 = vld [vmem:[#allocation2 + $0xfc] sm:$0xf] }
  0xec   : > { %v2084_v1 = vsel %vm7768_vm5, %v2079_v55, %v2083_v38  ;;  %v1743_v4 = vshrl.u32 %v1481_v62, 16  ;;  %7189 = vmatpush3.bf16.msra.mxu0 %v7435_v34  ;;  %v1270_v6 = vor.u32 %v1269_v59, %v1266_v57  ;;  %v1285_v8 = vrot.slane %v1283_v50, 5  ;;  %v1917_v10 = vld [vmem:[#allocation2 + $0x58] sm:$0xf]  ;;  %v1918_v11 = vld [vmem:[#allocation2 + $0x5c] sm:$0xf]  ;;  %v6726_v47 = vpop.f32.mrf.mxu0 }
  0xed   : > { %v2094_v2 = vsel %vm7768_vm5, %v2089_v56, %v2093_v42  ;;  %2443 = vst [vmem:[#allocation3 + $0xa4] sm:$0xf] %v2084_v1  ;;  %v1280_v7 = vor.u32 %v1279_v61, %v1275_v60  ;;  %v1746_v9 = vshll.u32 %v1481_v62, 16  ;;  %7190 = vmatprep.subr.bf16.mxu0 %v7449_v54  ;;  %v6230_v12 = vrot.slane %v1738_v63, 11  ;;  %1949 = vst [vmem:[#allocation3 + $0xe8] sm:$0xf] %v1917_v10 }
  0xee   : > { %2444 = vst [vmem:[#allocation3 + $0xc8] sm:$0xf] %v2094_v2  ;;  %v1745_v13 = vrot.slane %v1743_v4, 7  ;;  %v1752_v14 = vshrl.u32 %v1482_v3, 16  ;;  %v1755_v15 = vshll.u32 %v1482_v3, 16  ;;  %v1271_v19 = vrot.slane %v1270_v6, 4 }
  0xef   : > { %1950 = vst [vmem:[#allocation3 + $0x10c] sm:$0xf] %v1918_v11  ;;  %v1984_v16 = vld [vmem:[#allocation2 + $0x58] sm:$0xf]  ;;  %v7402_v18 = vld [vmem:[#allocation3 + $0x2d8] ss:$36 sps:$4 sm:$0xff]  }
  0xf0   : > { %v7398_v17 = vld [vmem:[#allocation3 + $0x2dc] ss:$36 sps:$4 sm:$0xff]   ;;  %v1281_v20 = vrot.slane %v1280_v7, 4  ;;  %v1748_v21 = vor.u32 %v1746_v9, %v1745_v13  ;;  %v1750_v24 = vrot.slane %v1745_v13, 4  ;;  %v1754_v23 = vrot.slane %v1752_v14, 7  ;;  %7191 = vmatpush3.bf16.msra.mxu0 %v7449_v54 }
  0xf1   : > { %v1985_v25 = vld [vmem:[#allocation2 + $0x5c] sm:$0xf]  ;;  %5241 = vmatprep.mubr.bf16.mxu1 %v7398_v17  ;;  %v1276_v26 = vsel %vm7768_vm5, %v1271_v19, %v1275_v60  ;;  %v1986_v27 = vld [vmem:[#allocation2 + $0x60] sm:$0x1]  ;;  %v2096_v29 = vshrl.u32 %v1984_v16, 16  ;;  %v2099_v30 = vshll.u32 %v1984_v16, 16  ;;  %7192 = vmatprep.subr.bf16.mxu0 %v7462_v5 }
  0xf2   : > { %v2105_v31 = vshll.u32 %v1985_v25, 16  ;;  %v7475_v32 = vld [vmem:[%s9019_s1 + $0x208] sm:$0xff]   ;;  %5242 = vmatmul.mubr.bf16.gmra.mxu1 %v7402_v18  ;;  %v1286_v33 = vsel %vm7768_vm5, %v1281_v20, %v1285_v8  ;;  %1437 = vst [vmem:[#allocation3 + $0x320] sm:$0xf] %v1276_v26  ;;  %v1749_v34 = vsel %vm7627_vm2, %v6230_v12, %v1748_v21  ;;  %v1757_v22 = vor.u32 %v1755_v15, %v1754_v23  ;;  %v984_v36 = vld [vmem:[#allocation2 + $0xf8] sm:$0xf] }
  0xf3   : > { %v2109_v35 = vshrl.u32 %v1985_v25, 16  ;;  %v985_v37 = vld [vmem:[#allocation2 + $0xfc] sm:$0xf]  ;;  %1438 = vst [vmem:[#allocation3 + $0x344] sm:$0xf] %v1286_v33  ;;  %v2098_v38 = vrot.slane %v2096_v29, 4 }
  0xf4   : > { %1901 = vst [vmem:[#allocation3 + $0x324] sm:$0xf] %v1749_v34  ;;  %v2101_v39 = vrot.slane %v2099_v30, 5  ;;  %v2107_v41 = vrot.slane %v2105_v31, 5  ;;  %v2115_v42 = vshll.u32 %v1986_v27, 16  ;;  %v1758_v45 = vsel %vm7627_vm2, %v1750_v24, %v1757_v22  ;;  %7193 = vmatpush3.bf16.msra.mxu0 %v7462_v5  ;;  %v6727_v5 = vpop.f32.mrf.mxu0  ;;  %v7488_v17 = vld [vmem:[%s9019_s1 + $0x200] sm:$0xff]  }
  0xf5   : > { %v986_v43 = vld [vmem:[#allocation2 + $0x100] sm:$0x1]  ;;  %v7400_v44 = vld [vmem:[#allocation3 + $0xa4] ss:$36 sps:$4 sm:$0xff]   ;;  %v2111_v46 = vrot.slane %v2109_v35, 4  ;;  %v1288_v40 = vshrl.u32 %v984_v36, 16  ;;  %7194 = vmatprep.subr.bf16.mxu0 %v7475_v32  ;;  %v8049_v24 = vadd.f32 %v6727_v5, %v6726_v47 }
  0xf6   : > { %v7403_v48 = vld [vmem:[#allocation3 + $0xa0] ss:$36 sps:$4 sm:$0xff]   ;;  %1902 = vst [vmem:[#allocation3 + $0x348] sm:$0xf] %v1758_v45  ;;  %v2102_v49 = vor.u32 %v2101_v39, %v2098_v38  ;;  %v2117_v51 = vrot.slane %v2115_v42, 5  ;;  %v1291_v52 = vshll.u32 %v984_v36, 16  ;;  %5338 = vmatprep.mubr.bf16.mxu0 %v7400_v44  ;;  %v8057_v36 = vpop.f32.mrf.mxu0 }
  0xf7   : > { %v1297_v53 = vshll.u32 %v985_v37, 16  ;;  %v2112_v54 = vor.u32 %v2111_v46, %v2107_v41  ;;  %v1290_v55 = vrot.slane %v1288_v40, 4  ;;  %v1301_v56 = vshrl.u32 %v985_v37, 16  ;;  %v1483_v50 = vld [vmem:[#allocation2 + $0x108] sm:$0x8]  ;;  %5339 = vmatmul.mubr.bf16.gmra.mxu0 %v7403_v48 }
  0xf8   : > { %v1307_v57 = vshll.u32 %v986_v43, 16  ;;  %v2103_v58 = vrot.slane %v2102_v49, 4  ;;  %v1293_v59 = vrot.slane %v1291_v52, 5  ;;  %v1484_v61 = vld [vmem:[#allocation2 + $0x10c] sm:$0xf]  ;;  %v1760_v62 = vshrl.u32 %v1483_v50, 16  ;;  %7195 = vmatpush3.bf16.msra.mxu0 %v7475_v32  ;;  %v6798_v44 = vpop.f32.mrf.mxu1 }
  0xf9   : > { %v1299_v60 = vrot.slane %v1297_v53, 5  ;;  %v2113_v63 = vrot.slane %v2112_v54, 4  ;;  %v1303_v1 = vrot.slane %v1301_v56, 4  ;;  %v1485_v3 = vld [vmem:[#allocation2 + $0x110] sm:$0xf]  ;;  %v1765_v4 = vshrl.u32 %v1484_v61, 16  ;;  %7196 = vmatprep.subr.bf16.mxu0 %v7488_v17  ;;  %v8061_v53 = vpop.f32.mrf.mxu0 }
  0xfa   : > { %v1309_v2 = vrot.slane %v1307_v57, 5  ;;  %v2108_v6 = vsel %vm7768_vm5, %v2103_v58, %v2107_v41  ;;  %v1294_v7 = vor.u32 %v1293_v59, %v1290_v55  ;;  %v6231_v8 = vrot.slane %v1760_v62, 11  ;;  %v1919_v10 = vld [vmem:[#allocation2 + $0x6c] sm:$0xf]  ;;  %v1920_v11 = vld [vmem:[#allocation2 + $0x70] sm:$0xf]  ;;  %v6799_v52 = vpop.f32.mrf.mxu1 }
  0xfb   : > { %v1768_v9 = vshll.u32 %v1484_v61, 16  ;;  %v2118_v12 = vsel %vm7768_vm5, %v2113_v63, %v2117_v51  ;;  %2445 = vst [vmem:[#allocation3 + $0xec] sm:$0xf] %v2108_v6  ;;  %v1304_v13 = vor.u32 %v1303_v1, %v1299_v60  ;;  %v1767_v14 = vrot.slane %v1765_v4, 7  ;;  %1951 = vst [vmem:[#allocation3 + $0x130] sm:$0xf] %v1919_v10 }
  0xfc   : > { %v1774_v15 = vshrl.u32 %v1485_v3, 16  ;;  %1952 = vst [vmem:[#allocation3 + $0x154] sm:$0xf] %v1920_v11  ;;  %v1987_v16 = vld [vmem:[#allocation2 + $0x6c] sm:$0xf]  ;;  %v1295_v18 = vrot.slane %v1294_v7, 4  ;;  %7197 = vmatpush3.bf16.msra.mxu0 %v7488_v17  ;;  %v8063_v58 = vadd.f32 %v6799_v52, %v6798_v44  ;;  %v8065_v1 = vpop.f32.mrf.mxu1 }
  0xfd   : > { %2446 = vst [vmem:[#allocation3 + $0x110] sm:$0xf] %v2118_v12  ;;  %v1777_v19 = vshll.u32 %v1485_v3, 16  ;;  %v1988_v20 = vld [vmem:[#allocation2 + $0x70] sm:$0xf]  ;;  %v1305_v26 = vrot.slane %v1304_v13, 4  ;;  %v1770_v27 = vor.u32 %v1768_v9, %v1767_v14  ;;  %v6732_v13 = vpop.f32.mrf.mxu0 }
  0xfe   : > { %v1989_v21 = vld [vmem:[#allocation2 + $0x74] sm:$0x1]  ;;  %v7407_v23 = vld [vmem:[#allocation3 + $0x324] ss:$36 sps:$4 sm:$0xff]   ;;  %v1300_v29 = vsel %vm7768_vm5, %v1295_v18, %v1299_v60  ;;  %v1772_v30 = vrot.slane %v1767_v14, 4  ;;  %v1776_v31 = vrot.slane %v1774_v15, 7  ;;  %v8069_v12 = vpop.f32.mrf.mxu1 }
  0xff   : > { %v7411_v25 = vld [vmem:[#allocation3 + $0x320] ss:$36 sps:$4 sm:$0xff]   ;;  %v2120_v32 = vshrl.u32 %v1987_v16, 16  ;;  %5249 = vmatprep.mubr.bf16.mxu1 %v7407_v23  ;;  %v1310_v33 = vsel %vm7768_vm5, %v1305_v26, %v1309_v2  ;;  %1439 = vst [vmem:[#allocation3 + $0x368] sm:$0xf] %v1300_v29  ;;  %v1771_v34 = vsel %vm7627_vm2, %v6231_v8, %v1770_v27  ;;  %v2123_v22 = vshll.u32 %v1987_v16, 16  ;;  %v6733_v27 = vpop.f32.mrf.mxu0 }
 0x100   : > { %v2129_v35 = vshll.u32 %v1988_v20, 16  ;;  %5250 = vmatmul.mubr.bf16.gmra.mxu1 %v7411_v25  ;;  %1440 = vst [vmem:[#allocation3 + $0x38c] sm:$0xf] %v1310_v33  ;;  %v1779_v37 = vor.u32 %v1777_v19, %v1776_v31  ;;  %1903 = vst [vmem:[#allocation3 + $0x36c] sm:$0xf] %v1771_v34  ;;  %v2133_v39 = vshrl.u32 %v1988_v20, 16  ;;  %v8073_v33 = vadd.f32 %v6733_v27, %v6732_v13 }
 0x101   : > { %v2122_v38 = vrot.slane %v2120_v32, 4  ;;  %v2139_v41 = vshll.u32 %v1989_v21, 16  ;;  %v2125_v42 = vrot.slane %v2123_v22, 5  ;;  %v987_v40 = vld [vmem:[#allocation2 + $0x10c] sm:$0xf]  ;;  %v6804_v32 = vpop.f32.mrf.mxu1 }
 0x102   : > { %v2131_v43 = vrot.slane %v2129_v35, 5  ;;  %v1780_v45 = vsel %vm7627_vm2, %v1772_v30, %v1779_v37  ;;  %v2135_v46 = vrot.slane %v2133_v39, 4  ;;  %v7412_v48 = vld [vmem:[#allocation3 + $0xe8] ss:$36 sps:$4 sm:$0xff]   ;;  %v1312_v51 = vshrl.u32 %v987_v40, 16 }
 0x103   : > { %1904 = vst [vmem:[#allocation3 + $0x390] sm:$0xf] %v1780_v45  ;;  %v2126_v49 = vor.u32 %v2125_v42, %v2122_v38  ;;  %v2141_v55 = vrot.slane %v2139_v41, 5  ;;  %v988_v56 = vld [vmem:[#allocation2 + $0x110] sm:$0xf]  ;;  %v1315_v50 = vshll.u32 %v987_v40, 16 }
 0x104   : > { %v7409_v47 = vld [vmem:[#allocation3 + $0xec] ss:$36 sps:$4 sm:$0xff]   ;;  %v2136_v54 = vor.u32 %v2135_v46, %v2131_v43  ;;  %v1314_v60 = vrot.slane %v1312_v51, 4  ;;  %v1321_v61 = vshll.u32 %v988_v56, 16  ;;  %v1325_v62 = vshrl.u32 %v988_v56, 16  ;;  %v6805_v51 = vpop.f32.mrf.mxu1 }
 0x105   : > { %v989_v57 = vld [vmem:[#allocation2 + $0x114] sm:$0x1]  ;;  %5346 = vmatprep.mubr.bf16.mxu0 %v7409_v47  ;;  %v2127_v59 = vrot.slane %v2126_v49, 4  ;;  %v1486_v63 = vld [vmem:[#allocation2 + $0x11c] sm:$0x8]  ;;  %v1317_v3 = vrot.slane %v1315_v50, 5 }
 0x106   : > { %5347 = vmatmul.mubr.bf16.gmra.mxu0 %v7412_v48  ;;  %v2137_v2 = vrot.slane %v2136_v54, 4  ;;  %v1331_v4 = vshll.u32 %v989_v57, 16  ;;  %v1487_v5 = vld [vmem:[#allocation2 + $0x120] sm:$0xf]  ;;  %v1782_v6 = vshrl.u32 %v1486_v63, 16  ;;  %v1323_v8 = vrot.slane %v1321_v61, 5 }
 0x107   : > { %v2132_v7 = vsel %vm7768_vm5, %v2127_v59, %v2131_v43  ;;  %v1327_v9 = vrot.slane %v1325_v62, 4  ;;  %v1488_v10 = vld [vmem:[#allocation2 + $0x124] sm:$0xf]  ;;  %v1787_v11 = vshrl.u32 %v1487_v5, 16  ;;  %v1318_v15 = vor.u32 %v1317_v3, %v1314_v60  ;;  %v1921_v18 = vld [vmem:[#allocation2 + $0x80] sm:$0xf] }
 0x108   : > { %v2142_v14 = vsel %vm7768_vm5, %v2137_v2, %v2141_v55  ;;  %2447 = vst [vmem:[#allocation3 + $0x134] sm:$0xf] %v2132_v7  ;;  %v1333_v16 = vrot.slane %v1331_v4, 5  ;;  %v6232_v17 = vrot.slane %v1782_v6, 11  ;;  %v1922_v19 = vld [vmem:[#allocation2 + $0x84] sm:$0xf] }
 0x109   : > { %2448 = vst [vmem:[#allocation3 + $0x158] sm:$0xf] %v2142_v14  ;;  %v1328_v20 = vor.u32 %v1327_v9, %v1323_v8  ;;  %v1789_v21 = vrot.slane %v1787_v11, 7  ;;  %v1790_v23 = vshll.u32 %v1487_v5, 16  ;;  %v1796_v25 = vshrl.u32 %v1488_v10, 16  ;;  %v8085_v11 = vpop.f32.mrf.mxu0 }
 0x10a   : > { %1953 = vst [vmem:[#allocation3 + $0x178] sm:$0xf] %v1921_v18  ;;  %1954 = vst [vmem:[#allocation3 + $0x19c] sm:$0xf] %v1922_v19  ;;  %v1990_v26 = vld [vmem:[#allocation2 + $0x80] sm:$0xf]  ;;  %v8083_v5 = vadd.f32 %v6805_v51, %v6804_v32 }
 0x10b   : > { %v7413_v29 = vld [vmem:[#allocation3 + $0x36c] ss:$36 sps:$4 sm:$0xff]   ;;  %v1319_v31 = vrot.slane %v1318_v15, 4  ;;  %v1329_v34 = vrot.slane %v1328_v20, 4  ;;  %v1792_v22 = vor.u32 %v1790_v23, %v1789_v21  ;;  %v1794_v35 = vrot.slane %v1789_v21, 4 }
 0x10c   : > { %v7417_v30 = vld [vmem:[#allocation3 + $0x368] ss:$36 sps:$4 sm:$0xff]   ;;  %v1798_v37 = vrot.slane %v1796_v25, 7  ;;  %v1991_v38 = vld [vmem:[#allocation2 + $0x84] sm:$0xf]  ;;  %5257 = vmatprep.mubr.bf16.mxu1 %v7413_v29  ;;  %v1799_v41 = vshll.u32 %v1488_v10, 16 }
 0x10d   : > { %v1324_v39 = vsel %vm7768_vm5, %v1319_v31, %v1323_v8  ;;  %v1992_v42 = vld [vmem:[#allocation2 + $0x88] sm:$0x1]  ;;  %v2144_v43 = vshrl.u32 %v1990_v26, 16  ;;  %v2147_v44 = vshll.u32 %v1990_v26, 16  ;;  %5258 = vmatmul.mubr.bf16.gmra.mxu1 %v7417_v30  ;;  %v1334_v45 = vsel %vm7768_vm5, %v1329_v34, %v1333_v16  ;;  %v990_v48 = vld [vmem:[#allocation2 + $0x120] sm:$0xf]  ;;  %v8089_v31 = vpop.f32.mrf.mxu1 }
 0x10e   : > { %1441 = vst [vmem:[#allocation3 + $0x3b0] sm:$0xf] %v1324_v39  ;;  %v1793_v46 = vsel %vm7627_vm2, %v6232_v17, %v1792_v22  ;;  %v2153_v40 = vshll.u32 %v1991_v38, 16  ;;  %v2157_v47 = vshrl.u32 %v1991_v38, 16  ;;  %v991_v49 = vld [vmem:[#allocation2 + $0x124] sm:$0xf]  ;;  %v1801_v52 = vor.u32 %v1799_v41, %v1798_v37  ;;  %v8093_v38 = vpop.f32.mrf.mxu0 }
 0x10f   : > { %1442 = vst [vmem:[#allocation3 + $0x3d4] sm:$0xf] %v1334_v45  ;;  %1905 = vst [vmem:[#allocation3 + $0x3b4] sm:$0xf] %v1793_v46  ;;  %v2146_v54 = vrot.slane %v2144_v43, 4  ;;  %v2149_v55 = vrot.slane %v2147_v44, 5 }
 0x110   : > { %v2163_v56 = vshll.u32 %v1992_v42, 16  ;;  %v992_v57 = vld [vmem:[#allocation2 + $0x128] sm:$0x1]  ;;  %v2155_v50 = vrot.slane %v2153_v40, 5  ;;  %v2159_v59 = vrot.slane %v2157_v47, 4  ;;  %v1336_v60 = vshrl.u32 %v990_v48, 16 }
 0x111   : > { %v1339_v61 = vshll.u32 %v990_v48, 16  ;;  %v7415_v62 = vld [vmem:[#allocation3 + $0x134] ss:$36 sps:$4 sm:$0xff]   ;;  %v1802_v2 = vsel %vm7627_vm2, %v1794_v35, %v1801_v52  ;;  %v2150_v3 = vor.u32 %v2149_v55, %v2146_v54  ;;  %v1345_v9 = vshll.u32 %v991_v49, 16  ;;  %v1489_v10 = vld [vmem:[#allocation2 + $0x130] sm:$0x8]  ;;  %v8097_v54 = vpop.f32.mrf.mxu1 }
 0x112   : > { %v7418_v63 = vld [vmem:[#allocation3 + $0x130] ss:$36 sps:$4 sm:$0xff]   ;;  %v2165_v4 = vrot.slane %v2163_v56, 5  ;;  %1906 = vst [vmem:[#allocation3 + $0x3d8] sm:$0xf] %v1802_v2  ;;  %v2160_v6 = vor.u32 %v2159_v59, %v2155_v50  ;;  %v1338_v7 = vrot.slane %v1336_v60, 4  ;;  %5354 = vmatprep.mubr.bf16.mxu0 %v7415_v62  ;;  %v6738_v59 = vpop.f32.mrf.mxu0 }
 0x113   : > { %v1341_v8 = vrot.slane %v1339_v61, 5  ;;  %v2151_v13 = vrot.slane %v2150_v3, 4  ;;  %v1349_v14 = vshrl.u32 %v991_v49, 16  ;;  %v1355_v15 = vshll.u32 %v992_v57, 16  ;;  %v1490_v16 = vld [vmem:[#allocation2 + $0x134] sm:$0xf]  ;;  %5355 = vmatmul.mubr.bf16.gmra.mxu0 %v7418_v63 }
 0x114   : > { %v1804_v17 = vshrl.u32 %v1489_v10, 16  ;;  %v2161_v18 = vrot.slane %v2160_v6, 4  ;;  %v1347_v20 = vrot.slane %v1345_v9, 5  ;;  %v1491_v21 = vld [vmem:[#allocation2 + $0x138] sm:$0xf]  ;;  %v1809_v23 = vshrl.u32 %v1490_v16, 16 }
 0x115   : > { %v1342_v19 = vor.u32 %v1341_v8, %v1338_v7  ;;  %v2156_v25 = vsel %vm7768_vm5, %v2151_v13, %v2155_v50  ;;  %v1351_v26 = vrot.slane %v1349_v14, 4  ;;  %v1357_v27 = vrot.slane %v1355_v15, 5  ;;  %v1923_v30 = vld [vmem:[#allocation2 + $0x94] sm:$0xf]  ;;  %v1924_v37 = vld [vmem:[#allocation2 + $0x98] sm:$0xf]  ;;  %v6810_v8 = vpop.f32.mrf.mxu1 }
 0x116   : > { %v6233_v29 = vrot.slane %v1804_v17, 11  ;;  %v2166_v32 = vsel %vm7768_vm5, %v2161_v18, %v2165_v4  ;;  %2449 = vst [vmem:[#allocation3 + $0x17c] sm:$0xf] %v2156_v25  ;;  %v1811_v22 = vrot.slane %v1809_v23, 7  ;;  %v1812_v35 = vshll.u32 %v1490_v16, 16  ;;  %v6739_v4 = vpop.f32.mrf.mxu0 }
 0x117   : > { %v1343_v34 = vrot.slane %v1342_v19, 4  ;;  %1955 = vst [vmem:[#allocation3 + $0x1c0] sm:$0xf] %v1923_v30  ;;  %2450 = vst [vmem:[#allocation3 + $0x1a0] sm:$0xf] %v2166_v32  ;;  %v1352_v39 = vor.u32 %v1351_v26, %v1347_v20  ;;  %v1818_v41 = vshrl.u32 %v1491_v21, 16  ;;  %v8103_v9 = vadd.f32 %v6739_v4, %v6738_v59  ;;  %v6811_v23 = vpop.f32.mrf.mxu1 }
 0x118   : > { %v1821_v42 = vshll.u32 %v1491_v21, 16  ;;  %1956 = vst [vmem:[#allocation3 + $0x1e4] sm:$0xf] %v1924_v37  ;;  %v1993_v43 = vld [vmem:[#allocation2 + $0x94] sm:$0xf]  ;;  %v1814_v46 = vor.u32 %v1812_v35, %v1811_v22  ;;  %v1816_v40 = vrot.slane %v1811_v22, 4  ;;  %v8107_v17 = vpop.f32.mrf.mxu0  ;;  %v8119_v4 = vadd.f32 %v6811_v23, %v6810_v8 }
 0x119   : > { %v1994_v44 = vld [vmem:[#allocation2 + $0x98] sm:$0xf]  ;;  %v1348_v45 = vsel %vm7768_vm5, %v1343_v34, %v1347_v20  ;;  %v1995_v47 = vld [vmem:[#allocation2 + $0x9c] sm:$0x1]  ;;  %v2168_v48 = vshrl.u32 %v1993_v43, 16  ;;  %v1353_v52 = vrot.slane %v1352_v39, 4 }
 0x11a   : > { %v7422_v49 = vld [vmem:[#allocation3 + $0x3b4] ss:$36 sps:$4 sm:$0xff]   ;;  %1443 = vst [vmem:[#allocation3 + $0x3f8] sm:$0xf] %v1348_v45  ;;  %v1815_v55 = vsel %vm7627_vm2, %v6233_v29, %v1814_v46  ;;  %v1820_v56 = vrot.slane %v1818_v41, 7  ;;  %v2171_v50 = vshll.u32 %v1993_v43, 16  ;;  %v8109_v32 = vpop.f32.mrf.mxu0  ;;  %v8111_v41 = vpop.f32.mrf.mxu1 }
 0x11b   : > { %v7426_v51 = vld [vmem:[#allocation3 + $0x3b0] ss:$36 sps:$4 sm:$0xff]   ;;  %v2170_v57 = vrot.slane %v2168_v48, 4  ;;  %5265 = vmatprep.mubr.bf16.mxu1 %v7422_v49  ;;  %v1358_v60 = vsel %vm7768_vm5, %v1353_v52, %v1357_v27  ;;  %1907 = vst [vmem:[#allocation3 + $0x3fc] sm:$0xf] %v1815_v55  ;;  %v2177_v61 = vshll.u32 %v1994_v44, 16 }
 0x11c   : > { %v2181_v62 = vshrl.u32 %v1994_v44, 16  ;;  %v2187_v63 = vshll.u32 %v1995_v47, 16  ;;  %5266 = vmatmul.mubr.bf16.gmra.mxu1 %v7426_v51  ;;  %1444 = vst [vmem:[#allocation3 + $0x41c] sm:$0xf] %v1358_v60  ;;  %v1823_v2 = vor.u32 %v1821_v42, %v1820_v56  ;;  %v2173_v3 = vrot.slane %v2171_v50, 5  ;;  %v8117_v52 = vpop.f32.mrf.mxu1 }
 0x11d   : > { %v2179_v6 = vrot.slane %v2177_v61, 5  ;;  %v7427_v13 = vld [vmem:[#allocation3 + $0x178] ss:$36 sps:$4 sm:$0xff]   ;;  %v993_v19 = vld [vmem:[#allocation2 + $0x134] sm:$0xf]  ;;  %9026 = vst [vmem:[#allocation4_spill] sm:$0xff] %v8117_v52 }
 0x11e   : > { %v2183_v7 = vrot.slane %v2181_v62, 4  ;;  %v7424_v10 = vld [vmem:[#allocation3 + $0x17c] ss:$36 sps:$4 sm:$0xff]   ;;  %v1824_v14 = vsel %vm7627_vm2, %v1816_v40, %v1823_v2  ;;  %v2174_v15 = vor.u32 %v2173_v3, %v2170_v57  ;;  %v2189_v16 = vrot.slane %v2187_v63, 5  ;;  %v994_v20 = vld [vmem:[#allocation2 + $0x138] sm:$0xf]  ;;  %v6744_v40 = vpop.f32.mrf.mxu0 }
 0x11f   : > { %1908 = vst [vmem:[#allocation3 + $0x420] sm:$0xf] %v1824_v14  ;;  %v995_v21 = vld [vmem:[#allocation2 + $0x13c] sm:$0x1]  ;;  %5362 = vmatprep.mubr.bf16.mxu0 %v7424_v10  ;;  %v1360_v26 = vshrl.u32 %v993_v19, 16  ;;  %v1363_v27 = vshll.u32 %v993_v19, 16 }
 0x120   : > { %v2184_v18 = vor.u32 %v2183_v7, %v2179_v6  ;;  %v2175_v25 = vrot.slane %v2174_v15, 4  ;;  %v1369_v29 = vshll.u32 %v994_v20, 16  ;;  %v1492_v30 = vld [vmem:[#allocation2 + $0x144] sm:$0x8]  ;;  %5363 = vmatmul.mubr.bf16.gmra.mxu0 %v7427_v13  ;;  %v1373_v22 = vshrl.u32 %v994_v20, 16  ;;  %v6745_v60 = vpop.f32.mrf.mxu0 }
 0x121   : > { %v1379_v35 = vshll.u32 %v995_v21, 16  ;;  %v1493_v37 = vld [vmem:[#allocation2 + $0x148] sm:$0xf]  ;;  %v1826_v39 = vshrl.u32 %v1492_v30, 16  ;;  %v1362_v43 = vrot.slane %v1360_v26, 4  ;;  %v1365_v44 = vrot.slane %v1363_v27, 5 }
 0x122   : > { %v2185_v34 = vrot.slane %v2184_v18, 4  ;;  %v2180_v42 = vsel %vm7768_vm5, %v2175_v25, %v2179_v6  ;;  %v1371_v45 = vrot.slane %v1369_v29, 5  ;;  %v1494_v46 = vld [vmem:[#allocation2 + $0x14c] sm:$0xf]  ;;  %v1375_v48 = vrot.slane %v1373_v22, 4  ;;  %v6816_v6 = vpop.f32.mrf.mxu1 }
 0x123   : > { %2451 = vst [vmem:[#allocation3 + $0x1c4] sm:$0xf] %v2180_v42  ;;  %v1381_v49 = vrot.slane %v1379_v35, 5  ;;  %v1925_v51 = vld [vmem:[#allocation2 + $0xa8] sm:$0xf]  ;;  %v1366_v55 = vor.u32 %v1365_v44, %v1362_v43  ;;  %v6234_v56 = vrot.slane %v1826_v39, 11  ;;  %v8121_v14 = vadd.f32 %v6745_v60, %v6744_v40 }
 0x124   : > { %v2190_v47 = vsel %vm7768_vm5, %v2185_v34, %v2189_v16  ;;  %v1831_v57 = vshrl.u32 %v1493_v37, 16  ;;  %v1840_v50 = vshrl.u32 %v1494_v46, 16  ;;  %v1926_v59 = vld [vmem:[#allocation2 + $0xac] sm:$0xf]  ;;  %1957 = vst [vmem:[#allocation3 + $0x208] sm:$0xf] %v1925_v51  ;;  %v1376_v61 = vor.u32 %v1375_v48, %v1371_v45  ;;  %v6817_v23 = vpop.f32.mrf.mxu1 }
 0x125   : > { %2452 = vst [vmem:[#allocation3 + $0x1e8] sm:$0xf] %v2190_v47  ;;  %v1834_v62 = vshll.u32 %v1493_v37, 16  ;;  %v1843_v63 = vshll.u32 %v1494_v46, 16  ;;  %1958 = vst [vmem:[#allocation3 + $0x22c] sm:$0xf] %v1926_v59 }
 0x126   : > { %v1996_v2 = vld [vmem:[#allocation2 + $0xa8] sm:$0xf]  ;;  %v1997_v3 = vld [vmem:[#allocation2 + $0xac] sm:$0xf]  ;;  %v7432_v10 = vld [vmem:[#allocation3 + $0x3f8] ss:$36 sps:$4 sm:$0xff]  }
 0x127   : > { %v7428_v7 = vld [vmem:[#allocation3 + $0x3fc] ss:$36 sps:$4 sm:$0xff]   ;;  %v1367_v13 = vrot.slane %v1366_v55, 4  ;;  %v1377_v15 = vrot.slane %v1376_v61, 4  ;;  %v1833_v16 = vrot.slane %v1831_v57, 7  ;;  %v1842_v18 = vrot.slane %v1840_v50, 7 }
 0x128   : > { %v1998_v19 = vld [vmem:[#allocation2 + $0xb0] sm:$0x1]  ;;  %v2192_v20 = vshrl.u32 %v1996_v2, 16  ;;  %5273 = vmatprep.mubr.bf16.mxu1 %v7428_v7  ;;  %v2195_v25 = vshll.u32 %v1996_v2, 16  ;;  %v2201_v26 = vshll.u32 %v1997_v3, 16  ;;  %v2205_v27 = vshrl.u32 %v1997_v3, 16 }
 0x129   : > { %v1372_v21 = vsel %vm7768_vm5, %v1367_v13, %v1371_v45  ;;  %v1927_v8 = vld [vmem:[#allocation2 + $0xbc] sm:$0xf]  ;;  %5274 = vmatmul.mubr.bf16.gmra.mxu1 %v7432_v10  ;;  %v1382_v29 = vsel %vm7768_vm5, %v1377_v15, %v1381_v49  ;;  %v1836_v30 = vor.u32 %v1834_v62, %v1833_v16  ;;  %v1838_v34 = vrot.slane %v1833_v16, 4  ;;  %v1928_v35 = vld [vmem:[#allocation2 + $0xc0] sm:$0xf]  ;;  %v8133_v15 = vpop.f32.mrf.mxu0  ;;  %v8135_v16 = vpop.f32.mrf.mxu1 }
 0x12a   : > { %1445 = vst [vmem:[#allocation3 + $0x440] sm:$0xf] %v1372_v21  ;;  %v1845_v22 = vor.u32 %v1843_v63, %v1842_v18  ;;  %1959 = vst [vmem:[#allocation3 + $0x250] sm:$0xf] %v1927_v8  ;;  %v1999_v37 = vld [vmem:[#allocation2 + $0xbc] sm:$0xf]  ;;  %v8131_v49 = vadd.f32 %v6817_v23, %v6816_v6 }
 0x12b   : > { %1446 = vst [vmem:[#allocation3 + $0x464] sm:$0xf] %v1382_v29  ;;  %v2194_v39 = vrot.slane %v2192_v20, 4  ;;  %v2197_v42 = vrot.slane %v2195_v25, 5  ;;  %v2203_v43 = vrot.slane %v2201_v26, 5  ;;  %v2207_v44 = vrot.slane %v2205_v27, 4 }
 0x12c   : > { %1960 = vst [vmem:[#allocation3 + $0x274] sm:$0xf] %v1928_v35  ;;  %v7430_v45 = vld [vmem:[#allocation3 + $0x1c4] ss:$36 sps:$4 sm:$0xff]   ;;  %v1837_v40 = vsel %vm7627_vm2, %v6234_v56, %v1836_v30  ;;  %v1846_v47 = vsel %vm7627_vm2, %v1838_v34, %v1845_v22  ;;  %v2211_v48 = vshll.u32 %v1998_v19, 16  ;;  %9027 = vst [vmem:[#allocation5_spill] sm:$0xff] %v8131_v49 }
 0x12d   : > { %v7433_v46 = vld [vmem:[#allocation3 + $0x1c0] ss:$36 sps:$4 sm:$0xff]   ;;  %1909 = vst [vmem:[#allocation3 + $0x444] sm:$0xf] %v1837_v40  ;;  %1910 = vst [vmem:[#allocation3 + $0x468] sm:$0xf] %v1846_v47  ;;  %v2198_v51 = vor.u32 %v2197_v42, %v2194_v39  ;;  %v2208_v55 = vor.u32 %v2207_v44, %v2203_v43  ;;  %5370 = vmatprep.mubr.bf16.mxu0 %v7430_v45  ;;  %v8143_v45 = vpop.f32.mrf.mxu1 }
 0x12e   : > { %v2000_v57 = vld [vmem:[#allocation2 + $0xc0] sm:$0xf]  ;;  %v2001_v50 = vld [vmem:[#allocation2 + $0xc4] sm:$0x1]  ;;  %v2216_v59 = vshrl.u32 %v1999_v37, 16  ;;  %v2219_v60 = vshll.u32 %v1999_v37, 16  ;;  %5371 = vmatmul.mubr.bf16.gmra.mxu0 %v7433_v46 }
 0x12f   : > { %v2213_v61 = vrot.slane %v2211_v48, 5  ;;  %v2225_v62 = vshll.u32 %v2000_v57, 16  ;;  %v2229_v63 = vshrl.u32 %v2000_v57, 16  ;;  %v2235_v2 = vshll.u32 %v2001_v50, 16  ;;  %v2472_v56 = vld [vmem:[#allocation2 + $0x2c] sm:$0x8] }
 0x130   : > { %v2199_v3 = vrot.slane %v2198_v51, 4  ;;  %v2209_v7 = vrot.slane %v2208_v55, 4  ;;  %v2218_v10 = vrot.slane %v2216_v59, 4  ;;  %v2221_v6 = vrot.slane %v2219_v60, 5  ;;  %v2473_v13 = vld [vmem:[#allocation2 + $0x30] sm:$0xf] }
 0x131   : > { %9028 = vst [vmem:[#allocation6_spill] sm:$0xff] %v8135_v16  ;;  %v2227_v18 = vrot.slane %v2225_v62, 5  ;;  %v2231_v19 = vrot.slane %v2229_v63, 4  ;;  %v2474_v20 = vld [vmem:[#allocation2 + $0x34] sm:$0xf]  ;;  %v2521_v21 = vshrl.u32 %v2472_v56, 16 }
 0x132   : > { %v2204_v25 = vsel %vm7768_vm5, %v2199_v3, %v2203_v43  ;;  %v2214_v26 = vsel %vm7768_vm5, %v2209_v7, %v2213_v61  ;;  %v2222_v27 = vor.u32 %v2221_v6, %v2218_v10  ;;  %v2526_v8 = vshrl.u32 %v2473_v13, 16  ;;  %v2936_v23 = vld [vmem:[#allocation2 + $0x30] sm:$0xf]  ;;  %v2937_v29 = vld [vmem:[#allocation2 + $0x34] sm:$0xf]  ;;  %v8141_v43 = vpop.f32.mrf.mxu0  ;;  %9029 = vst [vmem:[#allocation7_spill] sm:$0xff] %v8143_v45 }
 0x133   : > { %2453 = vst [vmem:[#allocation3 + $0x20c] sm:$0xf] %v2204_v25  ;;  %2454 = vst [vmem:[#allocation3 + $0x230] sm:$0xf] %v2214_v26  ;;  %v2232_v30 = vor.u32 %v2231_v19, %v2227_v18  ;;  %v2237_v34 = vrot.slane %v2235_v2, 5  ;;  %v2529_v22 = vshll.u32 %v2473_v13, 16  ;;  %v6838_v13 = vpop.f32.mrf.mxu1 }
 0x134   : > { %v2535_v35 = vshrl.u32 %v2474_v20, 16  ;;  %2968 = vst [vmem:[#allocation3 + $0x1c] sm:$0xf] %v2936_v23  ;;  %2969 = vst [vmem:[#allocation3 + $0x40] sm:$0xf] %v2937_v29  ;;  %v2223_v37 = vrot.slane %v2222_v27, 4  ;;  %v6750_v6 = vpop.f32.mrf.mxu0 }
 0x135   : > { %v6235_v39 = vrot.slane %v2521_v21, 11  ;;  %v2528_v42 = vrot.slane %v2526_v8, 7  ;;  %v2538_v44 = vshll.u32 %v2474_v20, 16  ;;  %v7437_v46 = vld [vmem:[#allocation3 + $0x444] ss:$36 sps:$4 sm:$0xff]   ;;  %v2233_v40 = vrot.slane %v2232_v30, 4  ;;  %v6839_v29 = vpop.f32.mrf.mxu1 }
 0x136   : > { %v2537_v47 = vrot.slane %v2535_v35, 7  ;;  %v7441_v48 = vld [vmem:[#allocation3 + $0x440] ss:$36 sps:$4 sm:$0xff]   ;;  %v2228_v51 = vsel %vm7768_vm5, %v2223_v37, %v2227_v18  ;;  %v1929_v50 = vld [vmem:[#allocation2 + $0xd0] sm:$0xf]  ;;  %5281 = vmatprep.mubr.bf16.mxu1 %v7437_v46  ;;  %v6751_v23 = vpop.f32.mrf.mxu0 }
 0x137   : > { %v2531_v55 = vor.u32 %v2529_v22, %v2528_v42  ;;  %v2533_v57 = vrot.slane %v2528_v42, 4  ;;  %v2238_v59 = vsel %vm7768_vm5, %v2233_v40, %v2237_v34  ;;  %2455 = vst [vmem:[#allocation3 + $0x254] sm:$0xf] %v2228_v51  ;;  %v1930_v61 = vld [vmem:[#allocation2 + $0xd4] sm:$0xf]  ;;  %5282 = vmatmul.mubr.bf16.gmra.mxu1 %v7441_v48  ;;  %v8153_v40 = vadd.f32 %v6751_v23, %v6750_v6 }
 0x138   : > { %v2540_v60 = vor.u32 %v2538_v44, %v2537_v47  ;;  %1961 = vst [vmem:[#allocation3 + $0x298] sm:$0xf] %v1929_v50  ;;  %v2002_v62 = vld [vmem:[#allocation2 + $0xd0] sm:$0xf]  ;;  %v2003_v63 = vld [vmem:[#allocation2 + $0xd4] sm:$0xf]  ;;  %v6841_v47 = vpop.f32.mrf.mxu1 }
 0x139   : > { %2456 = vst [vmem:[#allocation3 + $0x278] sm:$0xf] %v2238_v59  ;;  %v2532_v2 = vsel %vm7627_vm2, %v6235_v39, %v2531_v55  ;;  %1962 = vst [vmem:[#allocation3 + $0x2bc] sm:$0xf] %v1930_v61  ;;  %v2004_v56 = vld [vmem:[#allocation2 + $0xd8] sm:$0x1] }
 0x13a   : > { %v2240_v3 = vshrl.u32 %v2002_v62, 16  ;;  %v2243_v7 = vshll.u32 %v2002_v62, 16  ;;  %v2249_v10 = vshll.u32 %v2003_v63, 16  ;;  %v2541_v18 = vsel %vm7627_vm2, %v2533_v57, %v2540_v60  ;;  %2904 = vst [vmem:[#allocation3 + $0x18] sm:$0xf] %v2532_v2  ;;  %v6842_v2 = vpop.f32.mrf.mxu1 }
 0x13b   : > { %v2253_v19 = vshrl.u32 %v2003_v63, 16  ;;  %v2259_v20 = vshll.u32 %v2004_v56, 16  ;;  %v2475_v21 = vld [vmem:[#allocation2 + $0x40] sm:$0x8]  ;;  %v2476_v25 = vld [vmem:[#allocation2 + $0x44] sm:$0xf]  ;;  %v6840_v63 = vadd.f32 %v6839_v29, %v6838_v13  ;;  %v6843_v6 = vadd.f32 %v6842_v2, %v6841_v47 }
 0x13c   : > { %v7439_v26 = vld [vmem:[#allocation3 + $0x20c] ss:$36 sps:$4 sm:$0xff]   ;;  %2905 = vst [vmem:[#allocation3 + $0x3c] sm:$0xf] %v2541_v18  ;;  %v2242_v27 = vrot.slane %v2240_v3, 4  ;;  %v2245_v8 = vrot.slane %v2243_v7, 5 }
 0x13d   : > { %v7442_v30 = vld [vmem:[#allocation3 + $0x208] ss:$36 sps:$4 sm:$0xff]   ;;  %v2251_v34 = vrot.slane %v2249_v10, 5  ;;  %v2255_v22 = vrot.slane %v2253_v19, 4  ;;  %v2543_v35 = vshrl.u32 %v2475_v21, 16  ;;  %5378 = vmatprep.mubr.bf16.mxu0 %v7439_v26  ;;  %v2548_v42 = vshrl.u32 %v2476_v25, 16  ;;  %v8159_v26 = vpop.f32.mrf.mxu0 }
 0x13e   : > { %v2246_v37 = vor.u32 %v2245_v8, %v2242_v27  ;;  %v2477_v39 = vld [vmem:[#allocation2 + $0x48] sm:$0xf]  ;;  %v2551_v44 = vshll.u32 %v2476_v25, 16  ;;  %v2938_v46 = vld [vmem:[#allocation2 + $0x44] sm:$0xf]  ;;  %5379 = vmatmul.mubr.bf16.gmra.mxu0 %v7442_v30  ;;  %v2261_v51 = vrot.slane %v2259_v20, 5  ;;  %v6731_v10 = vadd.f32 %v8061_v53, %v8057_v36 }
 0x13f   : > { %v2256_v48 = vor.u32 %v2255_v22, %v2251_v34  ;;  %v6236_v55 = vrot.slane %v2543_v35, 11  ;;  %v2557_v57 = vshrl.u32 %v2477_v39, 16  ;;  %v2939_v50 = vld [vmem:[#allocation2 + $0x48] sm:$0xf]  ;;  %2970 = vst [vmem:[#allocation3 + $0x64] sm:$0xf] %v2938_v46  ;;  %v8164_v36 = vadd.f32 %v6840_v63, %v8049_v24  ;;  %v6844_v46 = vpop.f32.mrf.mxu1 }
 0x140   : > { %v2247_v59 = vrot.slane %v2246_v37, 4  ;;  %v2550_v60 = vrot.slane %v2548_v42, 7  ;;  %v2560_v61 = vshll.u32 %v2477_v39, 16  ;;  %2971 = vst [vmem:[#allocation3 + $0x88] sm:$0xf] %v2939_v50  ;;  %v8166_v53 = vadd.f32 %v6843_v6, %v6731_v10 }
 0x141   : > { %v1931_v62 = vld [vmem:[#allocation2 + $0xe4] sm:$0xf]  ;;  %v7443_v56 = vld [vmem:[#allocation3 + $0x254] ss:$36 sps:$4 sm:$0xff]   ;;  %v2257_v7 = vrot.slane %v2256_v48, 4  ;;  %v2559_v21 = vrot.slane %v2557_v57, 7  ;;  %v8172_v57 = vpop.f32.mrf.mxu0  ;;  %v6845_v63 = vpop.f32.mrf.mxu1 }
 0x142   : > { %v7448_v3 = vld [vmem:[#allocation3 + $0x250] ss:$36 sps:$4 sm:$0xff]   ;;  %1963 = vst [vmem:[#allocation3 + $0x2e0] sm:$0xf] %v1931_v62  ;;  %v2252_v18 = vsel %vm7768_vm5, %v2247_v59, %v2251_v34  ;;  %v2553_v19 = vor.u32 %v2551_v44, %v2550_v60  ;;  %v2555_v20 = vrot.slane %v2550_v60, 4  ;;  %5386 = vmatprep.mubr.bf16.mxu0 %v7443_v56 }
 0x143   : > { %v1932_v25 = vld [vmem:[#allocation2 + $0xe8] sm:$0xf]  ;;  %v7445_v13 = vld [vmem:[#allocation3 + $0x18] ss:$36 sps:$4 sm:$0xff]   ;;  %v2262_v8 = vsel %vm7768_vm5, %v2257_v7, %v2261_v51  ;;  %2457 = vst [vmem:[#allocation3 + $0x29c] sm:$0xf] %v2252_v18  ;;  %v2562_v29 = vor.u32 %v2560_v61, %v2559_v21 }
 0x144   : > { %v7447_v27 = vld [vmem:[#allocation3 + $0x1c] ss:$36 sps:$4 sm:$0xff]   ;;  %1964 = vst [vmem:[#allocation3 + $0x304] sm:$0xf] %v1932_v25  ;;  %2458 = vst [vmem:[#allocation3 + $0x2c0] sm:$0xf] %v2262_v8  ;;  %v2554_v23 = vsel %vm7627_vm2, %v6236_v55, %v2553_v19  ;;  %v6846_v8 = vadd.f32 %v6845_v63, %v6844_v46 }
 0x145   : > { %v2005_v30 = vld [vmem:[#allocation2 + $0xe4] sm:$0xf]  ;;  %v2006_v34 = vld [vmem:[#allocation2 + $0xe8] sm:$0xf]  ;;  %v2007_v22 = vld [vmem:[#allocation2 + $0xec] sm:$0x1]  ;;  %5483 = vmatprep.mubr.bf16.mxu1 %v7447_v27  ;;  %v2563_v24 = vsel %vm7627_vm2, %v2555_v20, %v2562_v29  ;;  %v6756_v27 = vpop.f32.mrf.mxu0 }
 0x146   : > { %2906 = vst [vmem:[#allocation3 + $0x60] sm:$0xf] %v2554_v23  ;;  %v2264_v35 = vshrl.u32 %v2005_v30, 16  ;;  %v2267_v37 = vshll.u32 %v2005_v30, 16  ;;  %v2273_v39 = vshll.u32 %v2006_v34, 16  ;;  %v2277_v42 = vshrl.u32 %v2006_v34, 16  ;;  %5484 = vmatmul.mubr.bf16.vlgmr.msra.gmra.mxu1 %v7445_v13  ;;  %5387 = vmatmul.mubr.bf16.gmra.mxu0 %v7448_v3  ;;  %v8174_v34 = vpop.f32.mrf.mxu1 }
 0x147   : > { %v2478_v44 = vld [vmem:[#allocation2 + $0x54] sm:$0x8]  ;;  %v2283_v47 = vshll.u32 %v2007_v22, 16  ;;  %v2479_v48 = vld [vmem:[#allocation2 + $0x58] sm:$0xf] }
 0x148   : > { %v2480_v51 = vld [vmem:[#allocation2 + $0x5c] sm:$0xf]  ;;  %v2565_v55 = vshrl.u32 %v2478_v44, 16  ;;  %2907 = vst [vmem:[#allocation3 + $0x84] sm:$0xf] %v2563_v24  ;;  %v2266_v50 = vrot.slane %v2264_v35, 4  ;;  %v6757_v44 = vpop.f32.mrf.mxu0 }
 0x149   : > { %v2269_v59 = vrot.slane %v2267_v37, 5  ;;  %v2275_v60 = vrot.slane %v2273_v39, 5  ;;  %v2279_v61 = vrot.slane %v2277_v42, 4  ;;  %v2940_v62 = vld [vmem:[#allocation2 + $0x58] sm:$0xf]  ;;  %v2285_v2 = vrot.slane %v2283_v47, 5 }
 0x14a   : > { %v6237_v56 = vrot.slane %v2565_v55, 11  ;;  %v2570_v7 = vshrl.u32 %v2479_v48, 16  ;;  %v2573_v10 = vshll.u32 %v2479_v48, 16  ;;  %v2941_v6 = vld [vmem:[#allocation2 + $0x5c] sm:$0xf]  ;;  %v2579_v20 = vshrl.u32 %v2480_v51, 16 }
 0x14b   : > { %2972 = vst [vmem:[#allocation3 + $0xac] sm:$0xf] %v2940_v62  ;;  %v2270_v18 = vor.u32 %v2269_v59, %v2266_v50  ;;  %v2280_v19 = vor.u32 %v2279_v61, %v2275_v60  ;;  %v2582_v21 = vshll.u32 %v2480_v51, 16  ;;  %2973 = vst [vmem:[#allocation3 + $0xd0] sm:$0xf] %v2941_v6  ;;  %v8178_v55 = vadd.f32 %v6757_v44, %v6756_v27 }
 0x14c   : > { %v2572_v25 = vrot.slane %v2570_v7, 7  ;;  %v1933_v3 = vld [vmem:[#allocation2 + $0xf8] sm:$0xf]  ;;  %v1934_v13 = vld [vmem:[#allocation2 + $0xfc] sm:$0xf]  ;;  %v2581_v39 = vrot.slane %v2579_v20, 7  ;;  %v8189_v27 = vadd.f32 %v6846_v8, %v8073_v33 }
 0x14d   : > { %v7450_v23 = vld [vmem:[#allocation3 + $0x29c] ss:$36 sps:$4 sm:$0xff]   ;;  %v2271_v30 = vrot.slane %v2270_v18, 4  ;;  %1965 = vst [vmem:[#allocation3 + $0x328] sm:$0xf] %v1933_v3  ;;  %v2281_v22 = vrot.slane %v2280_v19, 4 }
 0x14e   : > { %v7454_v29 = vld [vmem:[#allocation3 + $0x298] ss:$36 sps:$4 sm:$0xff]   ;;  %1966 = vst [vmem:[#allocation3 + $0x34c] sm:$0xf] %v1934_v13  ;;  %v2575_v35 = vor.u32 %v2573_v10, %v2572_v25  ;;  %v2577_v37 = vrot.slane %v2572_v25, 4  ;;  %5394 = vmatprep.mubr.bf16.mxu0 %v7450_v23  ;;  %v2584_v63 = vor.u32 %v2582_v21, %v2581_v39  ;;  %v8184_v10 = vpop.f32.mrf.mxu0  ;;  %v6848_v25 = vpop.f32.mrf.mxu1 }
 0x14f   : > { %v2008_v42 = vld [vmem:[#allocation2 + $0xf8] sm:$0xf]  ;;  %v2276_v24 = vsel %vm7768_vm5, %v2271_v30, %v2275_v60  ;;  %v2009_v47 = vld [vmem:[#allocation2 + $0xfc] sm:$0xf]  ;;  %v2010_v48 = vld [vmem:[#allocation2 + $0x100] sm:$0x1]  ;;  %v2286_v61 = vsel %vm7768_vm5, %v2281_v22, %v2285_v2  ;;  %5395 = vmatmul.mubr.bf16.gmra.mxu0 %v7454_v29 }
 0x150   : > { %v2288_v46 = vshrl.u32 %v2008_v42, 16  ;;  %v2291_v51 = vshll.u32 %v2008_v42, 16  ;;  %v7452_v50 = vld [vmem:[#allocation3 + $0x64] ss:$36 sps:$4 sm:$0xff]   ;;  %2459 = vst [vmem:[#allocation3 + $0x2e4] sm:$0xf] %v2276_v24  ;;  %v2576_v62 = vsel %vm7627_vm2, %v6237_v56, %v2575_v35  ;;  %v2585_v2 = vsel %vm7627_vm2, %v2577_v37, %v2584_v63  ;;  %v8191_v23 = vpop.f32.mrf.mxu0 }
 0x151   : > { %v7455_v59 = vld [vmem:[#allocation3 + $0x60] ss:$36 sps:$4 sm:$0xff]   ;;  %v2297_v7 = vshll.u32 %v2009_v47, 16  ;;  %2460 = vst [vmem:[#allocation3 + $0x308] sm:$0xf] %v2286_v61  ;;  %v2301_v18 = vshrl.u32 %v2009_v47, 16  ;;  %5491 = vmatprep.mubr.bf16.mxu1 %v7452_v50 }
 0x152   : > { %2908 = vst [vmem:[#allocation3 + $0xa8] sm:$0xf] %v2576_v62  ;;  %v2290_v60 = vrot.slane %v2288_v46, 4  ;;  %v2293_v6 = vrot.slane %v2291_v51, 5  ;;  %v2307_v19 = vshll.u32 %v2010_v48, 16  ;;  %5492 = vmatmul.mubr.bf16.gmra.mxu1 %v7455_v59  ;;  %v6762_v48 = vpop.f32.mrf.mxu0  ;;  %v6850_v59 = vpop.f32.mrf.mxu1 }
 0x153   : > { %v2481_v20 = vld [vmem:[#allocation2 + $0x68] sm:$0x8]  ;;  %v2299_v3 = vrot.slane %v2297_v7, 5  ;;  %v2482_v13 = vld [vmem:[#allocation2 + $0x6c] sm:$0xf]  ;;  %v2303_v30 = vrot.slane %v2301_v18, 4  ;;  %v6737_v7 = vadd.f32 %v8093_v38, %v8085_v11 }
 0x154   : > { %v2483_v56 = vld [vmem:[#allocation2 + $0x70] sm:$0xf]  ;;  %v2587_v21 = vshrl.u32 %v2481_v20, 16  ;;  %2909 = vst [vmem:[#allocation3 + $0xcc] sm:$0xf] %v2585_v2  ;;  %v2294_v29 = vor.u32 %v2293_v6, %v2290_v60  ;;  %v2309_v22 = vrot.slane %v2307_v19, 5  ;;  %v6849_v60 = vadd.f32 %v6848_v25, %v8174_v34  ;;  %v6763_v6 = vpop.f32.mrf.mxu0 }
 0x155   : > { %v2592_v35 = vshrl.u32 %v2482_v13, 16  ;;  %v2942_v39 = vld [vmem:[#allocation2 + $0x6c] sm:$0xf]  ;;  %v2595_v44 = vshll.u32 %v2482_v13, 16  ;;  %v2601_v24 = vshrl.u32 %v2483_v56, 16  ;;  %v2604_v37 = vshll.u32 %v2483_v56, 16  ;;  %v6851_v56 = vpop.f32.mrf.mxu1 }
 0x156   : > { %v6238_v42 = vrot.slane %v2587_v21, 11  ;;  %v2943_v47 = vld [vmem:[#allocation2 + $0x70] sm:$0xf]  ;;  %2974 = vst [vmem:[#allocation3 + $0xf4] sm:$0xf] %v2942_v39  ;;  %v2295_v46 = vrot.slane %v2294_v29, 4  ;;  %v2304_v51 = vor.u32 %v2303_v30, %v2299_v3  ;;  %v8198_v39 = vadd.f32 %v6849_v60, %v6737_v7 }
 0x157   : > { %v2594_v33 = vrot.slane %v2592_v35, 7  ;;  %2975 = vst [vmem:[#allocation3 + $0x118] sm:$0xf] %v2943_v47  ;;  %v1935_v8 = vld [vmem:[#allocation2 + $0x10c] sm:$0xf]  ;;  %v2603_v61 = vrot.slane %v2601_v24, 7 }
 0x158   : > { %v1936_v50 = vld [vmem:[#allocation2 + $0x110] sm:$0xf]  ;;  %1967 = vst [vmem:[#allocation3 + $0x370] sm:$0xf] %v1935_v8  ;;  %v2011_v62 = vld [vmem:[#allocation2 + $0x10c] sm:$0xf]  ;;  %v2300_v18 = vsel %vm7768_vm5, %v2295_v46, %v2299_v3  ;;  %v6852_v8 = vadd.f32 %v6851_v56, %v6850_v59 }
 0x159   : > { %1968 = vst [vmem:[#allocation3 + $0x394] sm:$0xf] %v1936_v50  ;;  %v2012_v63 = vld [vmem:[#allocation2 + $0x110] sm:$0xf]  ;;  %v2305_v19 = vrot.slane %v2304_v51, 4  ;;  %v2597_v20 = vor.u32 %v2595_v44, %v2594_v33  ;;  %v2599_v2 = vrot.slane %v2594_v33, 4  ;;  %v2606_v29 = vor.u32 %v2604_v37, %v2603_v61  ;;  %v6853_v44 = vpop.f32.mrf.mxu1 }
 0x15a   : > { %v2013_v13 = vld [vmem:[#allocation2 + $0x114] sm:$0x1]  ;;  %v7456_v21 = vld [vmem:[#allocation3 + $0x2e4] ss:$36 sps:$4 sm:$0xff]   ;;  %2461 = vst [vmem:[#allocation3 + $0x32c] sm:$0xf] %v2300_v18  ;;  %v8206_v33 = vadd.f32 %v6763_v6, %v6762_v48 }
 0x15b   : > { %v2312_v30 = vshrl.u32 %v2011_v62, 16  ;;  %v2315_v35 = vshll.u32 %v2011_v62, 16  ;;  %v7460_v24 = vld [vmem:[#allocation3 + $0x2e0] ss:$36 sps:$4 sm:$0xff]   ;;  %v2310_v11 = vsel %vm7768_vm5, %v2305_v19, %v2309_v22  ;;  %v2598_v38 = vsel %vm7627_vm2, %v6238_v42, %v2597_v20  ;;  %v2484_v3 = vld [vmem:[#allocation2 + $0x7c] sm:$0x8]  ;;  %5402 = vmatprep.mubr.bf16.mxu0 %v7456_v21  ;;  %v8208_v22 = vpop.f32.mrf.mxu0  ;;  %v6854_v48 = vpop.f32.mrf.mxu1 }
 0x15c   : > { %v2321_v34 = vshll.u32 %v2012_v63, 16  ;;  %v2325_v25 = vshrl.u32 %v2012_v63, 16  ;;  %v7458_v47 = vld [vmem:[#allocation3 + $0xac] ss:$36 sps:$4 sm:$0xff]   ;;  %2462 = vst [vmem:[#allocation3 + $0x350] sm:$0xf] %v2310_v11  ;;  %v2607_v37 = vsel %vm7627_vm2, %v2599_v2, %v2606_v29  ;;  %5403 = vmatmul.mubr.bf16.gmra.mxu0 %v7460_v24  ;;  %v8211_v20 = vadd.f32 %v6852_v8, %v8103_v9 }
 0x15d   : > { %v7461_v46 = vld [vmem:[#allocation3 + $0xa8] ss:$36 sps:$4 sm:$0xff]   ;;  %2910 = vst [vmem:[#allocation3 + $0xf0] sm:$0xf] %v2598_v38  ;;  %v2314_v51 = vrot.slane %v2312_v30, 4  ;;  %v2317_v42 = vrot.slane %v2315_v35, 5  ;;  %5499 = vmatprep.mubr.bf16.mxu1 %v7458_v47  ;;  %v6743_v24 = vadd.f32 %v8109_v32, %v8107_v17  ;;  %v8215_v11 = vpop.f32.mrf.mxu0 }
 0x15e   : > { %2911 = vst [vmem:[#allocation3 + $0x114] sm:$0xf] %v2607_v37  ;;  %v2323_v50 = vrot.slane %v2321_v34, 5  ;;  %v2327_v61 = vrot.slane %v2325_v25, 4  ;;  %v2331_v62 = vshll.u32 %v2013_v13, 16  ;;  %v2609_v60 = vshrl.u32 %v2484_v3, 16  ;;  %5500 = vmatmul.mubr.bf16.gmra.mxu1 %v7461_v46 }
 0x15f   : > { %v2485_v63 = vld [vmem:[#allocation2 + $0x80] sm:$0xf]  ;;  %v2486_v7 = vld [vmem:[#allocation2 + $0x84] sm:$0xf]  ;;  %v2318_v59 = vor.u32 %v2317_v42, %v2314_v51  ;;  %v6855_v25 = vadd.f32 %v6854_v48, %v6853_v44  ;;  %v8291_v49 = vld [vmem:[#allocation2 + $0xe8] sm:$0xf] }
 0x160   : > { %v2614_v18 = vshrl.u32 %v2485_v63, 16  ;;  %v2617_v19 = vshll.u32 %v2485_v63, 16  ;;  %v2328_v6 = vor.u32 %v2327_v61, %v2323_v50  ;;  %v2333_v2 = vrot.slane %v2331_v62, 5  ;;  %v2944_v21 = vld [vmem:[#allocation2 + $0x80] sm:$0xf]  ;;  %v6768_v63 = vpop.f32.mrf.mxu0 }
 0x161   : > { %v2623_v56 = vshrl.u32 %v2486_v7, 16  ;;  %v2945_v29 = vld [vmem:[#allocation2 + $0x84] sm:$0xf]  ;;  %v6239_v30 = vrot.slane %v2609_v60, 11  ;;  %v2626_v13 = vshll.u32 %v2486_v7, 16  ;;  %v2319_v9 = vrot.slane %v2318_v59, 4 }
 0x162   : > { %v2616_v35 = vrot.slane %v2614_v18, 7  ;;  %2976 = vst [vmem:[#allocation3 + $0x13c] sm:$0xf] %v2944_v21  ;;  %2977 = vst [vmem:[#allocation3 + $0x160] sm:$0xf] %v2945_v29  ;;  %v2329_v38 = vrot.slane %v2328_v6, 4  ;;  %v8221_v17 = vadd.f32 %v6855_v25, %v6743_v24 }
 0x163   : > { %v2625_v34 = vrot.slane %v2623_v56, 7  ;;  %v1937_v46 = vld [vmem:[#allocation2 + $0x120] sm:$0xf]  ;;  %v1938_v37 = vld [vmem:[#allocation2 + $0x124] sm:$0xf]  ;;  %v2324_v8 = vsel %vm7768_vm5, %v2319_v9, %v2323_v50  ;;  %v6769_v56 = vpop.f32.mrf.mxu0 }
 0x164   : > { %v2619_v3 = vor.u32 %v2617_v19, %v2616_v35  ;;  %v2621_v47 = vrot.slane %v2616_v35, 4  ;;  %v7463_v51 = vld [vmem:[#allocation3 + $0x32c] ss:$36 sps:$4 sm:$0xff]   ;;  %v2334_v42 = vsel %vm7768_vm5, %v2329_v38, %v2333_v2  ;;  %1969 = vst [vmem:[#allocation3 + $0x3b8] sm:$0xf] %v1937_v46  ;;  %v6856_v35 = vpop.f32.mrf.mxu1 }
 0x165   : > { %v2628_v61 = vor.u32 %v2626_v13, %v2625_v34  ;;  %1970 = vst [vmem:[#allocation3 + $0x3dc] sm:$0xf] %v1938_v37  ;;  %v7465_v32 = vld [vmem:[#allocation3 + $0xf4] ss:$36 sps:$4 sm:$0xff]   ;;  %v7467_v62 = vld [vmem:[#allocation3 + $0x328] ss:$36 sps:$4 sm:$0xff]   ;;  %5410 = vmatprep.mubr.bf16.mxu0 %v7463_v51  ;;  %v8227_v13 = vadd.f32 %v6769_v56, %v6768_v63 }
 0x166   : > { %2463 = vst [vmem:[#allocation3 + $0x374] sm:$0xf] %v2324_v8  ;;  %2464 = vst [vmem:[#allocation3 + $0x398] sm:$0xf] %v2334_v42  ;;  %v2620_v44 = vsel %vm7627_vm2, %v6239_v30, %v2619_v3  ;;  %v7468_v7 = vld [vmem:[#allocation3 + $0xf0] ss:$36 sps:$4 sm:$0xff]   ;;  %5507 = vmatprep.mubr.bf16.mxu1 %v7465_v32  ;;  %5411 = vmatmul.mubr.bf16.gmra.mxu0 %v7467_v62  ;;  %v8229_v3 = vpop.f32.mrf.mxu0  ;;  %v6857_v42 = vpop.f32.mrf.mxu1 }
 0x167   : > { %v2629_v50 = vsel %vm7627_vm2, %v2621_v47, %v2628_v61  ;;  %2912 = vst [vmem:[#allocation3 + $0x138] sm:$0xf] %v2620_v44  ;;  %v2014_v60 = vld [vmem:[#allocation2 + $0x120] sm:$0xf]  ;;  %v2015_v18 = vld [vmem:[#allocation2 + $0x124] sm:$0xf]  ;;  %5508 = vmatmul.mubr.bf16.gmra.mxu1 %v7468_v7 }
 0x168   : > { %2913 = vst [vmem:[#allocation3 + $0x15c] sm:$0xf] %v2629_v50  ;;  %v2016_v19 = vld [vmem:[#allocation2 + $0x128] sm:$0x1]  ;;  %v2336_v48 = vshrl.u32 %v2014_v60, 16  ;;  %v2339_v59 = vshll.u32 %v2014_v60, 16  ;;  %v8231_v50 = vpop.f32.mrf.mxu0 }
 0x169   : > { %v2345_v6 = vshll.u32 %v2015_v18, 16  ;;  %v2349_v2 = vshrl.u32 %v2015_v18, 16  ;;  %v2355_v21 = vshll.u32 %v2016_v19, 16  ;;  %v2487_v29 = vld [vmem:[#allocation2 + $0x90] sm:$0x8] }
 0x16a   : > { %v2488_v30 = vld [vmem:[#allocation2 + $0x94] sm:$0xf]  ;;  %v2338_v24 = vrot.slane %v2336_v48, 4  ;;  %v2341_v9 = vrot.slane %v2339_v59, 5  ;;  %v2489_v25 = vld [vmem:[#allocation2 + $0x98] sm:$0xf]  ;;  %v6858_v48 = vadd.f32 %v6857_v42, %v6856_v35  ;;  %v6859_v59 = vpop.f32.mrf.mxu1 }
 0x16b   : > { %v2347_v38 = vrot.slane %v2345_v6, 5  ;;  %v2351_v34 = vrot.slane %v2349_v2, 4  ;;  %v2357_v47 = vrot.slane %v2355_v21, 5  ;;  %v2631_v46 = vshrl.u32 %v2487_v29, 16  ;;  %v2946_v8 = vld [vmem:[#allocation2 + $0x94] sm:$0xf]  ;;  %v6774_v29 = vpop.f32.mrf.mxu0 }
 0x16c   : > { %v2636_v37 = vshrl.u32 %v2488_v30, 16  ;;  %v2639_v51 = vshll.u32 %v2488_v30, 16  ;;  %v2342_v61 = vor.u32 %v2341_v9, %v2338_v24  ;;  %v2645_v62 = vshrl.u32 %v2489_v25, 16  ;;  %v2947_v7 = vld [vmem:[#allocation2 + $0x98] sm:$0xf] }
 0x16d   : > { %v2352_v32 = vor.u32 %v2351_v34, %v2347_v38  ;;  %v2648_v44 = vshll.u32 %v2489_v25, 16  ;;  %2978 = vst [vmem:[#allocation3 + $0x184] sm:$0xf] %v2946_v8  ;;  %v1939_v63 = vld [vmem:[#allocation2 + $0x134] sm:$0xf]  ;;  %v6240_v18 = vrot.slane %v2631_v46, 11  ;;  %v6749_v25 = vadd.f32 %v8141_v43, %v8133_v15 }
 0x16e   : > { %v7469_v60 = vld [vmem:[#allocation3 + $0x374] ss:$36 sps:$4 sm:$0xff]   ;;  %v2638_v19 = vrot.slane %v2636_v37, 7  ;;  %2979 = vst [vmem:[#allocation3 + $0x1a8] sm:$0xf] %v2947_v7  ;;  %v2343_v2 = vrot.slane %v2342_v61, 4  ;;  %v8236_v46 = vadd.f32 %v6858_v48, %v8121_v14  ;;  %v6860_v37 = vpop.f32.mrf.mxu1  ;;  %v6775_v7 = vpop.f32.mrf.mxu0 }
 0x16f   : > { %1971 = vst [vmem:[#allocation3 + $0x400] sm:$0xf] %v1939_v63  ;;  %v7473_v6 = vld [vmem:[#allocation3 + $0x370] ss:$36 sps:$4 sm:$0xff]   ;;  %v2353_v56 = vrot.slane %v2352_v32, 4  ;;  %v2647_v21 = vrot.slane %v2645_v62, 7  ;;  %5418 = vmatprep.mubr.bf16.mxu0 %v7469_v60 }
 0x170   : > { %v7471_v30 = vld [vmem:[#allocation3 + $0x13c] ss:$36 sps:$4 sm:$0xff]   ;;  %v2641_v9 = vor.u32 %v2639_v51, %v2638_v19  ;;  %v2643_v34 = vrot.slane %v2638_v19, 4  ;;  %5419 = vmatmul.mubr.bf16.gmra.mxu0 %v7473_v6  ;;  %v2348_v35 = vsel %vm7768_vm5, %v2343_v2, %v2347_v38  ;;  %v1940_v61 = vld [vmem:[#allocation2 + $0x138] sm:$0xf]  ;;  %v6861_v51 = vadd.f32 %v6860_v37, %v6859_v59  ;;  %v6777_v6 = vpop.f32.mrf.mxu0 }
 0x171   : > { %v7474_v24 = vld [vmem:[#allocation3 + $0x138] ss:$36 sps:$4 sm:$0xff]   ;;  %v2358_v8 = vsel %vm7768_vm5, %v2353_v56, %v2357_v47  ;;  %v2650_v42 = vor.u32 %v2648_v44, %v2647_v21  ;;  %v2017_v32 = vld [vmem:[#allocation2 + $0x134] sm:$0xf]  ;;  %v2018_v62 = vld [vmem:[#allocation2 + $0x138] sm:$0xf]  ;;  %5515 = vmatprep.mubr.bf16.mxu1 %v7471_v30 }
 0x172   : > { %2465 = vst [vmem:[#allocation3 + $0x3bc] sm:$0xf] %v2348_v35  ;;  %2466 = vst [vmem:[#allocation3 + $0x3e0] sm:$0xf] %v2358_v8  ;;  %v2642_v14 = vsel %vm7627_vm2, %v6240_v18, %v2641_v9  ;;  %v2019_v15 = vld [vmem:[#allocation2 + $0x13c] sm:$0x1]  ;;  %5516 = vmatmul.mubr.bf16.gmra.mxu1 %v7474_v24  ;;  %v8246_v59 = vadd.f32 %v6861_v51, %v6749_v25  ;;  %v6862_v9 = vpop.f32.mrf.mxu1 }
 0x173   : > { %1972 = vst [vmem:[#allocation3 + $0x424] sm:$0xf] %v1940_v61  ;;  %v2360_v43 = vshrl.u32 %v2017_v32, 16  ;;  %v2363_v63 = vshll.u32 %v2017_v32, 16  ;;  %v2369_v38 = vshll.u32 %v2018_v62, 16  ;;  %v2651_v47 = vsel %vm7627_vm2, %v2643_v34, %v2650_v42  ;;  %v6778_v42 = vpop.f32.mrf.mxu0 }
 0x174   : > { %2914 = vst [vmem:[#allocation3 + $0x180] sm:$0xf] %v2642_v14  ;;  %v2373_v44 = vshrl.u32 %v2018_v62, 16  ;;  %v2379_v60 = vshll.u32 %v2019_v15, 16  ;;  %v2490_v19 = vld [vmem:[#allocation2 + $0xa4] sm:$0x8]  ;;  %v6863_v51 = vpop.f32.mrf.mxu1  ;;  %v8250_v45 = vadd.f32 %v6778_v42, %v6777_v6 }
 0x175   : > { %v2491_v48 = vld [vmem:[#allocation2 + $0xa8] sm:$0xf]  ;;  %2915 = vst [vmem:[#allocation3 + $0x1a4] sm:$0xf] %v2651_v47  ;;  %v2362_v2 = vrot.slane %v2360_v43, 4  ;;  %v2365_v18 = vrot.slane %v2363_v63, 5  ;;  %v8248_v63 = vadd.f32 %v6775_v7, %v6774_v29 }
 0x176   : > { %v2371_v56 = vrot.slane %v2369_v38, 5  ;;  %v2492_v21 = vld [vmem:[#allocation2 + $0xac] sm:$0xf]  ;;  %v2653_v30 = vshrl.u32 %v2490_v19, 16  ;;  %v2375_v37 = vrot.slane %v2373_v44, 4  ;;  %v2381_v24 = vrot.slane %v2379_v60, 5 }
 0x177   : > { %v2658_v35 = vshrl.u32 %v2491_v48, 16  ;;  %v2661_v8 = vshll.u32 %v2491_v48, 16  ;;  %v2948_v34 = vld [vmem:[#allocation2 + $0xa8] sm:$0xf]  ;;  %v2366_v61 = vor.u32 %v2365_v18, %v2362_v2  ;;  %v2667_v62 = vshrl.u32 %v2492_v21, 16  ;;  %v6865_v48 = vpop.f32.mrf.mxu1 }
 0x178   : > { %v6241_v32 = vrot.slane %v2653_v30, 11  ;;  %v2670_v14 = vshll.u32 %v2492_v21, 16  ;;  %v2949_v25 = vld [vmem:[#allocation2 + $0xac] sm:$0xf]  ;;  %2980 = vst [vmem:[#allocation3 + $0x1cc] sm:$0xf] %v2948_v34  ;;  %v2376_v15 = vor.u32 %v2375_v37, %v2371_v56  ;;  %v6864_v38 = vadd.f32 %v6863_v51, %v6862_v9 }
 0x179   : > { %v2660_v43 = vrot.slane %v2658_v35, 7  ;;  %2981 = vst [vmem:[#allocation3 + $0x1f0] sm:$0xf] %v2949_v25  ;;  %v2367_v47 = vrot.slane %v2366_v61, 4  ;;  %v2669_v44 = vrot.slane %v2667_v62, 7  ;;  %v6866_v34 = vpop.f32.mrf.mxu1  ;;  %v6780_v61 = vpop.f32.mrf.mxu0 }
 0x17a   : > { %v1941_v60 = vld [vmem:[#allocation2 + $0x148] sm:$0xf]  ;;  %v1942_v19 = vld [vmem:[#allocation2 + $0x14c] sm:$0xf]  ;;  %v2377_v18 = vrot.slane %v2376_v15, 4  ;;  %v8253_v37 = vadd.f32 %v6864_v38, %v8153_v40  ;;  %v6867_v25 = vadd.f32 %v6866_v34, %v6865_v48 }
 0x17b   : > { %v7476_v2 = vld [vmem:[#allocation3 + $0x3bc] ss:$36 sps:$4 sm:$0xff]   ;;  %v2663_v30 = vor.u32 %v2661_v8, %v2660_v43  ;;  %v2665_v21 = vrot.slane %v2660_v43, 4  ;;  %1973 = vst [vmem:[#allocation3 + $0x448] sm:$0xf] %v1941_v60  ;;  %v2372_v29 = vsel %vm7768_vm5, %v2367_v47, %v2371_v56  ;;  %v2672_v7 = vor.u32 %v2670_v14, %v2669_v44  ;;  %v6781_v38 = vpop.f32.mrf.mxu0 }
 0x17c   : > { %1974 = vst [vmem:[#allocation3 + $0x46c] sm:$0xf] %v1942_v19  ;;  %v7480_v35 = vld [vmem:[#allocation3 + $0x3b8] ss:$36 sps:$4 sm:$0xff]   ;;  %v2020_v9 = vld [vmem:[#allocation2 + $0x148] sm:$0xf]  ;;  %5426 = vmatprep.mubr.bf16.mxu0 %v7476_v2  ;;  %v2382_v8 = vsel %vm7768_vm5, %v2377_v18, %v2381_v24  ;;  %v6755_v43 = vadd.f32 %v8172_v57, %v8159_v26 }
 0x17d   : > { %v7478_v6 = vld [vmem:[#allocation3 + $0x184] ss:$36 sps:$4 sm:$0xff]   ;;  %2467 = vst [vmem:[#allocation3 + $0x404] sm:$0xf] %v2372_v29  ;;  %v2664_v62 = vsel %vm7627_vm2, %v6241_v32, %v2663_v30  ;;  %v2384_v40 = vshrl.u32 %v2020_v9, 16  ;;  %5427 = vmatmul.mubr.bf16.gmra.mxu0 %v7480_v35  ;;  %v2673_v56 = vsel %vm7627_vm2, %v2665_v21, %v2672_v7  ;;  %v2387_v15 = vshll.u32 %v2020_v9, 16  ;;  %v6783_v35 = vpop.f32.mrf.mxu0 }
 0x17e   : > { %v7481_v42 = vld [vmem:[#allocation3 + $0x180] ss:$36 sps:$4 sm:$0xff]   ;;  %2468 = vst [vmem:[#allocation3 + $0x428] sm:$0xf] %v2382_v8  ;;  %2916 = vst [vmem:[#allocation3 + $0x1c8] sm:$0xf] %v2664_v62  ;;  %5523 = vmatprep.mubr.bf16.mxu1 %v7478_v6  ;;  %v8265_v30 = vadd.f32 %v6867_v25, %v6755_v43  ;;  %v8267_v21 = vadd.f32 %v6781_v38, %v6780_v61 }
 0x17f   : > { %v2021_v14 = vld [vmem:[#allocation2 + $0x14c] sm:$0xf]  ;;  %v2022_v51 = vld [vmem:[#allocation2 + $0x150] sm:$0x1]  ;;  %2917 = vst [vmem:[#allocation3 + $0x1ec] sm:$0xf] %v2673_v56  ;;  %5524 = vmatmul.mubr.bf16.gmra.mxu1 %v7481_v42  ;;  %v6784_v42 = vpop.f32.mrf.mxu0 }
 0x180   : > { %v2386_v24 = vrot.slane %v2384_v40, 4  ;;  %v2393_v47 = vshll.u32 %v2021_v14, 16  ;;  %v2397_v32 = vshrl.u32 %v2021_v14, 16  ;;  %v2403_v44 = vshll.u32 %v2022_v51, 16  ;;  %v2493_v60 = vld [vmem:[#allocation2 + $0xb8] sm:$0x8] }
 0x181   : > { %v2389_v19 = vrot.slane %v2387_v15, 5  ;;  %v2494_v48 = vld [vmem:[#allocation2 + $0xbc] sm:$0xf]  ;;  %v2495_v2 = vld [vmem:[#allocation2 + $0xc0] sm:$0xf]  ;;  %v2675_v18 = vshrl.u32 %v2493_v60, 16  ;;  %v8269_v15 = vadd.f32 %v6784_v42, %v6783_v35 }
 0x182   : > { %v2395_v29 = vrot.slane %v2393_v47, 5  ;;  %v2399_v26 = vrot.slane %v2397_v32, 4  ;;  %v2405_v57 = vrot.slane %v2403_v44, 5  ;;  %v2680_v7 = vshrl.u32 %v2494_v48, 16  ;;  %v2950_v9 = vld [vmem:[#allocation2 + $0xbc] sm:$0xf]  ;;  %v6868_v44 = vpop.f32.mrf.mxu1 }
 0x183   : > { %v2390_v34 = vor.u32 %v2389_v19, %v2386_v24  ;;  %v6242_v6 = vrot.slane %v2675_v18, 11  ;;  %v2683_v8 = vshll.u32 %v2494_v48, 16  ;;  %v2689_v62 = vshrl.u32 %v2495_v2, 16  ;;  %v2951_v40 = vld [vmem:[#allocation2 + $0xc0] sm:$0xf] }
 0x184   : > { %2982 = vst [vmem:[#allocation3 + $0x214] sm:$0xf] %v2950_v9  ;;  %v2400_v56 = vor.u32 %v2399_v26, %v2395_v29  ;;  %v2682_v14 = vrot.slane %v2680_v7, 7  ;;  %v2692_v51 = vshll.u32 %v2495_v2, 16  ;;  %2983 = vst [vmem:[#allocation3 + $0x238] sm:$0xf] %v2951_v40  ;;  %v6869_v40 = vpop.f32.mrf.mxu1 }
 0x185   : > { %v2496_v25 = vld [vmem:[#allocation2 + $0xcc] sm:$0x8]  ;;  %v2497_v61 = vld [vmem:[#allocation2 + $0xd0] sm:$0xf]  ;;  %v2391_v43 = vrot.slane %v2390_v34, 4  ;;  %v2691_v38 = vrot.slane %v2689_v62, 7 }
 0x186   : > { %v2498_v47 = vld [vmem:[#allocation2 + $0xd4] sm:$0xf]  ;;  %v2697_v32 = vshrl.u32 %v2496_v25, 16  ;;  %v7482_v24 = vld [vmem:[#allocation3 + $0x404] ss:$36 sps:$4 sm:$0xff]   ;;  %v2401_v60 = vrot.slane %v2400_v56, 4  ;;  %v2685_v19 = vor.u32 %v2683_v8, %v2682_v14 }
 0x187   : > { %v2687_v48 = vrot.slane %v2682_v14, 4  ;;  %v7484_v18 = vld [vmem:[#allocation3 + $0x1cc] ss:$36 sps:$4 sm:$0xff]   ;;  %v7486_v9 = vld [vmem:[#allocation3 + $0x400] ss:$36 sps:$4 sm:$0xff]   ;;  %v2396_v26 = vsel %vm7768_vm5, %v2391_v43, %v2395_v29  ;;  %v2694_v2 = vor.u32 %v2692_v51, %v2691_v38  ;;  %5434 = vmatprep.mubr.bf16.mxu0 %v7482_v24  ;;  %v2702_v42 = vshrl.u32 %v2497_v61, 16  ;;  %v6871_v38 = vpop.f32.mrf.mxu1 }
 0x188   : > { %v6243_v7 = vrot.slane %v2697_v32, 11  ;;  %v7487_v35 = vld [vmem:[#allocation3 + $0x1c8] ss:$36 sps:$4 sm:$0xff]   ;;  %v2406_v34 = vsel %vm7768_vm5, %v2401_v60, %v2405_v57  ;;  %2469 = vst [vmem:[#allocation3 + $0x44c] sm:$0xf] %v2396_v26  ;;  %v2686_v62 = vsel %vm7627_vm2, %v6242_v6, %v2685_v19  ;;  %v2705_v8 = vshll.u32 %v2497_v61, 16  ;;  %5531 = vmatprep.mubr.bf16.mxu1 %v7484_v18  ;;  %5435 = vmatmul.mubr.bf16.gmra.mxu0 %v7486_v9 }
 0x189   : > { %v2952_v56 = vld [vmem:[#allocation2 + $0xd0] sm:$0xf]  ;;  %2470 = vst [vmem:[#allocation3 + $0x470] sm:$0xf] %v2406_v34  ;;  %v2695_v29 = vsel %vm7627_vm2, %v2687_v48, %v2694_v2  ;;  %2918 = vst [vmem:[#allocation3 + $0x210] sm:$0xf] %v2686_v62  ;;  %v6870_v57 = vadd.f32 %v6869_v40, %v6868_v44  ;;  %v8281_v6 = vadd.f32 %v8069_v12, %v8065_v1  ;;  %5532 = vmatmul.mubr.bf16.gmra.mxu1 %v7487_v35 }
 0x18a   : > { %v2711_v14 = vshrl.u32 %v2498_v47, 16  ;;  %v2714_v51 = vshll.u32 %v2498_v47, 16  ;;  %v2953_v25 = vld [vmem:[#allocation2 + $0xd4] sm:$0xf]  ;;  %2984 = vst [vmem:[#allocation3 + $0x25c] sm:$0xf] %v2952_v56  ;;  %v8285_v19 = vadd.f32 %v8191_v23, %v8184_v10  ;;  %v6786_v47 = vpop.f32.mrf.mxu0 }
 0x18b   : > { %v3000_v43 = vld [vmem:[#allocation2 + $0x30] sm:$0xf]  ;;  %2919 = vst [vmem:[#allocation3 + $0x234] sm:$0xf] %v2695_v29  ;;  %v2704_v61 = vrot.slane %v2702_v42, 7 }
 0x18c   : > { %2985 = vst [vmem:[#allocation3 + $0x280] sm:$0xf] %v2953_v25  ;;  %v3001_v32 = vld [vmem:[#allocation2 + $0x34] sm:$0xf]  ;;  %v3002_v24 = vld [vmem:[#allocation2 + $0x38] sm:$0x1]  ;;  %v6787_v34 = vpop.f32.mrf.mxu0  ;;  %v6872_v25 = vpop.f32.mrf.mxu1 }
 0x18d   : > { %v3049_v60 = vshrl.u32 %v3000_v43, 16  ;;  %v2713_v48 = vrot.slane %v2711_v14, 7  ;;  %v3052_v18 = vshll.u32 %v3000_v43, 16  ;;  %v3058_v44 = vshll.u32 %v3001_v32, 16  ;;  %v3003_v26 = vld [vmem:[#allocation2 + $0x44] sm:$0xf] }
 0x18e   : > { %v3062_v9 = vshrl.u32 %v3001_v32, 16  ;;  %v2707_v2 = vor.u32 %v2705_v8, %v2704_v61  ;;  %v2709_v1 = vrot.slane %v2704_v61, 4  ;;  %v3068_v40 = vshll.u32 %v3002_v24, 16  ;;  %v3004_v35 = vld [vmem:[#allocation2 + $0x48] sm:$0xf]  ;;  %v6789_v32 = vpop.f32.mrf.mxu0 }
 0x18f   : > { %v3051_v12 = vrot.slane %v3049_v60, 4  ;;  %v2716_v62 = vor.u32 %v2714_v51, %v2713_v48  ;;  %v3054_v42 = vrot.slane %v3052_v18, 5  ;;  %v3060_v56 = vrot.slane %v3058_v44, 5  ;;  %v3005_v14 = vld [vmem:[#allocation2 + $0x4c] sm:$0x1] }
 0x190   : > { %v3064_v29 = vrot.slane %v3062_v9, 4  ;;  %v2708_v10 = vsel %vm7627_vm2, %v6243_v7, %v2707_v2  ;;  %v3070_v23 = vrot.slane %v3068_v40, 5  ;;  %v3073_v43 = vshrl.u32 %v3003_v26, 16  ;;  %v2499_v51 = vld [vmem:[#allocation2 + $0xe0] sm:$0x8]  ;;  %v6790_v2 = vpop.f32.mrf.mxu0 }
 0x191   : > { %v3076_v16 = vshll.u32 %v3003_v26, 16  ;;  %v2717_v8 = vsel %vm7627_vm2, %v2709_v1, %v2716_v62  ;;  %2920 = vst [vmem:[#allocation3 + $0x258] sm:$0xf] %v2708_v10  ;;  %v3055_v61 = vor.u32 %v3054_v42, %v3051_v12  ;;  %v3082_v60 = vshll.u32 %v3004_v35, 16  ;;  %v2500_v48 = vld [vmem:[#allocation2 + $0xe4] sm:$0xf] }
 0x192   : > { %v3065_v24 = vor.u32 %v3064_v29, %v3060_v56  ;;  %v7489_v18 = vld [vmem:[#allocation3 + $0x44c] ss:$36 sps:$4 sm:$0xff]   ;;  %2921 = vst [vmem:[#allocation3 + $0x27c] sm:$0xf] %v2717_v8  ;;  %v3075_v44 = vrot.slane %v3073_v43, 4  ;;  %v8294_v7 = vadd.f32 %v6870_v57, %v8178_v55  ;;  %v6873_v26 = vadd.f32 %v6872_v25, %v6871_v38  ;;  %v6874_v57 = vpop.f32.mrf.mxu1 }
 0x193   : > { %v3078_v9 = vrot.slane %v3076_v16, 5  ;;  %v7491_v40 = vld [vmem:[#allocation3 + $0x214] ss:$36 sps:$4 sm:$0xff]   ;;  %v7493_v52 = vld [vmem:[#allocation3 + $0x448] ss:$36 sps:$4 sm:$0xff]   ;;  %v3056_v1 = vrot.slane %v3055_v61, 4  ;;  %v8298_v12 = vadd.f32 %v8215_v11, %v8208_v22  ;;  %v8300_v62 = vadd.f32 %v6787_v34, %v6786_v47  ;;  %5442 = vmatprep.mubr.bf16.mxu0 %v7489_v18 }
 0x194   : > { %v8302_v42 = vadd.f32 %v6790_v2, %v6789_v32  ;;  %v7494_v16 = vld [vmem:[#allocation3 + $0x210] ss:$36 sps:$4 sm:$0xff]   ;;  %v3066_v29 = vrot.slane %v3065_v24, 4  ;;  %v3084_v43 = vrot.slane %v3082_v60, 5  ;;  %v3086_v55 = vshrl.u32 %v3004_v35, 16  ;;  %5539 = vmatprep.mubr.bf16.mxu1 %v7491_v40  ;;  %5443 = vmatmul.mubr.bf16.gmra.mxu0 %v7493_v52  ;;  %v6875_v35 = vpop.f32.mrf.mxu1 }
 0x195   : > { %v3079_v10 = vor.u32 %v3078_v9, %v3075_v44  ;;  %v3061_v38 = vsel %vm7768_vm5, %v3056_v1, %v3060_v56  ;;  %v3092_v25 = vshll.u32 %v3005_v14, 16  ;;  %v2719_v8 = vshrl.u32 %v2499_v51, 16  ;;  %v2954_v11 = vld [vmem:[#allocation2 + $0xe4] sm:$0xf]  ;;  %5540 = vmatmul.mubr.bf16.gmra.mxu1 %v7494_v16  ;;  %v2955_v24 = vld [vmem:[#allocation2 + $0xe8] sm:$0xf] }
 0x196   : > { %v2724_v22 = vshrl.u32 %v2500_v48, 16  ;;  %v3071_v47 = vsel %vm7768_vm5, %v3066_v29, %v3070_v23  ;;  %3464 = vst [vmem:[#allocation3 + $0x20] sm:$0xf] %v3061_v38  ;;  %v3088_v32 = vrot.slane %v3086_v55, 4  ;;  %v2727_v61 = vshll.u32 %v2500_v48, 16 }
 0x197   : > { %v3080_v34 = vrot.slane %v3079_v10, 4  ;;  %2986 = vst [vmem:[#allocation3 + $0x2a4] sm:$0xf] %v2954_v11  ;;  %3465 = vst [vmem:[#allocation3 + $0x44] sm:$0xf] %v3071_v47  ;;  %v3094_v52 = vrot.slane %v3092_v25, 5  ;;  %v8313_v48 = vadd.f32 %v6873_v26, %v8285_v19  ;;  %v8317_v10 = vadd.f32 %v8231_v50, %v8229_v3 }
 0x198   : > { %v6244_v60 = vrot.slane %v2719_v8, 11  ;;  %v2726_v18 = vrot.slane %v2724_v22, 7  ;;  %v2733_v56 = vshrl.u32 %v8291_v49, 16  ;;  %2987 = vst [vmem:[#allocation3 + $0x2c8] sm:$0xf] %v2955_v24  ;;  %v3089_v44 = vor.u32 %v3088_v32, %v3084_v43  ;;  %v6877_v24 = vpop.f32.mrf.mxu1 }
 0x199   : > { %v3006_v14 = vld [vmem:[#allocation2 + $0x58] sm:$0xf]  ;;  %v3085_v51 = vsel %vm7768_vm5, %v3080_v34, %v3084_v43  ;;  %v2736_v23 = vshll.u32 %v8291_v49, 16  ;;  %v3007_v9 = vld [vmem:[#allocation2 + $0x5c] sm:$0xf]  ;;  %v8319_v55 = vadd.f32 %v6875_v35, %v6874_v57 }
 0x19a   : > { %v3008_v2 = vld [vmem:[#allocation2 + $0x60] sm:$0x1]  ;;  %v7497_v1 = vld [vmem:[#allocation3 + $0x25c] ss:$36 sps:$4 sm:$0xff]   ;;  %3466 = vst [vmem:[#allocation3 + $0x68] sm:$0xf] %v3085_v51  ;;  %v2729_v16 = vor.u32 %v2727_v61, %v2726_v18 }
 0x19b   : > { %v7495_v40 = vld [vmem:[#allocation3 + $0x258] ss:$36 sps:$4 sm:$0xff]   ;;  %v2731_v29 = vrot.slane %v2726_v18, 4  ;;  %v3090_v38 = vrot.slane %v3089_v44, 4  ;;  %v2735_v43 = vrot.slane %v2733_v56, 7  ;;  %v3097_v25 = vshrl.u32 %v3006_v14, 16  ;;  %5547 = vmatprep.mubr.bf16.mxu1 %v7497_v1 }
 0x19c   : > { %v3100_v49 = vshll.u32 %v3006_v14, 16  ;;  %v3009_v8 = vld [vmem:[#allocation2 + $0x6c] sm:$0xf]  ;;  %v2730_v19 = vsel %vm7627_vm2, %v6244_v60, %v2729_v16  ;;  %v3106_v26 = vshll.u32 %v3007_v9, 16  ;;  %v3110_v22 = vshrl.u32 %v3007_v9, 16 }
 0x19d   : > { %v3116_v11 = vshll.u32 %v3008_v2, 16  ;;  %v3010_v47 = vld [vmem:[#allocation2 + $0x70] sm:$0xf]  ;;  %v3095_v34 = vsel %vm7768_vm5, %v3090_v38, %v3094_v52  ;;  %v2738_v3 = vor.u32 %v2736_v23, %v2735_v43  ;;  %2922 = vst [vmem:[#allocation3 + $0x2a0] sm:$0xf] %v2730_v19  ;;  %v3099_v50 = vrot.slane %v3097_v25, 4  ;;  %5548 = vmatmul.mubr.bf16.gmra.mxu1 %v7495_v40  ;;  %v6792_v43 = vpop.f32.mrf.mxu0 }
 0x19e   : > { %v3102_v57 = vrot.slane %v3100_v49, 5  ;;  %v3011_v32 = vld [vmem:[#allocation2 + $0x74] sm:$0x1]  ;;  %v2502_v61 = vld [vmem:[#allocation2 + $0xf4] sm:$0x8]  ;;  %v3108_v35 = vrot.slane %v3106_v26, 5 }
 0x19f   : > { %3467 = vst [vmem:[#allocation3 + $0x8c] sm:$0xf] %v3095_v34  ;;  %v3112_v18 = vrot.slane %v3110_v22, 4  ;;  %v3118_v56 = vrot.slane %v3116_v11, 5  ;;  %v3121_v14 = vshrl.u32 %v3009_v8, 16  ;;  %v2739_v51 = vsel %vm7627_vm2, %v2731_v29, %v2738_v3  ;;  %v6878_v22 = vpop.f32.mrf.mxu1 }
 0x1a0   : > { %v7498_v60 = vld [vmem:[#allocation3 + $0x20] ss:$36 sps:$4 sm:$0xff]   ;;  %v3103_v44 = vor.u32 %v3102_v57, %v3099_v50  ;;  %v3124_v9 = vshll.u32 %v3009_v8, 16  ;;  %v3130_v52 = vshll.u32 %v3010_v47, 16  ;;  %2923 = vst [vmem:[#allocation3 + $0x2c4] sm:$0xf] %v2739_v51 }
 0x1a1   : > { %v3113_v23 = vor.u32 %v3112_v18, %v3108_v35  ;;  %v3123_v2 = vrot.slane %v3121_v14, 4  ;;  %v3134_v1 = vshrl.u32 %v3010_v47, 16  ;;  %v3140_v16 = vshll.u32 %v3011_v32, 16  ;;  %v2503_v38 = vld [vmem:[#allocation2 + $0xf8] sm:$0xf]  ;;  %7198 = vmatprep.mubr.bf16.mxu0 %v7498_v60 }
 0x1a2   : > { %v3104_v25 = vrot.slane %v3103_v44, 4  ;;  %v3126_v49 = vrot.slane %v3124_v9, 5  ;;  %v3132_v19 = vrot.slane %v3130_v52, 5  ;;  %v2741_v26 = vshrl.u32 %v2502_v61, 16  ;;  %v2504_v29 = vld [vmem:[#allocation2 + $0xfc] sm:$0xf]  ;;  %v6793_v9 = vpop.f32.mrf.mxu0 }
 0x1a3   : > { %v3114_v40 = vrot.slane %v3113_v23, 4  ;;  %v3136_v11 = vrot.slane %v3134_v1, 4  ;;  %v3142_v34 = vrot.slane %v3140_v16, 5  ;;  %v2746_v3 = vshrl.u32 %v2503_v38, 16  ;;  %v2956_v32 = vld [vmem:[#allocation2 + $0xf8] sm:$0xf]  ;;  %v6880_v16 = vpop.f32.mrf.mxu1 }
 0x1a4   : > { %v3109_v8 = vsel %vm7768_vm5, %v3104_v25, %v3108_v35  ;;  %v3127_v50 = vor.u32 %v3126_v49, %v3123_v2  ;;  %v6245_v57 = vrot.slane %v2741_v26, 11  ;;  %v2749_v47 = vshll.u32 %v2503_v38, 16  ;;  %v2957_v18 = vld [vmem:[#allocation2 + $0xfc] sm:$0xf]  ;;  %2988 = vst [vmem:[#allocation3 + $0x2ec] sm:$0xf] %v2956_v32 }
 0x1a5   : > { %v3119_v14 = vsel %vm7768_vm5, %v3114_v40, %v3118_v56  ;;  %3468 = vst [vmem:[#allocation3 + $0xb0] sm:$0xf] %v3109_v8  ;;  %v3137_v60 = vor.u32 %v3136_v11, %v3132_v19  ;;  %v2748_v61 = vrot.slane %v2746_v3, 7  ;;  %v2755_v51 = vshrl.u32 %v2504_v29, 16  ;;  %2989 = vst [vmem:[#allocation3 + $0x310] sm:$0xf] %v2957_v18 }
 0x1a6   : > { %v3012_v44 = vld [vmem:[#allocation2 + $0x80] sm:$0xf]  ;;  %v7499_v52 = vld [vmem:[#allocation3 + $0x68] ss:$36 sps:$4 sm:$0xff]   ;;  %3469 = vst [vmem:[#allocation3 + $0xd4] sm:$0xf] %v3119_v14  ;;  %v8333_v2 = vadd.f32 %v8319_v55, %v8206_v33  ;;  %v6879_v1 = vadd.f32 %v6878_v22, %v6877_v24  ;;  %v6881_v33 = vpop.f32.mrf.mxu1 }
 0x1a7   : > { %v3128_v23 = vrot.slane %v3127_v50, 4  ;;  %v2758_v35 = vshll.u32 %v2504_v29, 16  ;;  %v3138_v38 = vrot.slane %v3137_v60, 4  ;;  %v2751_v56 = vor.u32 %v2749_v47, %v2748_v61  ;;  %v3013_v26 = vld [vmem:[#allocation2 + $0x84] sm:$0xf]  ;;  %7199 = vmatmul.mubr.bf16.vlgmr.msra.gmra.mxu0 %v7499_v52 }
 0x1a8   : > { %v2753_v25 = vrot.slane %v2748_v61, 4  ;;  %v2757_v49 = vrot.slane %v2755_v51, 7  ;;  %v7500_v40 = vld [vmem:[#allocation3 + $0x2a0] ss:$36 sps:$4 sm:$0xff]   ;;  %v3145_v8 = vshrl.u32 %v3012_v44, 16  ;;  %v8338_v29 = vadd.f32 %v6879_v1, %v8298_v12  ;;  %v6795_v61 = vpop.f32.mrf.mxu0  ;;  %v6883_v51 = vpop.f32.mrf.mxu1 }
 0x1a9   : > { %v7502_v11 = vld [vmem:[#allocation3 + $0x2a4] ss:$36 sps:$4 sm:$0xff]   ;;  %v3133_v3 = vsel %vm7768_vm5, %v3128_v23, %v3132_v19  ;;  %v8340_v50 = vadd.f32 %v6793_v9, %v6792_v43  ;;  %v3143_v55 = vsel %vm7768_vm5, %v3138_v38, %v3142_v34  ;;  %v2752_v24 = vsel %vm7627_vm2, %v6245_v57, %v2751_v56  ;;  %v3014_v47 = vld [vmem:[#allocation2 + $0x88] sm:$0x1]  ;;  %v3015_v18 = vld [vmem:[#allocation2 + $0x94] sm:$0xf] }
 0x1aa   : > { %9030 = vst [vmem:[#allocation8_spill] sm:$0xff] %v8338_v29  ;;  %3470 = vst [vmem:[#allocation3 + $0xf8] sm:$0xf] %v3133_v3  ;;  %v2760_v22 = vor.u32 %v2758_v35, %v2757_v49  ;;  %v3148_v32 = vshll.u32 %v3012_v44, 16  ;;  %5555 = vmatprep.mubr.bf16.mxu1 %v7502_v11  ;;  %v3147_v19 = vrot.slane %v3145_v8, 4  ;;  %v3154_v12 = vshll.u32 %v3013_v26, 16  ;;  %v6884_v56 = vpop.f32.mrf.mxu1 }
 0x1ab   : > { %3471 = vst [vmem:[#allocation3 + $0x11c] sm:$0xf] %v3143_v55  ;;  %2924 = vst [vmem:[#allocation3 + $0x2e8] sm:$0xf] %v2752_v24  ;;  %v3158_v14 = vshrl.u32 %v3013_v26, 16  ;;  %v3164_v43 = vshll.u32 %v3014_v47, 16  ;;  %5556 = vmatmul.mubr.bf16.gmra.mxu1 %v7500_v40  ;;  %v6882_v8 = vadd.f32 %v6881_v33, %v6880_v16 }
 0x1ac   : > { %v3016_v60 = vld [vmem:[#allocation2 + $0x98] sm:$0xf]  ;;  %v2761_v34 = vsel %vm7627_vm2, %v2753_v25, %v2760_v22  ;;  %v3150_v9 = vrot.slane %v3148_v32, 5  ;;  %v3017_v57 = vld [vmem:[#allocation2 + $0x9c] sm:$0x1]  ;;  %v3169_v52 = vshrl.u32 %v3015_v18, 16  ;;  %v6796_v22 = vpop.f32.mrf.mxu0  ;;  %v6886_v32 = vpop.f32.mrf.mxu1 }
 0x1ad   : > { %v3172_v23 = vshll.u32 %v3015_v18, 16  ;;  %2925 = vst [vmem:[#allocation3 + $0x30c] sm:$0xf] %v2761_v34  ;;  %v3156_v44 = vrot.slane %v3154_v12, 5  ;;  %v3160_v35 = vrot.slane %v3158_v14, 4  ;;  %v3166_v1 = vrot.slane %v3164_v43, 5 }
 0x1ae   : > { %v3178_v38 = vshll.u32 %v3016_v60, 16  ;;  %v7503_v49 = vld [vmem:[#allocation3 + $0xb0] ss:$36 sps:$4 sm:$0xff]   ;;  %v3151_v26 = vor.u32 %v3150_v9, %v3147_v19  ;;  %v3171_v11 = vrot.slane %v3169_v52, 4  ;;  %v3182_v24 = vshrl.u32 %v3016_v60, 16  ;;  %v6887_v33 = vpop.f32.mrf.mxu1 }
 0x1af   : > { %v3174_v3 = vrot.slane %v3172_v23, 5  ;;  %v3161_v55 = vor.u32 %v3160_v35, %v3156_v44  ;;  %v3188_v47 = vshll.u32 %v3017_v57, 16  ;;  %v2505_v25 = vld [vmem:[#allocation2 + $0x108] sm:$0x8]  ;;  %7202 = vmatprep.mubr.bf16.mxu0 %v7503_v49  ;;  %v2506_v12 = vld [vmem:[#allocation2 + $0x10c] sm:$0xf]  ;;  %v8349_v29 = vadd.f32 %v6882_v8, %v8227_v13 }
 0x1b0   : > { %v3180_v40 = vrot.slane %v3178_v38, 5  ;;  %v3152_v18 = vrot.slane %v3151_v26, 4  ;;  %v2507_v14 = vld [vmem:[#allocation2 + $0x110] sm:$0xf]  ;;  %v2763_v43 = vshrl.u32 %v2505_v25, 16  ;;  %v3184_v9 = vrot.slane %v3182_v24, 4 }
 0x1b1   : > { %v3175_v34 = vor.u32 %v3174_v3, %v3171_v11  ;;  %v3162_v19 = vrot.slane %v3161_v55, 4  ;;  %v3190_v52 = vrot.slane %v3188_v47, 5  ;;  %v2768_v16 = vshrl.u32 %v2506_v12, 16  ;;  %v2958_v3 = vld [vmem:[#allocation2 + $0x10c] sm:$0xf]  ;;  %v8357_v55 = vpop.f32.mrf.mxu1 }
 0x1b2   : > { %v7504_v23 = vld [vmem:[#allocation3 + $0xf8] ss:$36 sps:$4 sm:$0xff]   ;;  %v3157_v60 = vsel %vm7768_vm5, %v3152_v18, %v3156_v44  ;;  %v8353_v35 = vadd.f32 %v6796_v22, %v6795_v61  ;;  %v6885_v38 = vadd.f32 %v6884_v56, %v6883_v51  ;;  %v3185_v26 = vor.u32 %v3184_v9, %v3180_v40  ;;  %v2959_v8 = vld [vmem:[#allocation2 + $0x110] sm:$0xf]  ;;  %v7507_v47 = vld [vmem:[#allocation3 + $0x2ec] ss:$36 sps:$4 sm:$0xff]  }
 0x1b3   : > { %v3176_v57 = vrot.slane %v3175_v34, 4  ;;  %v3167_v49 = vsel %vm7768_vm5, %v3162_v19, %v3166_v1  ;;  %3472 = vst [vmem:[#allocation3 + $0x140] sm:$0xf] %v3157_v60  ;;  %v6246_v13 = vrot.slane %v2763_v43, 11  ;;  %v2770_v11 = vrot.slane %v2768_v16, 7  ;;  %7203 = vmatmul.mubr.bf16.gmra.mxu0 %v7504_v23  ;;  %v6950_v1 = vpop.f32.mrf.mxu0  ;;  %5563 = vmatprep.mubr.bf16.mxu1 %v7507_v47 }
 0x1b4   : > { %v7505_v24 = vld [vmem:[#allocation3 + $0x2e8] ss:$36 sps:$4 sm:$0xff]   ;;  %3473 = vst [vmem:[#allocation3 + $0x164] sm:$0xf] %v3167_v49  ;;  %v2771_v44 = vshll.u32 %v2506_v12, 16  ;;  %v8362_v51 = vadd.f32 %v6885_v38, %v8317_v10  ;;  %v6888_v56 = vadd.f32 %v6887_v33, %v6886_v32  ;;  %v3186_v25 = vrot.slane %v3185_v26, 4  ;;  %v6890_v10 = vpop.f32.mrf.mxu1 }
 0x1b5   : > { %v3181_v61 = vsel %vm7768_vm5, %v3176_v57, %v3180_v40  ;;  %2990 = vst [vmem:[#allocation3 + $0x334] sm:$0xf] %v2958_v3  ;;  %2991 = vst [vmem:[#allocation3 + $0x358] sm:$0xf] %v2959_v8  ;;  %v2775_v22 = vrot.slane %v2770_v11, 4  ;;  %v2777_v18 = vshrl.u32 %v2507_v14, 16  ;;  %v6951_v60 = vpop.f32.mrf.mxu0  ;;  %5564 = vmatmul.mubr.bf16.gmra.mxu1 %v7505_v24 }
 0x1b6   : > { %9031 = vst [vmem:[#allocation9_spill] sm:$0xff] %v8362_v51  ;;  %3474 = vst [vmem:[#allocation3 + $0x188] sm:$0xf] %v3181_v61  ;;  %v2780_v34 = vshll.u32 %v2507_v14, 16  ;;  %v3018_v43 = vld [vmem:[#allocation2 + $0xa8] sm:$0xf]  ;;  %v2773_v19 = vor.u32 %v2771_v44, %v2770_v11  ;;  %v8365_v12 = vadd.f32 %v6888_v56, %v8248_v63  ;;  %v3191_v32 = vsel %vm7768_vm5, %v3186_v25, %v3190_v52 }
 0x1b7   : > { %v3019_v9 = vld [vmem:[#allocation2 + $0xac] sm:$0xf]  ;;  %v3020_v16 = vld [vmem:[#allocation2 + $0xb0] sm:$0x1]  ;;  %v3193_v23 = vshrl.u32 %v3018_v43, 16  ;;  %v3196_v40 = vshll.u32 %v3018_v43, 16  ;;  %v8371_v63 = vpop.f32.mrf.mxu0  ;;  %v6891_v51 = vadd.f32 %v6890_v10, %v8357_v55 }
 0x1b8   : > { %9032 = vst [vmem:[#allocation10_spill] sm:$0xff] %v8365_v12  ;;  %v2779_v33 = vrot.slane %v2777_v18, 7  ;;  %v3202_v57 = vshll.u32 %v3019_v9, 16  ;;  %v3206_v38 = vshrl.u32 %v3019_v9, 16  ;;  %v3021_v14 = vld [vmem:[#allocation2 + $0xbc] sm:$0xf]  ;;  %v2774_v49 = vsel %vm7627_vm2, %v6246_v13, %v2773_v19  ;;  %v6892_v9 = vpop.f32.mrf.mxu1 }
 0x1b9   : > { %3475 = vst [vmem:[#allocation3 + $0x1ac] sm:$0xf] %v3191_v32  ;;  %v3195_v26 = vrot.slane %v3193_v23, 4  ;;  %v3198_v11 = vrot.slane %v3196_v40, 5  ;;  %v3212_v3 = vshll.u32 %v3020_v16, 16  ;;  %v3217_v52 = vshrl.u32 %v3021_v14, 16 }
 0x1ba   : > { %v3022_v8 = vld [vmem:[#allocation2 + $0xc0] sm:$0xf]  ;;  %v2782_v47 = vor.u32 %v2780_v34, %v2779_v33  ;;  %2926 = vst [vmem:[#allocation3 + $0x330] sm:$0xf] %v2774_v49  ;;  %v3204_v24 = vrot.slane %v3202_v57, 5  ;;  %v3208_v61 = vrot.slane %v3206_v38, 4  ;;  %v6954_v38 = vpop.f32.mrf.mxu0  ;;  %v6893_v49 = vpop.f32.mrf.mxu1  ;;  %v6952_v12 = vadd.f32 %v6951_v60, %v6950_v1 }
 0x1bb   : > { %v3023_v44 = vld [vmem:[#allocation2 + $0xc4] sm:$0x1]  ;;  %v3199_v56 = vor.u32 %v3198_v11, %v3195_v26  ;;  %v3214_v25 = vrot.slane %v3212_v3, 5  ;;  %v3220_v18 = vshll.u32 %v3021_v14, 16  ;;  %v3226_v43 = vshll.u32 %v3022_v8, 16 }
 0x1bc   : > { %v7508_v32 = vld [vmem:[#allocation3 + $0x140] ss:$36 sps:$4 sm:$0xff]   ;;  %v2783_v13 = vsel %vm7627_vm2, %v2775_v22, %v2782_v47  ;;  %v3209_v19 = vor.u32 %v3208_v61, %v3204_v24  ;;  %v3219_v16 = vrot.slane %v3217_v52, 4  ;;  %v3230_v23 = vshrl.u32 %v3022_v8, 16  ;;  %v2508_v14 = vld [vmem:[#allocation2 + $0x11c] sm:$0x8]  ;;  %v8380_v1 = vpop.f32.mrf.mxu1 }
 0x1bd   : > { %2927 = vst [vmem:[#allocation3 + $0x354] sm:$0xf] %v2783_v13  ;;  %v3200_v40 = vrot.slane %v3199_v56, 4  ;;  %v3222_v34 = vrot.slane %v3220_v18, 5  ;;  %v3228_v33 = vrot.slane %v3226_v43, 5  ;;  %v3236_v57 = vshll.u32 %v3023_v44, 16  ;;  %7206 = vmatprep.mubr.bf16.mxu0 %v7508_v32 }
 0x1be   : > { %v3210_v26 = vrot.slane %v3209_v19, 4  ;;  %v3232_v11 = vrot.slane %v3230_v23, 4  ;;  %v2509_v3 = vld [vmem:[#allocation2 + $0x120] sm:$0xf]  ;;  %v2510_v61 = vld [vmem:[#allocation2 + $0x124] sm:$0xf]  ;;  %v6956_v19 = vpop.f32.mrf.mxu0 }
 0x1bf   : > { %v3205_v22 = vsel %vm7768_vm5, %v3200_v40, %v3204_v24  ;;  %v3223_v47 = vor.u32 %v3222_v34, %v3219_v16  ;;  %v3238_v8 = vrot.slane %v3236_v57, 5  ;;  %v2785_v52 = vshrl.u32 %v2508_v14, 16  ;;  %v2960_v56 = vld [vmem:[#allocation2 + $0x120] sm:$0xf]  ;;  %v2961_v40 = vld [vmem:[#allocation2 + $0x124] sm:$0xf] }
 0x1c0   : > { %v7509_v18 = vld [vmem:[#allocation3 + $0x188] ss:$36 sps:$4 sm:$0xff]   ;;  %v3215_v44 = vsel %vm7768_vm5, %v3210_v26, %v3214_v25  ;;  %3476 = vst [vmem:[#allocation3 + $0x1d0] sm:$0xf] %v3205_v22  ;;  %v3233_v43 = vor.u32 %v3232_v11, %v3228_v33  ;;  %v2790_v32 = vshrl.u32 %v2509_v3, 16  ;;  %v2793_v13 = vshll.u32 %v2509_v3, 16 }
 0x1c1   : > { %2992 = vst [vmem:[#allocation3 + $0x37c] sm:$0xf] %v2960_v56  ;;  %3477 = vst [vmem:[#allocation3 + $0x1f4] sm:$0xf] %v3215_v44  ;;  %v3224_v55 = vrot.slane %v3223_v47, 4  ;;  %v6247_v60 = vrot.slane %v2785_v52, 11  ;;  %7207 = vmatmul.mubr.bf16.gmra.mxu0 %v7509_v18  ;;  %v8383_v25 = vadd.f32 %v6952_v12, %v8164_v36  ;;  %v8386_v57 = vadd.f32 %v6891_v51, %v8250_v45  ;;  %v6896_v18 = vpop.f32.mrf.mxu1 }
 0x1c2   : > { %v2799_v10 = vshrl.u32 %v2510_v61, 16  ;;  %v2802_v24 = vshll.u32 %v2510_v61, 16  ;;  %v3234_v16 = vrot.slane %v3233_v43, 4  ;;  %v2792_v23 = vrot.slane %v2790_v32, 7  ;;  %v3024_v34 = vld [vmem:[#allocation2 + $0xd0] sm:$0xf]  ;;  %v6957_v61 = vpop.f32.mrf.mxu0 }
 0x1c3   : > { %9033 = vst [vmem:[#allocation11_spill] sm:$0xff] %v8383_v25  ;;  %v3229_v26 = vsel %vm7768_vm5, %v3224_v55, %v3228_v33  ;;  %2993 = vst [vmem:[#allocation3 + $0x3a0] sm:$0xf] %v2961_v40  ;;  %v3025_v14 = vld [vmem:[#allocation2 + $0xd4] sm:$0xf]  ;;  %v3241_v22 = vshrl.u32 %v3024_v34, 16  ;;  %v6955_v47 = vadd.f32 %v6954_v38, %v8371_v63  ;;  %v6894_v51 = vadd.f32 %v6893_v49, %v6892_v9 }
 0x1c4   : > { %v2801_v11 = vrot.slane %v2799_v10, 7  ;;  %v3026_v3 = vld [vmem:[#allocation2 + $0xd8] sm:$0x1]  ;;  %v7512_v56 = vld [vmem:[#allocation3 + $0x334] ss:$36 sps:$4 sm:$0xff]   ;;  %v3239_v36 = vsel %vm7768_vm5, %v3234_v16, %v3238_v8  ;;  %v2795_v12 = vor.u32 %v2793_v13, %v2792_v23  ;;  %v2797_v45 = vrot.slane %v2792_v23, 4  ;;  %v6959_v10 = vpop.f32.mrf.mxu0 }
 0x1c5   : > { %v7510_v52 = vld [vmem:[#allocation3 + $0x330] ss:$36 sps:$4 sm:$0xff]   ;;  %3478 = vst [vmem:[#allocation3 + $0x218] sm:$0xf] %v3229_v26  ;;  %3479 = vst [vmem:[#allocation3 + $0x23c] sm:$0xf] %v3239_v36  ;;  %5571 = vmatprep.mubr.bf16.mxu1 %v7512_v56  ;;  %v8396_v13 = vadd.f32 %v6955_v47, %v8166_v53 }
 0x1c6   : > { %v2804_v33 = vor.u32 %v2802_v24, %v2801_v11  ;;  %v3243_v44 = vrot.slane %v3241_v22, 4  ;;  %v3244_v43 = vshll.u32 %v3024_v34, 16  ;;  %v3250_v32 = vshll.u32 %v3025_v14, 16  ;;  %v3027_v55 = vld [vmem:[#allocation2 + $0xe4] sm:$0xf]  ;;  %5572 = vmatmul.mubr.bf16.gmra.mxu1 %v7510_v52  ;;  %v6960_v56 = vpop.f32.mrf.mxu0 }
 0x1c7   : > { %v2796_v63 = vsel %vm7627_vm2, %v6247_v60, %v2795_v12  ;;  %v3254_v38 = vshrl.u32 %v3025_v14, 16  ;;  %v3260_v40 = vshll.u32 %v3026_v3, 16  ;;  %v3028_v25 = vld [vmem:[#allocation2 + $0xe8] sm:$0xf]  ;;  %v3029_v8 = vld [vmem:[#allocation2 + $0xec] sm:$0x1]  ;;  %v8401_v60 = vadd.f32 %v6894_v51, %v8267_v21  ;;  %v6898_v14 = vpop.f32.mrf.mxu1 }
 0x1c8   : > { %9034 = vst [vmem:[#allocation12_spill] sm:$0xff] %v8396_v13  ;;  %v2805_v9 = vsel %vm7627_vm2, %v2797_v45, %v2804_v33  ;;  %2928 = vst [vmem:[#allocation3 + $0x378] sm:$0xf] %v2796_v63  ;;  %v3246_v49 = vrot.slane %v3244_v43, 5  ;;  %v3252_v24 = vrot.slane %v3250_v32, 5  ;;  %v3265_v16 = vshrl.u32 %v3027_v55, 16 }
 0x1c9   : > { %v7513_v23 = vld [vmem:[#allocation3 + $0x1d0] ss:$36 sps:$4 sm:$0xff]   ;;  %2929 = vst [vmem:[#allocation3 + $0x39c] sm:$0xf] %v2805_v9  ;;  %v3256_v34 = vrot.slane %v3254_v38, 4  ;;  %v3262_v26 = vrot.slane %v3260_v40, 5  ;;  %v6958_v11 = vadd.f32 %v6957_v61, %v6956_v19  ;;  %v6899_v32 = vpop.f32.mrf.mxu1  ;;  %v6897_v40 = vadd.f32 %v6896_v18, %v8380_v1 }
 0x1ca   : > { %v3247_v3 = vor.u32 %v3246_v49, %v3243_v44  ;;  %v3267_v53 = vrot.slane %v3265_v16, 4  ;;  %v3268_v22 = vshll.u32 %v3027_v55, 16  ;;  %v3274_v47 = vshll.u32 %v3028_v25, 16  ;;  %v2511_v52 = vld [vmem:[#allocation2 + $0x130] sm:$0x8]  ;;  %7210 = vmatprep.mubr.bf16.mxu0 %v7513_v23 }
 0x1cb   : > { %v3257_v36 = vor.u32 %v3256_v34, %v3252_v24  ;;  %v3278_v12 = vshrl.u32 %v3028_v25, 16  ;;  %v3284_v45 = vshll.u32 %v3029_v8, 16  ;;  %v2512_v33 = vld [vmem:[#allocation2 + $0x134] sm:$0xf]  ;;  %v8404_v43 = vadd.f32 %v6958_v11, %v8189_v27  ;;  %v2513_v19 = vld [vmem:[#allocation2 + $0x138] sm:$0xf]  ;;  %v8409_v34 = vpop.f32.mrf.mxu0  ;;  %v8411_v11 = vpop.f32.mrf.mxu1 }
 0x1cc   : > { %v3248_v63 = vrot.slane %v3247_v3, 4  ;;  %v3270_v21 = vrot.slane %v3268_v22, 5  ;;  %v3276_v51 = vrot.slane %v3274_v47, 5  ;;  %v2807_v61 = vshrl.u32 %v2511_v52, 16  ;;  %v7514_v44 = vld [vmem:[#allocation3 + $0x218] ss:$36 sps:$4 sm:$0xff]  }
 0x1cd   : > { %v3258_v38 = vrot.slane %v3257_v36, 4  ;;  %v3280_v55 = vrot.slane %v3278_v12, 4  ;;  %v6961_v9 = vadd.f32 %v6960_v56, %v6959_v10  ;;  %v3286_v49 = vrot.slane %v3284_v45, 5  ;;  %v2962_v27 = vld [vmem:[#allocation2 + $0x134] sm:$0xf]  ;;  %7211 = vmatmul.mubr.bf16.gmra.mxu0 %v7514_v44  ;;  %v8421_v12 = vpop.f32.mrf.mxu0 }
 0x1ce   : > { %v3253_v25 = vsel %vm7768_vm5, %v3248_v63, %v3252_v24  ;;  %v3271_v8 = vor.u32 %v3270_v21, %v3267_v53  ;;  %v6248_v16 = vrot.slane %v2807_v61, 11  ;;  %v2963_v23 = vld [vmem:[#allocation2 + $0x138] sm:$0xf]  ;;  %v2812_v1 = vshrl.u32 %v2512_v33, 16  ;;  %2994 = vst [vmem:[#allocation3 + $0x3c4] sm:$0xf] %v2962_v27 }
 0x1cf   : > { %v3263_v3 = vsel %vm7768_vm5, %v3258_v38, %v3262_v26  ;;  %3480 = vst [vmem:[#allocation3 + $0x260] sm:$0xf] %v3253_v25  ;;  %v3281_v22 = vor.u32 %v3280_v55, %v3276_v51  ;;  %v2815_v18 = vshll.u32 %v2512_v33, 16  ;;  %2995 = vst [vmem:[#allocation3 + $0x3e8] sm:$0xf] %v2963_v23  ;;  %v8416_v52 = vadd.f32 %v6897_v40, %v8269_v15  ;;  %v6902_v40 = vpop.f32.mrf.mxu1 }
 0x1d0   : > { %v3030_v10 = vld [vmem:[#allocation2 + $0xf8] sm:$0xf]  ;;  %v7515_v24 = vld [vmem:[#allocation3 + $0x378] ss:$36 sps:$4 sm:$0xff]   ;;  %3481 = vst [vmem:[#allocation3 + $0x284] sm:$0xf] %v3263_v3  ;;  %v8419_v56 = vadd.f32 %v6961_v9, %v8198_v39  ;;  %v6900_v36 = vadd.f32 %v6899_v32, %v6898_v14 }
 0x1d1   : > { %v7517_v53 = vld [vmem:[#allocation3 + $0x37c] ss:$36 sps:$4 sm:$0xff]   ;;  %v3272_v47 = vrot.slane %v3271_v8, 4  ;;  %v3282_v26 = vrot.slane %v3281_v22, 4  ;;  %v2814_v45 = vrot.slane %v2812_v1, 7  ;;  %v2821_v63 = vshrl.u32 %v2513_v19, 16  ;;  %v8427_v22 = vpop.f32.mrf.mxu0 }
 0x1d2   : > { %v2824_v33 = vshll.u32 %v2513_v19, 16  ;;  %v3031_v21 = vld [vmem:[#allocation2 + $0xfc] sm:$0xf]  ;;  %5579 = vmatprep.mubr.bf16.mxu1 %v7517_v53  ;;  %v3032_v44 = vld [vmem:[#allocation2 + $0x100] sm:$0x1]  ;;  %v3289_v38 = vshrl.u32 %v3030_v10, 16 }
 0x1d3   : > { %v3277_v61 = vsel %vm7768_vm5, %v3272_v47, %v3276_v51  ;;  %v3292_v55 = vshll.u32 %v3030_v10, 16  ;;  %v3298_v15 = vshll.u32 %v3031_v21, 16  ;;  %5580 = vmatmul.mubr.bf16.gmra.mxu1 %v7515_v24  ;;  %v3287_v39 = vsel %vm7768_vm5, %v3282_v26, %v3286_v49  ;;  %v3033_v25 = vld [vmem:[#allocation2 + $0x10c] sm:$0xf]  ;;  %v3034_v19 = vld [vmem:[#allocation2 + $0x110] sm:$0xf] }
 0x1d4   : > { %3482 = vst [vmem:[#allocation3 + $0x2a8] sm:$0xf] %v3277_v61  ;;  %v2817_v14 = vor.u32 %v2815_v18, %v2814_v45  ;;  %v2819_v32 = vrot.slane %v2814_v45, 4  ;;  %v2823_v9 = vrot.slane %v2821_v63, 7  ;;  %3483 = vst [vmem:[#allocation3 + $0x2cc] sm:$0xf] %v3287_v39  ;;  %v8431_v61 = vpop.f32.mrf.mxu1 }
 0x1d5   : > { %v3291_v8 = vrot.slane %v3289_v38, 4  ;;  %v3294_v27 = vrot.slane %v3292_v55, 5  ;;  %v3300_v23 = vrot.slane %v3298_v15, 5  ;;  %v3302_v51 = vshrl.u32 %v3031_v21, 16  ;;  %v3035_v3 = vld [vmem:[#allocation2 + $0x114] sm:$0x1] }
 0x1d6   : > { %v2818_v1 = vsel %vm7627_vm2, %v6248_v16, %v2817_v14  ;;  %v2826_v10 = vor.u32 %v2824_v33, %v2823_v9  ;;  %v3308_v24 = vshll.u32 %v3032_v44, 16  ;;  %v3313_v49 = vshrl.u32 %v3033_v25, 16  ;;  %v2514_v53 = vld [vmem:[#allocation2 + $0x144] sm:$0x8]  ;;  %v2515_v18 = vld [vmem:[#allocation2 + $0x148] sm:$0xf] }
 0x1d7   : > { %2930 = vst [vmem:[#allocation3 + $0x3c0] sm:$0xf] %v2818_v1  ;;  %v3295_v47 = vor.u32 %v3294_v27, %v3291_v8  ;;  %v3304_v26 = vrot.slane %v3302_v51, 4  ;;  %v3316_v45 = vshll.u32 %v3033_v25, 16  ;;  %v3322_v63 = vshll.u32 %v3034_v19, 16  ;;  %v6966_v25 = vpop.f32.mrf.mxu0  ;;  %v8440_v8 = vpop.f32.mrf.mxu1 }
 0x1d8   : > { %v7518_v38 = vld [vmem:[#allocation3 + $0x260] ss:$36 sps:$4 sm:$0xff]   ;;  %v2827_v21 = vsel %vm7627_vm2, %v2819_v32, %v2826_v10  ;;  %v3310_v55 = vrot.slane %v3308_v24, 5  ;;  %v3315_v15 = vrot.slane %v3313_v49, 4  ;;  %v8436_v16 = vadd.f32 %v6900_v36, %v8300_v62 }
 0x1d9   : > { %2931 = vst [vmem:[#allocation3 + $0x3e4] sm:$0xf] %v2827_v21  ;;  %v3296_v33 = vrot.slane %v3295_v47, 4  ;;  %v3305_v44 = vor.u32 %v3304_v26, %v3300_v23  ;;  %v3318_v39 = vrot.slane %v3316_v45, 5  ;;  %v3324_v14 = vrot.slane %v3322_v63, 5  ;;  %7214 = vmatprep.mubr.bf16.mxu0 %v7518_v38 }
 0x1da   : > { %v8438_v9 = vld [vmem:[#allocation2 + $0x14c] sm:$0xf]  ;;  %v3326_v27 = vshrl.u32 %v3034_v19, 16  ;;  %v3332_v51 = vshll.u32 %v3035_v3, 16  ;;  %v2829_v1 = vshrl.u32 %v2514_v53, 16  ;;  %v2834_v32 = vshrl.u32 %v2515_v18, 16  ;;  %v8447_v53 = vpop.f32.mrf.mxu1 }
 0x1db   : > { %v2964_v10 = vld [vmem:[#allocation2 + $0x148] sm:$0xf]  ;;  %v3301_v62 = vsel %vm7768_vm5, %v3296_v33, %v3300_v23  ;;  %v3306_v36 = vrot.slane %v3305_v44, 4  ;;  %v3319_v24 = vor.u32 %v3318_v39, %v3315_v15  ;;  %v2837_v49 = vshll.u32 %v2515_v18, 16  ;;  %v2965_v47 = vld [vmem:[#allocation2 + $0x14c] sm:$0xf]  ;;  %v8451_v33 = vpop.f32.mrf.mxu0 }
 0x1dc   : > { %2996 = vst [vmem:[#allocation3 + $0x40c] sm:$0xf] %v2964_v10  ;;  %v7519_v26 = vld [vmem:[#allocation3 + $0x2a8] ss:$36 sps:$4 sm:$0xff]   ;;  %3484 = vst [vmem:[#allocation3 + $0x2f0] sm:$0xf] %v3301_v62  ;;  %v6964_v19 = vadd.f32 %v8421_v12, %v8409_v34  ;;  %v6903_v3 = vadd.f32 %v6902_v40, %v8411_v11 }
 0x1dd   : > { %v3328_v45 = vrot.slane %v3326_v27, 4  ;;  %v3334_v63 = vrot.slane %v3332_v51, 5  ;;  %2997 = vst [vmem:[#allocation3 + $0x430] sm:$0xf] %v2965_v47  ;;  %v3311_v23 = vsel %vm7768_vm5, %v3306_v36, %v3310_v55  ;;  %v3320_v38 = vrot.slane %v3319_v24, 4  ;;  %7215 = vmatmul.mubr.bf16.gmra.mxu0 %v7519_v26  ;;  %v8457_v10 = vpop.f32.mrf.mxu0 }
 0x1de   : > { %v6249_v21 = vrot.slane %v2829_v1, 11  ;;  %v2836_v18 = vrot.slane %v2834_v32, 7  ;;  %v3036_v15 = vld [vmem:[#allocation2 + $0x120] sm:$0xf]  ;;  %3485 = vst [vmem:[#allocation3 + $0x314] sm:$0xf] %v3311_v23  ;;  %v8460_v47 = vadd.f32 %v6964_v19, %v8211_v20  ;;  %v6967_v26 = vadd.f32 %v6966_v25, %v8427_v22 }
 0x1df   : > { %v3329_v44 = vor.u32 %v3328_v45, %v3324_v14  ;;  %v2843_v39 = vshrl.u32 %v8438_v9, 16  ;;  %v2846_v34 = vshll.u32 %v8438_v9, 16  ;;  %v3037_v12 = vld [vmem:[#allocation2 + $0x124] sm:$0xf]  ;;  %v3337_v11 = vshrl.u32 %v3036_v15, 16 }
 0x1e0   : > { %v3325_v40 = vsel %vm7768_vm5, %v3320_v38, %v3324_v14  ;;  %v2839_v27 = vor.u32 %v2837_v49, %v2836_v18  ;;  %v2841_v55 = vrot.slane %v2836_v18, 4  ;;  %v3038_v51 = vld [vmem:[#allocation2 + $0x128] sm:$0x1]  ;;  %v3340_v1 = vshll.u32 %v3036_v15, 16  ;;  %v3039_v32 = vld [vmem:[#allocation2 + $0x134] sm:$0xf]  ;;  %v8466_v14 = vpop.f32.mrf.mxu1 }
 0x1e1   : > { %v7520_v62 = vld [vmem:[#allocation3 + $0x3c0] ss:$36 sps:$4 sm:$0xff]   ;;  %v3330_v24 = vrot.slane %v3329_v44, 4  ;;  %3486 = vst [vmem:[#allocation3 + $0x338] sm:$0xf] %v3325_v40  ;;  %9035 = vst [vmem:[#allocation13_spill] sm:$0xff] %v8460_v47  ;;  %v8463_v9 = vadd.f32 %v6903_v3, %v8302_v42  ;;  %v8472_v44 = vpop.f32.mrf.mxu0 }
 0x1e2   : > { %v7522_v36 = vld [vmem:[#allocation3 + $0x3c4] ss:$36 sps:$4 sm:$0xff]   ;;  %v2840_v49 = vsel %vm7627_vm2, %v6249_v21, %v2839_v27  ;;  %v2845_v45 = vrot.slane %v2843_v39, 7  ;;  %v3339_v23 = vrot.slane %v3337_v11, 4  ;;  %v3342_v38 = vrot.slane %v3340_v1, 5 }
 0x1e3   : > { %v3040_v18 = vld [vmem:[#allocation2 + $0x138] sm:$0xf]  ;;  %5587 = vmatprep.mubr.bf16.mxu1 %v7522_v36  ;;  %v3335_v15 = vsel %vm7768_vm5, %v3330_v24, %v3334_v63  ;;  %2932 = vst [vmem:[#allocation3 + $0x408] sm:$0xf] %v2840_v49  ;;  %v3346_v20 = vshll.u32 %v3037_v12, 16  ;;  %v3350_v19 = vshrl.u32 %v3037_v12, 16  ;;  %v8474_v63 = vpop.f32.mrf.mxu1 }
 0x1e4   : > { %v3356_v42 = vshll.u32 %v3038_v51, 16  ;;  %v3041_v3 = vld [vmem:[#allocation2 + $0x13c] sm:$0x1]  ;;  %5588 = vmatmul.mubr.bf16.gmra.mxu1 %v7520_v62  ;;  %3487 = vst [vmem:[#allocation3 + $0x35c] sm:$0xf] %v3335_v15  ;;  %v2848_v22 = vor.u32 %v2846_v34, %v2845_v45  ;;  %v3343_v25 = vor.u32 %v3342_v38, %v3339_v23  ;;  %v3361_v21 = vshrl.u32 %v3039_v32, 16  ;;  %v8481_v15 = vpop.f32.mrf.mxu0 }
 0x1e5   : > { %v3364_v39 = vshll.u32 %v3039_v32, 16  ;;  %v2517_v11 = vld [vmem:[#allocation2 + $0x158] sm:$0x8]  ;;  %v3348_v40 = vrot.slane %v3346_v20, 5  ;;  %v3352_v27 = vrot.slane %v3350_v19, 4  ;;  %v3370_v36 = vshll.u32 %v3040_v18, 16  ;;  %v8483_v20 = vpop.f32.mrf.mxu1 }
 0x1e6   : > { %v3358_v1 = vrot.slane %v3356_v42, 5  ;;  %v2518_v47 = vld [vmem:[#allocation2 + $0x15c] sm:$0xf]  ;;  %v2849_v12 = vsel %vm7627_vm2, %v2841_v55, %v2848_v22  ;;  %v3344_v51 = vrot.slane %v3343_v25, 4  ;;  %v3363_v49 = vrot.slane %v3361_v21, 4 }
 0x1e7   : > { %v7523_v24 = vld [vmem:[#allocation3 + $0x2f0] ss:$36 sps:$4 sm:$0xff]   ;;  %v8479_v62 = vadd.f32 %v6967_v26, %v8221_v17  ;;  %2933 = vst [vmem:[#allocation3 + $0x42c] sm:$0xf] %v2849_v12  ;;  %v3353_v34 = vor.u32 %v3352_v27, %v3348_v40  ;;  %v3366_v32 = vrot.slane %v3364_v39, 5  ;;  %v3372_v45 = vrot.slane %v3370_v36, 5 }
 0x1e8   : > { %v3374_v23 = vshrl.u32 %v3040_v18, 16  ;;  %v2519_v38 = vld [vmem:[#allocation2 + $0x160] sm:$0xf]  ;;  %7218 = vmatprep.mubr.bf16.mxu0 %v7523_v24  ;;  %v3349_v19 = vsel %vm7768_vm5, %v3344_v51, %v3348_v40  ;;  %v3380_v55 = vshll.u32 %v3041_v3, 16  ;;  %v2851_v42 = vshrl.u32 %v2517_v11, 16  ;;  %v8489_v11 = vpop.f32.mrf.mxu0  ;;  %v8491_v51 = vpop.f32.mrf.mxu1 }
 0x1e9   : > { %9036 = vst [vmem:[#allocation14_spill] sm:$0xff] %v8479_v62  ;;  %v2856_v22 = vshrl.u32 %v2518_v47, 16  ;;  %v3354_v25 = vrot.slane %v3353_v34, 4  ;;  %3488 = vst [vmem:[#allocation3 + $0x380] sm:$0xf] %v3349_v19  ;;  %v3367_v17 = vor.u32 %v3366_v32, %v3363_v49  ;;  %v2859_v21 = vshll.u32 %v2518_v47, 16 }
 0x1ea   : > { %v3376_v26 = vrot.slane %v3374_v23, 4  ;;  %v2966_v39 = vld [vmem:[#allocation2 + $0x15c] sm:$0xf]  ;;  %v3382_v27 = vrot.slane %v3380_v55, 5  ;;  %v6250_v18 = vrot.slane %v2851_v42, 11  ;;  %v2865_v12 = vshrl.u32 %v2519_v38, 16 }
 0x1eb   : > { %v2858_v36 = vrot.slane %v2856_v22, 7  ;;  %2998 = vst [vmem:[#allocation3 + $0x454] sm:$0xf] %v2966_v39  ;;  %v7524_v62 = vld [vmem:[#allocation3 + $0x338] ss:$36 sps:$4 sm:$0xff]   ;;  %v3359_v24 = vsel %vm7768_vm5, %v3354_v25, %v3358_v1  ;;  %v3368_v13 = vrot.slane %v3367_v17, 4  ;;  %v6906_v19 = vadd.f32 %v8440_v8, %v8431_v61  ;;  %v6975_v17 = vpop.f32.mrf.mxu0 }
 0x1ec   : > { %v3377_v40 = vor.u32 %v3376_v26, %v3372_v45  ;;  %v2868_v3 = vshll.u32 %v2519_v38, 16  ;;  %3489 = vst [vmem:[#allocation3 + $0x3a4] sm:$0xf] %v3359_v24  ;;  %v2867_v34 = vrot.slane %v2865_v12, 7  ;;  %v2967_v32 = vld [vmem:[#allocation2 + $0x160] sm:$0xf]  ;;  %7219 = vmatmul.mubr.bf16.gmra.mxu0 %v7524_v62  ;;  %v6970_v25 = vadd.f32 %v8457_v10, %v8451_v33  ;;  %v6914_v10 = vpop.f32.mrf.mxu1 }
 0x1ed   : > { %v2861_v49 = vor.u32 %v2859_v21, %v2858_v36  ;;  %v2863_v47 = vrot.slane %v2858_v36, 4  ;;  %v3042_v23 = vld [vmem:[#allocation2 + $0x148] sm:$0xf]  ;;  %v3373_v1 = vsel %vm7768_vm5, %v3368_v13, %v3372_v45  ;;  %2999 = vst [vmem:[#allocation3 + $0x478] sm:$0xf] %v2967_v32  ;;  %v8502_v62 = vadd.f32 %v6906_v19, %v8340_v50 }
 0x1ee   : > { %v3378_v55 = vrot.slane %v3377_v40, 4  ;;  %v3043_v38 = vld [vmem:[#allocation2 + $0x14c] sm:$0xf]  ;;  %v3044_v42 = vld [vmem:[#allocation2 + $0x150] sm:$0x1]  ;;  %v3385_v22 = vshrl.u32 %v3042_v23, 16  ;;  %v2870_v61 = vor.u32 %v2868_v3, %v2867_v34  ;;  %v8509_v50 = vadd.f32 %v6970_v25, %v8236_v46  ;;  %v6916_v25 = vpop.f32.mrf.mxu1 }
 0x1ef   : > { %v7525_v26 = vld [vmem:[#allocation3 + $0x408] ss:$36 sps:$4 sm:$0xff]   ;;  %3490 = vst [vmem:[#allocation3 + $0x3c8] sm:$0xf] %v3373_v1  ;;  %v2862_v39 = vsel %vm7627_vm2, %v6250_v18, %v2861_v49  ;;  %v3388_v8 = vshll.u32 %v3042_v23, 16  ;;  %v3394_v36 = vshll.u32 %v3043_v38, 16  ;;  %v6977_v49 = vpop.f32.mrf.mxu0  ;;  %v6909_v46 = vadd.f32 %v8466_v14, %v8447_v53 }
 0x1f0   : > { %v7527_v21 = vld [vmem:[#allocation3 + $0x40c] ss:$36 sps:$4 sm:$0xff]   ;;  %v3383_v13 = vsel %vm7768_vm5, %v3378_v55, %v3382_v27  ;;  %2934 = vst [vmem:[#allocation3 + $0x450] sm:$0xf] %v2862_v39  ;;  %v3387_v45 = vrot.slane %v3385_v22, 4  ;;  %v3398_v12 = vshrl.u32 %v3043_v38, 16  ;;  %v2871_v24 = vsel %vm7627_vm2, %v2863_v47, %v2870_v61 }
 0x1f1   : > { %v3045_v33 = vld [vmem:[#allocation2 + $0x15c] sm:$0xf]  ;;  %5595 = vmatprep.mubr.bf16.mxu1 %v7527_v21  ;;  %3491 = vst [vmem:[#allocation3 + $0x3ec] sm:$0xf] %v3383_v13  ;;  %v3390_v18 = vrot.slane %v3388_v8, 5  ;;  %v3404_v40 = vshll.u32 %v3044_v42, 16  ;;  %v6978_v13 = vpop.f32.mrf.mxu0 }
 0x1f2   : > { %v3046_v3 = vld [vmem:[#allocation2 + $0x160] sm:$0xf]  ;;  %5596 = vmatmul.mubr.bf16.gmra.mxu1 %v7525_v26  ;;  %2935 = vst [vmem:[#allocation3 + $0x474] sm:$0xf] %v2871_v24  ;;  %v3396_v27 = vrot.slane %v3394_v36, 5  ;;  %v3400_v34 = vrot.slane %v3398_v12, 4  ;;  %v6917_v24 = vpop.f32.mrf.mxu1 }
 0x1f3   : > { %v3047_v32 = vld [vmem:[#allocation2 + $0x164] sm:$0x1]  ;;  %v3409_v23 = vshrl.u32 %v3045_v33, 16  ;;  %v3412_v19 = vshll.u32 %v3045_v33, 16  ;;  %v3391_v1 = vor.u32 %v3390_v18, %v3387_v45  ;;  %v3406_v55 = vrot.slane %v3404_v40, 5 }
 0x1f4   : > { %v3418_v38 = vshll.u32 %v3046_v3, 16  ;;  %v3422_v22 = vshrl.u32 %v3046_v3, 16  ;;  %v7528_v28 = vld [vmem:[#allocation3 + $0x380] ss:$36 sps:$4 sm:$0xff]   ;;  %v3401_v47 = vor.u32 %v3400_v34, %v3396_v27  ;;  %v3428_v8 = vshll.u32 %v3047_v32, 16 }
 0x1f5   : > { %v3411_v21 = vrot.slane %v3409_v23, 4  ;;  %v3414_v42 = vrot.slane %v3412_v19, 5  ;;  %v3392_v39 = vrot.slane %v3391_v1, 4  ;;  %7222 = vmatprep.mubr.bf16.mxu0 %v7528_v28  ;;  %v8514_v45 = vadd.f32 %v6909_v46, %v8353_v35  ;;  %v7532_v19 = vld [vmem:[#allocation3 + $0x454] ss:$36 sps:$4 sm:$0xff]  }
 0x1f6   : > { %v3420_v26 = vrot.slane %v3418_v38, 5  ;;  %v3424_v61 = vrot.slane %v3422_v22, 4  ;;  %v3402_v36 = vrot.slane %v3401_v47, 4  ;;  %v6973_v33 = vadd.f32 %v8481_v15, %v8472_v44  ;;  %v6919_v15 = vpop.f32.mrf.mxu1  ;;  %v6980_v38 = vpop.f32.mrf.mxu0  ;;  %5603 = vmatprep.mubr.bf16.mxu1 %v7532_v19 }
 0x1f7   : > { %v3415_v12 = vor.u32 %v3414_v42, %v3411_v21  ;;  %v3397_v18 = vsel %vm7768_vm5, %v3392_v39, %v3396_v27  ;;  %v3430_v14 = vrot.slane %v3428_v8, 5  ;;  %v6912_v40 = vadd.f32 %v8483_v20, %v8474_v63 }
 0x1f8   : > { %v3425_v53 = vor.u32 %v3424_v61, %v3420_v26  ;;  %v7529_v3 = vld [vmem:[#allocation3 + $0x3c8] ss:$36 sps:$4 sm:$0xff]   ;;  %v3407_v34 = vsel %vm7768_vm5, %v3402_v36, %v3406_v55  ;;  %3492 = vst [vmem:[#allocation3 + $0x410] sm:$0xf] %v3397_v18  ;;  %v8525_v35 = vadd.f32 %v6973_v33, %v8246_v59  ;;  %v6976_v44 = vadd.f32 %v6975_v17, %v8489_v11  ;;  %v6920_v22 = vpop.f32.mrf.mxu1 }
 0x1f9   : > { %v3416_v32 = vrot.slane %v3415_v12, 4  ;;  %v7530_v23 = vld [vmem:[#allocation3 + $0x450] ss:$36 sps:$4 sm:$0xff]   ;;  %3493 = vst [vmem:[#allocation3 + $0x434] sm:$0xf] %v3407_v34  ;;  %v8529_v1 = vadd.f32 %v6912_v40, %v8063_v58  ;;  %v6915_v63 = vadd.f32 %v6914_v10, %v8491_v51  ;;  %v6979_v20 = vadd.f32 %v6978_v13, %v6977_v49  ;;  %7223 = vmatmul.mubr.bf16.gmra.mxu0 %v7529_v3  ;;  %v9038_v34 = vld [vmem:[#allocation8_spill] sm:$0xff] }
 0x1fa   : > { %v3426_v27 = vrot.slane %v3425_v53, 4  ;;  %v6809_v55 = vadd.f32 %v8097_v54, %v8089_v31  ;;  %v8537_v11 = vadd.f32 %v6976_v44, %v8253_v37  ;;  %v6918_v17 = vadd.f32 %v6917_v24, %v6916_v25  ;;  %v6981_v31 = vpop.f32.mrf.mxu0  ;;  %5604 = vmatmul.mubr.bf16.gmra.mxu1 %v7530_v23  ;;  %v6922_v46 = vpop.f32.mrf.mxu1 }
 0x1fb   : > { %v3421_v59 = vsel %vm7768_vm5, %v3416_v32, %v3420_v26  ;;  %v8542_v51 = vadd.f32 %v6915_v63, %v8281_v6  ;;  %v8545_v10 = vadd.f32 %v6979_v20, %v8265_v30  ;;  %v6921_v54 = vadd.f32 %v6920_v22, %v6919_v15  ;;  %v9040_v63 = vld [vmem:[#allocation6_spill] sm:$0xff]  ;;  %v9041_v20 = vld [vmem:[#allocation7_spill] sm:$0xff] }
 0x1fc   : > { %v3431_v58 = vsel %vm7768_vm5, %v3426_v27, %v3430_v14  ;;  %3494 = vst [vmem:[#allocation3 + $0x458] sm:$0xf] %v3421_v59  ;;  %v8548_v37 = vadd.f32 %v6918_v17, %v8083_v5  ;;  %v6982_v49 = vadd.f32 %v6981_v31, %v6980_v38  ;;  %v6983_v28 = vpop.f32.mrf.mxu0  ;;  %v6923_v39 = vpop.f32.mrf.mxu1  ;;  %v6821_v38 = vadd.f32 %v9041_v20, %v9040_v63 }
 0x1fd   : > { %3495 = vst [vmem:[#allocation3 + $0x47c] sm:$0xf] %v3431_v58  ;;  %v8550_v47 = vadd.f32 %v6921_v54, %v6809_v55  ;;  %v6924_v26 = vadd.f32 %v6923_v39, %v6922_v46 }
 0x1fe   : > { %v8553_v0 = vadd.f32 %v6982_v49, %v8294_v7  ;;  %v6984_v21 = vpop.f32.mrf.mxu0  ;;  %v6925_v5 = vpop.f32.mrf.mxu1  ;;  %v9037_v7 = vld [vmem:[#allocation4_spill] sm:$0xff] }
 0x1ff   : > { %v6985_v42 = vadd.f32 %v6984_v21, %v6983_v28  ;;  %v8559_v8 = vadd.f32 %v6924_v26, %v8119_v4  ;;  %v6815_v36 = vadd.f32 %v9037_v7, %v8111_v41  ;;  %v9039_v41 = vld [vmem:[#allocation5_spill] sm:$0xff] }
 0x200   : > { %v7533_v6 = vld [vmem:[#allocation3 + $0x410] ss:$36 sps:$4 sm:$0xff]   ;;  %v6986_v61 = vpop.f32.mrf.mxu0  ;;  %v6926_v13 = vpop.f32.mrf.mxu1  ;;  %v9042_v21 = vld [vmem:[#allocation9_spill] sm:$0xff] }
 0x201   : > { %7226 = vmatprep.mubr.bf16.mxu0 %v7533_v6  ;;  %v8556_v30 = vadd.f32 %v6985_v42, %v8313_v48  ;;  %v6927_v33 = vadd.f32 %v6926_v13, %v6925_v5  ;;  %v9043_v5 = vld [vmem:[#allocation10_spill] sm:$0xff] }
 0x202   : > { %v6987_v12 = vpop.f32.mrf.mxu0  ;;  %v6928_v3 = vpop.f32.mrf.mxu1 }
 0x203   : > { %v6988_v24 = vadd.f32 %v6987_v12, %v6986_v61  ;;  %v8563_v53 = vadd.f32 %v6927_v33, %v6815_v36 }
 0x204   : > { %v7534_v25 = vld [vmem:[#allocation3 + $0x458] ss:$36 sps:$4 sm:$0xff]   ;;  %v6989_v18 = vpop.f32.mrf.mxu0  ;;  %v6929_v4 = vpop.f32.mrf.mxu1 }
 0x205   : > { %7227 = vmatmul.mubr.bf16.gmra.mxu0 %v7534_v25  ;;  %v8566_v48 = vadd.f32 %v6988_v24, %v8333_v2  ;;  %v6930_v44 = vadd.f32 %v6929_v4, %v6928_v3 }
 0x206   : > { %v6990_v14 = vpop.f32.mrf.mxu0  ;;  %v6931_v15 = vpop.f32.mrf.mxu1 }
 0x207   : > { %v6991_v40 = vadd.f32 %v6990_v14, %v6989_v18  ;;  %v8572_v19 = vadd.f32 %v6930_v44, %v9039_v41 }
 0x208   : > { %v6992_v23 = vpop.f32.mrf.mxu0  ;;  %v6932_v27 = vpop.f32.mrf.mxu1 }
 0x209   : > { %v8569_v32 = vadd.f32 %v6991_v40, %v9038_v34  ;;  %v6933_v2 = vadd.f32 %v6932_v27, %v6931_v15 }
 0x20a   : > { %v6993_v55 = vpop.f32.mrf.mxu0  ;;  %v8581_v49 = vpop.f32.mrf.mxu1 }
 0x20b   : > { %v6994_v59 = vadd.f32 %v6993_v55, %v6992_v23  ;;  %v8576_v22 = vadd.f32 %v6933_v2, %v6821_v38 }
 0x20c   : > { %v6995_v17 = vpop.f32.mrf.mxu0  ;;  %v8586_v42 = vpop.f32.mrf.mxu1 }
 0x20d   : > { %v8579_v58 = vadd.f32 %v6994_v59, %v8349_v29 }
 0x20e   : > { %v6996_v31 = vpop.f32.mrf.mxu0  ;;  %v8588_v39 = vpop.f32.mrf.mxu1 }
 0x20f   : > { %v6997_v54 = vadd.f32 %v6996_v31, %v6995_v17 }
 0x210   : > { %v6998_v28 = vpop.f32.mrf.mxu0  ;;  %v8593_v13 = vpop.f32.mrf.mxu1 }
 0x211   : > { %v8584_v6 = vadd.f32 %v6997_v54, %v9042_v21 }
 0x212   : > { %v6999_v46 = vpop.f32.mrf.mxu0  ;;  %v8598_v33 = vpop.f32.mrf.mxu1 }
 0x213   : > { %v7000_v25 = vadd.f32 %v6999_v46, %v6998_v28 }
 0x214   : > { %v7001_v26 = vpop.f32.mrf.mxu0  ;;  %v8600_v14 = vpop.f32.mrf.mxu1 }
 0x215   : > { %v8591_v61 = vadd.f32 %v7000_v25, %v9043_v5 }
 0x216   : > { %v7002_v29 = vpop.f32.mrf.mxu0  ;;  %v8605_v34 = vpop.f32.mrf.mxu1 }
 0x217   : > { %v7003_v7 = vadd.f32 %v7002_v29, %v7001_v26 }
 0x218   : > { %v7004_v36 = vpop.f32.mrf.mxu0  ;;  %v8607_v15 = vpop.f32.mrf.mxu1 }
 0x219   : > { %v8596_v12 = vadd.f32 %v7003_v7, %v8386_v57 }
 0x21a   : > { %v7005_v24 = vpop.f32.mrf.mxu0 }
 0x21b   : > { %v7006_v18 = vadd.f32 %v7005_v24, %v7004_v36 }
 0x21c   : > { %v7007_v40 = vpop.f32.mrf.mxu0 }
 0x21d   : > { %v8603_v3 = vadd.f32 %v7006_v18, %v8401_v60 }
 0x21e   : > { %v7008_v4 = vpop.f32.mrf.mxu0  ;;  %v8612_v41 = vpop.f32.mrf.mxu1 }
 0x21f   : > { %v7009_v44 = vadd.f32 %v7008_v4, %v7007_v40 }
 0x220   : > { %v7010_v57 = vpop.f32.mrf.mxu0  ;;  %v8614_v20 = vpop.f32.mrf.mxu1 }
 0x221   : > { %v8610_v23 = vadd.f32 %v7009_v44, %v8416_v52 }
 0x222   : > { %v7011_v27 = vpop.f32.mrf.mxu0  ;;  %v8619_v55 = vpop.f32.mrf.mxu1 }
 0x223   : > { %v7012_v63 = vadd.f32 %v7011_v27, %v7010_v57 }
 0x224   : > { %v7013_v38 = vpop.f32.mrf.mxu0  ;;  %v8621_v17 = vpop.f32.mrf.mxu1 }
 0x225   : > { %v8617_v60 = vadd.f32 %v7012_v63, %v8436_v16 }
 0x226   : > { %v7014_v2 = vpop.f32.mrf.mxu0 }
 0x227   : > { %v7015_v59 = vadd.f32 %v7014_v2, %v7013_v38  ;;  %v8626_v54 = vpop.f32.mrf.mxu1 }
 0x228   : > { %v7016_v31 = vpop.f32.mrf.mxu0 }
 0x229   : > { %v8624_v52 = vadd.f32 %v7015_v59, %v8463_v9  ;;  %v8628_v46 = vpop.f32.mrf.mxu1 }
 0x22a   : > { %v7017_v28 = vpop.f32.mrf.mxu0 }
 0x22b   : > { %9044 = vst [vmem:[#allocation4_spill] sm:$0xff] %v8624_v52  ;;  %v7018_v21 = vadd.f32 %v7017_v28, %v7016_v31  ;;  %v8633_v26 = vpop.f32.mrf.mxu1 }
 0x22c   : > { %v7019_v25 = vpop.f32.mrf.mxu0 }
 0x22d   : > { %v8631_v16 = vadd.f32 %v7018_v21, %v8502_v62  ;;  %v8635_v7 = vpop.f32.mrf.mxu1 }
 0x22e   : > { %v7020_v5 = vpop.f32.mrf.mxu0 }
 0x22f   : > { %9045 = vst [vmem:[#allocation8_spill] sm:$0xff] %v8631_v16  ;;  %v7021_v29 = vadd.f32 %v7020_v5, %v7019_v25  ;;  %v9056_v16 = vld [vmem:[#allocation12_spill] sm:$0xff] }
 0x230   : > { %v7022_v36 = vpop.f32.mrf.mxu0 }
 0x231   : > { %v8638_v9 = vadd.f32 %v7021_v29, %v8514_v45 }
 0x232   : > { %v8640_v24 = vpop.f32.mrf.mxu1  ;;  %v7023_v18 = vpop.f32.mrf.mxu0 }
 0x233   : > { %9046 = vst [vmem:[#allocation5_spill] sm:$0xff] %v8638_v9  ;;  %v7024_v40 = vadd.f32 %v7023_v18, %v7022_v36 }
 0x234   : > { %v8642_v4 = vpop.f32.mrf.mxu1  ;;  %v7025_v44 = vpop.f32.mrf.mxu0 }
 0x235   : > { %v8645_v62 = vadd.f32 %v7024_v40, %v8529_v1 }
 0x236   : > { %v8647_v57 = vpop.f32.mrf.mxu1  ;;  %v7026_v27 = vpop.f32.mrf.mxu0 }
 0x237   : > { %9047 = vst [vmem:[#allocation6_spill] sm:$0xff] %v8645_v62  ;;  %v7027_v63 = vadd.f32 %v7026_v27, %v7025_v44 }
 0x238   : > { %v8652_v2 = vpop.f32.mrf.mxu1 }
 0x239   : > { %v8650_v38 = vadd.f32 %v7027_v63, %v8542_v51 }
 0x23b   : > { %9048 = vst [vmem:[#allocation7_spill] sm:$0xff] %v8650_v38 }
 0x23d   : > { %v7028_v45 = vpop.f32.mrf.mxu0 }
 0x23f   : > { %v8654_v59 = vpop.f32.mrf.mxu1  ;;  %v7029_v31 = vpop.f32.mrf.mxu0 }
 0x240   : > { %v7030_v28 = vadd.f32 %v7029_v31, %v7028_v45 }
 0x241   : > { %v8656_v21 = vpop.f32.mrf.mxu1  ;;  %v7031_v25 = vpop.f32.mrf.mxu0 }
 0x242   : > { %v8659_v1 = vadd.f32 %v7030_v28, %v8548_v37 }
 0x243   : > { %v8661_v5 = vpop.f32.mrf.mxu1  ;;  %v7032_v29 = vpop.f32.mrf.mxu0 }
 0x244   : > { %9049 = vst [vmem:[#allocation9_spill] sm:$0xff] %v8659_v1  ;;  %v7033_v36 = vadd.f32 %v7032_v29, %v7031_v25 }
 0x245   : > { %v8663_v18 = vpop.f32.mrf.mxu1 }
 0x246   : > { %v8666_v51 = vadd.f32 %v7033_v36, %v8550_v47 }
 0x248   : > { %9050 = vst [vmem:[#allocation10_spill] sm:$0xff] %v8666_v51  ;;  %v7034_v40 = vpop.f32.mrf.mxu0 }
 0x249   : > { %v8668_v44 = vpop.f32.mrf.mxu1 }
 0x24a   : > { %v7035_v27 = vpop.f32.mrf.mxu0 }
 0x24b   : > { %v7036_v63 = vadd.f32 %v7035_v27, %v7034_v40  ;;  %v8670_v45 = vpop.f32.mrf.mxu1 }
 0x24c   : > { %v7037_v31 = vpop.f32.mrf.mxu0 }
 0x24d   : > { %v8673_v37 = vadd.f32 %v7036_v63, %v8559_v8  ;;  %v8675_v28 = vpop.f32.mrf.mxu1 }
 0x24e   : > { %v7038_v38 = vpop.f32.mrf.mxu0 }
 0x24f   : > { %9051 = vst [vmem:[#allocation15_spill] sm:$0xff] %v8673_v37  ;;  %v7039_v25 = vadd.f32 %v7038_v38, %v7037_v31  ;;  %v8677_v29 = vpop.f32.mrf.mxu1 }
 0x251   : > { %v8680_v47 = vadd.f32 %v7039_v25, %v8563_v53 }
 0x253   : > { %9052 = vst [vmem:[#allocation16_spill] sm:$0xff] %v8680_v47 }
 0x254   : > { %v7040_v36 = vpop.f32.mrf.mxu0 }
 0x255   : > { %v8682_v51 = vpop.f32.mrf.mxu1 }
 0x256   : > { %v7041_v1 = vpop.f32.mrf.mxu0 }
 0x257   : > { %v7042_v40 = vadd.f32 %v7041_v1, %v7040_v36  ;;  %v8684_v27 = vpop.f32.mrf.mxu1  ;;  %v7073_v36 = vadd.f32 %v8607_v15, %v8605_v34  ;;  %v9055_v34 = vld [vmem:[#allocation11_spill] sm:$0xff] }
 0x258   : > { %v7043_v62 = vpop.f32.mrf.mxu0 }
 0x259   : > { %v8687_v8 = vadd.f32 %v7042_v40, %v8572_v19  ;;  %v8689_v63 = vpop.f32.mrf.mxu1  ;;  %v7070_v19 = vadd.f32 %v8600_v14, %v8598_v33 }
 0x25a   : > { %v7044_v38 = vpop.f32.mrf.mxu0 }
 0x25b   : > { %9053 = vst [vmem:[#allocation17_spill] sm:$0xff] %v8687_v8  ;;  %v7045_v31 = vadd.f32 %v7044_v38, %v7043_v62  ;;  %v8691_v37 = vpop.f32.mrf.mxu1  ;;  %v7064_v38 = vadd.f32 %v8586_v42, %v8581_v49  ;;  %v5497_v8 = vadd.f32 %v7073_v36, %v8419_v56  ;;  %v7082_v36 = vadd.f32 %v8628_v46, %v8626_v54 }
 0x25d   : > { %v8694_v53 = vadd.f32 %v7045_v31, %v8576_v22  ;;  %v8696_v25 = vpop.f32.mrf.mxu1  ;;  %v7067_v22 = vadd.f32 %v8593_v13, %v8588_v39  ;;  %v5486_v15 = vadd.f32 %v7064_v38, %v9055_v34  ;;  %v5510_v54 = vadd.f32 %v7082_v36, %v8509_v50 }
 0x25f   : > { %9054 = vst [vmem:[#allocation18_spill] sm:$0xff] %v8694_v53  ;;  %v8698_v47 = vpop.f32.mrf.mxu1  ;;  %v5494_v53 = vadd.f32 %v7070_v19, %v8404_v43  ;;  %v5489_v49 = vadd.f32 %v7067_v22, %v9056_v16  ;;  %v7076_v16 = vadd.f32 %v8614_v20, %v8612_v41  ;;  %v7079_v41 = vadd.f32 %v8621_v17, %v8619_v55  ;;  %v9057_v20 = vld [vmem:[#allocation13_spill] sm:$0xff] }
 0x261   : > { %v8700_v1 = vpop.f32.mrf.mxu1 }
 0x263   : > { %v8706_v40 = vpop.f32.mrf.mxu1 }
 0x267   : > { %v7200_v62 = vpop.f32.mrf.mxu0 }
 0x268   : > { %v8717_v14 = vadd.f32 %v7200_v62, %v5494_v53  ;;  %v7085_v62 = vadd.f32 %v8635_v7, %v8633_v26 }
 0x269   : > { %v5646_v31 = vpop.f32.mrf.mxu0 }
 0x26a   : > { %v8730_v56 = vadd.f32 %v5646_v31, %v5486_v15  ;;  %v5513_v26 = vadd.f32 %v7085_v62, %v8525_v35 }
 0x26b   : > { %v8715_v52 = vpop.f32.mrf.mxu1  ;;  %v7201_v33 = vpop.f32.mrf.mxu0 }
 0x26c   : > { %v8720_v9 = vadd.f32 %v7201_v33, %v5497_v8  ;;  %v5502_v33 = vadd.f32 %v7076_v16, %v9057_v20  ;;  %v7094_v20 = vadd.f32 %v8656_v21, %v8654_v59 }
 0x26d   : > { %v8723_v42 = vpop.f32.mrf.mxu1  ;;  %v5649_v43 = vpop.f32.mrf.mxu0 }
 0x26e   : > { %v6615_v39 = vpack.c.bf16 %v8720_v9, %v8717_v14  ;;  %v8734_v13 = vadd.f32 %v5649_v43, %v5489_v49 }
 0x26f   : > { %v8736_v8 = vpop.f32.mrf.mxu1 }
 0x270   : > { %6695 = vst [vmem:[%s8728_s19 + $0x8] sm:$0xff] %v6615_v39   ;;  %v5773_v53 = vadd.f32 %v8734_v13, %v8730_v56  ;;  %v6610_v19 = vpack.c.bf16 %v8734_v13, %v8730_v56  ;;  %v9058_v39 = vld [vmem:[#allocation14_spill] sm:$0xff] }
 0x271   : > { %v8749_v38 = vpop.f32.mrf.mxu1  ;;  %v5505_v16 = vadd.f32 %v7079_v41, %v9058_v39 }
 0x272   : > { %v5774_v22 = vadd.f32 %v5773_v53, %v8717_v14  ;;  %6611 = vst [vmem:[%s8728_s19] sm:$0xff] %v6610_v19  }
 0x273   : > { %v7204_v31 = vpop.f32.mrf.mxu0 }
 0x274   : > { %v5775_v15 = vadd.f32 %v5774_v22, %v8720_v9  ;;  %v8763_v43 = vadd.f32 %v7204_v31, %v5510_v54  ;;  %v7088_v22 = vadd.f32 %v8642_v4, %v8640_v24 }
 0x275   : > { %v5662_v34 = vpop.f32.mrf.mxu0  ;;  %v8761_v7 = vpop.f32.mrf.mxu1 }
 0x276   : > { %v8758_v46 = vadd.f32 %v5662_v34, %v5502_v33  ;;  %v7097_v33 = vadd.f32 %v8663_v18, %v8661_v5  ;;  %v5518_v54 = vadd.f32 %v7088_v22, %v8537_v11  ;;  %v7109_v22 = vadd.f32 %v8691_v37, %v8689_v63 }
 0x277   : > { %v7205_v49 = vpop.f32.mrf.mxu0  ;;  %v8769_v19 = vpop.f32.mrf.mxu1 }
 0x278   : > { %v5776_v55 = vadd.f32 %v5775_v15, %v8758_v46  ;;  %v8766_v17 = vadd.f32 %v7205_v49, %v5513_v26  ;;  %v7091_v15 = vadd.f32 %v8652_v2, %v8647_v57  ;;  %v5526_v49 = vadd.f32 %v7094_v20, %v8553_v0 }
 0x279   : > { %v5665_v53 = vpop.f32.mrf.mxu0  ;;  %v8781_v31 = vpop.f32.mrf.mxu1  ;;  %v5529_v59 = vadd.f32 %v7097_v33, %v8556_v30  ;;  %v7100_v30 = vadd.f32 %v8670_v45, %v8668_v44  ;;  %v7103_v44 = vadd.f32 %v8677_v29, %v8675_v28  ;;  %v5545_v37 = vadd.f32 %v7109_v22, %v8584_v6 }
 0x27a   : > { %v6625_v50 = vpack.c.bf16 %v8766_v17, %v8763_v43  ;;  %v8773_v36 = vadd.f32 %v5665_v53, %v5505_v16  ;;  %v5521_v11 = vadd.f32 %v7091_v15, %v8545_v10 }
 0x27b   : > { %v8793_v24 = vpop.f32.mrf.mxu1  ;;  %v5534_v45 = vadd.f32 %v7100_v30, %v8566_v48  ;;  %v5537_v48 = vadd.f32 %v7103_v44, %v8569_v32 }
 0x27c   : > { %6697 = vst [vmem:[%s8728_s19 + $0x18] sm:$0xff] %v6625_v50   ;;  %v5777_v35 = vadd.f32 %v5776_v55, %v8773_v36  ;;  %v6620_v62 = vpack.c.bf16 %v8773_v36, %v8758_v46 }
 0x27e   : > { %v5778_v41 = vadd.f32 %v5777_v35, %v8763_v43  ;;  %6696 = vst [vmem:[%s8728_s19 + $0x10] sm:$0xff] %v6620_v62   ;;  %v7106_v62 = vadd.f32 %v8684_v27, %v8682_v51 }
 0x280   : > { %v5779_v26 = vadd.f32 %v5778_v41, %v8766_v17 }
 0x281   : > { %v7208_v34 = vpop.f32.mrf.mxu0 }
 0x282   : > { %v8799_v5 = vadd.f32 %v7208_v34, %v5526_v49 }
 0x283   : > { %v5678_v4 = vpop.f32.mrf.mxu0 }
 0x284   : > { %v8796_v55 = vadd.f32 %v5678_v4, %v5518_v54  ;;  %v5542_v54 = vadd.f32 %v7106_v62, %v8579_v58 }
 0x285   : > { %v7209_v21 = vpop.f32.mrf.mxu0 }
 0x286   : > { %v5780_v18 = vadd.f32 %v5779_v26, %v8796_v55  ;;  %v8802_v57 = vadd.f32 %v7209_v21, %v5529_v59  ;;  %v8805_v2 = vpop.f32.mrf.mxu1 }
 0x287   : > { %v5681_v39 = vpop.f32.mrf.mxu0 }
 0x288   : > { %v6635_v0 = vpack.c.bf16 %v8802_v57, %v8799_v5  ;;  %v8809_v16 = vadd.f32 %v5681_v39, %v5521_v11  ;;  %v8811_v53 = vpop.f32.mrf.mxu1  ;;  %v7118_v39 = vadd.f32 %v8723_v42, %v8715_v52 }
 0x28a   : > { %6699 = vst [vmem:[%s8728_s19 + $0x28] sm:$0xff] %v6635_v0   ;;  %v5781_v50 = vadd.f32 %v5780_v18, %v8809_v16  ;;  %v6630_v35 = vpack.c.bf16 %v8809_v16, %v8796_v55  ;;  %v7131_v10 = vpop.f32.mrf.mxu1  ;;  %v7112_v18 = vadd.f32 %v8698_v47, %v8696_v25  ;;  %v7121_v0 = vadd.f32 %v8749_v38, %v8736_v8 }
 0x28b   : > { %v5558_v22 = vadd.f32 %v7118_v39, %v8603_v3 }
 0x28c   : > { %v5782_v41 = vadd.f32 %v5781_v50, %v8799_v5  ;;  %6698 = vst [vmem:[%s8728_s19 + $0x20] sm:$0xff] %v6630_v35   ;;  %v7132_v33 = vpop.f32.mrf.mxu1  ;;  %v7115_v50 = vadd.f32 %v8706_v40, %v8700_v1  ;;  %v5550_v35 = vadd.f32 %v7112_v18, %v8591_v61  ;;  %v5561_v52 = vadd.f32 %v7121_v0, %v8610_v23  ;;  %v9059_v18 = vld [vmem:[#allocation8_spill] sm:$0xff] }
 0x28d   : > { %v7212_v20 = vpop.f32.mrf.mxu0 }
 0x28e   : > { %v5783_v34 = vadd.f32 %v5782_v41, %v8802_v57  ;;  %v8835_v26 = vadd.f32 %v7212_v20, %v5542_v54  ;;  %v5553_v61 = vadd.f32 %v7115_v50, %v8596_v12  ;;  %v7124_v54 = vadd.f32 %v8769_v19, %v8761_v7 }
 0x28f   : > { %v5694_v15 = vpop.f32.mrf.mxu0 }
 0x290   : > { %v8830_v51 = vadd.f32 %v5694_v15, %v5534_v45 }
 0x291   : > { %v7213_v27 = vpop.f32.mrf.mxu0 }
 0x292   : > { %v5784_v28 = vadd.f32 %v5783_v34, %v8830_v51  ;;  %v8838_v29 = vadd.f32 %v7213_v27, %v5545_v37  ;;  %v7130_v37 = vadd.f32 %v8811_v53, %v8805_v2  ;;  %v7133_v27 = vadd.f32 %v7132_v33, %v7131_v10 }
 0x293   : > { %v8833_v63 = vpop.f32.mrf.mxu1  ;;  %v5697_v4 = vpop.f32.mrf.mxu0 }
 0x294   : > { %v6645_v58 = vpack.c.bf16 %v8838_v29, %v8835_v26  ;;  %v8843_v49 = vadd.f32 %v5697_v4, %v5537_v48  ;;  %v5574_v7 = vadd.f32 %v7130_v37, %v9059_v18 }
 0x295   : > { %v7135_v59 = vpop.f32.mrf.mxu1 }
 0x296   : > { %6701 = vst [vmem:[%s8728_s19 + $0x38] sm:$0xff] %v6645_v58   ;;  %v5785_v6 = vadd.f32 %v5784_v28, %v8843_v49  ;;  %v6640_v21 = vpack.c.bf16 %v8843_v49, %v8830_v51  ;;  %v7127_v58 = vadd.f32 %v8793_v24, %v8781_v31  ;;  %v9061_v31 = vld [vmem:[#allocation4_spill] sm:$0xff] }
 0x297   : > { %v7137_v32 = vpop.f32.mrf.mxu1 }
 0x298   : > { %v5786_v11 = vadd.f32 %v5785_v6, %v8835_v26  ;;  %6700 = vst [vmem:[%s8728_s19 + $0x30] sm:$0xff] %v6640_v21   ;;  %v5566_v6 = vadd.f32 %v7124_v54, %v8617_v60  ;;  %v5569_v24 = vadd.f32 %v7127_v58, %v9061_v31 }
 0x299   : > { %v7138_v47 = vpop.f32.mrf.mxu1 }
 0x29a   : > { %v5787_v62 = vadd.f32 %v5786_v11, %v8838_v29  ;;  %v9060_v11 = vld [vmem:[#allocation5_spill] sm:$0xff] }
 0x29b   : > { %v5577_v39 = vadd.f32 %v7133_v27, %v9060_v11 }
 0x29d   : > { %v7216_v30 = vpop.f32.mrf.mxu0 }
 0x29e   : > { %v8865_v8 = vadd.f32 %v7216_v30, %v5558_v22 }
 0x29f   : > { %v5710_v25 = vpop.f32.mrf.mxu0 }
 0x2a0   : > { %v8862_v41 = vadd.f32 %v5710_v25, %v5550_v35  ;;  %v7136_v25 = vadd.f32 %v7135_v59, %v8833_v63  ;;  %v9063_v59 = vld [vmem:[#allocation9_spill] sm:$0xff] }
 0x2a1   : > { %v7217_v42 = vpop.f32.mrf.mxu0 }
 0x2a2   : > { %v5788_v38 = vadd.f32 %v5787_v62, %v8862_v41  ;;  %v8868_v1 = vadd.f32 %v7217_v42, %v5561_v52 }
 0x2a3   : > { %v5713_v20 = vpop.f32.mrf.mxu0 }
 0x2a4   : > { %v7140_v40 = vpop.f32.mrf.mxu1  ;;  %v6655_v44 = vpack.c.bf16 %v8868_v1, %v8865_v8  ;;  %v8873_v3 = vadd.f32 %v5713_v20, %v5553_v61 }
 0x2a6   : > { %v7141_v45 = vpop.f32.mrf.mxu1  ;;  %6703 = vst [vmem:[%s8728_s19 + $0x48] sm:$0xff] %v6655_v44   ;;  %v5789_v23 = vadd.f32 %v5788_v38, %v8873_v3  ;;  %v6650_v34 = vpack.c.bf16 %v8873_v3, %v8862_v41 }
 0x2a7   : > { %v7142_v38 = vadd.f32 %v7141_v45, %v7140_v40 }
 0x2a8   : > { %v7143_v15 = vpop.f32.mrf.mxu1  ;;  %v5790_v12 = vadd.f32 %v5789_v23, %v8865_v8  ;;  %6702 = vst [vmem:[%s8728_s19 + $0x40] sm:$0xff] %v6650_v34   ;;  %v7139_v23 = vadd.f32 %v7138_v47, %v7137_v32  ;;  %v9062_v34 = vld [vmem:[#allocation6_spill] sm:$0xff] }
 0x2a9   : > { %v5582_v54 = vadd.f32 %v7136_v25, %v9062_v34  ;;  %v5590_v27 = vadd.f32 %v7142_v38, %v9063_v59  ;;  %v9069_v59 = vld [vmem:[#allocation16_spill] sm:$0xff] }
 0x2aa   : > { %v5791_v28 = vadd.f32 %v5790_v12, %v8868_v1  ;;  %v7144_v4 = vpop.f32.mrf.mxu1 }
 0x2ab   : > { %v7145_v61 = vadd.f32 %v7144_v4, %v7143_v15 }
 0x2ac   : > { %v7220_v48 = vpop.f32.mrf.mxu0 }
 0x2ad   : > { %v8893_v53 = vadd.f32 %v7220_v48, %v5574_v7  ;;  %v9064_v48 = vld [vmem:[#allocation10_spill] sm:$0xff] }
 0x2ae   : > { %v5726_v21 = vpop.f32.mrf.mxu0  ;;  %v5593_v58 = vadd.f32 %v7145_v61, %v9064_v48  ;;  %v9067_v61 = vld [vmem:[#allocation15_spill] sm:$0xff] }
 0x2af   : > { %v8890_v19 = vadd.f32 %v5726_v21, %v5566_v6  ;;  %v9065_v21 = vld [vmem:[#allocation7_spill] sm:$0xff] }
 0x2b0   : > { %v7221_v0 = vpop.f32.mrf.mxu0  ;;  %v5585_v32 = vadd.f32 %v7139_v23, %v9065_v21 }
 0x2b1   : > { %v5792_v10 = vadd.f32 %v5791_v28, %v8890_v19  ;;  %v8896_v33 = vadd.f32 %v7221_v0, %v5577_v39 }
 0x2b2   : > { %v7146_v2 = vpop.f32.mrf.mxu1  ;;  %v5729_v60 = vpop.f32.mrf.mxu0 }
 0x2b3   : > { %v6665_v50 = vpack.c.bf16 %v8896_v33, %v8893_v53  ;;  %v8901_v35 = vadd.f32 %v5729_v60, %v5569_v24 }
 0x2b4   : > { %v7147_v30 = vpop.f32.mrf.mxu1 }
 0x2b5   : > { %6705 = vst [vmem:[%s8728_s19 + $0x58] sm:$0xff] %v6665_v50   ;;  %v5793_v22 = vadd.f32 %v5792_v10, %v8901_v35  ;;  %v6660_v52 = vpack.c.bf16 %v8901_v35, %v8890_v19  ;;  %v7148_v39 = vadd.f32 %v7147_v30, %v7146_v2 }
 0x2b6   : > { %v7149_v62 = vpop.f32.mrf.mxu1 }
 0x2b7   : > { %v5794_v20 = vadd.f32 %v5793_v22, %v8893_v53  ;;  %6704 = vst [vmem:[%s8728_s19 + $0x50] sm:$0xff] %v6660_v52   ;;  %v9066_v52 = vld [vmem:[#allocation17_spill] sm:$0xff] }
 0x2b8   : > { %v7150_v42 = vpop.f32.mrf.mxu1 }
 0x2b9   : > { %v7224_v44 = vpop.f32.mrf.mxu0  ;;  %v5795_v12 = vadd.f32 %v5794_v20, %v8896_v33  ;;  %v7151_v22 = vadd.f32 %v7150_v42, %v7149_v62  ;;  %v5598_v20 = vadd.f32 %v7148_v39, %v9067_v61 }
 0x2ba   : > { %v7152_v63 = vpop.f32.mrf.mxu1  ;;  %v5751_v45 = vadd.f32 %v7224_v44, %v5590_v27  ;;  %v9068_v44 = vld [vmem:[#allocation18_spill] sm:$0xff] }
 0x2bb   : > { %v5742_v37 = vpop.f32.mrf.mxu0  ;;  %v5601_v27 = vadd.f32 %v7151_v22, %v9069_v59 }
 0x2bc   : > { %v5743_v28 = vadd.f32 %v5742_v37, %v5582_v54  ;;  %v7153_v40 = vpop.f32.mrf.mxu1 }
 0x2bd   : > { %v7225_v6 = vpop.f32.mrf.mxu0  ;;  %v7154_v0 = vadd.f32 %v7153_v40, %v7152_v63 }
 0x2be   : > { %v5796_v15 = vadd.f32 %v5795_v12, %v5743_v28  ;;  %v5754_v4 = vadd.f32 %v7225_v6, %v5593_v58  ;;  %v7155_v18 = vpop.f32.mrf.mxu1 }
 0x2bf   : > { %v5745_v47 = vpop.f32.mrf.mxu0  ;;  %v5606_v38 = vadd.f32 %v7154_v0, %v9066_v52 }
 0x2c0   : > { %v6675_v7 = vpack.c.bf16 %v5754_v4, %v5751_v45  ;;  %v5746_v11 = vadd.f32 %v5745_v47, %v5585_v32  ;;  %v7156_v10 = vpop.f32.mrf.mxu1 }
 0x2c1   : > { %v7157_v60 = vadd.f32 %v7156_v10, %v7155_v18 }
 0x2c2   : > { %6707 = vst [vmem:[%s8728_s19 + $0x68] sm:$0xff] %v6675_v7   ;;  %v5797_v31 = vadd.f32 %v5796_v15, %v5746_v11  ;;  %v6670_v24 = vpack.c.bf16 %v5746_v11, %v5743_v28 }
 0x2c3   : > { %v5609_v23 = vadd.f32 %v7157_v60, %v9068_v44 }
 0x2c4   : > { %v5798_v50 = vadd.f32 %v5797_v31, %v5751_v45  ;;  %6706 = vst [vmem:[%s8728_s19 + $0x60] sm:$0xff] %v6670_v24  }
 0x2c5   : > { %v7228_v25 = vpop.f32.mrf.mxu0 }
 0x2c6   : > { %v5799_v2 = vadd.f32 %v5798_v50, %v5754_v4  ;;  %v5767_v12 = vadd.f32 %v7228_v25, %v5606_v38 }
 0x2c7   : > { %v5758_v34 = vpop.f32.mrf.mxu0 }
 0x2c8   : > { %v5759_v30 = vadd.f32 %v5758_v34, %v5598_v20 }
 0x2c9   : > { %v7229_v54 = vpop.f32.mrf.mxu0 }
 0x2ca   : > { %v5800_v37 = vadd.f32 %v5799_v2, %v5759_v30  ;;  %v5770_v63 = vadd.f32 %v7229_v54, %v5609_v23 }
 0x2cb   : > { %v5761_v48 = vpop.f32.mrf.mxu0 }
 0x2cc   : > { %v6685_v58 = vpack.c.bf16 %v5770_v63, %v5767_v12  ;;  %v5762_v62 = vadd.f32 %v5761_v48, %v5601_v27 }
 0x2ce   : > { %6709 = vst [vmem:[%s8728_s19 + $0x78] sm:$0xff] %v6685_v58   ;;  %v5801_v42 = vadd.f32 %v5800_v37, %v5762_v62  ;;  %v6680_v6 = vpack.c.bf16 %v5762_v62, %v5759_v30 }
 0x2d0   : > { %v5802_v40 = vadd.f32 %v5801_v42, %v5767_v12  ;;  %6708 = vst [vmem:[%s8728_s19 + $0x70] sm:$0xff] %v6680_v6  }
 0x2d2   : > { %v5803_v15 = vadd.f32 %v5802_v40, %v5770_v63 }
 0x2d4   : > { %v5804_v21 = vrot.slane %v5803_v15, 4 }
 0x2d6   : > { %v5805_v32 = vadd.f32 %v5804_v21, %v5803_v15 }
 0x2d8   : > { %v5806_v47 = vrot.slane %v5805_v32, 2 }
 0x2da   : > { %v5807_v18 = vadd.f32 %v5806_v47, %v5805_v32 }
 0x2dc   : > { %v5808_v7 = vrot.slane %v5807_v18, 1 }
 0x2de   : > { %v5809_v39 = vadd.f32 %v5808_v7, %v5807_v18 }
 0x2e0   : > { %5913 = vst [vmem:[%s8927_s23] sm:$0x1] %v5809_v39  ;;  %v5811_v0 = vmul.f32 0.00390625, %v5809_v39 }
 0x2e2   : > { %v8931_v10 = vsub.f32 %v8873_v3, %v5811_v0  ;;  %v8934_v31 = vsub.f32 %v8865_v8, %v5811_v0  ;;  %v8937_v24 = vsub.f32 %v8868_v1, %v5811_v0  ;;  %v8940_v60 = vsub.f32 %v8890_v19, %v5811_v0 }
 0x2e3   : > { %v8943_v50 = vsub.f32 %v8901_v35, %v5811_v0  ;;  %v8946_v25 = vsub.f32 %v8893_v53, %v5811_v0  ;;  %v8949_v22 = vsub.f32 %v8896_v33, %v5811_v0  ;;  %v8951_v3 = vsub.f32 %v5743_v28, %v5811_v0 }
 0x2e4   : > { %v8953_v52 = vsub.f32 %v5746_v11, %v5811_v0  ;;  %v8955_v8 = vsub.f32 %v5751_v45, %v5811_v0  ;;  %v8957_v1 = vsub.f32 %v5754_v4, %v5811_v0  ;;  %v8959_v38 = vsub.f32 %v5759_v30, %v5811_v0 }
 0x2e5   : > { %v8961_v19 = vsub.f32 %v5762_v62, %v5811_v0  ;;  %v8963_v35 = vsub.f32 %v5767_v12, %v5811_v0  ;;  %v8965_v61 = vsub.f32 %v5770_v63, %v5811_v0  ;;  %v5812_v53 = vsub.f32 %v8730_v56, %v5811_v0 }
 0x2e6   : > { %v5813_v33 = vsub.f32 %v8734_v13, %v5811_v0  ;;  %v5814_v28 = vsub.f32 %v8717_v14, %v5811_v0  ;;  %v5815_v45 = vsub.f32 %v8720_v9, %v5811_v0  ;;  %v5816_v4 = vsub.f32 %v8758_v46, %v5811_v0 }
 0x2e7   : > { %v5844_v11 = vmul.f32 %v5812_v53, %v5812_v53  ;;  %v5817_v34 = vsub.f32 %v8773_v36, %v5811_v0  ;;  %v5818_v54 = vsub.f32 %v8763_v43, %v5811_v0  ;;  %v5819_v13 = vsub.f32 %v8766_v17, %v5811_v0 }
 0x2e8   : > { %v5845_v20 = vmul.f32 %v5813_v33, %v5813_v33  ;;  %v5846_v44 = vmul.f32 %v5814_v28, %v5814_v28  ;;  %v5847_v2 = vmul.f32 %v5815_v45, %v5815_v45  ;;  %v5848_v12 = vmul.f32 %v5816_v4, %v5816_v4 }
 0x2e9   : > { %v5849_v37 = vmul.f32 %v5817_v34, %v5817_v34  ;;  %v5820_v63 = vsub.f32 %v8796_v55, %v5811_v0  ;;  %v5850_v59 = vmul.f32 %v5818_v54, %v5818_v54  ;;  %v5821_v46 = vsub.f32 %v8809_v16, %v5811_v0 }
 0x2ea   : > { %v5876_v23 = vadd.f32 %v5845_v20, %v5844_v11  ;;  %v5851_v27 = vmul.f32 %v5819_v13, %v5819_v13  ;;  %v5822_v36 = vsub.f32 %v8799_v5, %v5811_v0  ;;  %v5823_v43 = vsub.f32 %v8802_v57, %v5811_v0 }
 0x2eb   : > { %v5852_v58 = vmul.f32 %v5820_v63, %v5820_v63  ;;  %v5853_v42 = vmul.f32 %v5821_v46, %v5821_v46  ;;  %v5824_v17 = vsub.f32 %v8830_v51, %v5811_v0  ;;  %v5825_v55 = vsub.f32 %v8843_v49, %v5811_v0 }
 0x2ec   : > { %v5877_v30 = vadd.f32 %v5876_v23, %v5846_v44  ;;  %v5854_v40 = vmul.f32 %v5822_v36, %v5822_v36  ;;  %v5855_v21 = vmul.f32 %v5823_v43, %v5823_v43  ;;  %v5826_v16 = vsub.f32 %v8835_v26, %v5811_v0 }
 0x2ed   : > { %v5856_v47 = vmul.f32 %v5824_v17, %v5824_v17  ;;  %v5827_v5 = vsub.f32 %v8838_v29, %v5811_v0  ;;  %v5857_v7 = vmul.f32 %v5825_v55, %v5825_v55  ;;  %v5828_v57 = vsub.f32 %v8862_v41, %v5811_v0 }
 0x2ee   : > { %v5878_v56 = vadd.f32 %v5877_v30, %v5847_v2  ;;  %v5858_v53 = vmul.f32 %v5826_v16, %v5826_v16  ;;  %v5861_v49 = vmul.f32 %v8931_v10, %v8931_v10  ;;  %v5862_v26 = vmul.f32 %v8934_v31, %v8934_v31 }
 0x2ef   : > { %v5859_v28 = vmul.f32 %v5827_v5, %v5827_v5  ;;  %v5860_v11 = vmul.f32 %v5828_v57, %v5828_v57  ;;  %v5863_v29 = vmul.f32 %v8937_v24, %v8937_v24  ;;  %v5864_v41 = vmul.f32 %v8940_v60, %v8940_v60 }
 0x2f0   : > { %v5879_v14 = vadd.f32 %v5878_v56, %v5848_v12  ;;  %v5865_v23 = vmul.f32 %v8943_v50, %v8943_v50  ;;  %v5866_v10 = vmul.f32 %v8946_v25, %v8946_v25  ;;  %v5867_v31 = vmul.f32 %v8949_v22, %v8949_v22 }
 0x2f1   : > { %v5868_v24 = vmul.f32 %v8951_v3, %v8951_v3  ;;  %v5869_v60 = vmul.f32 %v8953_v52, %v8953_v52  ;;  %v5870_v50 = vmul.f32 %v8955_v8, %v8955_v8  ;;  %v5871_v25 = vmul.f32 %v8957_v1, %v8957_v1 }
 0x2f2   : > { %v5880_v9 = vadd.f32 %v5879_v14, %v5849_v37  ;;  %v5872_v22 = vmul.f32 %v8959_v38, %v8959_v38  ;;  %v5873_v3 = vmul.f32 %v8961_v19, %v8961_v19  ;;  %v5874_v52 = vmul.f32 %v8963_v35, %v8963_v35 }
 0x2f3   : > { %v5875_v8 = vmul.f32 %v8965_v61, %v8965_v61 }
 0x2f4   : > { %v5881_v48 = vadd.f32 %v5880_v9, %v5850_v59 }
 0x2f6   : > { %v5882_v62 = vadd.f32 %v5881_v48, %v5851_v27 }
 0x2f8   : > { %v5883_v6 = vadd.f32 %v5882_v62, %v5852_v58 }
 0x2fa   : > { %v5884_v15 = vadd.f32 %v5883_v6, %v5853_v42 }
 0x2fc   : > { %v5885_v32 = vadd.f32 %v5884_v15, %v5854_v40 }
 0x2fe   : > { %v5886_v18 = vadd.f32 %v5885_v32, %v5855_v21 }
 0x300   : > { %v5887_v39 = vadd.f32 %v5886_v18, %v5856_v47 }
 0x302   : > { %v5888_v33 = vadd.f32 %v5887_v39, %v5857_v7 }
 0x304   : > { %v5889_v51 = vadd.f32 %v5888_v33, %v5858_v53 }
 0x306   : > { %v5890_v20 = vadd.f32 %v5889_v51, %v5859_v28 }
 0x308   : > { %v5891_v45 = vadd.f32 %v5890_v20, %v5860_v11 }
 0x30a   : > { %v5892_v4 = vadd.f32 %v5891_v45, %v5861_v49 }
 0x30c   : > { %v5893_v44 = vadd.f32 %v5892_v4, %v5862_v26 }
 0x30e   : > { %v5894_v0 = vadd.f32 %v5893_v44, %v5863_v29 }
 0x310   : > { %v5895_v34 = vadd.f32 %v5894_v0, %v5864_v41 }
 0x312   : > { %v5896_v2 = vadd.f32 %v5895_v34, %v5865_v23 }
 0x314   : > { %v5897_v30 = vadd.f32 %v5896_v2, %v5866_v10 }
 0x316   : > { %v5898_v54 = vadd.f32 %v5897_v30, %v5867_v31 }
 0x318   : > { %v5899_v12 = vadd.f32 %v5898_v54, %v5868_v24 }
 0x31a   : > { %v5900_v56 = vadd.f32 %v5899_v12, %v5869_v60 }
 0x31c   : > { %v5901_v13 = vadd.f32 %v5900_v56, %v5870_v50 }
 0x31e   : > { %v5902_v37 = vadd.f32 %v5901_v13, %v5871_v25 }
 0x320   : > { %v5903_v14 = vadd.f32 %v5902_v37, %v5872_v22 }
 0x322   : > { %v5904_v63 = vadd.f32 %v5903_v14, %v5873_v3 }
 0x324   : > { %v5905_v59 = vadd.f32 %v5904_v63, %v5874_v52 }
 0x326   : > { %v5906_v9 = vadd.f32 %v5905_v59, %v5875_v8 }
 0x328   : > { %v5907_v1 = vrot.slane %v5906_v9, 4 }
 0x32a   : > { %v5908_v46 = vadd.f32 %v5907_v1, %v5906_v9 }
 0x32c   : > { %v5909_v27 = vrot.slane %v5908_v46, 2 }
 0x32e   : > { %v5910_v48 = vadd.f32 %v5909_v27, %v5908_v46 }
 0x330   : > { %v5911_v36 = vrot.slane %v5910_v48, 1 }
 0x332   : > { %v5912_v38 = vadd.f32 %v5911_v36, %v5910_v48 }
 0x334   : > { %5914 = vst [vmem:[%s8927_s23 + $0x1] sm:$0x1] %v5912_v38 }
 0x335 PF: > { %s14_s12 = sadd.s32 1, %s7541_s12  }
 0x336   : > { %p11_p4 = scmp.ge.s32.totalorder %s14_s12, 4  }
 0x338   :  { %13 = sbr.rel (!%p11_p4) target bundleno = 1 (0x1), region = 73 }

// kernel: basic_block.4
= control target key start
LH: loop header
LB: loop body
LE: loop exit
PB: predicated region body
PF: predicated region fallthrough
CT: control target
= control target key end

     0   :  { %s7855_s18 = smov 0   ;;  %s9535_s0 = inlined_call_operand.vmem [shape: bf16[2,16,16,128], index: 0, kind: input, shape index: {}]   ;;  %s9536_s1 = inlined_call_operand.vmem [shape: f32[1,128], index: 1, kind: input, shape index: {}]   ;;  %s9537_s2 = inlined_call_operand.vmem [shape: f32[1,128], index: 2, kind: input, shape index: {}]   ;;  %s9538_s3 = inlined_call_operand.vmem [shape: bf16[1152,128], index: 3, kind: input, shape index: {}]   ;;  %s9539_s4 = inlined_call_operand.vmem [shape: bf16[2,16,16,128], index: 4, kind: output, shape index: {0}]   ;;  %s9540_s5 = inlined_call_operand.vmem [shape: f32[2,2,128], index: 5, kind: output, shape index: {1}]  }
   0x1 LB: > { %s6357_s19 = sadd.s32 4294967295, %s7822_s18   ;;  %p6361_p0 = scmp.ge.s32.totalorder %s7822_s18, 1  ;;  %s7822_s18 = sphi %s7855_s18, %s16_s18  }
   0x2   : > { %p190_p1 = scmp.lt.s32.totalorder %s7822_s18, 3 }
   0x4   : > { %p191_p2 = pnand %p6361_p0, %p190_p1 }
   0x6   : > { %194 = sbr.rel (%p191_p2) target bundleno = 827 (0x33b), region = 36 }
   0xb   : > { %v7532_v0 = vld [vmem:[%s9538_s3 + $0x78] sm:$0xff]   ;;  %v7824_v2 = vmov 0   ;;  %v7534_v3 = vld [vmem:[%s9538_s3 + $0x70] sm:$0xff]   ;;  %v7536_v5 = vld [vmem:[%s9538_s3 + $0x68] sm:$0xff]   ;;  %p222_p3 = scmp.lt.s32.totalorder %s6357_s19, 1 }
   0xc   : > { %v7533_v1 = vld [vmem:[%s9538_s3 + $0x38] sm:$0xff]   ;;  %427 = vst [vmem:[#allocation2 + $0x4] sm:$0xf] %v7824_v2  ;;  %428 = vst [vmem:[#allocation2 + $0x8] sm:$0xf] %v7824_v2  ;;  %6987 = vmatprep.subr.bf16.mxu0 %v7532_v0  ;;  %7507 = vmatprep.subr.bf16.mxu1 %v7532_v0  ;;  %v7535_v4 = vld [vmem:[%s9538_s3 + $0x30] sm:$0xff]  }
   0xd   : > { %429 = vst [vmem:[#allocation2 + $0xc] sm:$0xf] %v7824_v2  ;;  %430 = vst [vmem:[#allocation2 + $0x10] sm:$0xf] %v7824_v2  ;;  %6988 = vmatpush3.bf16.msra.mxu0 %v7533_v1  ;;  %7515 = vmatpush3.bf16.msra.mxu1 %v7533_v1  ;;  %v7537_v6 = vld [vmem:[%s9538_s3 + $0x28] sm:$0xff]   ;;  %v7538_v7 = vld [vmem:[%s9538_s3 + $0x60] sm:$0xff]  }
   0xe   : > { %432 = vst [vmem:[#allocation2 + $0x158] sm:$0xf] %v7824_v2  ;;  %433 = vst [vmem:[#allocation2 + $0x15c] sm:$0xf] %v7824_v2  ;;  %6989 = vmatprep.subr.bf16.mxu0 %v7534_v3  ;;  %7508 = vmatprep.subr.bf16.mxu1 %v7534_v3  ;;  %s9590_s19 = smov (!%p222_p3, %s6357_s19), 1  ;;  %v7539_v8 = vld [vmem:[%s9538_s3 + $0x20] sm:$0xff]  }
   0xf   : > { %434 = vst [vmem:[#allocation2 + $0x160] sm:$0xf] %v7824_v2  ;;  %435 = vst [vmem:[#allocation2 + $0x164] sm:$0xf] %v7824_v2  ;;  %v7540_v9 = vld [vmem:[%s9538_s3 + $0x58] sm:$0xff]   ;;  %s6699_s13 = sshll.u32 %s9590_s19, 7 }
  0x10   : > { %437 = vst [vmem:[#allocation2 + $0x18] sm:$0xf] %v7824_v2  ;;  %438 = vst [vmem:[#allocation2 + $0x2c] sm:$0xf] %v7824_v2  ;;  %v7541_v10 = vld [vmem:[%s9538_s3 + $0x18] sm:$0xff]   ;;  %v7542_v11 = vld [vmem:[%s9538_s3 + $0x50] sm:$0xff]   ;;  %s7908_s22 = scalar_lea.vmem %s9535_s0, %s6699_s13  ;;  %s9237_s7 = scalar_lea.vmem %s9539_s4, %s6699_s13 }
  0x11   : > { %439 = vst [vmem:[#allocation2 + $0x40] sm:$0xf] %v7824_v2  ;;  %440 = vst [vmem:[#allocation2 + $0x54] sm:$0xf] %v7824_v2  ;;  %6990 = vmatpush3.bf16.msra.mxu0 %v7535_v4  ;;  %7516 = vmatpush3.bf16.msra.mxu1 %v7535_v4  ;;  %v7543_v15 = vld [vmem:[%s9538_s3 + $0x10] sm:$0xff]   ;;  %v7544_v18 = vld [vmem:[%s9538_s3 + $0x48] sm:$0xff]  }
  0x12   : > { %441 = vst [vmem:[#allocation2 + $0x68] sm:$0xf] %v7824_v2  ;;  %442 = vst [vmem:[#allocation2 + $0x7c] sm:$0xf] %v7824_v2  ;;  %6991 = vmatprep.subr.bf16.mxu0 %v7536_v5  ;;  %7509 = vmatprep.subr.bf16.mxu1 %v7536_v5  ;;  %vm661_vm0 = vsmask.f32 256 }
  0x13   : > { %443 = vst [vmem:[#allocation2 + $0x90] sm:$0xf] %v7824_v2  ;;  %444 = vst [vmem:[#allocation2 + $0xa4] sm:$0xf] %v7824_v2  ;;  %v613_v12 = vld [vmem:[#allocation2 + $0x4] sm:$0x8] }
  0x14   : > { %445 = vst [vmem:[#allocation2 + $0xb8] sm:$0xf] %v7824_v2  ;;  %446 = vst [vmem:[#allocation2 + $0xcc] sm:$0xf] %v7824_v2  ;;  %v614_v13 = vld [vmem:[#allocation2 + $0x8] sm:$0xf] }
  0x15   : > { %447 = vst [vmem:[#allocation2 + $0xe0] sm:$0xf] %v7824_v2  ;;  %448 = vst [vmem:[#allocation2 + $0xf4] sm:$0xf] %v7824_v2  ;;  %6992 = vmatpush3.bf16.msra.mxu0 %v7537_v6  ;;  %7517 = vmatpush3.bf16.msra.mxu1 %v7537_v6  ;;  %v615_v14 = vld [vmem:[#allocation2 + $0xc] sm:$0xf] }
  0x16   : > { %449 = vst [vmem:[#allocation2 + $0x108] sm:$0xf] %v7824_v2  ;;  %450 = vst [vmem:[#allocation2 + $0x11c] sm:$0xf] %v7824_v2  ;;  %6993 = vmatprep.subr.bf16.mxu0 %v7538_v7  ;;  %7510 = vmatprep.subr.bf16.mxu1 %v7538_v7  ;;  %vm662_vm1 = vsmask.f32 4368 }
  0x17   : > { %451 = vst [vmem:[#allocation2 + $0x130] sm:$0xf] %v7824_v2  ;;  %452 = vst [vmem:[#allocation2 + $0x144] sm:$0xf] %v7824_v2  ;;  %v665_v16 = vshrl.u32 %v613_v12, 16  ;;  %v670_v17 = vshrl.u32 %v614_v13, 16 }
  0x18   : > { %453 = vst [vmem:[#allocation2 + $0x24] sm:$0xf] %v7824_v2  ;;  %454 = vst [vmem:[#allocation2 + $0x38] sm:$0xf] %v7824_v2  ;;  %v673_v19 = vshll.u32 %v614_v13, 16  ;;  %v679_v20 = vshrl.u32 %v615_v14, 16 }
  0x19   : > { %455 = vst [vmem:[#allocation2 + $0x4c] sm:$0xf] %v7824_v2  ;;  %456 = vst [vmem:[#allocation2 + $0x60] sm:$0xf] %v7824_v2  ;;  %6994 = vmatpush3.bf16.msra.mxu0 %v7539_v8  ;;  %7518 = vmatpush3.bf16.msra.mxu1 %v7539_v8  ;;  %v682_v21 = vshll.u32 %v615_v14, 16  ;;  %v6766_v23 = vld [vmem:[%s7908_s22] sm:$0xff]  }
  0x1a   : > { %457 = vst [vmem:[#allocation2 + $0x74] sm:$0xf] %v7824_v2  ;;  %458 = vst [vmem:[#allocation2 + $0x88] sm:$0xf] %v7824_v2  ;;  %6995 = vmatprep.subr.bf16.mxu0 %v7540_v9  ;;  %7511 = vmatprep.subr.bf16.mxu1 %v7540_v9  ;;  %v1080_v22 = vld [vmem:[#allocation2 + $0x8] sm:$0xf]  ;;  %v6767_v28 = vunpack.c.l.bf16 %v6766_v23  ;;  %v6768_v29 = vunpack.c.h.bf16 %v6766_v23 }
  0x1b   : > { %459 = vst [vmem:[#allocation2 + $0x9c] sm:$0xf] %v7824_v2  ;;  %460 = vst [vmem:[#allocation2 + $0xb0] sm:$0xf] %v7824_v2  ;;  %v6401_v24 = vrot.slane %v665_v16, 11  ;;  %v672_v25 = vrot.slane %v670_v17, 7 }
  0x1c   : > { %461 = vst [vmem:[#allocation2 + $0xc4] sm:$0xf] %v7824_v2  ;;  %462 = vst [vmem:[#allocation2 + $0xd8] sm:$0xf] %v7824_v2  ;;  %v1081_v26 = vld [vmem:[#allocation2 + $0xc] sm:$0xf] }
  0x1d   : > { %463 = vst [vmem:[#allocation2 + $0xec] sm:$0xf] %v7824_v2  ;;  %464 = vst [vmem:[#allocation2 + $0x100] sm:$0xf] %v7824_v2  ;;  %6996 = vmatpush3.bf16.msra.mxu0 %v7541_v10  ;;  %7519 = vmatpush3.bf16.msra.mxu1 %v7541_v10  ;;  %v7920_v27 = vld [vmem:[%s9536_s1] ss:$0 sm:$0xff]  ;;  %v675_v34 = vor.u32 %v673_v19, %v672_v25 }
  0x1e   : > { %465 = vst [vmem:[#allocation2 + $0x114] sm:$0xf] %v7824_v2  ;;  %466 = vst [vmem:[#allocation2 + $0x128] sm:$0xf] %v7824_v2  ;;  %6997 = vmatprep.subr.bf16.mxu0 %v7542_v11  ;;  %7512 = vmatprep.subr.bf16.mxu1 %v7542_v11  ;;  %v681_v31 = vrot.slane %v679_v20, 7  ;;  %v6959_v33 = vld [vmem:[%s7908_s22 + $0x58] sm:$0xff]   ;;  %v309_v36 = vmul.f32 %v6767_v28, %v7920_v27  ;;  %v310_v37 = vmul.f32 %v6768_v29, %v7920_v27 }
  0x1f   : > { %467 = vst [vmem:[#allocation2 + $0x13c] sm:$0xf] %v7824_v2  ;;  %468 = vst [vmem:[#allocation2 + $0x150] sm:$0xf] %v7824_v2  ;;  %v7931_v32 = vld [vmem:[%s9537_s2] ss:$0 sm:$0xff]  ;;  %v6811_v40 = vunpack.c.l.bf16 %v6959_v33  ;;  %v6812_v41 = vunpack.c.h.bf16 %v6959_v33 }
  0x20   : > { %1112 = vst [vmem:[#allocation3 + $0x4] sm:$0xf] %v1080_v22  ;;  %vm7924_vm2 = vmor %vm661_vm0, %vm662_vm1  ;;  %v677_v35 = vrot.slane %v672_v25, 4  ;;  %v7545_v38 = vld [vmem:[%s9538_s3 + $0x8] sm:$0xff]   ;;  %v684_v39 = vor.u32 %v682_v21, %v681_v31  ;;  %v7546_v42 = vld [vmem:[%s9538_s3 + $0x40] sm:$0xff]   ;;  %v347_v44 = vadd.f32 %v7931_v32, %v309_v36  ;;  %v348_v45 = vadd.f32 %v7931_v32, %v310_v37  ;;  %s6366_s13 = sshll.u32 %s9590_s19, 1 }
  0x21   : > { %1113 = vst [vmem:[#allocation3 + $0x28] sm:$0xf] %v1081_v26  ;;  %6998 = vmatpush3.bf16.msra.mxu0 %v7543_v15  ;;  %7520 = vmatpush3.bf16.msra.mxu1 %v7543_v15  ;;  %v676_v43 = vsel %vm7924_vm2, %v6401_v24, %v675_v34  ;;  %v616_v47 = vld [vmem:[#allocation2 + $0x18] sm:$0x8]  ;;  %v331_v48 = vmul.f32 %v6811_v40, %v7920_v27  ;;  %v7547_v50 = vld [vmem:[%s9538_s3] sm:$0xff]   ;;  %v6949_v59 = vld [vmem:[%s7908_s22 + $0x8] sm:$0xff]   ;;  %s9422_s10 = scalar_lea.vmem %s9540_s5, %s6366_s13 }
  0x22   : > { %6999 = vmatprep.subr.bf16.mxu0 %v7544_v18  ;;  %7513 = vmatprep.subr.bf16.mxu1 %v7544_v18  ;;  %v685_v46 = vsel %vm7924_vm2, %v677_v35, %v684_v39  ;;  %1048 = vst [vmem:[#allocation3] sm:$0xf] %v676_v43  ;;  %v332_v49 = vmul.f32 %v6812_v41, %v7920_v27  ;;  %v379_v51 = vmax.f32 %v347_v44, 0.0  ;;  %v380_v52 = vmax.f32 %v348_v45, 0.0  ;;  %v649_v58 = vld [vmem:[#allocation2 + $0xf4] sm:$0x8] }
  0x23   : > { %1049 = vst [vmem:[#allocation3 + $0x24] sm:$0xf] %v685_v46  ;;  %v369_v53 = vadd.f32 %v7931_v32, %v331_v48  ;;  %v687_v57 = vshrl.u32 %v616_v47, 16  ;;  %v7556_v62 = vld [vmem:[%s9538_s3 + $0xf8] sm:$0xff]   ;;  %v6771_v0 = vunpack.c.l.bf16 %v6949_v59  ;;  %v6772_v1 = vunpack.c.h.bf16 %v6949_v59  ;;  %v6960_v2 = vld [vmem:[%s7908_s22 + $0x60] sm:$0xff]   ;;  %v7572_v24 = vld [vmem:[%s9538_s3 + $0x170] sm:$0xff]  }
  0x24   : > { %v370_v54 = vadd.f32 %v7931_v32, %v332_v49  ;;  %v6701_v55 = vpack.c.bf16 %v379_v51, %v379_v51  ;;  %v6702_v56 = vpack.c.bf16 %v380_v52, %v380_v52  ;;  %v7557_v63 = vld [vmem:[%s9538_s3 + $0x178] sm:$0xff]   ;;  %v6815_v3 = vunpack.c.l.bf16 %v6960_v2  ;;  %v619_v17 = vld [vmem:[#allocation2 + $0x2c] sm:$0x8]  ;;  %v7976_v20 = vld [vmem:[#allocation2 + $0x108] sm:$0x8] }
  0x25   : > { %7000 = vmatpush3.bf16.msra.mxu0 %v7545_v38  ;;  %7521 = vmatpush3.bf16.msra.mxu1 %v7545_v38  ;;  %v401_v60 = vmax.f32 %v369_v53, 0.0  ;;  %v6816_v4 = vunpack.c.h.bf16 %v6960_v2  ;;  %v929_v6 = vshrl.u32 %v649_v58, 16  ;;  %v7560_v7 = vld [vmem:[%s9538_s3 + $0x138] sm:$0xff]   ;;  %v311_v8 = vmul.f32 %v6771_v0, %v7920_v27  ;;  %v7574_v43 = vld [vmem:[%s9538_s3 + $0x130] sm:$0xff]  }
  0x26   : > { %7001 = vmatprep.subr.bf16.mxu0 %v7546_v42  ;;  %7514 = vmatprep.subr.bf16.mxu1 %v7546_v42  ;;  %v402_v61 = vmax.f32 %v370_v54, 0.0  ;;  %581 = vst [vmem:[#allocation2 + $0x1c] sm:$0xf] %v6701_v55  ;;  %582 = vst [vmem:[#allocation2 + $0x20] sm:$0xf] %v6702_v56  ;;  %v312_v9 = vmul.f32 %v6772_v1, %v7920_v27  ;;  %v333_v10 = vmul.f32 %v6815_v3, %v7920_v27  ;;  %v6950_v44 = vld [vmem:[%s7908_s22 + $0x10] sm:$0xff]  }
  0x27   : > { %v334_v11 = vmul.f32 %v6816_v4, %v7920_v27  ;;  %v7970_v14 = vrot.slane %v687_v57, 11  ;;  %v349_v15 = vadd.f32 %v7931_v32, %v311_v8  ;;  %v7978_v21 = vrot.slane %v929_v6, 11 }
  0x28   : > { %v6857_v5 = vpack.c.bf16 %v402_v61, %v401_v60  ;;  %v7550_v13 = vld [vmem:[#allocation3 + $0x4] ss:$36 sps:$4 sm:$0xff]   ;;  %v350_v16 = vadd.f32 %v7931_v32, %v312_v9  ;;  %v371_v18 = vadd.f32 %v7931_v32, %v333_v10  ;;  %v709_v39 = vshrl.u32 %v619_v17, 16 }
  0x29   : > { %7002 = vmatpush3.bf16.msra.mxu0 %v7547_v50  ;;  %7522 = vmatpush3.bf16.msra.mxu1 %v7547_v50  ;;  %v372_v19 = vadd.f32 %v7931_v32, %v334_v11  ;;  %v381_v22 = vmax.f32 %v349_v15, 0.0  ;;  %v951_v42 = vshrl.u32 %v7976_v20, 16  ;;  %v6775_v49 = vunpack.c.l.bf16 %v6950_v44  ;;  %v6961_v61 = vld [vmem:[%s7908_s22 + $0x68] sm:$0xff]  }
  0x2a   : > { %v7548_v12 = vld [vmem:[#allocation3] ss:$36 sps:$4 sm:$0xff]   ;;  %6969 = vst [vmem:[#allocation2 + $0xf8] sm:$0xff] %v6857_v5   ;;  %7099 = vmatprep.subr.bf16.mxu1 %v7556_v62  ;;  %7211 = vmatprep.subr.bf16.mxu0 %v7557_v63  ;;  %v382_v23 = vmax.f32 %v350_v16, 0.0  ;;  %v403_v25 = vmax.f32 %v371_v18, 0.0  ;;  %v6776_v50 = vunpack.c.h.bf16 %v6950_v44  ;;  %v7990_v0 = vrot.slane %v709_v39, 11 }
  0x2b   : > { %5196 = vmatprep.mubr.bf16.mxu0 %v7550_v13  ;;  %v404_v26 = vmax.f32 %v372_v19, 0.0  ;;  %v313_v60 = vmul.f32 %v6775_v49, %v7920_v27  ;;  %v6819_v4 = vunpack.c.l.bf16 %v6961_v61  ;;  %v7998_v8 = vrot.slane %v951_v42, 11 }
  0x2c   : > { %5197 = vmatmul.mubr.bf16.vlgmr.msra.gmra.mxu0 %v7548_v12  ;;  %v6832_v33 = vpack.c.bf16 %v382_v23, %v381_v22  ;;  %v6725_v40 = vpack.c.bf16 %v403_v25, %v403_v25  ;;  %v314_v1 = vmul.f32 %v6776_v50, %v7920_v27  ;;  %v6820_v15 = vunpack.c.h.bf16 %v6961_v61  ;;  %v6962_v61 = vld [vmem:[%s7908_s22 + $0x70] sm:$0xff]  }
  0x2d   : > { %v617_v28 = vld [vmem:[#allocation2 + $0x1c] sm:$0xf]  ;;  %v618_v29 = vld [vmem:[#allocation2 + $0x20] sm:$0xf]  ;;  %7212 = vmatpush3.bf16.msra.mxu0 %v7560_v7  ;;  %v6726_v41 = vpack.c.bf16 %v404_v26, %v404_v26  ;;  %v351_v12 = vadd.f32 %v7931_v32, %v313_v60  ;;  %vm1192_vm3 = vsmask.f32 3328 }
  0x2e   : > { %v1082_v31 = vld [vmem:[#allocation2 + $0x1c] sm:$0xf]  ;;  %v692_v34 = vshrl.u32 %v617_v28, 16  ;;  %v695_v35 = vshll.u32 %v617_v28, 16  ;;  %v701_v36 = vshrl.u32 %v618_v29, 16  ;;  %v704_v37 = vshll.u32 %v618_v29, 16  ;;  %7213 = vmatprep.subr.bf16.mxu0 %v7572_v24 }
  0x2f   : > { %v1083_v38 = vld [vmem:[#allocation2 + $0x20] sm:$0xf]  ;;  %1114 = vst [vmem:[#allocation3 + $0x4c] sm:$0xf] %v1082_v31  ;;  %6964 = vst [vmem:[#allocation2 + $0x30] sm:$0xff] %v6832_v33   ;;  %v352_v13 = vadd.f32 %v7931_v32, %v314_v1  ;;  %v336_v26 = vmul.f32 %v6820_v15, %v7920_v27  ;;  %v383_v39 = vmax.f32 %v351_v12, 0.0 }
  0x30   : > { %1115 = vst [vmem:[#allocation3 + $0x70] sm:$0xf] %v1083_v38  ;;  %v694_v45 = vrot.slane %v692_v34, 7  ;;  %v703_v46 = vrot.slane %v701_v36, 7  ;;  %605 = vst [vmem:[#allocation2 + $0x10c] sm:$0xf] %v6725_v40 }
  0x31   : > { %v650_v47 = vld [vmem:[#allocation2 + $0xf8] sm:$0xf]  ;;  %v651_v48 = vld [vmem:[#allocation2 + $0xfc] sm:$0xf]  ;;  %606 = vst [vmem:[#allocation2 + $0x110] sm:$0xf] %v6726_v41  ;;  %7214 = vmatpush3.bf16.msra.mxu0 %v7574_v43 }
  0x32   : > { %v934_v51 = vshrl.u32 %v650_v47, 16  ;;  %v937_v52 = vshll.u32 %v650_v47, 16  ;;  %v943_v53 = vshrl.u32 %v651_v48, 16  ;;  %v946_v54 = vshll.u32 %v651_v48, 16  ;;  %v1104_v55 = vld [vmem:[#allocation2 + $0xf8] sm:$0xf] }
  0x33   : > { %v697_v56 = vor.u32 %v695_v35, %v694_v45  ;;  %v699_v57 = vrot.slane %v694_v45, 4  ;;  %v706_v58 = vor.u32 %v704_v37, %v703_v46  ;;  %v1105_v59 = vld [vmem:[#allocation2 + $0xfc] sm:$0xf]  ;;  %1136 = vst [vmem:[#allocation3 + $0x364] sm:$0xf] %v1104_v55  ;;  %v384_v40 = vmax.f32 %v352_v13, 0.0 }
  0x34   : > { %v936_v62 = vrot.slane %v934_v51, 7  ;;  %v945_v63 = vrot.slane %v943_v53, 7  ;;  %1137 = vst [vmem:[#allocation3 + $0x388] sm:$0xf] %v1105_v59  ;;  %v622_v35 = vld [vmem:[#allocation2 + $0x40] sm:$0x8]  ;;  %v6705_v47 = vpack.c.bf16 %v383_v39, %v383_v39 }
  0x35   : > { %v698_v2 = vsel %vm7924_vm2, %v7970_v14, %v697_v56  ;;  %v707_v3 = vsel %vm7924_vm2, %v699_v57, %v706_v58  ;;  %v335_v14 = vmul.f32 %v6819_v4, %v7920_v27  ;;  %v6706_v48 = vpack.c.bf16 %v384_v40, %v384_v40  ;;  %v8019_v59 = vld [vmem:[#allocation2 + $0x11c] sm:$0x8]  ;;  %v7561_v4 = vld [vmem:[%s9538_s3 + $0xf0] sm:$0xff]  }
  0x36   : > { %1050 = vst [vmem:[#allocation3 + $0x48] sm:$0xf] %v698_v2  ;;  %1051 = vst [vmem:[#allocation3 + $0x6c] sm:$0xf] %v707_v3  ;;  %v939_v5 = vor.u32 %v937_v52, %v936_v62  ;;  %v941_v6 = vrot.slane %v936_v62, 4  ;;  %v948_v7 = vor.u32 %v946_v54, %v945_v63  ;;  %v7559_v54 = vld [vmem:[%s9538_s3 + $0xb8] sm:$0xff]   ;;  %v374_v57 = vadd.f32 %v7931_v32, %v336_v26 }
  0x37   : > { %v620_v9 = vld [vmem:[#allocation2 + $0x30] sm:$0xf]  ;;  %v621_v10 = vld [vmem:[#allocation2 + $0x34] sm:$0xf]  ;;  %v653_v24 = vld [vmem:[#allocation2 + $0x10c] sm:$0xf]  ;;  %v373_v28 = vadd.f32 %v7931_v32, %v335_v14 }
  0x38   : > { %v1084_v11 = vld [vmem:[#allocation2 + $0x30] sm:$0xf]  ;;  %v940_v16 = vsel %vm7924_vm2, %v7978_v21, %v939_v5  ;;  %v949_v17 = vsel %vm7924_vm2, %v941_v6, %v948_v7  ;;  %v714_v18 = vshrl.u32 %v620_v9, 16  ;;  %v717_v19 = vshll.u32 %v620_v9, 16  ;;  %v1085_v20 = vld [vmem:[#allocation2 + $0x34] sm:$0xf] }
  0x39   : > { %1116 = vst [vmem:[#allocation3 + $0x94] sm:$0xf] %v1084_v11  ;;  %1072 = vst [vmem:[#allocation3 + $0x360] sm:$0xf] %v940_v16  ;;  %v723_v22 = vshrl.u32 %v621_v10, 16  ;;  %v726_v23 = vshll.u32 %v621_v10, 16  ;;  %v6823_v7 = vunpack.c.l.bf16 %v6962_v61  ;;  %v6824_v10 = vunpack.c.h.bf16 %v6962_v61 }
  0x3a   : > { %1073 = vst [vmem:[#allocation3 + $0x384] sm:$0xf] %v949_v17  ;;  %1117 = vst [vmem:[#allocation3 + $0xb8] sm:$0xf] %v1085_v20  ;;  %v654_v25 = vld [vmem:[#allocation2 + $0x110] sm:$0xf] }
  0x3b   : > { %v716_v29 = vrot.slane %v714_v18, 7  ;;  %v956_v21 = vshrl.u32 %v653_v24, 16  ;;  %v959_v31 = vshll.u32 %v653_v24, 16  ;;  %v965_v33 = vshrl.u32 %v654_v25, 16  ;;  %v1106_v34 = vld [vmem:[#allocation2 + $0x10c] sm:$0xf] }
  0x3c   : > { %v725_v36 = vrot.slane %v723_v22, 7  ;;  %v968_v37 = vshll.u32 %v654_v25, 16  ;;  %v1107_v38 = vld [vmem:[#allocation2 + $0x110] sm:$0xf]  ;;  %1138 = vst [vmem:[#allocation3 + $0x3ac] sm:$0xf] %v1106_v34  ;;  %v337_v14 = vmul.f32 %v6823_v7, %v7920_v27 }
  0x3d   : > { %v719_v41 = vor.u32 %v717_v19, %v716_v29  ;;  %v721_v42 = vrot.slane %v716_v29, 4  ;;  %v958_v43 = vrot.slane %v956_v21, 7  ;;  %v967_v44 = vrot.slane %v965_v33, 7  ;;  %1139 = vst [vmem:[#allocation3 + $0x3d0] sm:$0xf] %v1107_v38  ;;  %v6951_v60 = vld [vmem:[%s7908_s22 + $0x18] sm:$0xff]  }
  0x3e   : > { %v7551_v45 = vld [vmem:[#allocation3 + $0x4c] ss:$36 sps:$4 sm:$0xff]   ;;  %v728_v46 = vor.u32 %v726_v23, %v725_v36  ;;  %585 = vst [vmem:[#allocation2 + $0x44] sm:$0xf] %v6705_v47  ;;  %586 = vst [vmem:[#allocation2 + $0x48] sm:$0xf] %v6706_v48  ;;  %v6779_v1 = vunpack.c.l.bf16 %v6951_v60  ;;  %v6780_v2 = vunpack.c.h.bf16 %v6951_v60  ;;  %v338_v19 = vmul.f32 %v6824_v10, %v7920_v27 }
  0x3f   : > { %v7558_v49 = vld [vmem:[#allocation3 + $0x48] ss:$36 sps:$4 sm:$0xff]   ;;  %v720_v50 = vsel %vm7924_vm2, %v7990_v0, %v719_v41  ;;  %v961_v51 = vor.u32 %v959_v31, %v958_v43  ;;  %v963_v52 = vrot.slane %v958_v43, 4  ;;  %v970_v53 = vor.u32 %v968_v37, %v967_v44  ;;  %5204 = vmatprep.mubr.bf16.mxu0 %v7551_v45  ;;  %v7567_v16 = vld [vmem:[%s9538_s3 + $0xe8] sm:$0xff]   ;;  %v7571_v37 = vld [vmem:[%s9538_s3 + $0xe0] sm:$0xff]  }
  0x40   : > { %v729_v55 = vsel %vm7924_vm2, %v721_v42, %v728_v46  ;;  %1052 = vst [vmem:[#allocation3 + $0x90] sm:$0xf] %v720_v50  ;;  %v731_v56 = vshrl.u32 %v622_v35, 16  ;;  %v405_v58 = vmax.f32 %v373_v28, 0.0  ;;  %5205 = vmatmul.mubr.bf16.gmra.mxu0 %v7558_v49  ;;  %v7555_v3 = vld [vmem:[#allocation3 + $0x364] ss:$36 sps:$4 sm:$0xff]   ;;  %v315_v9 = vmul.f32 %v6779_v1, %v7920_v27 }
  0x41   : > { %v7553_v62 = vld [vmem:[#allocation3 + $0x360] ss:$36 sps:$4 sm:$0xff]   ;;  %1053 = vst [vmem:[#allocation3 + $0xb4] sm:$0xf] %v729_v55  ;;  %v962_v63 = vsel %vm7924_vm2, %v7998_v8, %v961_v51  ;;  %v971_v0 = vsel %vm7924_vm2, %v963_v52, %v970_v53  ;;  %v406_v5 = vmax.f32 %v374_v57, 0.0  ;;  %v316_v8 = vmul.f32 %v6780_v2, %v7920_v27  ;;  %5292 = vmatprep.mubr.bf16.mxu1 %v7555_v3  ;;  %v7562_v12 = vld [vmem:[%s9538_s3 + $0xb0] sm:$0xff]  }
  0x42   : > { %1074 = vst [vmem:[#allocation3 + $0x3a8] sm:$0xf] %v962_v63  ;;  %1075 = vst [vmem:[#allocation3 + $0x3cc] sm:$0xf] %v971_v0  ;;  %v8031_v6 = vld [vmem:[#allocation2 + $0x54] sm:$0x8]  ;;  %5293 = vmatmul.mubr.bf16.vlgmr.msra.gmra.mxu1 %v7553_v62  ;;  %v353_v18 = vadd.f32 %v7931_v32, %v315_v9  ;;  %v375_v29 = vadd.f32 %v7931_v32, %v337_v14  ;;  %v376_v21 = vadd.f32 %v7931_v32, %v338_v19 }
  0x43   : > { %v8035_v11 = vld [vmem:[#allocation2 + $0x130] sm:$0x8]  ;;  %v8040_v13 = vrot.slane %v731_v56, 11  ;;  %v6862_v15 = vpack.c.bf16 %v406_v5, %v405_v58  ;;  %v973_v17 = vshrl.u32 %v8019_v59, 16  ;;  %v7590_v20 = vld [vmem:[%s9538_s3 + $0x168] sm:$0xff]   ;;  %7100 = vmatpush3.bf16.msra.mxu1 %v7559_v54  ;;  %v753_v22 = vshrl.u32 %v8031_v6, 16 }
  0x44   : > { %v995_v23 = vshrl.u32 %v8035_v11, 16  ;;  %7101 = vmatprep.subr.bf16.mxu1 %v7561_v4  ;;  %v354_v26 = vadd.f32 %v7931_v32, %v316_v8  ;;  %v385_v28 = vmax.f32 %v353_v18, 0.0  ;;  %7215 = vmatprep.subr.bf16.mxu0 %v7590_v20  ;;  %v7563_v31 = vld [vmem:[#allocation3 + $0x94] ss:$36 sps:$4 sm:$0xff]   ;;  %v7570_v34 = vld [vmem:[%s9538_s3 + $0xa8] sm:$0xff]   ;;  %v407_v47 = vmax.f32 %v375_v29, 0.0 }
  0x45   : > { %6970 = vst [vmem:[#allocation2 + $0x120] sm:$0xff] %v6862_v15   ;;  %v623_v24 = vld [vmem:[#allocation2 + $0x44] sm:$0xf]  ;;  %v624_v25 = vld [vmem:[#allocation2 + $0x48] sm:$0xf]  ;;  %5212 = vmatprep.mubr.bf16.mxu0 %v7563_v31  ;;  %v408_v48 = vmax.f32 %v376_v21, 0.0 }
  0x46   : > { %v736_v35 = vshrl.u32 %v623_v24, 16  ;;  %v7565_v36 = vld [vmem:[#allocation3 + $0x3ac] ss:$36 sps:$4 sm:$0xff]   ;;  %v739_v38 = vshll.u32 %v623_v24, 16  ;;  %v745_v39 = vshrl.u32 %v624_v25, 16  ;;  %v748_v42 = vshll.u32 %v624_v25, 16 }
  0x47   : > { %7102 = vmatpush3.bf16.msra.mxu1 %v7562_v12  ;;  %v1086_v43 = vld [vmem:[#allocation2 + $0x44] sm:$0xf]  ;;  %5300 = vmatprep.mubr.bf16.mxu1 %v7565_v36  ;;  %v1087_v45 = vld [vmem:[#allocation2 + $0x48] sm:$0xf]  ;;  %v386_v46 = vmax.f32 %v354_v26, 0.0  ;;  %v6729_v58 = vpack.c.bf16 %v407_v47, %v407_v47  ;;  %v6730_v60 = vpack.c.bf16 %v408_v48, %v408_v48  ;;  %v7579_v2 = vld [vmem:[%s9538_s3 + $0xd8] sm:$0xff]  }
  0x48   : > { %v7568_v33 = vld [vmem:[#allocation3 + $0x90] ss:$36 sps:$4 sm:$0xff]   ;;  %v738_v41 = vrot.slane %v736_v35, 7  ;;  %7103 = vmatprep.subr.bf16.mxu1 %v7567_v16  ;;  %v747_v44 = vrot.slane %v745_v39, 7  ;;  %1118 = vst [vmem:[#allocation3 + $0xdc] sm:$0xf] %v1086_v43 }
  0x49   : > { %v7569_v40 = vld [vmem:[#allocation3 + $0x3a8] ss:$36 sps:$4 sm:$0xff]   ;;  %5213 = vmatmul.mubr.bf16.gmra.mxu0 %v7568_v33  ;;  %v7573_v49 = vld [vmem:[%s9538_s3 + $0xa0] sm:$0xff]   ;;  %1119 = vst [vmem:[#allocation3 + $0x100] sm:$0xf] %v1087_v45  ;;  %v7594_v52 = vld [vmem:[%s9538_s3 + $0x128] sm:$0xff]   ;;  %v6837_v57 = vpack.c.bf16 %v386_v46, %v385_v28 }
  0x4a   : > { %v741_v50 = vor.u32 %v739_v38, %v738_v41  ;;  %v743_v51 = vrot.slane %v738_v41, 4  ;;  %5301 = vmatmul.mubr.bf16.gmra.mxu1 %v7569_v40  ;;  %v750_v53 = vor.u32 %v748_v42, %v747_v44  ;;  %7216 = vmatpush3.bf16.msra.mxu0 %v7594_v52  ;;  %v6415_v4 = vrot.slane %v973_v17, 11  ;;  %609 = vst [vmem:[#allocation2 + $0x134] sm:$0xf] %v6729_v58  ;;  %v6952_v10 = vld [vmem:[%s7908_s22 + $0x20] sm:$0xff]   ;;  %v7582_v20 = vld [vmem:[%s9538_s3 + $0x98] sm:$0xff]  }
  0x4b   : > { %7104 = vmatpush3.bf16.msra.mxu1 %v7570_v34  ;;  %6965 = vst [vmem:[#allocation2 + $0x58] sm:$0xff] %v6837_v57   ;;  %610 = vst [vmem:[#allocation2 + $0x138] sm:$0xf] %v6730_v60  ;;  %v8081_v8 = vrot.slane %v753_v22, 11  ;;  %v628_v12 = vld [vmem:[#allocation2 + $0x68] sm:$0x8]  ;;  %v6784_v15 = vunpack.c.h.bf16 %v6952_v10 }
  0x4c   : > { %v656_v54 = vld [vmem:[#allocation2 + $0x120] sm:$0xf]  ;;  %v657_v55 = vld [vmem:[#allocation2 + $0x124] sm:$0xf]  ;;  %v742_v61 = vsel %vm7924_vm2, %v8040_v13, %v741_v50  ;;  %7105 = vmatprep.subr.bf16.mxu1 %v7571_v37  ;;  %v751_v3 = vsel %vm7924_vm2, %v743_v51, %v750_v53  ;;  %vm1193_vm4 = vsmask.f32 7440  ;;  %v6783_v13 = vunpack.c.l.bf16 %v6952_v10 }
  0x4d   : > { %v1108_v56 = vld [vmem:[#allocation2 + $0x120] sm:$0xf]  ;;  %v978_v62 = vshrl.u32 %v656_v54, 16  ;;  %v981_v63 = vshll.u32 %v656_v54, 16  ;;  %v987_v0 = vshrl.u32 %v657_v55, 16  ;;  %v990_v5 = vshll.u32 %v657_v55, 16  ;;  %vm8127_vm5 = vmor %vm1192_vm3, %vm1193_vm4 }
  0x4e   : > { %v1109_v1 = vld [vmem:[#allocation2 + $0x124] sm:$0xf]  ;;  %1140 = vst [vmem:[#allocation3 + $0x3f4] sm:$0xf] %v1108_v56  ;;  %1054 = vst [vmem:[#allocation3 + $0xd8] sm:$0xf] %v742_v61  ;;  %v318_v24 = vmul.f32 %v6784_v15, %v7920_v27 }
  0x4f   : > { %1141 = vst [vmem:[#allocation3 + $0x418] sm:$0xf] %v1109_v1  ;;  %1055 = vst [vmem:[#allocation3 + $0xfc] sm:$0xf] %v751_v3  ;;  %v980_v7 = vrot.slane %v978_v62, 7  ;;  %v989_v9 = vrot.slane %v987_v0, 7  ;;  %7106 = vmatpush3.bf16.msra.mxu1 %v7573_v49 }
  0x50   : > { %v8086_v59 = vrot.slane %v995_v23, 11  ;;  %v775_v14 = vshrl.u32 %v628_v12, 16  ;;  %v1144_v16 = vld [vmem:[#allocation2 + $0x8] sm:$0xf]  ;;  %v8088_v17 = vld [vmem:[#allocation2 + $0xc] sm:$0xf]  ;;  %7107 = vmatprep.subr.bf16.mxu1 %v7579_v2  ;;  %v317_v23 = vmul.f32 %v6783_v13, %v7920_v27  ;;  %v356_v35 = vadd.f32 %v7931_v32, %v318_v24 }
  0x51   : > { %v983_v18 = vor.u32 %v981_v63, %v980_v7  ;;  %v985_v19 = vrot.slane %v980_v7, 4  ;;  %v992_v6 = vor.u32 %v990_v5, %v989_v9  ;;  %v1196_v22 = vshrl.u32 %v1144_v16, 16  ;;  %v7583_v11 = vld [vmem:[%s9538_s3 + $0xd0] sm:$0xff]   ;;  %v7589_v27 = vld [vmem:[%s9538_s3 + $0xc8] sm:$0xff]   ;;  %v7595_v53 = vld [vmem:[%s9538_s3 + $0xc0] sm:$0xff]  }
  0x52   : > { %v8098_v25 = vrot.slane %v775_v14, 11  ;;  %v1199_v26 = vshll.u32 %v1144_v16, 16  ;;  %v7584_v21 = vld [vmem:[%s9538_s3 + $0x90] sm:$0xff]   ;;  %v1205_v33 = vshll.u32 %v8088_v17, 16  ;;  %v355_v34 = vadd.f32 %v7931_v32, %v317_v23  ;;  %v626_v38 = vld [vmem:[#allocation2 + $0x58] sm:$0xf] }
  0x53   : > { %v984_v28 = vsel %vm7924_vm2, %v6415_v4, %v983_v18  ;;  %v993_v29 = vsel %vm7924_vm2, %v985_v19, %v992_v6  ;;  %v1198_v31 = vrot.slane %v1196_v22, 4  ;;  %v1209_v37 = vshrl.u32 %v8088_v17, 16  ;;  %7108 = vmatpush3.bf16.msra.mxu1 %v7582_v20  ;;  %v627_v39 = vld [vmem:[#allocation2 + $0x5c] sm:$0xf]  ;;  %v7575_v41 = vld [vmem:[#allocation3 + $0xdc] ss:$36 sps:$4 sm:$0xff]  }
  0x54   : > { %1076 = vst [vmem:[#allocation3 + $0x3f0] sm:$0xf] %v984_v28  ;;  %1077 = vst [vmem:[#allocation3 + $0x414] sm:$0xf] %v993_v29  ;;  %v1201_v36 = vrot.slane %v1199_v26, 5  ;;  %v8114_v40 = vrot.slane %v1205_v33, 5  ;;  %7109 = vmatprep.subr.bf16.mxu1 %v7583_v11  ;;  %5220 = vmatprep.mubr.bf16.mxu0 %v7575_v41 }
  0x55   : > { %v758_v43 = vshrl.u32 %v626_v38, 16  ;;  %v761_v45 = vshll.u32 %v626_v38, 16  ;;  %v767_v46 = vshrl.u32 %v627_v39, 16  ;;  %v770_v47 = vshll.u32 %v627_v39, 16  ;;  %v1088_v48 = vld [vmem:[#allocation2 + $0x58] sm:$0xf] }
  0x56   : > { %v7580_v42 = vld [vmem:[#allocation3 + $0xd8] ss:$36 sps:$4 sm:$0xff]   ;;  %v1202_v44 = vor.u32 %v1201_v36, %v1198_v31  ;;  %v7593_v32 = vld [vmem:[%s9538_s3 + $0x88] sm:$0xff]   ;;  %v387_v49 = vmax.f32 %v355_v34, 0.0  ;;  %v1089_v51 = vld [vmem:[#allocation2 + $0x5c] sm:$0xf] }
  0x57   : > { %v760_v50 = vrot.slane %v758_v43, 7  ;;  %1120 = vst [vmem:[#allocation3 + $0x124] sm:$0xf] %v1088_v48  ;;  %v659_v52 = vld [vmem:[#allocation2 + $0x134] sm:$0xf]  ;;  %v388_v54 = vmax.f32 %v356_v35, 0.0  ;;  %5221 = vmatmul.mubr.bf16.gmra.mxu0 %v7580_v42  ;;  %7110 = vmatpush3.bf16.msra.mxu1 %v7584_v21 }
  0x58   : > { %v769_v55 = vrot.slane %v767_v46, 7  ;;  %1121 = vst [vmem:[#allocation3 + $0x148] sm:$0xf] %v1089_v51  ;;  %v660_v56 = vld [vmem:[#allocation2 + $0x138] sm:$0xf]  ;;  %v1000_v57 = vshrl.u32 %v659_v52, 16  ;;  %v6709_v60 = vpack.c.bf16 %v387_v49, %v387_v49  ;;  %7111 = vmatprep.subr.bf16.mxu1 %v7589_v27 }
  0x59   : > { %v1003_v58 = vshll.u32 %v659_v52, 16  ;;  %v1146_v61 = vld [vmem:[#allocation2 + $0x10] sm:$0x1]  ;;  %v1643_v62 = vld [vmem:[#allocation2 + $0x18] sm:$0x8]  ;;  %v7605_v63 = vld [vmem:[%s9538_s3 + $0x160] sm:$0xff]   ;;  %v763_v0 = vor.u32 %v761_v45, %v760_v50  ;;  %v6710_v16 = vpack.c.bf16 %v388_v54, %v388_v54 }
  0x5a   : > { %v765_v1 = vrot.slane %v760_v50, 4  ;;  %v1009_v2 = vshrl.u32 %v660_v56, 16  ;;  %v1012_v3 = vshll.u32 %v660_v56, 16  ;;  %v1110_v4 = vld [vmem:[#allocation2 + $0x134] sm:$0xf]  ;;  %v7606_v10 = vld [vmem:[%s9538_s3 + $0x120] sm:$0xff]   ;;  %v772_v13 = vor.u32 %v770_v47, %v769_v55  ;;  %7217 = vmatprep.subr.bf16.mxu0 %v7605_v63 }
  0x5b   : > { %v8131_v7 = vld [vmem:[#allocation2 + $0x1c] sm:$0xf]  ;;  %v8133_v9 = vld [vmem:[#allocation2 + $0x20] sm:$0xf]  ;;  %v1002_v15 = vrot.slane %v1000_v57, 7  ;;  %v1203_v17 = vrot.slane %v1202_v44, 4  ;;  %v764_v19 = vsel %vm7924_vm2, %v8081_v8, %v763_v0  ;;  %7218 = vmatpush3.bf16.msra.mxu0 %v7606_v10  ;;  %7112 = vmatpush3.bf16.msra.mxu1 %v7593_v32 }
  0x5c   : > { %v7577_v12 = vld [vmem:[#allocation3 + $0x3f4] ss:$36 sps:$4 sm:$0xff]   ;;  %1142 = vst [vmem:[#allocation3 + $0x43c] sm:$0xf] %v1110_v4  ;;  %589 = vst [vmem:[#allocation2 + $0x6c] sm:$0xf] %v6709_v60  ;;  %v773_v23 = vsel %vm7924_vm2, %v765_v1, %v772_v13  ;;  %7113 = vmatprep.subr.bf16.mxu1 %v7595_v53 }
  0x5d   : > { %v7596_v14 = vld [vmem:[%s9538_s3 + $0x80] sm:$0xff]   ;;  %v7581_v18 = vld [vmem:[#allocation3 + $0x3f0] ss:$36 sps:$4 sm:$0xff]   ;;  %v1011_v6 = vrot.slane %v1009_v2, 7  ;;  %v1211_v22 = vrot.slane %v1209_v37, 4  ;;  %5308 = vmatprep.mubr.bf16.mxu1 %v7577_v12  ;;  %v1005_v24 = vor.u32 %v1003_v58, %v1002_v15  ;;  %v1007_v26 = vrot.slane %v1002_v15, 4 }
  0x5e   : > { %v1111_v20 = vld [vmem:[#allocation2 + $0x138] sm:$0xf]  ;;  %1056 = vst [vmem:[#allocation3 + $0x120] sm:$0xf] %v764_v19  ;;  %590 = vst [vmem:[#allocation2 + $0x70] sm:$0xf] %v6710_v16  ;;  %v1208_v8 = vsel %vm8127_vm5, %v1203_v17, %v8114_v40  ;;  %5309 = vmatmul.mubr.bf16.gmra.mxu1 %v7581_v18 }
  0x5f   : > { %v7602_v11 = vld [vmem:[%s9538_s3 + $0x1f8] sm:$0xff]   ;;  %1143 = vst [vmem:[#allocation3 + $0x460] sm:$0xf] %v1111_v20  ;;  %v6953_v28 = vld [vmem:[%s7908_s22 + $0x28] sm:$0xff]   ;;  %1057 = vst [vmem:[#allocation3 + $0x144] sm:$0xf] %v773_v23  ;;  %v1014_v29 = vor.u32 %v1012_v3, %v1011_v6  ;;  %v1212_v21 = vor.u32 %v1211_v22, %v8114_v40  ;;  %v1006_v27 = vsel %vm7924_vm2, %v8086_v59, %v1005_v24  ;;  %7114 = vmatpush3.bf16.msra.mxu1 %v7596_v14 }
  0x60   : > { %v1215_v31 = vshll.u32 %v1146_v61, 16  ;;  %1611 = vst [vmem:[#allocation3 + $0x8] sm:$0xf] %v1208_v8  ;;  %v1692_v33 = vshrl.u32 %v1643_v62, 16  ;;  %v1697_v34 = vshrl.u32 %v8131_v7, 16  ;;  %v1700_v35 = vshll.u32 %v8131_v7, 16  ;;  %7323 = vmatprep.subr.bf16.mxu1 %v7602_v11 }
  0x61   : > { %v1706_v36 = vshrl.u32 %v8133_v9, 16  ;;  %v631_v37 = vld [vmem:[#allocation2 + $0x7c] sm:$0x8]  ;;  %v1015_v38 = vsel %vm7924_vm2, %v1007_v26, %v1014_v29  ;;  %1078 = vst [vmem:[#allocation3 + $0x438] sm:$0xf] %v1006_v27  ;;  %v1213_v39 = vrot.slane %v1212_v21, 4  ;;  %v6787_v46 = vunpack.c.l.bf16 %v6953_v28 }
  0x62   : > { %v1217_v40 = vrot.slane %v1215_v31, 5  ;;  %v6417_v41 = vrot.slane %v1692_v33, 11  ;;  %v8162_v42 = vld [vmem:[#allocation2 + $0x1c] sm:$0xf]  ;;  %1079 = vst [vmem:[#allocation3 + $0x45c] sm:$0xf] %v1015_v38  ;;  %v6788_v50 = vunpack.c.h.bf16 %v6953_v28 }
  0x63   : > { %v7617_v59 = vld [vmem:[%s9538_s3 + $0x158] sm:$0xff]   ;;  %v1699_v43 = vrot.slane %v1697_v34, 7  ;;  %v1708_v44 = vrot.slane %v1706_v36, 7  ;;  %v1709_v45 = vshll.u32 %v8133_v9, 16  ;;  %v6954_v47 = vld [vmem:[%s7908_s22 + $0x30] sm:$0xff]   ;;  %v797_v51 = vshrl.u32 %v631_v37, 16 }
  0x64   : > { %v629_v48 = vld [vmem:[#allocation2 + $0x6c] sm:$0xf]  ;;  %v1218_v49 = vsel %vm8127_vm5, %v1213_v39, %v1217_v40  ;;  %v1220_v52 = vshrl.u32 %v8162_v42, 16  ;;  %7219 = vmatprep.subr.bf16.mxu0 %v7617_v59  ;;  %v7621_v57 = vld [vmem:[%s9538_s3 + $0x118] sm:$0xff]   ;;  %v8178_v62 = vld [vmem:[%s9536_s1] ss:$0 sm:$0xff]  ;;  %v6791_v10 = vunpack.c.l.bf16 %v6954_v47  ;;  %v6792_v12 = vunpack.c.h.bf16 %v6954_v47 }
  0x65   : > { %v1090_v32 = vld [vmem:[#allocation2 + $0x6c] sm:$0xf]  ;;  %v780_v53 = vshrl.u32 %v629_v48, 16  ;;  %v783_v54 = vshll.u32 %v629_v48, 16  ;;  %1612 = vst [vmem:[#allocation3 + $0x2c] sm:$0xf] %v1218_v49  ;;  %v1702_v55 = vor.u32 %v1700_v35, %v1699_v43  ;;  %v1711_v61 = vor.u32 %v1709_v45, %v1708_v44  ;;  %7220 = vmatpush3.bf16.msra.mxu0 %v7621_v57 }
  0x66   : > { %1122 = vst [vmem:[#allocation3 + $0x16c] sm:$0xf] %v1090_v32  ;;  %v1704_v56 = vrot.slane %v1699_v43, 4  ;;  %v630_v58 = vld [vmem:[#allocation2 + $0x70] sm:$0xf]  ;;  %v319_v63 = vmul.f32 %v8178_v62, %v6787_v46  ;;  %v320_v0 = vmul.f32 %v8178_v62, %v6788_v50  ;;  %v8182_v1 = vrot.slane %v797_v51, 11 }
  0x67   : > { %v1091_v60 = vld [vmem:[#allocation2 + $0x70] sm:$0xf]  ;;  %v7591_v3 = vld [vmem:[#allocation3 + $0x120] ss:$36 sps:$4 sm:$0xff]   ;;  %v782_v4 = vrot.slane %v780_v53, 7  ;;  %v1703_v7 = vsel %vm7924_vm2, %v6417_v41, %v1702_v55  ;;  %v789_v13 = vshrl.u32 %v630_v58, 16  ;;  %v321_v28 = vmul.f32 %v8178_v62, %v6791_v10 }
  0x68   : > { %v7585_v2 = vld [vmem:[#allocation3 + $0x124] ss:$36 sps:$4 sm:$0xff]   ;;  %1123 = vst [vmem:[#allocation3 + $0x190] sm:$0xf] %v1091_v60  ;;  %v1148_v9 = vld [vmem:[#allocation2 + $0x20] sm:$0xf]  ;;  %v1712_v14 = vsel %vm7924_vm2, %v1704_v56, %v1711_v61  ;;  %v322_v29 = vmul.f32 %v8178_v62, %v6792_v12 }
  0x69   : > { %v792_v15 = vshll.u32 %v630_v58, 16  ;;  %2075 = vst [vmem:[#allocation3 + $0xc] sm:$0xf] %v1703_v7  ;;  %v8191_v16 = vld [vmem:[%s9537_s2] ss:$0 sm:$0xff]  ;;  %5228 = vmatprep.mubr.bf16.mxu0 %v7585_v2  ;;  %v785_v6 = vor.u32 %v783_v54, %v782_v4  ;;  %v787_v20 = vrot.slane %v782_v4, 4 }
  0x6a   : > { %v357_v17 = vadd.f32 %v8191_v16, %v319_v63  ;;  %v1149_v18 = vld [vmem:[#allocation2 + $0x24] sm:$0x1]  ;;  %v1646_v19 = vld [vmem:[#allocation2 + $0x2c] sm:$0x8]  ;;  %2076 = vst [vmem:[#allocation3 + $0x30] sm:$0xf] %v1712_v14  ;;  %v358_v22 = vadd.f32 %v8191_v16, %v320_v0  ;;  %5229 = vmatmul.mubr.bf16.gmra.mxu0 %v7591_v3  ;;  %v359_v55 = vadd.f32 %v8191_v16, %v321_v28 }
  0x6b   : > { %v1222_v11 = vrot.slane %v1220_v52, 4  ;;  %v1647_v23 = vld [vmem:[#allocation2 + $0x30] sm:$0xf]  ;;  %v7587_v24 = vld [vmem:[#allocation3 + $0x43c] ss:$36 sps:$4 sm:$0xff]   ;;  %v791_v8 = vrot.slane %v789_v13, 7  ;;  %v786_v21 = vsel %vm7924_vm2, %v8098_v25, %v785_v6  ;;  %v360_v56 = vadd.f32 %v8191_v16, %v322_v29 }
  0x6c   : > { %v7592_v26 = vld [vmem:[#allocation3 + $0x438] ss:$36 sps:$4 sm:$0xff]   ;;  %v389_v31 = vmax.f32 %v357_v17, 0.0  ;;  %v390_v33 = vmax.f32 %v358_v22, 0.0  ;;  %v1223_v27 = vshll.u32 %v8162_v42, 16  ;;  %5316 = vmatprep.mubr.bf16.mxu1 %v7587_v24  ;;  %v1229_v35 = vshll.u32 %v1148_v9, 16 }
  0x6d   : > { %v794_v34 = vor.u32 %v792_v15, %v791_v8  ;;  %1058 = vst [vmem:[#allocation3 + $0x168] sm:$0xf] %v786_v21  ;;  %v1233_v36 = vshrl.u32 %v1148_v9, 16  ;;  %v1239_v37 = vshll.u32 %v1149_v18, 16  ;;  %v7629_v38 = vld [vmem:[%s9538_s3 + $0x150] sm:$0xff]   ;;  %5317 = vmatmul.mubr.bf16.gmra.mxu1 %v7592_v26  ;;  %v1714_v59 = vshrl.u32 %v1646_v19, 16 }
  0x6e   : > { %v6842_v39 = vpack.c.bf16 %v390_v33, %v389_v31  ;;  %v1225_v40 = vrot.slane %v1223_v27, 5  ;;  %v1648_v41 = vld [vmem:[#allocation2 + $0x34] sm:$0xf]  ;;  %v1719_v25 = vshrl.u32 %v1647_v23, 16  ;;  %v1231_v44 = vrot.slane %v1229_v35, 5  ;;  %7221 = vmatprep.subr.bf16.mxu0 %v7629_v38  ;;  %v7604_v52 = vld [vmem:[%s9538_s3 + $0x1b8] sm:$0xff]  }
  0x6f   : > { %v7630_v42 = vld [vmem:[%s9538_s3 + $0x110] sm:$0xff]   ;;  %v795_v43 = vsel %vm7924_vm2, %v787_v20, %v794_v34  ;;  %v1235_v45 = vrot.slane %v1233_v36, 4  ;;  %v1241_v46 = vrot.slane %v1239_v37, 5  ;;  %v6418_v48 = vrot.slane %v1714_v59, 11  ;;  %v8218_v12 = vld [vmem:[%s7908_s22 + $0x38] sm:$0xff]   ;;  %v8225_v18 = vld [vmem:[%s7908_s22 + $0x40] sm:$0xff]  }
  0x70   : > { %1059 = vst [vmem:[#allocation3 + $0x18c] sm:$0xf] %v795_v43  ;;  %6966 = vst [vmem:[#allocation2 + $0x80] sm:$0xff] %v6842_v39   ;;  %v1226_v47 = vor.u32 %v1225_v40, %v1222_v11  ;;  %v1721_v32 = vrot.slane %v1719_v25, 7  ;;  %v1722_v49 = vshll.u32 %v1647_v23, 16  ;;  %7222 = vmatpush3.bf16.msra.mxu0 %v7630_v42  ;;  %v1728_v54 = vshrl.u32 %v1648_v41, 16 }
  0x71   : > { %v634_v50 = vld [vmem:[#allocation2 + $0x90] sm:$0x8]  ;;  %v7601_v51 = vld [vmem:[#allocation3 + $0xc] ss:$36 sps:$4 sm:$0xff]   ;;  %v1236_v53 = vor.u32 %v1235_v45, %v1231_v44  ;;  %v1731_v0 = vshll.u32 %v1648_v41, 16  ;;  %v391_v7 = vmax.f32 %v359_v55, 0.0  ;;  %v6795_v39 = vunpack.c.l.bf16 %v8218_v12 }
  0x72   : > { %v1150_v57 = vld [vmem:[#allocation2 + $0x30] sm:$0xf]  ;;  %v1227_v60 = vrot.slane %v1226_v47, 4  ;;  %v1724_v61 = vor.u32 %v1722_v49, %v1721_v32  ;;  %v1726_v63 = vrot.slane %v1721_v32, 4  ;;  %5357 = vmatprep.mubr.bf16.mxu1 %v7601_v51  ;;  %v1730_v4 = vrot.slane %v1728_v54, 7  ;;  %v7635_v31 = vld [vmem:[%s9538_s3 + $0x1e8] sm:$0xff]  }
  0x73   : > { %v7599_v58 = vld [vmem:[#allocation3 + $0x8] ss:$36 sps:$4 sm:$0xff]   ;;  %v1237_v3 = vrot.slane %v1236_v53, 4  ;;  %v392_v9 = vmax.f32 %v360_v56, 0.0  ;;  %v819_v14 = vshrl.u32 %v634_v50, 16  ;;  %v1244_v17 = vshrl.u32 %v1150_v57, 16 }
  0x74   : > { %v7618_v2 = vld [vmem:[%s9538_s3 + $0x1f0] sm:$0xff]   ;;  %v1232_v13 = vsel %vm8127_vm5, %v1227_v60, %v1231_v44  ;;  %v1725_v15 = vsel %vm7924_vm2, %v6418_v48, %v1724_v61  ;;  %v1733_v6 = vor.u32 %v1731_v0, %v1730_v4  ;;  %v6713_v20 = vpack.c.bf16 %v391_v7, %v391_v7  ;;  %v1152_v11 = vld [vmem:[#allocation2 + $0x38] sm:$0x1]  ;;  %v1649_v29 = vld [vmem:[#allocation2 + $0x40] sm:$0x8] }
  0x75   : > { %v1151_v10 = vld [vmem:[#allocation2 + $0x34] sm:$0xf]  ;;  %v1242_v19 = vsel %vm8127_vm5, %v1237_v3, %v1241_v46  ;;  %1613 = vst [vmem:[#allocation3 + $0x50] sm:$0xf] %v1232_v13  ;;  %2077 = vst [vmem:[#allocation3 + $0x54] sm:$0xf] %v1725_v15  ;;  %v6714_v22 = vpack.c.bf16 %v392_v9, %v392_v9  ;;  %5358 = vmatmul.mubr.bf16.vlgmr.msra.gmra.mxu1 %v7599_v58  ;;  %v6796_v40 = vunpack.c.h.bf16 %v8218_v12  ;;  %v6799_v41 = vunpack.c.l.bf16 %v8225_v18 }
  0x76   : > { %v7622_v23 = vld [vmem:[%s9538_s3 + $0x1b0] sm:$0xff]   ;;  %1614 = vst [vmem:[#allocation3 + $0x74] sm:$0xf] %v1242_v19  ;;  %v8232_v24 = vrot.slane %v819_v14, 11  ;;  %v8234_v26 = vrot.slane %v1244_v17, 4  ;;  %v1247_v8 = vshll.u32 %v1150_v57, 16  ;;  %7324 = vmatpush3.bf16.msra.mxu1 %v7604_v52  ;;  %v1734_v34 = vsel %vm7924_vm2, %v1726_v63, %v1733_v6 }
  0x77   : > { %v1253_v28 = vshll.u32 %v1151_v10, 16  ;;  %v8236_v21 = vld [vmem:[#allocation2 + $0x44] sm:$0xf]  ;;  %v7597_v33 = vld [vmem:[#allocation3 + $0x16c] ss:$36 sps:$4 sm:$0xff]   ;;  %v1257_v35 = vshrl.u32 %v1151_v10, 16  ;;  %7325 = vmatprep.subr.bf16.mxu1 %v7618_v2  ;;  %v6800_v59 = vunpack.c.h.bf16 %v8225_v18  ;;  %v323_v9 = vmul.f32 %v8178_v62, %v6795_v39 }
  0x78   : > { %v7603_v27 = vld [vmem:[#allocation3 + $0x168] ss:$36 sps:$4 sm:$0xff]   ;;  %593 = vst [vmem:[#allocation2 + $0x94] sm:$0xf] %v6713_v20  ;;  %594 = vst [vmem:[#allocation2 + $0x98] sm:$0xf] %v6714_v22  ;;  %5236 = vmatprep.mubr.bf16.mxu0 %v7597_v33  ;;  %v324_v10 = vmul.f32 %v8178_v62, %v6796_v40  ;;  %v325_v12 = vmul.f32 %v8178_v62, %v6799_v41 }
  0x79   : > { %v632_v36 = vld [vmem:[#allocation2 + $0x80] sm:$0xf]  ;;  %v633_v37 = vld [vmem:[#allocation2 + $0x84] sm:$0xf]  ;;  %2078 = vst [vmem:[#allocation3 + $0x78] sm:$0xf] %v1734_v34  ;;  %5237 = vmatmul.mubr.bf16.gmra.mxu0 %v7603_v27  ;;  %v326_v13 = vmul.f32 %v8178_v62, %v6800_v59  ;;  %v361_v27 = vadd.f32 %v8191_v16, %v323_v9 }
  0x7a   : > { %v1092_v38 = vld [vmem:[#allocation2 + $0x80] sm:$0xf]  ;;  %v802_v25 = vshrl.u32 %v632_v36, 16  ;;  %v805_v42 = vshll.u32 %v632_v36, 16  ;;  %v811_v43 = vshrl.u32 %v633_v37, 16  ;;  %v814_v44 = vshll.u32 %v633_v37, 16  ;;  %7326 = vmatpush3.bf16.msra.mxu1 %v7622_v23 }
  0x7b   : > { %v1093_v45 = vld [vmem:[#allocation2 + $0x84] sm:$0xf]  ;;  %1124 = vst [vmem:[#allocation3 + $0x1b4] sm:$0xf] %v1092_v38  ;;  %v7638_v46 = vld [vmem:[%s9538_s3 + $0x1a8] sm:$0xff]   ;;  %v1249_v47 = vrot.slane %v1247_v8, 5  ;;  %7327 = vmatprep.subr.bf16.mxu1 %v7635_v31 }
  0x7c   : > { %1125 = vst [vmem:[#allocation3 + $0x1d8] sm:$0xf] %v1093_v45  ;;  %v1255_v48 = vrot.slane %v1253_v28, 5  ;;  %v1259_v32 = vrot.slane %v1257_v35, 4  ;;  %v1263_v49 = vshll.u32 %v1152_v11, 16  ;;  %v804_v50 = vrot.slane %v802_v25, 7 }
  0x7d   : > { %v813_v51 = vrot.slane %v811_v43, 7  ;;  %v1736_v52 = vshrl.u32 %v1649_v29, 16  ;;  %v1741_v53 = vshrl.u32 %v8236_v21, 16  ;;  %v1250_v54 = vor.u32 %v1249_v47, %v8234_v26  ;;  %v8254_v58 = vld [vmem:[%s7908_s22 + $0x48] sm:$0xff]   ;;  %v7612_v18 = vld [vmem:[#allocation3 + $0x50] ss:$36 sps:$4 sm:$0xff]  }
  0x7e   : > { %v1260_v55 = vor.u32 %v1259_v32, %v1255_v48  ;;  %v1265_v56 = vrot.slane %v1263_v49, 5  ;;  %v1744_v57 = vshll.u32 %v8236_v21, 16  ;;  %v807_v60 = vor.u32 %v805_v42, %v804_v50  ;;  %v1651_v0 = vld [vmem:[#allocation2 + $0x48] sm:$0xf]  ;;  %7328 = vmatpush3.bf16.msra.mxu1 %v7638_v46  ;;  %v637_v34 = vld [vmem:[#allocation2 + $0xa4] sm:$0x8] }
  0x7f   : > { %v809_v61 = vrot.slane %v804_v50, 4  ;;  %v816_v63 = vor.u32 %v814_v44, %v813_v51  ;;  %v6419_v2 = vrot.slane %v1736_v52, 11  ;;  %v635_v3 = vld [vmem:[#allocation2 + $0x94] sm:$0xf]  ;;  %v636_v4 = vld [vmem:[#allocation2 + $0x98] sm:$0xf]  ;;  %v6803_v6 = vunpack.c.l.bf16 %v8254_v58 }
  0x80   : > { %v1094_v7 = vld [vmem:[#allocation2 + $0x94] sm:$0xf]  ;;  %v808_v15 = vsel %vm7924_vm2, %v8182_v1, %v807_v60  ;;  %v7609_v17 = vld [vmem:[#allocation3 + $0x54] ss:$36 sps:$4 sm:$0xff]   ;;  %v824_v19 = vshrl.u32 %v635_v3, 16  ;;  %v827_v20 = vshll.u32 %v635_v3, 16  ;;  %v362_v43 = vadd.f32 %v8191_v16, %v324_v10 }
  0x81   : > { %v817_v14 = vsel %vm7924_vm2, %v809_v61, %v816_v63  ;;  %1126 = vst [vmem:[#allocation3 + $0x1fc] sm:$0xf] %v1094_v7  ;;  %1060 = vst [vmem:[#allocation3 + $0x1b0] sm:$0xf] %v808_v15  ;;  %v833_v22 = vshrl.u32 %v636_v4, 16  ;;  %v836_v11 = vshll.u32 %v636_v4, 16  ;;  %5365 = vmatprep.mubr.bf16.mxu1 %v7609_v17  ;;  %v364_v60 = vadd.f32 %v8191_v16, %v326_v13 }
  0x82   : > { %1061 = vst [vmem:[#allocation3 + $0x1d4] sm:$0xf] %v817_v14  ;;  %v1095_v23 = vld [vmem:[#allocation2 + $0x98] sm:$0xf]  ;;  %v1251_v26 = vrot.slane %v1250_v54, 4  ;;  %v826_v8 = vrot.slane %v824_v19, 7  ;;  %5366 = vmatmul.mubr.bf16.gmra.mxu1 %v7612_v18 }
  0x83   : > { %1127 = vst [vmem:[#allocation3 + $0x220] sm:$0xf] %v1095_v23  ;;  %v1261_v1 = vrot.slane %v1260_v55, 4  ;;  %v1743_v28 = vrot.slane %v1741_v53, 7  ;;  %v1750_v29 = vshrl.u32 %v1651_v0, 16  ;;  %v835_v21 = vrot.slane %v833_v22, 7 }
  0x84   : > { %v1256_v31 = vsel %vm8127_vm5, %v1251_v26, %v1255_v48  ;;  %v1753_v33 = vshll.u32 %v1651_v0, 16  ;;  %v829_v35 = vor.u32 %v827_v20, %v826_v8  ;;  %v831_v36 = vrot.slane %v826_v8, 4  ;;  %v1153_v39 = vld [vmem:[#allocation2 + $0x44] sm:$0xf]  ;;  %v1154_v40 = vld [vmem:[#allocation2 + $0x48] sm:$0xf] }
  0x85   : > { %v1266_v37 = vsel %vm8127_vm5, %v1261_v1, %v1265_v56  ;;  %1615 = vst [vmem:[#allocation3 + $0x98] sm:$0xf] %v1256_v31  ;;  %v1746_v38 = vor.u32 %v1744_v57, %v1743_v28  ;;  %v7643_v41 = vld [vmem:[%s9538_s3 + $0x148] sm:$0xff]   ;;  %v838_v59 = vor.u32 %v836_v11, %v835_v21  ;;  %v1748_v25 = vrot.slane %v1743_v28, 4  ;;  %v1652_v45 = vld [vmem:[#allocation2 + $0x54] sm:$0x8] }
  0x86   : > { %1616 = vst [vmem:[#allocation3 + $0xbc] sm:$0xf] %v1266_v37  ;;  %v1752_v42 = vrot.slane %v1750_v29, 7  ;;  %v1155_v44 = vld [vmem:[#allocation2 + $0x4c] sm:$0x1]  ;;  %v830_v46 = vsel %vm7924_vm2, %v8232_v24, %v829_v35  ;;  %v393_v48 = vmax.f32 %v361_v27, 0.0  ;;  %7223 = vmatprep.subr.bf16.mxu0 %v7643_v41  ;;  %v363_v57 = vadd.f32 %v8191_v16, %v325_v12 }
  0x87   : > { %v1747_v47 = vsel %vm7924_vm2, %v6419_v2, %v1746_v38  ;;  %v841_v32 = vshrl.u32 %v637_v34, 16  ;;  %v839_v49 = vsel %vm7924_vm2, %v831_v36, %v838_v59  ;;  %1062 = vst [vmem:[#allocation3 + $0x1f8] sm:$0xf] %v830_v46  ;;  %v394_v51 = vmax.f32 %v362_v43, 0.0  ;;  %v1653_v53 = vld [vmem:[#allocation2 + $0x58] sm:$0xf] }
  0x88   : > { %v1755_v50 = vor.u32 %v1753_v33, %v1752_v42  ;;  %2079 = vst [vmem:[#allocation3 + $0x9c] sm:$0xf] %v1747_v47  ;;  %v1268_v52 = vshrl.u32 %v1153_v39, 16  ;;  %v1654_v54 = vld [vmem:[#allocation2 + $0x5c] sm:$0xf]  ;;  %v1271_v24 = vshll.u32 %v1153_v39, 16 }
  0x89   : > { %v7607_v55 = vld [vmem:[#allocation3 + $0x1b4] ss:$36 sps:$4 sm:$0xff]   ;;  %1063 = vst [vmem:[#allocation3 + $0x21c] sm:$0xf] %v839_v49  ;;  %v8282_v56 = vrot.slane %v841_v32, 11  ;;  %v6847_v0 = vpack.c.bf16 %v394_v51, %v393_v48  ;;  %v1277_v3 = vshll.u32 %v1154_v40, 16 }
  0x8a   : > { %v7611_v61 = vld [vmem:[#allocation3 + $0x1b0] ss:$36 sps:$4 sm:$0xff]   ;;  %v1756_v63 = vsel %vm7924_vm2, %v1748_v25, %v1755_v50  ;;  %v1270_v2 = vrot.slane %v1268_v52, 4  ;;  %5244 = vmatprep.mubr.bf16.mxu0 %v7607_v55  ;;  %v1273_v4 = vrot.slane %v1271_v24, 5  ;;  %v1281_v7 = vshrl.u32 %v1154_v40, 16  ;;  %v7646_v11 = vld [vmem:[%s9538_s3 + $0x108] sm:$0xff]  }
  0x8b   : > { %2080 = vst [vmem:[#allocation3 + $0xc0] sm:$0xf] %v1756_v63  ;;  %v1287_v9 = vshll.u32 %v1155_v44, 16  ;;  %v1758_v10 = vshrl.u32 %v1652_v45, 16  ;;  %5245 = vmatmul.mubr.bf16.gmra.mxu0 %v7611_v61  ;;  %6967 = vst [vmem:[#allocation2 + $0xa8] sm:$0xff] %v6847_v0   ;;  %v1279_v15 = vrot.slane %v1277_v3, 5  ;;  %v6804_v50 = vunpack.c.h.bf16 %v8254_v58 }
  0x8c   : > { %v1763_v14 = vshrl.u32 %v1653_v53, 16  ;;  %v1766_v12 = vshll.u32 %v1653_v53, 16  ;;  %v1772_v17 = vshrl.u32 %v1654_v54, 16  ;;  %v640_v13 = vld [vmem:[#allocation2 + $0xb8] sm:$0x8]  ;;  %v1274_v18 = vor.u32 %v1273_v4, %v1270_v2  ;;  %7224 = vmatpush3.bf16.msra.mxu0 %v7646_v11  ;;  %v8292_v27 = vld [vmem:[%s7908_s22 + $0x50] sm:$0xff]  }
  0x8d   : > { %v1283_v19 = vrot.slane %v1281_v7, 4  ;;  %v1289_v20 = vrot.slane %v1287_v9, 5  ;;  %v6420_v22 = vrot.slane %v1758_v10, 11  ;;  %v1775_v8 = vshll.u32 %v1654_v54, 16  ;;  %v1156_v28 = vld [vmem:[#allocation2 + $0x58] sm:$0xf] }
  0x8e   : > { %v1765_v23 = vrot.slane %v1763_v14, 7  ;;  %v1774_v26 = vrot.slane %v1772_v17, 7  ;;  %v395_v1 = vmax.f32 %v363_v57, 0.0  ;;  %v1275_v29 = vrot.slane %v1274_v18, 4  ;;  %v7613_v34 = vld [vmem:[#allocation3 + $0x1fc] ss:$36 sps:$4 sm:$0xff]  }
  0x8f   : > { %v1284_v21 = vor.u32 %v1283_v19, %v1279_v15  ;;  %v396_v31 = vmax.f32 %v364_v60, 0.0  ;;  %v863_v33 = vshrl.u32 %v640_v13, 16  ;;  %v1157_v40 = vld [vmem:[#allocation2 + $0x5c] sm:$0xf]  ;;  %v1158_v43 = vld [vmem:[#allocation2 + $0x60] sm:$0x1]  ;;  %5252 = vmatprep.mubr.bf16.mxu0 %v7613_v34  ;;  %v327_v55 = vmul.f32 %v8178_v62, %v6803_v6 }
  0x90   : > { %v7619_v35 = vld [vmem:[#allocation3 + $0x1f8] ss:$36 sps:$4 sm:$0xff]   ;;  %v1768_v36 = vor.u32 %v1766_v12, %v1765_v23  ;;  %v1770_v37 = vrot.slane %v1765_v23, 4  ;;  %v1777_v38 = vor.u32 %v1775_v8, %v1774_v26  ;;  %v6717_v39 = vpack.c.bf16 %v395_v1, %v395_v1  ;;  %v1655_v44 = vld [vmem:[#allocation2 + $0x68] sm:$0x8] }
  0x91   : > { %v1280_v41 = vsel %vm8127_vm5, %v1275_v29, %v1279_v15  ;;  %v1285_v59 = vrot.slane %v1284_v21, 4  ;;  %v6718_v25 = vpack.c.bf16 %v396_v31, %v396_v31  ;;  %v8296_v42 = vrot.slane %v863_v33, 11  ;;  %v7620_v46 = vld [vmem:[#allocation3 + $0x98] ss:$36 sps:$4 sm:$0xff]   ;;  %v8302_v49 = vld [vmem:[#allocation2 + $0x6c] sm:$0xf] }
  0x92   : > { %v7615_v45 = vld [vmem:[#allocation3 + $0x9c] ss:$36 sps:$4 sm:$0xff]   ;;  %1617 = vst [vmem:[#allocation3 + $0xe0] sm:$0xf] %v1280_v41  ;;  %v1769_v47 = vsel %vm7924_vm2, %v6420_v22, %v1768_v36  ;;  %v1778_v48 = vsel %vm7924_vm2, %v1770_v37, %v1777_v38  ;;  %597 = vst [vmem:[#allocation2 + $0xbc] sm:$0xf] %v6717_v39  ;;  %v6807_v24 = vunpack.c.l.bf16 %v8292_v27  ;;  %v6808_v57 = vunpack.c.h.bf16 %v8292_v27 }
  0x93   : > { %v1292_v32 = vshrl.u32 %v1156_v28, 16  ;;  %v638_v51 = vld [vmem:[#allocation2 + $0xa8] sm:$0xf]  ;;  %v639_v52 = vld [vmem:[#allocation2 + $0xac] sm:$0xf]  ;;  %v1290_v54 = vsel %vm8127_vm5, %v1285_v59, %v1289_v20  ;;  %5373 = vmatprep.mubr.bf16.mxu1 %v7615_v45  ;;  %5253 = vmatmul.mubr.bf16.gmra.mxu0 %v7619_v35  ;;  %v1295_v4 = vshll.u32 %v1156_v28, 16 }
  0x94   : > { %v1096_v53 = vld [vmem:[#allocation2 + $0xa8] sm:$0xf]  ;;  %2081 = vst [vmem:[#allocation3 + $0xe4] sm:$0xf] %v1769_v47  ;;  %2082 = vst [vmem:[#allocation3 + $0x108] sm:$0xf] %v1778_v48  ;;  %5374 = vmatmul.mubr.bf16.gmra.mxu1 %v7620_v46  ;;  %v329_v41 = vmul.f32 %v8178_v62, %v6807_v24 }
  0x95   : > { %598 = vst [vmem:[#allocation2 + $0xc0] sm:$0xf] %v6718_v25  ;;  %v846_v60 = vshrl.u32 %v638_v51, 16  ;;  %v849_v61 = vshll.u32 %v638_v51, 16  ;;  %v855_v63 = vshrl.u32 %v639_v52, 16  ;;  %v858_v0 = vshll.u32 %v639_v52, 16 }
  0x96   : > { %v1097_v2 = vld [vmem:[#allocation2 + $0xac] sm:$0xf]  ;;  %1128 = vst [vmem:[#allocation3 + $0x244] sm:$0xf] %v1096_v53  ;;  %1618 = vst [vmem:[#allocation3 + $0x104] sm:$0xf] %v1290_v54 }
  0x97   : > { %1129 = vst [vmem:[#allocation3 + $0x268] sm:$0xf] %v1097_v2  ;;  %v1294_v3 = vrot.slane %v1292_v32, 4  ;;  %v1301_v58 = vshll.u32 %v1157_v40, 16  ;;  %v1305_v7 = vshrl.u32 %v1157_v40, 16  ;;  %v848_v6 = vrot.slane %v846_v60, 7 }
  0x98   : > { %v857_v9 = vrot.slane %v855_v63, 7  ;;  %v1311_v10 = vshll.u32 %v1158_v43, 16  ;;  %v1780_v15 = vshrl.u32 %v1655_v44, 16  ;;  %v1297_v14 = vrot.slane %v1295_v4, 5  ;;  %v1657_v11 = vld [vmem:[#allocation2 + $0x70] sm:$0xf] }
  0x99   : > { %v1303_v12 = vrot.slane %v1301_v58, 5  ;;  %v1307_v17 = vrot.slane %v1305_v7, 4  ;;  %v1785_v13 = vshrl.u32 %v8302_v49, 16  ;;  %v851_v18 = vor.u32 %v849_v61, %v848_v6  ;;  %v641_v23 = vld [vmem:[#allocation2 + $0xbc] sm:$0xf]  ;;  %v7651_v36 = vld [vmem:[%s9538_s3 + $0x1e0] sm:$0xff]  }
  0x9a   : > { %v853_v19 = vrot.slane %v848_v6, 4  ;;  %v860_v20 = vor.u32 %v858_v0, %v857_v9  ;;  %v1313_v22 = vrot.slane %v1311_v10, 5  ;;  %v1098_v26 = vld [vmem:[#allocation2 + $0xbc] sm:$0xf]  ;;  %v1298_v8 = vor.u32 %v1297_v14, %v1294_v3  ;;  %7329 = vmatprep.subr.bf16.mxu1 %v7651_v36  ;;  %v643_v51 = vld [vmem:[#allocation2 + $0xcc] sm:$0x8] }
  0x9b   : > { %v1308_v1 = vor.u32 %v1307_v17, %v1303_v12  ;;  %v6421_v28 = vrot.slane %v1780_v15, 11  ;;  %v8313_v29 = vrot.slane %v1785_v13, 7  ;;  %v852_v21 = vsel %vm7924_vm2, %v8282_v56, %v851_v18  ;;  %1130 = vst [vmem:[#allocation3 + $0x28c] sm:$0xf] %v1098_v26  ;;  %v7625_v37 = vld [vmem:[#allocation3 + $0xe4] ss:$36 sps:$4 sm:$0xff]  }
  0x9c   : > { %v861_v31 = vsel %vm7924_vm2, %v853_v19, %v860_v20  ;;  %v642_v33 = vld [vmem:[#allocation2 + $0xc0] sm:$0xf]  ;;  %v868_v34 = vshrl.u32 %v641_v23, 16  ;;  %v871_v35 = vshll.u32 %v641_v23, 16  ;;  %1064 = vst [vmem:[#allocation3 + $0x240] sm:$0xf] %v852_v21  ;;  %v328_v40 = vmul.f32 %v8178_v62, %v6804_v50  ;;  %5381 = vmatprep.mubr.bf16.mxu1 %v7625_v37 }
  0x9d   : > { %1065 = vst [vmem:[#allocation3 + $0x264] sm:$0xf] %v861_v31  ;;  %v7628_v38 = vld [vmem:[#allocation3 + $0xe0] ss:$36 sps:$4 sm:$0xff]   ;;  %v877_v39 = vshrl.u32 %v642_v33, 16  ;;  %v365_v56 = vadd.f32 %v8191_v16, %v327_v55  ;;  %v880_v25 = vshll.u32 %v642_v33, 16  ;;  %v330_v20 = vmul.f32 %v8178_v62, %v6808_v57 }
  0x9e   : > { %v870_v59 = vrot.slane %v868_v34, 7  ;;  %v1099_v43 = vld [vmem:[#allocation2 + $0xc0] sm:$0xf]  ;;  %v1299_v44 = vrot.slane %v1298_v8, 4  ;;  %v1309_v45 = vrot.slane %v1308_v1, 4  ;;  %v1788_v47 = vshll.u32 %v8302_v49, 16  ;;  %5382 = vmatmul.mubr.bf16.gmra.mxu1 %v7628_v38 }
  0x9f   : > { %v879_v46 = vrot.slane %v877_v39, 7  ;;  %1131 = vst [vmem:[#allocation3 + $0x2b0] sm:$0xf] %v1099_v43  ;;  %v1792_v48 = vrot.slane %v8313_v29, 4  ;;  %v1794_v32 = vshrl.u32 %v1657_v11, 16  ;;  %v7654_v60 = vld [vmem:[%s9538_s3 + $0x1a0] sm:$0xff]   ;;  %v366_v58 = vadd.f32 %v8191_v16, %v328_v40 }
  0xa0   : > { %v873_v50 = vor.u32 %v871_v35, %v870_v59  ;;  %v875_v52 = vrot.slane %v870_v59, 4  ;;  %v1304_v53 = vsel %vm8127_vm5, %v1299_v44, %v1303_v12  ;;  %v1314_v54 = vsel %vm8127_vm5, %v1309_v45, %v1313_v22  ;;  %v1159_v55 = vld [vmem:[#allocation2 + $0x6c] sm:$0xf]  ;;  %v1160_v24 = vld [vmem:[#allocation2 + $0x70] sm:$0xf]  ;;  %7330 = vmatpush3.bf16.msra.mxu1 %v7654_v60  ;;  %v7667_v57 = vld [vmem:[%s9538_s3 + $0x1d8] sm:$0xff]  }
  0xa1   : > { %v882_v49 = vor.u32 %v880_v25, %v879_v46  ;;  %1619 = vst [vmem:[#allocation3 + $0x128] sm:$0xf] %v1304_v53  ;;  %1620 = vst [vmem:[#allocation3 + $0x14c] sm:$0xf] %v1314_v54  ;;  %v1790_v61 = vor.u32 %v1788_v47, %v8313_v29  ;;  %v1796_v63 = vrot.slane %v1794_v32, 7  ;;  %v1797_v0 = vshll.u32 %v1657_v11, 16  ;;  %7331 = vmatprep.subr.bf16.mxu1 %v7667_v57 }
  0xa2   : > { %v1161_v2 = vld [vmem:[#allocation2 + $0x74] sm:$0x1]  ;;  %v1658_v3 = vld [vmem:[#allocation2 + $0x7c] sm:$0x8]  ;;  %v874_v4 = vsel %vm7924_vm2, %v8296_v42, %v873_v50  ;;  %v397_v7 = vmax.f32 %v365_v56, 0.0  ;;  %v885_v6 = vshrl.u32 %v643_v51, 16  ;;  %v367_v22 = vadd.f32 %v8191_v16, %v329_v41 }
  0xa3   : > { %v1659_v9 = vld [vmem:[#allocation2 + $0x80] sm:$0xf]  ;;  %v883_v10 = vsel %vm7924_vm2, %v875_v52, %v882_v49  ;;  %1066 = vst [vmem:[#allocation3 + $0x288] sm:$0xf] %v874_v4  ;;  %v1791_v15 = vsel %vm7924_vm2, %v6421_v28, %v1790_v61  ;;  %v1799_v14 = vor.u32 %v1797_v0, %v1796_v63  ;;  %v1316_v12 = vshrl.u32 %v1159_v55, 16 }
  0xa4   : > { %v1660_v17 = vld [vmem:[#allocation2 + $0x84] sm:$0xf]  ;;  %v7623_v13 = vld [vmem:[#allocation3 + $0x244] ss:$36 sps:$4 sm:$0xff]   ;;  %1067 = vst [vmem:[#allocation3 + $0x2ac] sm:$0xf] %v883_v10  ;;  %v368_v25 = vadd.f32 %v8191_v16, %v330_v20 }
  0xa5   : > { %v7655_v42 = vld [vmem:[%s9538_s3 + $0x140] sm:$0xff]   ;;  %2083 = vst [vmem:[#allocation3 + $0x12c] sm:$0xf] %v1791_v15  ;;  %v398_v18 = vmax.f32 %v366_v58, 0.0  ;;  %v8347_v19 = vrot.slane %v885_v6, 11  ;;  %v1800_v23 = vsel %vm7924_vm2, %v1792_v48, %v1799_v14  ;;  %v1318_v26 = vrot.slane %v1316_v12, 4  ;;  %5260 = vmatprep.mubr.bf16.mxu0 %v7623_v13 }
  0xa6   : > { %v7627_v11 = vld [vmem:[#allocation3 + $0x240] ss:$36 sps:$4 sm:$0xff]   ;;  %v1319_v8 = vshll.u32 %v1159_v55, 16  ;;  %v1325_v1 = vshll.u32 %v1160_v24, 16  ;;  %7225 = vmatprep.subr.bf16.mxu0 %v7655_v42  ;;  %v7656_v28 = vld [vmem:[%s9538_s3 + $0x100] sm:$0xff]   ;;  %v1329_v27 = vshrl.u32 %v1160_v24, 16 }
  0xa7   : > { %2084 = vst [vmem:[#allocation3 + $0x150] sm:$0xf] %v1800_v23  ;;  %v6852_v29 = vpack.c.bf16 %v398_v18, %v397_v7  ;;  %v1335_v21 = vshll.u32 %v1161_v2, 16  ;;  %v1802_v62 = vshrl.u32 %v1658_v3, 16  ;;  %5261 = vmatmul.mubr.bf16.gmra.mxu0 %v7627_v11  ;;  %v1807_v34 = vshrl.u32 %v1659_v9, 16  ;;  %v8377_v10 = vld [vmem:[%s9538_s3 + $0x238] sm:$0xff]  }
  0xa8   : > { %v1321_v31 = vrot.slane %v1319_v8, 5  ;;  %v1327_v33 = vrot.slane %v1325_v1, 5  ;;  %v1810_v35 = vshll.u32 %v1659_v9, 16  ;;  %v646_v36 = vld [vmem:[#allocation2 + $0xe0] sm:$0x8]  ;;  %v1331_v37 = vrot.slane %v1329_v27, 4  ;;  %7226 = vmatpush3.bf16.msra.mxu0 %v7656_v28 }
  0xa9   : > { %6968 = vst [vmem:[#allocation2 + $0xd0] sm:$0xff] %v6852_v29   ;;  %v1337_v38 = vrot.slane %v1335_v21, 5  ;;  %v6422_v39 = vrot.slane %v1802_v62, 11  ;;  %v1816_v40 = vshrl.u32 %v1660_v17, 16  ;;  %v1809_v41 = vrot.slane %v1807_v34, 7  ;;  %7459 = vmatprep.subr.bf16.mxu0 %v8377_v10 }
  0xaa   : > { %v1322_v56 = vor.u32 %v1321_v31, %v1318_v26  ;;  %v1819_v59 = vshll.u32 %v1660_v17, 16  ;;  %v1332_v43 = vor.u32 %v1331_v37, %v1327_v33  ;;  %v399_v45 = vmax.f32 %v367_v22, 0.0  ;;  %v1162_v47 = vld [vmem:[#allocation2 + $0x80] sm:$0xf]  ;;  %v7631_v48 = vld [vmem:[#allocation3 + $0x28c] ss:$36 sps:$4 sm:$0xff]  }
  0xab   : > { %v1818_v44 = vrot.slane %v1816_v40, 7  ;;  %v907_v46 = vshrl.u32 %v646_v36, 16  ;;  %v1812_v51 = vor.u32 %v1810_v35, %v1809_v41  ;;  %v1814_v50 = vrot.slane %v1809_v41, 4  ;;  %v7636_v52 = vld [vmem:[#allocation3 + $0x288] ss:$36 sps:$4 sm:$0xff]   ;;  %5268 = vmatprep.mubr.bf16.mxu0 %v7631_v48 }
  0xac   : > { %v1323_v32 = vrot.slane %v1322_v56, 4  ;;  %v1333_v53 = vrot.slane %v1332_v43, 4  ;;  %v400_v55 = vmax.f32 %v368_v25, 0.0  ;;  %v6721_v24 = vpack.c.bf16 %v399_v45, %v399_v45  ;;  %v1163_v60 = vld [vmem:[#allocation2 + $0x84] sm:$0xf] }
  0xad   : > { %v1821_v54 = vor.u32 %v1819_v59, %v1818_v44  ;;  %v7637_v61 = vld [vmem:[#allocation3 + $0x128] ss:$36 sps:$4 sm:$0xff]   ;;  %v1813_v63 = vsel %vm7924_vm2, %v6422_v39, %v1812_v51  ;;  %v8366_v0 = vrot.slane %v907_v46, 11  ;;  %v1164_v2 = vld [vmem:[#allocation2 + $0x88] sm:$0x1]  ;;  %v1340_v6 = vshrl.u32 %v1162_v47, 16 }
  0xae   : > { %v7633_v49 = vld [vmem:[#allocation3 + $0x12c] ss:$36 sps:$4 sm:$0xff]   ;;  %v1328_v16 = vsel %vm8127_vm5, %v1323_v32, %v1327_v33  ;;  %v1661_v3 = vld [vmem:[#allocation2 + $0x90] sm:$0x8]  ;;  %v1338_v4 = vsel %vm8127_vm5, %v1333_v53, %v1337_v38  ;;  %2085 = vst [vmem:[#allocation3 + $0x174] sm:$0xf] %v1813_v63  ;;  %v6722_v7 = vpack.c.bf16 %v400_v55, %v400_v55 }
  0xaf   : > { %1621 = vst [vmem:[#allocation3 + $0x170] sm:$0xf] %v1328_v16  ;;  %v1822_v58 = vsel %vm7924_vm2, %v1814_v50, %v1821_v54  ;;  %601 = vst [vmem:[#allocation2 + $0xe4] sm:$0xf] %v6721_v24  ;;  %v8372_v9 = vld [vmem:[#allocation2 + $0x94] sm:$0xf]  ;;  %5389 = vmatprep.mubr.bf16.mxu1 %v7633_v49  ;;  %5269 = vmatmul.mubr.bf16.gmra.mxu0 %v7636_v52 }
  0xb0   : > { %v644_v15 = vld [vmem:[#allocation2 + $0xd0] sm:$0xf]  ;;  %v645_v14 = vld [vmem:[#allocation2 + $0xd4] sm:$0xf]  ;;  %1622 = vst [vmem:[#allocation3 + $0x194] sm:$0xf] %v1338_v4  ;;  %5390 = vmatmul.mubr.bf16.gmra.mxu1 %v7637_v61 }
  0xb1   : > { %v1100_v12 = vld [vmem:[#allocation2 + $0xd0] sm:$0xf]  ;;  %2086 = vst [vmem:[#allocation3 + $0x198] sm:$0xf] %v1822_v58  ;;  %v890_v17 = vshrl.u32 %v644_v15, 16  ;;  %v893_v42 = vshll.u32 %v644_v15, 16 }
  0xb2   : > { %v899_v13 = vshrl.u32 %v645_v14, 16  ;;  %v902_v18 = vshll.u32 %v645_v14, 16  ;;  %v1101_v20 = vld [vmem:[#allocation2 + $0xd4] sm:$0xf]  ;;  %1132 = vst [vmem:[#allocation3 + $0x2d4] sm:$0xf] %v1100_v12 }
  0xb3   : > { %602 = vst [vmem:[#allocation2 + $0xe8] sm:$0xf] %v6722_v7  ;;  %1133 = vst [vmem:[#allocation3 + $0x2f8] sm:$0xf] %v1101_v20  ;;  %v1342_v22 = vrot.slane %v1340_v6, 4  ;;  %v1343_v11 = vshll.u32 %v1162_v47, 16 }
  0xb4   : > { %v1349_v23 = vshll.u32 %v1163_v60, 16  ;;  %v1353_v26 = vshrl.u32 %v1163_v60, 16  ;;  %v892_v8 = vrot.slane %v890_v17, 7  ;;  %v901_v1 = vrot.slane %v899_v13, 7  ;;  %v1663_v36 = vld [vmem:[#allocation2 + $0x98] sm:$0xf] }
  0xb5   : > { %v1359_v28 = vshll.u32 %v1164_v2, 16  ;;  %v1824_v29 = vshrl.u32 %v1661_v3, 16  ;;  %v1345_v27 = vrot.slane %v1343_v11, 5  ;;  %v1829_v57 = vshrl.u32 %v8372_v9, 16  ;;  %v1165_v24 = vld [vmem:[#allocation2 + $0x94] sm:$0xf] }
  0xb6   : > { %v1351_v21 = vrot.slane %v1349_v23, 5  ;;  %v1355_v62 = vrot.slane %v1353_v26, 4  ;;  %v895_v31 = vor.u32 %v893_v42, %v892_v8  ;;  %v897_v33 = vrot.slane %v892_v8, 4  ;;  %v647_v37 = vld [vmem:[#allocation2 + $0xe4] sm:$0xf]  ;;  %v7671_v60 = vld [vmem:[%s9538_s3 + $0x198] sm:$0xff]  }
  0xb7   : > { %v904_v34 = vor.u32 %v902_v18, %v901_v1  ;;  %v1361_v35 = vrot.slane %v1359_v28, 5  ;;  %v1102_v38 = vld [vmem:[#allocation2 + $0xe4] sm:$0xf]  ;;  %v1346_v39 = vor.u32 %v1345_v27, %v1342_v22  ;;  %v6423_v56 = vrot.slane %v1824_v29, 11  ;;  %v7645_v43 = vld [vmem:[#allocation3 + $0x170] ss:$36 sps:$4 sm:$0xff]   ;;  %7332 = vmatpush3.bf16.msra.mxu1 %v7671_v60 }
  0xb8   : > { %v1356_v40 = vor.u32 %v1355_v62, %v1351_v21  ;;  %v896_v41 = vsel %vm7924_vm2, %v8347_v19, %v895_v31  ;;  %v7641_v25 = vld [vmem:[#allocation3 + $0x174] ss:$36 sps:$4 sm:$0xff]   ;;  %v912_v44 = vshrl.u32 %v647_v37, 16  ;;  %1134 = vst [vmem:[#allocation3 + $0x31c] sm:$0xf] %v1102_v38  ;;  %v915_v46 = vshll.u32 %v647_v37, 16 }
  0xb9   : > { %v905_v59 = vsel %vm7924_vm2, %v897_v33, %v904_v34  ;;  %1068 = vst [vmem:[#allocation3 + $0x2d0] sm:$0xf] %v896_v41  ;;  %v1347_v48 = vrot.slane %v1346_v39, 4  ;;  %5397 = vmatprep.mubr.bf16.mxu1 %v7641_v25  ;;  %v1831_v53 = vrot.slane %v1829_v57, 7  ;;  %v1832_v54 = vshll.u32 %v8372_v9, 16  ;;  %v7682_v14 = vld [vmem:[%s9538_s3 + $0x1d0] sm:$0xff]  }
  0xba   : > { %1069 = vst [vmem:[#allocation3 + $0x2f4] sm:$0xf] %v905_v59  ;;  %v648_v45 = vld [vmem:[#allocation2 + $0xe8] sm:$0xf]  ;;  %v914_v32 = vrot.slane %v912_v44, 7  ;;  %v1357_v52 = vrot.slane %v1356_v40, 4  ;;  %5398 = vmatmul.mubr.bf16.gmra.mxu1 %v7645_v43  ;;  %7333 = vmatprep.subr.bf16.mxu1 %v7682_v14 }
  0xbb   : > { %v1103_v47 = vld [vmem:[#allocation2 + $0xe8] sm:$0xf]  ;;  %v921_v51 = vshrl.u32 %v648_v45, 16  ;;  %v924_v50 = vshll.u32 %v648_v45, 16  ;;  %v1352_v19 = vsel %vm8127_vm5, %v1347_v48, %v1351_v21  ;;  %v1838_v55 = vshrl.u32 %v1663_v36, 16  ;;  %v7686_v39 = vld [vmem:[%s9538_s3 + $0x190] sm:$0xff]  }
  0xbc   : > { %1135 = vst [vmem:[#allocation3 + $0x340] sm:$0xf] %v1103_v47  ;;  %v917_v49 = vor.u32 %v915_v46, %v914_v32  ;;  %v919_v61 = vrot.slane %v914_v32, 4  ;;  %v1362_v63 = vsel %vm8127_vm5, %v1357_v52, %v1361_v35  ;;  %1623 = vst [vmem:[#allocation3 + $0x1b8] sm:$0xf] %v1352_v19  ;;  %v1834_v4 = vor.u32 %v1832_v54, %v1831_v53  ;;  %v7697_v25 = vld [vmem:[%s9538_s3 + $0x1c8] sm:$0xff]  }
  0xbd   : > { %v923_v16 = vrot.slane %v921_v51, 7  ;;  %v1166_v2 = vld [vmem:[#allocation2 + $0x98] sm:$0xf]  ;;  %v1167_v3 = vld [vmem:[#allocation2 + $0x9c] sm:$0x1]  ;;  %v1836_v58 = vrot.slane %v1831_v53, 4  ;;  %7334 = vmatpush3.bf16.msra.mxu1 %v7686_v39 }
  0xbe   : > { %1624 = vst [vmem:[#allocation3 + $0x1dc] sm:$0xf] %v1362_v63  ;;  %v1840_v7 = vrot.slane %v1838_v55, 7  ;;  %v1841_v6 = vshll.u32 %v1663_v36, 16  ;;  %v1664_v9 = vld [vmem:[#allocation2 + $0xa4] sm:$0x8]  ;;  %v918_v12 = vsel %vm7924_vm2, %v8366_v0, %v917_v49  ;;  %v1835_v22 = vsel %vm7924_vm2, %v6423_v56, %v1834_v4  ;;  %7335 = vmatprep.subr.bf16.mxu1 %v7697_v25 }
  0xbf   : > { %v1665_v15 = vld [vmem:[#allocation2 + $0xa8] sm:$0xf]  ;;  %v926_v17 = vor.u32 %v924_v50, %v923_v16  ;;  %v1364_v42 = vshrl.u32 %v1165_v24, 16  ;;  %v1367_v13 = vshll.u32 %v1165_v24, 16  ;;  %v1666_v18 = vld [vmem:[#allocation2 + $0xac] sm:$0xf] }
  0xc0   : > { %v2107_v20 = vld [vmem:[#allocation2 + $0x1c] sm:$0xf]  ;;  %1070 = vst [vmem:[#allocation3 + $0x318] sm:$0xf] %v918_v12  ;;  %v1843_v11 = vor.u32 %v1841_v6, %v1840_v7  ;;  %v1373_v23 = vshll.u32 %v1166_v2, 16  ;;  %v1377_v26 = vshrl.u32 %v1166_v2, 16 }
  0xc1   : > { %v2108_v8 = vld [vmem:[#allocation2 + $0x20] sm:$0xf]  ;;  %2139 = vst [vmem:[#allocation3 + $0x10] sm:$0xf] %v2107_v20  ;;  %v2171_v1 = vld [vmem:[#allocation2 + $0x1c] sm:$0xf]  ;;  %v927_v0 = vsel %vm7924_vm2, %v919_v61, %v926_v17 }
  0xc2   : > { %v7639_v28 = vld [vmem:[#allocation3 + $0x2d4] ss:$36 sps:$4 sm:$0xff]   ;;  %2087 = vst [vmem:[#allocation3 + $0x1bc] sm:$0xf] %v1835_v22  ;;  %v1366_v29 = vrot.slane %v1364_v42, 4  ;;  %v1369_v27 = vrot.slane %v1367_v13, 5  ;;  %v1844_v62 = vsel %vm7924_vm2, %v1836_v58, %v1843_v11 }
  0xc3   : > { %2140 = vst [vmem:[#allocation3 + $0x34] sm:$0xf] %v2108_v8  ;;  %v7644_v21 = vld [vmem:[#allocation3 + $0x2d0] ss:$36 sps:$4 sm:$0xff]   ;;  %1071 = vst [vmem:[#allocation3 + $0x33c] sm:$0xf] %v927_v0  ;;  %5276 = vmatprep.mubr.bf16.mxu0 %v7639_v28 }
  0xc4   : > { %v1375_v57 = vrot.slane %v1373_v23, 5  ;;  %v1379_v31 = vrot.slane %v1377_v26, 4  ;;  %v1383_v33 = vshll.u32 %v1167_v3, 16  ;;  %2088 = vst [vmem:[#allocation3 + $0x1e0] sm:$0xf] %v1844_v62  ;;  %v1370_v34 = vor.u32 %v1369_v27, %v1366_v29  ;;  %5277 = vmatmul.mubr.bf16.gmra.mxu0 %v7644_v21  ;;  %v7701_v2 = vld [vmem:[%s9538_s3 + $0x188] sm:$0xff]  }
  0xc5   : > { %v1846_v35 = vshrl.u32 %v1664_v9, 16  ;;  %v1851_v36 = vshrl.u32 %v1665_v15, 16  ;;  %v1854_v37 = vshll.u32 %v1665_v15, 16  ;;  %v2172_v38 = vld [vmem:[#allocation2 + $0x20] sm:$0xf]  ;;  %v1860_v41 = vshrl.u32 %v1666_v18, 16  ;;  %7336 = vmatpush3.bf16.msra.mxu1 %v7701_v2 }
  0xc6   : > { %v1380_v40 = vor.u32 %v1379_v31, %v1375_v57  ;;  %v1385_v56 = vrot.slane %v1383_v33, 5  ;;  %v1863_v59 = vshll.u32 %v1666_v18, 16  ;;  %v1371_v43 = vrot.slane %v1370_v34, 4  ;;  %v2173_v46 = vld [vmem:[#allocation2 + $0x24] sm:$0x1] }
  0xc7   : > { %v6424_v44 = vrot.slane %v1846_v35, 11  ;;  %v1853_v45 = vrot.slane %v1851_v36, 7  ;;  %v2220_v47 = vshrl.u32 %v2171_v1, 16  ;;  %v1862_v32 = vrot.slane %v1860_v41, 7  ;;  %v1168_v52 = vld [vmem:[#allocation2 + $0xa8] sm:$0xf] }
  0xc8   : > { %v1381_v48 = vrot.slane %v1380_v40, 4  ;;  %v2223_v51 = vshll.u32 %v2171_v1, 16  ;;  %v2229_v50 = vshll.u32 %v2172_v38, 16  ;;  %v1376_v19 = vsel %vm8127_vm5, %v1371_v43, %v1375_v57  ;;  %v1169_v24 = vld [vmem:[#allocation2 + $0xac] sm:$0xf]  ;;  %v7712_v62 = vld [vmem:[%s9538_s3 + $0x1c0] sm:$0xff]  }
  0xc9   : > { %v1856_v53 = vor.u32 %v1854_v37, %v1853_v45  ;;  %v1858_v54 = vrot.slane %v1853_v45, 4  ;;  %v2222_v55 = vrot.slane %v2220_v47, 4  ;;  %1625 = vst [vmem:[#allocation3 + $0x200] sm:$0xf] %v1376_v19  ;;  %v1865_v49 = vor.u32 %v1863_v59, %v1862_v32  ;;  %v1170_v63 = vld [vmem:[#allocation2 + $0xb0] sm:$0x1]  ;;  %7337 = vmatprep.subr.bf16.mxu1 %v7712_v62 }
  0xca   : > { %v1386_v60 = vsel %vm8127_vm5, %v1381_v48, %v1385_v56  ;;  %v2225_v61 = vrot.slane %v2223_v51, 5  ;;  %v2231_v16 = vrot.slane %v2229_v50, 5  ;;  %v7647_v3 = vld [vmem:[#allocation3 + $0x31c] ss:$36 sps:$4 sm:$0xff]   ;;  %v2233_v7 = vshrl.u32 %v2172_v38, 16 }
  0xcb   : > { %v7652_v4 = vld [vmem:[#allocation3 + $0x318] ss:$36 sps:$4 sm:$0xff]   ;;  %1626 = vst [vmem:[#allocation3 + $0x224] sm:$0xf] %v1386_v60  ;;  %v1857_v58 = vsel %vm7924_vm2, %v6424_v44, %v1856_v53  ;;  %v1667_v6 = vld [vmem:[#allocation2 + $0xb8] sm:$0x8]  ;;  %v1866_v14 = vsel %vm7924_vm2, %v1858_v54, %v1865_v49  ;;  %5284 = vmatprep.mubr.bf16.mxu0 %v7647_v3 }
  0xcc   : > { %v7649_v9 = vld [vmem:[#allocation3 + $0x1bc] ss:$36 sps:$4 sm:$0xff]   ;;  %2089 = vst [vmem:[#allocation3 + $0x204] sm:$0xf] %v1857_v58  ;;  %v2226_v12 = vor.u32 %v2225_v61, %v2222_v55  ;;  %v2239_v17 = vshll.u32 %v2173_v46, 16  ;;  %v2235_v42 = vrot.slane %v2233_v7, 4  ;;  %5285 = vmatmul.mubr.bf16.gmra.mxu0 %v7652_v4 }
  0xcd   : > { %v7653_v15 = vld [vmem:[#allocation3 + $0x1b8] ss:$36 sps:$4 sm:$0xff]   ;;  %2090 = vst [vmem:[#allocation3 + $0x228] sm:$0xf] %v1866_v14  ;;  %v1388_v13 = vshrl.u32 %v1168_v52, 16  ;;  %v1391_v18 = vshll.u32 %v1168_v52, 16  ;;  %5405 = vmatprep.mubr.bf16.mxu1 %v7649_v9 }
  0xce   : > { %v1397_v20 = vshll.u32 %v1169_v24, 16  ;;  %v1668_v22 = vld [vmem:[#allocation2 + $0xbc] sm:$0xf]  ;;  %v2227_v11 = vrot.slane %v2226_v12, 4  ;;  %v2241_v23 = vrot.slane %v2239_v17, 5  ;;  %v1401_v26 = vshrl.u32 %v1169_v24, 16  ;;  %5406 = vmatmul.mubr.bf16.gmra.mxu1 %v7653_v15 }
  0xcf   : > { %v1407_v8 = vshll.u32 %v1170_v63, 16  ;;  %v1669_v1 = vld [vmem:[#allocation2 + $0xc0] sm:$0xf]  ;;  %v2236_v28 = vor.u32 %v2235_v42, %v2231_v16  ;;  %v1390_v0 = vrot.slane %v1388_v13, 4  ;;  %v1393_v29 = vrot.slane %v1391_v18, 5 }
  0xd0   : > { %v1399_v27 = vrot.slane %v1397_v20, 5  ;;  %v2109_v21 = vld [vmem:[#allocation2 + $0x30] sm:$0xf]  ;;  %v2232_v57 = vsel %vm8127_vm5, %v2227_v11, %v2231_v16  ;;  %v1403_v31 = vrot.slane %v1401_v26, 4  ;;  %v1868_v34 = vshrl.u32 %v1667_v6, 16  ;;  %v7716_v56 = vld [vmem:[%s9538_s3 + $0x180] sm:$0xff]  }
  0xd1   : > { %v1409_v33 = vrot.slane %v1407_v8, 5  ;;  %v2110_v35 = vld [vmem:[#allocation2 + $0x34] sm:$0xf]  ;;  %2141 = vst [vmem:[#allocation3 + $0x58] sm:$0xf] %v2109_v21  ;;  %v2237_v36 = vrot.slane %v2236_v28, 4  ;;  %v1394_v37 = vor.u32 %v1393_v29, %v1390_v0  ;;  %7338 = vmatpush3.bf16.msra.mxu1 %v7716_v56 }
  0xd2   : > { %2635 = vst [vmem:[#allocation3 + $0x14] sm:$0xf] %v2232_v57  ;;  %v1873_v38 = vshrl.u32 %v1668_v22, 16  ;;  %v1876_v39 = vshll.u32 %v1668_v22, 16  ;;  %2142 = vst [vmem:[#allocation3 + $0x7c] sm:$0xf] %v2110_v35  ;;  %v1404_v41 = vor.u32 %v1403_v31, %v1399_v27 }
  0xd3   : > { %v2174_v40 = vld [vmem:[#allocation2 + $0x30] sm:$0xf]  ;;  %v6425_v59 = vrot.slane %v1868_v34, 11  ;;  %v1882_v25 = vshrl.u32 %v1669_v1, 16  ;;  %v1885_v43 = vshll.u32 %v1669_v1, 16  ;;  %v2242_v45 = vsel %vm8127_vm5, %v2237_v36, %v2241_v23 }
  0xd4   : > { %v2175_v44 = vld [vmem:[#allocation2 + $0x34] sm:$0xf]  ;;  %v1395_v46 = vrot.slane %v1394_v37, 4  ;;  %v1875_v47 = vrot.slane %v1873_v38, 7  ;;  %v2176_v48 = vld [vmem:[#allocation2 + $0x38] sm:$0x1] }
  0xd5   : > { %v2244_v32 = vshrl.u32 %v2174_v40, 16  ;;  %v7657_v51 = vld [vmem:[#allocation3 + $0x204] ss:$36 sps:$4 sm:$0xff]   ;;  %2636 = vst [vmem:[#allocation3 + $0x38] sm:$0xf] %v2242_v45  ;;  %v1405_v52 = vrot.slane %v1404_v41, 4 }
  0xd6   : > { %v7662_v50 = vld [vmem:[#allocation3 + $0x200] ss:$36 sps:$4 sm:$0xff]   ;;  %v1400_v19 = vsel %vm8127_vm5, %v1395_v46, %v1399_v27  ;;  %v1878_v53 = vor.u32 %v1876_v39, %v1875_v47  ;;  %v1880_v54 = vrot.slane %v1875_v47, 4  ;;  %v1884_v55 = vrot.slane %v1882_v25, 7  ;;  %5413 = vmatprep.mubr.bf16.mxu1 %v7657_v51  ;;  %v1171_v15 = vld [vmem:[#allocation2 + $0xbc] sm:$0xf] }
  0xd7   : > { %v1410_v24 = vsel %vm8127_vm5, %v1405_v52, %v1409_v33  ;;  %1627 = vst [vmem:[#allocation3 + $0x248] sm:$0xf] %v1400_v19  ;;  %v2246_v60 = vrot.slane %v2244_v32, 4  ;;  %v2247_v49 = vshll.u32 %v2174_v40, 16  ;;  %v2253_v61 = vshll.u32 %v2175_v44, 16  ;;  %5414 = vmatmul.mubr.bf16.gmra.mxu1 %v7662_v50  ;;  %v7683_v20 = vld [vmem:[%s9538_s3 + $0x230] sm:$0xff]  }
  0xd8   : > { %1628 = vst [vmem:[#allocation3 + $0x26c] sm:$0xf] %v1410_v24  ;;  %v1879_v16 = vsel %vm7924_vm2, %v6425_v59, %v1878_v53  ;;  %v1887_v63 = vor.u32 %v1885_v43, %v1884_v55  ;;  %v2257_v2 = vshrl.u32 %v2175_v44, 16  ;;  %v2263_v3 = vshll.u32 %v2176_v48, 16  ;;  %v1172_v14 = vld [vmem:[#allocation2 + $0xc0] sm:$0xf] }
  0xd9   : > { %2091 = vst [vmem:[#allocation3 + $0x24c] sm:$0xf] %v1879_v16  ;;  %v2249_v4 = vrot.slane %v2247_v49, 5  ;;  %v2255_v58 = vrot.slane %v2253_v61, 5  ;;  %v1173_v17 = vld [vmem:[#allocation2 + $0xc4] sm:$0x1] }
  0xda   : > { %v1888_v7 = vsel %vm7924_vm2, %v1880_v54, %v1887_v63  ;;  %v2259_v6 = vrot.slane %v2257_v2, 4  ;;  %v2265_v9 = vrot.slane %v2263_v3, 5  ;;  %v1412_v42 = vshrl.u32 %v1171_v15, 16  ;;  %v7659_v22 = vld [vmem:[#allocation3 + $0x10] ss:$36 sps:$4 sm:$0xff]   ;;  %v7698_v25 = vld [vmem:[%s9538_s3 + $0x228] sm:$0xff]  }
  0xdb   : > { %2092 = vst [vmem:[#allocation3 + $0x270] sm:$0xf] %v1888_v7  ;;  %v2250_v12 = vor.u32 %v2249_v4, %v2246_v60  ;;  %v1415_v13 = vshll.u32 %v1171_v15, 16  ;;  %v1421_v18 = vshll.u32 %v1172_v14, 16  ;;  %v1425_v26 = vshrl.u32 %v1172_v14, 16  ;;  %v7713_v16 = vld [vmem:[%s9538_s3 + $0x220] sm:$0xff]  }
  0xdc   : > { %v7661_v11 = vld [vmem:[#allocation3 + $0x14] ss:$36 sps:$4 sm:$0xff]   ;;  %v2260_v23 = vor.u32 %v2259_v6, %v2255_v58  ;;  %v1414_v1 = vrot.slane %v1412_v42, 4  ;;  %v1670_v29 = vld [vmem:[#allocation2 + $0xcc] sm:$0x8]  ;;  %v1431_v62 = vshll.u32 %v1173_v17, 16 }
  0xdd   : > { %v2251_v8 = vrot.slane %v2250_v12, 4  ;;  %v1417_v28 = vrot.slane %v1415_v13, 5  ;;  %v1423_v0 = vrot.slane %v1421_v18, 5  ;;  %5518 = vmatprep.mubr.bf16.mxu0 %v7661_v11  ;;  %v1427_v21 = vrot.slane %v1425_v26, 4  ;;  %v1671_v57 = vld [vmem:[#allocation2 + $0xd0] sm:$0xf] }
  0xde   : > { %v2261_v27 = vrot.slane %v2260_v23, 4  ;;  %v1890_v31 = vshrl.u32 %v1670_v29, 16  ;;  %5519 = vmatmul.mubr.bf16.vlgmr.msra.gmra.mxu0 %v7659_v22  ;;  %v1672_v35 = vld [vmem:[#allocation2 + $0xd4] sm:$0xf]  ;;  %v1895_v36 = vshrl.u32 %v1671_v57, 16  ;;  %v1898_v37 = vshll.u32 %v1671_v57, 16 }
  0xdf   : > { %v2256_v33 = vsel %vm8127_vm5, %v2251_v8, %v2255_v58  ;;  %v1418_v34 = vor.u32 %v1417_v28, %v1414_v1  ;;  %v2111_v38 = vld [vmem:[#allocation2 + $0x44] sm:$0xf]  ;;  %7460 = vmatpush3.bf16.msra.mxu0 %v8377_v10  ;;  %v1428_v40 = vor.u32 %v1427_v21, %v1423_v0  ;;  %v1433_v56 = vrot.slane %v1431_v62, 5  ;;  %v2112_v59 = vld [vmem:[#allocation2 + $0x48] sm:$0xf] }
  0xe0   : > { %v2266_v39 = vsel %vm8127_vm5, %v2261_v27, %v2265_v9  ;;  %2637 = vst [vmem:[#allocation3 + $0x5c] sm:$0xf] %v2256_v33  ;;  %v6426_v41 = vrot.slane %v1890_v31, 11  ;;  %2143 = vst [vmem:[#allocation3 + $0xa0] sm:$0xf] %v2111_v38  ;;  %v1897_v44 = vrot.slane %v1895_v36, 7  ;;  %7461 = vmatprep.subr.bf16.mxu0 %v7683_v20 }
  0xe1   : > { %2638 = vst [vmem:[#allocation3 + $0x80] sm:$0xf] %v2266_v39  ;;  %v1419_v43 = vrot.slane %v1418_v34, 4  ;;  %v1904_v45 = vshrl.u32 %v1672_v35, 16  ;;  %v1907_v46 = vshll.u32 %v1672_v35, 16  ;;  %v1429_v10 = vrot.slane %v1428_v40, 4 }
  0xe2   : > { %2144 = vst [vmem:[#allocation3 + $0xc4] sm:$0xf] %v2112_v59  ;;  %v2177_v47 = vld [vmem:[#allocation2 + $0x44] sm:$0xf]  ;;  %v7663_v48 = vld [vmem:[#allocation3 + $0x24c] ss:$36 sps:$4 sm:$0xff]   ;;  %v1900_v50 = vor.u32 %v1898_v37, %v1897_v44 }
  0xe3   : > { %v7669_v32 = vld [vmem:[#allocation3 + $0x248] ss:$36 sps:$4 sm:$0xff]   ;;  %v1424_v51 = vsel %vm8127_vm5, %v1419_v43, %v1423_v0  ;;  %v1902_v52 = vrot.slane %v1897_v44, 4  ;;  %v1906_v19 = vrot.slane %v1904_v45, 7  ;;  %v2178_v53 = vld [vmem:[#allocation2 + $0x48] sm:$0xf]  ;;  %5421 = vmatprep.mubr.bf16.mxu1 %v7663_v48  ;;  %v1434_v55 = vsel %vm8127_vm5, %v1429_v10, %v1433_v56  ;;  %7462 = vmatpush3.bf16.msra.mxu0 %v7683_v20 }
  0xe4   : > { %v2179_v54 = vld [vmem:[#allocation2 + $0x4c] sm:$0x1]  ;;  %1629 = vst [vmem:[#allocation3 + $0x290] sm:$0xf] %v1424_v51  ;;  %v2268_v24 = vshrl.u32 %v2177_v47, 16  ;;  %v2271_v60 = vshll.u32 %v2177_v47, 16  ;;  %5422 = vmatmul.mubr.bf16.gmra.mxu1 %v7669_v32  ;;  %v1901_v63 = vsel %vm7924_vm2, %v6426_v41, %v1900_v50  ;;  %7463 = vmatprep.subr.bf16.mxu0 %v7698_v25 }
  0xe5   : > { %v2277_v49 = vshll.u32 %v2178_v53, 16  ;;  %v1174_v61 = vld [vmem:[#allocation2 + $0xd0] sm:$0xf]  ;;  %1630 = vst [vmem:[#allocation3 + $0x2b4] sm:$0xf] %v1434_v55  ;;  %v1909_v2 = vor.u32 %v1907_v46, %v1906_v19  ;;  %v2281_v3 = vshrl.u32 %v2178_v53, 16 }
  0xe6   : > { %v2287_v4 = vshll.u32 %v2179_v54, 16  ;;  %v1175_v58 = vld [vmem:[#allocation2 + $0xd4] sm:$0xf]  ;;  %v1176_v7 = vld [vmem:[#allocation2 + $0xd8] sm:$0x1]  ;;  %v2270_v6 = vrot.slane %v2268_v24, 4 }
  0xe7   : > { %2093 = vst [vmem:[#allocation3 + $0x294] sm:$0xf] %v1901_v63  ;;  %v2273_v9 = vrot.slane %v2271_v60, 5  ;;  %v2279_v15 = vrot.slane %v2277_v49, 5  ;;  %v1436_v14 = vshrl.u32 %v1174_v61, 16  ;;  %v1910_v17 = vsel %vm7924_vm2, %v1902_v52, %v1909_v2  ;;  %7464 = vmatpush3.bf16.msra.mxu0 %v7698_v25  ;;  %v7728_v27 = vld [vmem:[%s9538_s3 + $0x218] sm:$0xff]  }
  0xe8   : > { %v1673_v12 = vld [vmem:[#allocation2 + $0xe0] sm:$0x8]  ;;  %v2283_v42 = vrot.slane %v2281_v3, 4  ;;  %v2289_v13 = vrot.slane %v2287_v4, 5  ;;  %v1439_v18 = vshll.u32 %v1174_v61, 16  ;;  %v1445_v28 = vshll.u32 %v1175_v58, 16  ;;  %7465 = vmatprep.subr.bf16.mxu0 %v7713_v16 }
  0xe9   : > { %v1674_v20 = vld [vmem:[#allocation2 + $0xe4] sm:$0xf]  ;;  %2094 = vst [vmem:[#allocation3 + $0x2b8] sm:$0xf] %v1910_v17  ;;  %v2274_v23 = vor.u32 %v2273_v9, %v2270_v6  ;;  %v1438_v26 = vrot.slane %v1436_v14, 4  ;;  %v1449_v0 = vshrl.u32 %v1175_v58, 16 }
  0xea   : > { %v7665_v22 = vld [vmem:[#allocation3 + $0x5c] ss:$36 sps:$4 sm:$0xff]   ;;  %v2284_v8 = vor.u32 %v2283_v42, %v2279_v15  ;;  %v1441_v1 = vrot.slane %v1439_v18, 5  ;;  %v1455_v62 = vshll.u32 %v1176_v7, 16  ;;  %v1912_v57 = vshrl.u32 %v1673_v12, 16  ;;  %v7740_v47 = vld [vmem:[%s9538_s3 + $0x210] sm:$0xff]  }
  0xeb   : > { %v7670_v11 = vld [vmem:[#allocation3 + $0x58] ss:$36 sps:$4 sm:$0xff]   ;;  %v1675_v29 = vld [vmem:[#allocation2 + $0xe8] sm:$0xf]  ;;  %5526 = vmatprep.mubr.bf16.mxu0 %v7665_v22  ;;  %v2275_v21 = vrot.slane %v2274_v23, 4  ;;  %v1917_v31 = vshrl.u32 %v1674_v20, 16  ;;  %7466 = vmatpush3.bf16.msra.mxu0 %v7713_v16 }
  0xec   : > { %v2113_v33 = vld [vmem:[#allocation2 + $0x58] sm:$0xf]  ;;  %5527 = vmatmul.mubr.bf16.gmra.mxu0 %v7670_v11  ;;  %v2285_v34 = vrot.slane %v2284_v8, 4  ;;  %v1442_v35 = vor.u32 %v1441_v1, %v1438_v26  ;;  %v1447_v36 = vrot.slane %v1445_v28, 5  ;;  %v1451_v37 = vrot.slane %v1449_v0, 4  ;;  %7467 = vmatprep.subr.bf16.mxu0 %v7728_v27 }
  0xed   : > { %v2114_v38 = vld [vmem:[#allocation2 + $0x5c] sm:$0xf]  ;;  %2145 = vst [vmem:[#allocation3 + $0xe8] sm:$0xf] %v2113_v33  ;;  %v2280_v39 = vsel %vm8127_vm5, %v2275_v21, %v2279_v15  ;;  %v1457_v40 = vrot.slane %v1455_v62, 5  ;;  %v6427_v56 = vrot.slane %v1912_v57, 11 }
  0xee   : > { %v1919_v41 = vrot.slane %v1917_v31, 7  ;;  %2146 = vst [vmem:[#allocation3 + $0x10c] sm:$0xf] %v2114_v38  ;;  %v2180_v59 = vld [vmem:[#allocation2 + $0x58] sm:$0xf]  ;;  %v2290_v25 = vsel %vm8127_vm5, %v2285_v34, %v2289_v13  ;;  %v1443_v43 = vrot.slane %v1442_v35, 4  ;;  %v1452_v44 = vor.u32 %v1451_v37, %v1447_v36 }
  0xef   : > { %2639 = vst [vmem:[#allocation3 + $0xa4] sm:$0xf] %v2280_v39  ;;  %v1920_v45 = vshll.u32 %v1674_v20, 16  ;;  %v2181_v46 = vld [vmem:[#allocation2 + $0x5c] sm:$0xf]  ;;  %v1926_v32 = vshrl.u32 %v1675_v29, 16  ;;  %7468 = vmatpush3.bf16.msra.mxu0 %v7728_v27 }
  0xf0   : > { %2640 = vst [vmem:[#allocation3 + $0xc8] sm:$0xf] %v2290_v25  ;;  %v1924_v48 = vrot.slane %v1919_v41, 4  ;;  %v1929_v10 = vshll.u32 %v1675_v29, 16  ;;  %v2182_v51 = vld [vmem:[#allocation2 + $0x60] sm:$0x1]  ;;  %v1448_v53 = vsel %vm8127_vm5, %v1443_v43, %v1447_v36  ;;  %7469 = vmatprep.subr.bf16.mxu0 %v7740_v47 }
  0xf1   : > { %v2292_v50 = vshrl.u32 %v2180_v59, 16  ;;  %v7672_v52 = vld [vmem:[#allocation3 + $0x294] ss:$36 sps:$4 sm:$0xff]   ;;  %v1453_v54 = vrot.slane %v1452_v44, 4  ;;  %v1922_v55 = vor.u32 %v1920_v45, %v1919_v41  ;;  %1631 = vst [vmem:[#allocation3 + $0x2d8] sm:$0xf] %v1448_v53 }
  0xf2   : > { %v7676_v19 = vld [vmem:[#allocation3 + $0x290] ss:$36 sps:$4 sm:$0xff]   ;;  %v1928_v24 = vrot.slane %v1926_v32, 7  ;;  %v2295_v49 = vshll.u32 %v2180_v59, 16  ;;  %v2301_v61 = vshll.u32 %v2181_v46, 16  ;;  %5429 = vmatprep.mubr.bf16.mxu1 %v7672_v52  ;;  %v2305_v2 = vshrl.u32 %v2181_v46, 16  ;;  %v7003_v52 = vpop.f32.mrf.mxu0 }
  0xf3   : > { %v2294_v60 = vrot.slane %v2292_v50, 4  ;;  %v1458_v16 = vsel %vm8127_vm5, %v1453_v54, %v1457_v40  ;;  %v1923_v63 = vsel %vm7924_vm2, %v6427_v56, %v1922_v55  ;;  %v2311_v3 = vshll.u32 %v2182_v51, 16  ;;  %5430 = vmatmul.mubr.bf16.gmra.mxu1 %v7676_v19  ;;  %v1177_v15 = vld [vmem:[#allocation2 + $0xe4] sm:$0xf]  ;;  %v1178_v17 = vld [vmem:[#allocation2 + $0xe8] sm:$0xf]  ;;  %7470 = vmatpush3.bf16.msra.mxu0 %v7740_v47 }
  0xf4   : > { %1632 = vst [vmem:[#allocation3 + $0x2fc] sm:$0xf] %v1458_v16  ;;  %v1931_v4 = vor.u32 %v1929_v10, %v1928_v24  ;;  %2095 = vst [vmem:[#allocation3 + $0x2dc] sm:$0xf] %v1923_v63  ;;  %v2297_v58 = vrot.slane %v2295_v49, 5  ;;  %v2303_v7 = vrot.slane %v2301_v61, 5 }
  0xf5   : > { %v2307_v6 = vrot.slane %v2305_v2, 4  ;;  %v2313_v9 = vrot.slane %v2311_v3, 5  ;;  %v1179_v42 = vld [vmem:[#allocation2 + $0xec] sm:$0x1]  ;;  %v1460_v13 = vshrl.u32 %v1177_v15, 16  ;;  %v1463_v11 = vshll.u32 %v1177_v15, 16 }
  0xf6   : > { %v1932_v14 = vsel %vm7924_vm2, %v1924_v48, %v1931_v4  ;;  %v2298_v12 = vor.u32 %v2297_v58, %v2294_v60  ;;  %v7677_v20 = vld [vmem:[#allocation3 + $0xa0] ss:$36 sps:$4 sm:$0xff]   ;;  %v1469_v8 = vshll.u32 %v1178_v17, 16  ;;  %v1473_v1 = vshrl.u32 %v1178_v17, 16  ;;  %v1676_v28 = vld [vmem:[#allocation2 + $0xf4] sm:$0x8]  ;;  %v7004_v17 = vpop.f32.mrf.mxu0 }
  0xf7   : > { %v7674_v18 = vld [vmem:[#allocation3 + $0xa4] ss:$36 sps:$4 sm:$0xff]   ;;  %2096 = vst [vmem:[#allocation3 + $0x300] sm:$0xf] %v1932_v14  ;;  %v2308_v22 = vor.u32 %v2307_v6, %v2303_v7  ;;  %v1462_v26 = vrot.slane %v1460_v13, 4  ;;  %v1465_v29 = vrot.slane %v1463_v11, 5 }
  0xf8   : > { %v2299_v23 = vrot.slane %v2298_v12, 4  ;;  %5534 = vmatprep.mubr.bf16.mxu0 %v7674_v18  ;;  %v1479_v27 = vshll.u32 %v1179_v42, 16  ;;  %v1677_v21 = vld [vmem:[#allocation2 + $0xf8] sm:$0xf]  ;;  %v1934_v62 = vshrl.u32 %v1676_v28, 16  ;;  %v1471_v31 = vrot.slane %v1469_v8, 5 }
  0xf9   : > { %v2309_v0 = vrot.slane %v2308_v22, 4  ;;  %5535 = vmatmul.mubr.bf16.gmra.mxu0 %v7677_v20  ;;  %v1475_v33 = vrot.slane %v1473_v1, 4  ;;  %v1678_v34 = vld [vmem:[#allocation2 + $0xfc] sm:$0xf]  ;;  %v1939_v35 = vshrl.u32 %v1677_v21, 16  ;;  %v7753_v36 = vld [vmem:[%s9538_s3 + $0x208] sm:$0xff]   ;;  %v1466_v38 = vor.u32 %v1465_v29, %v1462_v26 }
  0xfa   : > { %v2304_v57 = vsel %vm8127_vm5, %v2299_v23, %v2303_v7  ;;  %v1481_v39 = vrot.slane %v1479_v27, 5  ;;  %v6428_v40 = vrot.slane %v1934_v62, 11  ;;  %v2115_v56 = vld [vmem:[#allocation2 + $0x6c] sm:$0xf]  ;;  %v1942_v25 = vshll.u32 %v1677_v21, 16  ;;  %7471 = vmatprep.subr.bf16.mxu0 %v7753_v36 }
  0xfb   : > { %v2314_v37 = vsel %vm8127_vm5, %v2309_v0, %v2313_v9  ;;  %2641 = vst [vmem:[#allocation3 + $0xec] sm:$0xf] %v2304_v57  ;;  %v1476_v41 = vor.u32 %v1475_v33, %v1471_v31  ;;  %v1941_v59 = vrot.slane %v1939_v35, 7  ;;  %v1948_v43 = vshrl.u32 %v1678_v34, 16  ;;  %v2116_v44 = vld [vmem:[#allocation2 + $0x70] sm:$0xf]  ;;  %7472 = vmatpush3.bf16.msra.mxu0 %v7753_v36 }
  0xfc   : > { %2642 = vst [vmem:[#allocation3 + $0x110] sm:$0xf] %v2314_v37  ;;  %2147 = vst [vmem:[#allocation3 + $0x130] sm:$0xf] %v2115_v56  ;;  %v1467_v45 = vrot.slane %v1466_v38, 4  ;;  %v1951_v46 = vshll.u32 %v1678_v34, 16  ;;  %v8496_v22 = vadd.f32 %v7004_v17, %v7003_v52 }
  0xfd   : > { %2148 = vst [vmem:[#allocation3 + $0x154] sm:$0xf] %v2116_v44  ;;  %v2183_v47 = vld [vmem:[#allocation2 + $0x6c] sm:$0xf]  ;;  %v2184_v48 = vld [vmem:[#allocation2 + $0x70] sm:$0xf]  ;;  %v1944_v50 = vor.u32 %v1942_v25, %v1941_v59 }
  0xfe   : > { %v7678_v32 = vld [vmem:[#allocation3 + $0x2dc] ss:$36 sps:$4 sm:$0xff]   ;;  %v1477_v51 = vrot.slane %v1476_v41, 4  ;;  %v1472_v19 = vsel %vm8127_vm5, %v1467_v45, %v1471_v31  ;;  %v1946_v53 = vrot.slane %v1941_v59, 4  ;;  %v1950_v54 = vrot.slane %v1948_v43, 7 }
  0xff   : > { %v7684_v10 = vld [vmem:[#allocation3 + $0x2d8] ss:$36 sps:$4 sm:$0xff]   ;;  %v2185_v55 = vld [vmem:[#allocation2 + $0x74] sm:$0x1]  ;;  %v2316_v24 = vshrl.u32 %v2183_v47, 16  ;;  %5437 = vmatprep.mubr.bf16.mxu1 %v7678_v32  ;;  %v1945_v49 = vsel %vm7924_vm2, %v6428_v40, %v1944_v50  ;;  %v2319_v61 = vshll.u32 %v2183_v47, 16  ;;  %v8498_v40 = vpop.f32.mrf.mxu0 }
 0x100   : > { %v1482_v60 = vsel %vm8127_vm5, %v1477_v51, %v1481_v39  ;;  %1633 = vst [vmem:[#allocation3 + $0x320] sm:$0xf] %v1472_v19  ;;  %v2325_v16 = vshll.u32 %v2184_v48, 16  ;;  %v1180_v63 = vld [vmem:[#allocation2 + $0xf8] sm:$0xf]  ;;  %5438 = vmatmul.mubr.bf16.gmra.mxu1 %v7684_v10  ;;  %v1953_v3 = vor.u32 %v1951_v46, %v1950_v54  ;;  %v2329_v58 = vshrl.u32 %v2184_v48, 16 }
 0x101   : > { %v1181_v2 = vld [vmem:[#allocation2 + $0xfc] sm:$0xf]  ;;  %1634 = vst [vmem:[#allocation3 + $0x344] sm:$0xf] %v1482_v60  ;;  %2097 = vst [vmem:[#allocation3 + $0x324] sm:$0xf] %v1945_v49  ;;  %v8509_v49 = vpop.f32.mrf.mxu0 }
 0x102   : > { %v2318_v4 = vrot.slane %v2316_v24, 4  ;;  %v2335_v7 = vshll.u32 %v2185_v55, 16  ;;  %v1182_v6 = vld [vmem:[#allocation2 + $0x100] sm:$0x1]  ;;  %v2321_v9 = vrot.slane %v2319_v61, 5  ;;  %v2327_v15 = vrot.slane %v2325_v16, 5 }
 0x103   : > { %v1484_v14 = vshrl.u32 %v1180_v63, 16  ;;  %v1487_v12 = vshll.u32 %v1180_v63, 16  ;;  %v7680_v42 = vld [vmem:[#allocation3 + $0xec] ss:$36 sps:$4 sm:$0xff]   ;;  %v1954_v18 = vsel %vm7924_vm2, %v1946_v53, %v1953_v3  ;;  %v2331_v20 = vrot.slane %v2329_v58, 4  ;;  %v7766_v53 = vld [vmem:[%s9538_s3 + $0x200] sm:$0xff]  }
 0x104   : > { %v7685_v13 = vld [vmem:[#allocation3 + $0xe8] ss:$36 sps:$4 sm:$0xff]   ;;  %2098 = vst [vmem:[#allocation3 + $0x348] sm:$0xf] %v1954_v18  ;;  %v2322_v11 = vor.u32 %v2321_v9, %v2318_v4  ;;  %v2337_v23 = vrot.slane %v2335_v7, 5  ;;  %5542 = vmatprep.mubr.bf16.mxu0 %v7680_v42  ;;  %v1493_v0 = vshll.u32 %v1181_v2, 16  ;;  %7473 = vmatprep.subr.bf16.mxu0 %v7766_v53 }
 0x105   : > { %v1486_v26 = vrot.slane %v1484_v14, 4  ;;  %v1489_v8 = vrot.slane %v1487_v12, 5  ;;  %v1679_v1 = vld [vmem:[#allocation2 + $0x108] sm:$0x8]  ;;  %v2332_v28 = vor.u32 %v2331_v20, %v2327_v15  ;;  %v1497_v29 = vshrl.u32 %v1181_v2, 16  ;;  %5543 = vmatmul.mubr.bf16.gmra.mxu0 %v7685_v13  ;;  %v8512_v3 = vld [vmem:[%s7908_s22 + $0x78] sm:$0xff]   ;;  %v7009_v13 = vpop.f32.mrf.mxu0 }
 0x106   : > { %v1503_v27 = vshll.u32 %v1182_v6, 16  ;;  %v1680_v21 = vld [vmem:[#allocation2 + $0x10c] sm:$0xf]  ;;  %v2323_v62 = vrot.slane %v2322_v11, 4  ;;  %v1681_v31 = vld [vmem:[#allocation2 + $0x110] sm:$0xf]  ;;  %7474 = vmatpush3.bf16.msra.mxu0 %v7766_v53 }
 0x107   : > { %v1490_v57 = vor.u32 %v1489_v8, %v1486_v26  ;;  %v1956_v33 = vshrl.u32 %v1679_v1, 16  ;;  %v1961_v34 = vshrl.u32 %v1680_v21, 16  ;;  %v2333_v35 = vrot.slane %v2332_v28, 4  ;;  %v2117_v39 = vld [vmem:[#allocation2 + $0x80] sm:$0xf] }
 0x108   : > { %v1495_v36 = vrot.slane %v1493_v0, 5  ;;  %v1499_v37 = vrot.slane %v1497_v29, 4  ;;  %v1505_v38 = vrot.slane %v1503_v27, 5  ;;  %v2328_v56 = vsel %vm8127_vm5, %v2323_v62, %v2327_v15  ;;  %v2118_v43 = vld [vmem:[#allocation2 + $0x84] sm:$0xf] }
 0x109   : > { %v1491_v41 = vrot.slane %v1490_v57, 4  ;;  %v6429_v59 = vrot.slane %v1956_v33, 11  ;;  %v1963_v25 = vrot.slane %v1961_v34, 7  ;;  %2149 = vst [vmem:[#allocation3 + $0x178] sm:$0xf] %v2117_v39  ;;  %v2338_v44 = vsel %vm8127_vm5, %v2333_v35, %v2337_v23 }
 0x10a   : > { %2643 = vst [vmem:[#allocation3 + $0x134] sm:$0xf] %v2328_v56  ;;  %v1500_v45 = vor.u32 %v1499_v37, %v1495_v36  ;;  %v1964_v46 = vshll.u32 %v1680_v21, 16  ;;  %v1970_v47 = vshrl.u32 %v1681_v31, 16  ;;  %2150 = vst [vmem:[#allocation3 + $0x19c] sm:$0xf] %v2118_v43  ;;  %v6827_v29 = vunpack.c.l.bf16 %v8512_v3  ;;  %v7010_v21 = vpop.f32.mrf.mxu0  ;;  %v7075_v56 = vpop.f32.mrf.mxu1 }
 0x10b   : > { %v2186_v48 = vld [vmem:[#allocation2 + $0x80] sm:$0xf]  ;;  %v2187_v32 = vld [vmem:[#allocation2 + $0x84] sm:$0xf]  ;;  %2644 = vst [vmem:[#allocation3 + $0x158] sm:$0xf] %v2338_v44  ;;  %v1496_v10 = vsel %vm8127_vm5, %v1491_v41, %v1495_v36  ;;  %v6828_v27 = vunpack.c.h.bf16 %v8512_v3 }
 0x10c   : > { %v1968_v51 = vrot.slane %v1963_v25, 4  ;;  %v1973_v50 = vshll.u32 %v1681_v31, 16  ;;  %v2188_v52 = vld [vmem:[#allocation2 + $0x88] sm:$0x1]  ;;  %v2340_v19 = vshrl.u32 %v2186_v48, 16  ;;  %v1501_v24 = vrot.slane %v1500_v45, 4  ;;  %v8522_v41 = vpop.f32.mrf.mxu0 }
 0x10d   : > { %v7687_v54 = vld [vmem:[#allocation3 + $0x324] ss:$36 sps:$4 sm:$0xff]   ;;  %1635 = vst [vmem:[#allocation3 + $0x368] sm:$0xf] %v1496_v10  ;;  %v1966_v60 = vor.u32 %v1964_v46, %v1963_v25  ;;  %v1972_v61 = vrot.slane %v1970_v47, 7  ;;  %v2343_v63 = vshll.u32 %v2186_v48, 16 }
 0x10e   : > { %v7691_v55 = vld [vmem:[#allocation3 + $0x320] ss:$36 sps:$4 sm:$0xff]   ;;  %v2342_v16 = vrot.slane %v2340_v19, 4  ;;  %v2349_v2 = vshll.u32 %v2187_v32, 16  ;;  %5445 = vmatprep.mubr.bf16.mxu1 %v7687_v54  ;;  %v1506_v4 = vsel %vm8127_vm5, %v1501_v24, %v1505_v38  ;;  %v2353_v7 = vshrl.u32 %v2187_v32, 16 }
 0x10f   : > { %v1967_v58 = vsel %vm7924_vm2, %v6429_v59, %v1966_v60  ;;  %v2359_v6 = vshll.u32 %v2188_v52, 16  ;;  %5446 = vmatmul.mubr.bf16.gmra.mxu1 %v7691_v55  ;;  %1636 = vst [vmem:[#allocation3 + $0x38c] sm:$0xf] %v1506_v4  ;;  %v1975_v9 = vor.u32 %v1973_v50, %v1972_v61  ;;  %v2345_v15 = vrot.slane %v2343_v63, 5  ;;  %v1183_v42 = vld [vmem:[#allocation2 + $0x10c] sm:$0xf]  ;;  %v8528_v55 = vpop.f32.mrf.mxu0 }
 0x110   : > { %2099 = vst [vmem:[#allocation3 + $0x36c] sm:$0xf] %v1967_v58  ;;  %v2351_v14 = vrot.slane %v2349_v2, 5  ;;  %v2355_v12 = vrot.slane %v2353_v7, 4  ;;  %v1184_v11 = vld [vmem:[#allocation2 + $0x110] sm:$0xf]  ;;  %v8530_v63 = vadd.f32 %v7010_v21, %v7009_v13 }
 0x111   : > { %v2361_v17 = vrot.slane %v2359_v6, 5  ;;  %v1976_v18 = vsel %vm7924_vm2, %v1968_v51, %v1975_v9  ;;  %v2346_v20 = vor.u32 %v2345_v15, %v2342_v16  ;;  %v1185_v23 = vld [vmem:[#allocation2 + $0x114] sm:$0x1]  ;;  %v1508_v26 = vshrl.u32 %v1183_v42, 16  ;;  %v7692_v1 = vld [vmem:[#allocation3 + $0x130] ss:$36 sps:$4 sm:$0xff]   ;;  %v7076_v51 = vpop.f32.mrf.mxu1 }
 0x112   : > { %v7689_v8 = vld [vmem:[#allocation3 + $0x134] ss:$36 sps:$4 sm:$0xff]   ;;  %2100 = vst [vmem:[#allocation3 + $0x390] sm:$0xf] %v1976_v18  ;;  %v2356_v28 = vor.u32 %v2355_v12, %v2351_v14  ;;  %v1511_v0 = vshll.u32 %v1183_v42, 16  ;;  %v1517_v31 = vshll.u32 %v1184_v11, 16  ;;  %v8532_v2 = vadd.f32 %v7076_v51, %v7075_v56 }
 0x113   : > { %v2347_v62 = vrot.slane %v2346_v20, 4  ;;  %v1510_v57 = vrot.slane %v1508_v26, 4  ;;  %v1521_v33 = vshrl.u32 %v1184_v11, 16  ;;  %v1682_v34 = vld [vmem:[#allocation2 + $0x11c] sm:$0x8]  ;;  %5550 = vmatprep.mubr.bf16.mxu0 %v7689_v8  ;;  %v1527_v37 = vshll.u32 %v1185_v23, 16  ;;  %v8534_v3 = vpop.f32.mrf.mxu1 }
 0x114   : > { %v2357_v35 = vrot.slane %v2356_v28, 4  ;;  %v1513_v36 = vrot.slane %v1511_v0, 5  ;;  %v1683_v38 = vld [vmem:[#allocation2 + $0x120] sm:$0xf]  ;;  %v1978_v39 = vshrl.u32 %v1682_v34, 16  ;;  %5551 = vmatmul.mubr.bf16.gmra.mxu0 %v7692_v1  ;;  %v1519_v25 = vrot.slane %v1517_v31, 5  ;;  %v7015_v0 = vpop.f32.mrf.mxu0 }
 0x115   : > { %v2352_v59 = vsel %vm8127_vm5, %v2347_v62, %v2351_v14  ;;  %v1523_v43 = vrot.slane %v1521_v33, 4  ;;  %v1684_v44 = vld [vmem:[#allocation2 + $0x124] sm:$0xf]  ;;  %v1983_v45 = vshrl.u32 %v1683_v38, 16  ;;  %v1529_v48 = vrot.slane %v1527_v37, 5  ;;  %v8543_v20 = vpop.f32.mrf.mxu1 }
 0x116   : > { %v2362_v46 = vsel %vm8127_vm5, %v2357_v35, %v2361_v17  ;;  %2645 = vst [vmem:[#allocation3 + $0x17c] sm:$0xf] %v2352_v59  ;;  %v1514_v47 = vor.u32 %v1513_v36, %v1510_v57  ;;  %v6430_v32 = vrot.slane %v1978_v39, 11  ;;  %v2119_v10 = vld [vmem:[#allocation2 + $0x94] sm:$0xf]  ;;  %v1986_v19 = vshll.u32 %v1683_v38, 16  ;;  %v7016_v36 = vpop.f32.mrf.mxu0 }
 0x117   : > { %2646 = vst [vmem:[#allocation3 + $0x1a0] sm:$0xf] %v2362_v46  ;;  %v1524_v50 = vor.u32 %v1523_v43, %v1519_v25  ;;  %v1985_v52 = vrot.slane %v1983_v45, 7  ;;  %v1992_v53 = vshrl.u32 %v1684_v44, 16  ;;  %v2120_v54 = vld [vmem:[#allocation2 + $0x98] sm:$0xf]  ;;  %v7081_v43 = vpop.f32.mrf.mxu1 }
 0x118   : > { %2151 = vst [vmem:[#allocation3 + $0x1c0] sm:$0xf] %v2119_v10  ;;  %v1515_v24 = vrot.slane %v1514_v47, 4  ;;  %v1995_v60 = vshll.u32 %v1684_v44, 16  ;;  %2152 = vst [vmem:[#allocation3 + $0x1e4] sm:$0xf] %v2120_v54  ;;  %v8556_v44 = vadd.f32 %v7016_v36, %v7015_v0 }
 0x119   : > { %v2189_v61 = vld [vmem:[#allocation2 + $0x94] sm:$0xf]  ;;  %v2190_v16 = vld [vmem:[#allocation2 + $0x98] sm:$0xf]  ;;  %v1525_v7 = vrot.slane %v1524_v50, 4  ;;  %v1988_v6 = vor.u32 %v1986_v19, %v1985_v52  ;;  %v1990_v17 = vrot.slane %v1985_v52, 4 }
 0x11a   : > { %v7693_v4 = vld [vmem:[#allocation3 + $0x36c] ss:$36 sps:$4 sm:$0xff]   ;;  %v7814_v9 = vld [vmem:[%s9536_s1] ss:$0 sm:$0xff]  ;;  %v1520_v12 = vsel %vm8127_vm5, %v1515_v24, %v1519_v25  ;;  %v1994_v42 = vrot.slane %v1992_v53, 7  ;;  %v2364_v18 = vshrl.u32 %v2189_v61, 16 }
 0x11b   : > { %v7699_v58 = vld [vmem:[#allocation3 + $0x368] ss:$36 sps:$4 sm:$0xff]   ;;  %v339_v15 = vmul.f32 %v7814_v9, %v6827_v29  ;;  %v8539_v14 = vmul.f32 %v7814_v9, %v6828_v27  ;;  %v2191_v13 = vld [vmem:[#allocation2 + $0x9c] sm:$0x1]  ;;  %5453 = vmatprep.mubr.bf16.mxu1 %v7693_v4  ;;  %v1530_v11 = vsel %vm8127_vm5, %v1525_v7, %v1529_v48  ;;  %1637 = vst [vmem:[#allocation3 + $0x3b0] sm:$0xf] %v1520_v12 }
 0x11c   : > { %v1989_v23 = vsel %vm7924_vm2, %v6430_v32, %v1988_v6  ;;  %v2367_v26 = vshll.u32 %v2189_v61, 16  ;;  %v2373_v8 = vshll.u32 %v2190_v16, 16  ;;  %v1186_v1 = vld [vmem:[#allocation2 + $0x120] sm:$0xf]  ;;  %v1187_v28 = vld [vmem:[#allocation2 + $0x124] sm:$0xf]  ;;  %5454 = vmatmul.mubr.bf16.gmra.mxu1 %v7699_v58  ;;  %v1997_v29 = vor.u32 %v1995_v60, %v1994_v42 }
 0x11d   : > { %1638 = vst [vmem:[#allocation3 + $0x3d4] sm:$0xf] %v1530_v11  ;;  %2101 = vst [vmem:[#allocation3 + $0x3b4] sm:$0xf] %v1989_v23  ;;  %v2366_v27 = vrot.slane %v2364_v18, 4  ;;  %v2377_v21 = vshrl.u32 %v2190_v16, 16  ;;  %v8558_v16 = vpop.f32.mrf.mxu0 }
 0x11e   : > { %v2383_v62 = vshll.u32 %v2191_v13, 16  ;;  %v1188_v57 = vld [vmem:[#allocation2 + $0x128] sm:$0x1]  ;;  %v2369_v31 = vrot.slane %v2367_v26, 5  ;;  %v2375_v33 = vrot.slane %v2373_v8, 5  ;;  %v1532_v34 = vshrl.u32 %v1186_v1, 16 }
 0x11f   : > { %v1535_v35 = vshll.u32 %v1186_v1, 16  ;;  %v7695_v37 = vld [vmem:[#allocation3 + $0x17c] ss:$36 sps:$4 sm:$0xff]   ;;  %v1998_v39 = vsel %vm7924_vm2, %v1990_v17, %v1997_v29  ;;  %v2379_v56 = vrot.slane %v2377_v21, 4  ;;  %v7815_v59 = vld [vmem:[%s9537_s2] ss:$0 sm:$0xff] }
 0x120   : > { %v7700_v38 = vld [vmem:[#allocation3 + $0x178] ss:$36 sps:$4 sm:$0xff]   ;;  %v8554_v25 = vadd.f32 %v7815_v59, %v339_v15  ;;  %2102 = vst [vmem:[#allocation3 + $0x3d8] sm:$0xf] %v1998_v39  ;;  %v2370_v45 = vor.u32 %v2369_v31, %v2366_v27  ;;  %v2385_v46 = vrot.slane %v2383_v62, 5  ;;  %v1534_v47 = vrot.slane %v1532_v34, 4  ;;  %5558 = vmatprep.mubr.bf16.mxu0 %v7695_v37  ;;  %v7082_v15 = vpop.f32.mrf.mxu1 }
 0x121   : > { %v1537_v48 = vrot.slane %v1535_v35, 5  ;;  %v1685_v32 = vld [vmem:[#allocation2 + $0x130] sm:$0x8]  ;;  %v2380_v10 = vor.u32 %v2379_v56, %v2375_v33  ;;  %v1541_v51 = vshll.u32 %v1187_v28, 16  ;;  %v1545_v50 = vshrl.u32 %v1187_v28, 16  ;;  %5559 = vmatmul.mubr.bf16.gmra.mxu0 %v7700_v38 }
 0x122   : > { %v1551_v52 = vshll.u32 %v1188_v57, 16  ;;  %v1686_v19 = vld [vmem:[#allocation2 + $0x134] sm:$0xf]  ;;  %v2371_v53 = vrot.slane %v2370_v45, 4  ;;  %v1687_v24 = vld [vmem:[#allocation2 + $0x138] sm:$0xf]  ;;  %v8566_v57 = vpop.f32.mrf.mxu0  ;;  %v378_v36 = vadd.f32 %v7815_v59, %v8539_v14  ;;  %v8569_v37 = vadd.f32 %v7082_v15, %v7081_v43  ;;  %v8571_v38 = vpop.f32.mrf.mxu1 }
 0x123   : > { %v1538_v54 = vor.u32 %v1537_v48, %v1534_v47  ;;  %v2000_v60 = vshrl.u32 %v1685_v32, 16  ;;  %v2005_v61 = vshrl.u32 %v1686_v19, 16  ;;  %v2381_v4 = vrot.slane %v2380_v10, 4  ;;  %v2121_v9 = vld [vmem:[#allocation2 + $0xa8] sm:$0xf] }
 0x124   : > { %v1543_v58 = vrot.slane %v1541_v51, 5  ;;  %v1547_v7 = vrot.slane %v1545_v50, 4  ;;  %v1553_v6 = vrot.slane %v1551_v52, 5  ;;  %v2376_v12 = vsel %vm8127_vm5, %v2371_v53, %v2375_v33  ;;  %v2122_v18 = vld [vmem:[#allocation2 + $0xac] sm:$0xf]  ;;  %v7021_v51 = vpop.f32.mrf.mxu0  ;;  %v8578_v53 = vpop.f32.mrf.mxu1 }
 0x125   : > { %v1539_v17 = vrot.slane %v1538_v54, 4  ;;  %v6431_v42 = vrot.slane %v2000_v60, 11  ;;  %v2007_v13 = vrot.slane %v2005_v61, 7  ;;  %2153 = vst [vmem:[#allocation3 + $0x208] sm:$0xf] %v2121_v9  ;;  %v2386_v11 = vsel %vm8127_vm5, %v2381_v4, %v2385_v46  ;;  %9545 = vst [vmem:[#allocation4_spill] sm:$0xff] %v8578_v53 }
 0x126   : > { %2647 = vst [vmem:[#allocation3 + $0x1c4] sm:$0xf] %v2376_v12  ;;  %v1548_v23 = vor.u32 %v1547_v7, %v1543_v58  ;;  %v2008_v26 = vshll.u32 %v1686_v19, 16  ;;  %v2014_v8 = vshrl.u32 %v1687_v24, 16  ;;  %2154 = vst [vmem:[#allocation3 + $0x22c] sm:$0xf] %v2122_v18 }
 0x127   : > { %v2192_v1 = vld [vmem:[#allocation2 + $0xa8] sm:$0xf]  ;;  %v2193_v28 = vld [vmem:[#allocation2 + $0xac] sm:$0xf]  ;;  %2648 = vst [vmem:[#allocation3 + $0x1e8] sm:$0xf] %v2386_v11  ;;  %v1544_v0 = vsel %vm8127_vm5, %v1539_v17, %v1543_v58  ;;  %v7022_v58 = vpop.f32.mrf.mxu0 }
 0x128   : > { %v2012_v29 = vrot.slane %v2007_v13, 4  ;;  %v2017_v27 = vshll.u32 %v1687_v24, 16  ;;  %v2194_v21 = vld [vmem:[#allocation2 + $0xb0] sm:$0x1]  ;;  %v2388_v62 = vshrl.u32 %v2192_v1, 16  ;;  %v1549_v34 = vrot.slane %v1548_v23, 4 }
 0x129   : > { %v7702_v31 = vld [vmem:[#allocation3 + $0x3b4] ss:$36 sps:$4 sm:$0xff]   ;;  %1639 = vst [vmem:[#allocation3 + $0x3f8] sm:$0xf] %v1544_v0  ;;  %v2010_v35 = vor.u32 %v2008_v26, %v2007_v13  ;;  %v2016_v39 = vrot.slane %v2014_v8, 7  ;;  %v2391_v45 = vshll.u32 %v2192_v1, 16  ;;  %v8582_v17 = vadd.f32 %v7022_v58, %v7021_v51 }
 0x12a   : > { %v7706_v33 = vld [vmem:[#allocation3 + $0x3b0] ss:$36 sps:$4 sm:$0xff]   ;;  %v2390_v56 = vrot.slane %v2388_v62, 4  ;;  %v2397_v46 = vshll.u32 %v2193_v28, 16  ;;  %5461 = vmatprep.mubr.bf16.mxu1 %v7702_v31  ;;  %v1554_v47 = vsel %vm8127_vm5, %v1549_v34, %v1553_v6  ;;  %v2401_v32 = vshrl.u32 %v2193_v28, 16  ;;  %v7087_v28 = vpop.f32.mrf.mxu1 }
 0x12b   : > { %v2011_v48 = vsel %vm7924_vm2, %v6431_v42, %v2010_v35  ;;  %v2407_v10 = vshll.u32 %v2194_v21, 16  ;;  %5462 = vmatmul.mubr.bf16.gmra.mxu1 %v7706_v33  ;;  %1640 = vst [vmem:[#allocation3 + $0x41c] sm:$0xf] %v1554_v47  ;;  %v2019_v14 = vor.u32 %v2017_v27, %v2016_v39  ;;  %v2393_v59 = vrot.slane %v2391_v45, 5  ;;  %v1189_v61 = vld [vmem:[#allocation2 + $0x134] sm:$0xf]  ;;  %v8588_v39 = vpop.f32.mrf.mxu0 }
 0x12c   : > { %2103 = vst [vmem:[#allocation3 + $0x3fc] sm:$0xf] %v2011_v48  ;;  %v2399_v43 = vrot.slane %v2397_v46, 5  ;;  %v2403_v50 = vrot.slane %v2401_v32, 4  ;;  %v409_v52 = vmax.f32 %v8554_v25, 0.0  ;;  %v410_v19 = vmax.f32 %v378_v36, 0.0  ;;  %v7088_v36 = vpop.f32.mrf.mxu1 }
 0x12d   : > { %v2020_v54 = vsel %vm7924_vm2, %v2012_v29, %v2019_v14  ;;  %v2394_v24 = vor.u32 %v2393_v59, %v2390_v56  ;;  %v2409_v60 = vrot.slane %v2407_v10, 5  ;;  %v1190_v4 = vld [vmem:[#allocation2 + $0x138] sm:$0xf]  ;;  %v7707_v6 = vld [vmem:[#allocation3 + $0x1c0] ss:$36 sps:$4 sm:$0xff]   ;;  %v1556_v12 = vshrl.u32 %v1189_v61, 16 }
 0x12e   : > { %v7704_v7 = vld [vmem:[#allocation3 + $0x1c4] ss:$36 sps:$4 sm:$0xff]   ;;  %2104 = vst [vmem:[#allocation3 + $0x420] sm:$0xf] %v2020_v54  ;;  %v2404_v9 = vor.u32 %v2403_v50, %v2399_v43  ;;  %v6867_v15 = vpack.c.bf16 %v410_v19, %v409_v52  ;;  %v1191_v42 = vld [vmem:[#allocation2 + $0x13c] sm:$0x1]  ;;  %v8590_v32 = vadd.f32 %v7088_v36, %v7087_v28  ;;  %v8594_v54 = vpop.f32.mrf.mxu1 }
 0x12f   : > { %v2395_v25 = vrot.slane %v2394_v24, 4  ;;  %v1559_v13 = vshll.u32 %v1189_v61, 16  ;;  %v1565_v18 = vshll.u32 %v1190_v4, 16  ;;  %v1569_v11 = vshrl.u32 %v1190_v4, 16  ;;  %5566 = vmatprep.mubr.bf16.mxu0 %v7704_v7  ;;  %v1688_v1 = vld [vmem:[#allocation2 + $0x144] sm:$0x8]  ;;  %v8596_v7 = vpop.f32.mrf.mxu0 }
 0x130   : > { %v2405_v23 = vrot.slane %v2404_v9, 4  ;;  %6971 = vst [vmem:[#allocation2 + $0x148] sm:$0xff] %v6867_v15   ;;  %v1558_v26 = vrot.slane %v1556_v12, 4  ;;  %v1575_v8 = vshll.u32 %v1191_v42, 16  ;;  %5567 = vmatmul.mubr.bf16.gmra.mxu0 %v7707_v6  ;;  %v2123_v62 = vld [vmem:[#allocation2 + $0xbc] sm:$0xf] }
 0x131   : > { %v2400_v0 = vsel %vm8127_vm5, %v2395_v25, %v2399_v43  ;;  %v1561_v29 = vrot.slane %v1559_v13, 5  ;;  %v1567_v27 = vrot.slane %v1565_v18, 5  ;;  %v1571_v21 = vrot.slane %v1569_v11, 4  ;;  %v2124_v35 = vld [vmem:[#allocation2 + $0xc0] sm:$0xf]  ;;  %9546 = vst [vmem:[#allocation5_spill] sm:$0xff] %v8590_v32 }
 0x132   : > { %v2410_v31 = vsel %vm8127_vm5, %v2405_v23, %v2409_v60  ;;  %2649 = vst [vmem:[#allocation3 + $0x20c] sm:$0xf] %v2400_v0  ;;  %v1577_v33 = vrot.slane %v1575_v8, 5  ;;  %v2022_v34 = vshrl.u32 %v1688_v1, 16  ;;  %2155 = vst [vmem:[#allocation3 + $0x250] sm:$0xf] %v2123_v62 }
 0x133   : > { %2650 = vst [vmem:[#allocation3 + $0x230] sm:$0xf] %v2410_v31  ;;  %v1562_v56 = vor.u32 %v1561_v29, %v1558_v26  ;;  %v1572_v45 = vor.u32 %v1571_v21, %v1567_v27  ;;  %2156 = vst [vmem:[#allocation3 + $0x274] sm:$0xf] %v2124_v35  ;;  %v2195_v46 = vld [vmem:[#allocation2 + $0xbc] sm:$0xf]  ;;  %v8602_v29 = vpop.f32.mrf.mxu1  ;;  %v7027_v31 = vpop.f32.mrf.mxu0 }
 0x134   : > { %v2196_v47 = vld [vmem:[#allocation2 + $0xc0] sm:$0xf]  ;;  %v2197_v48 = vld [vmem:[#allocation2 + $0xc4] sm:$0x1]  ;;  %v8592_v10 = vrot.slane %v2022_v34, 11  ;;  %v2412_v14 = vshrl.u32 %v2195_v46, 16 }
 0x135   : > { %v2415_v59 = vshll.u32 %v2195_v46, 16  ;;  %v2421_v43 = vshll.u32 %v2196_v47, 16  ;;  %v2125_v51 = vld [vmem:[#allocation2 + $0xd0] sm:$0xf]  ;;  %v7708_v50 = vld [vmem:[#allocation3 + $0x3fc] ss:$36 sps:$4 sm:$0xff]  }
 0x136   : > { %v7714_v52 = vld [vmem:[#allocation3 + $0x3f8] ss:$36 sps:$4 sm:$0xff]   ;;  %v1563_v19 = vrot.slane %v1562_v56, 4  ;;  %2157 = vst [vmem:[#allocation3 + $0x298] sm:$0xf] %v2125_v51  ;;  %9547 = vst [vmem:[#allocation6_spill] sm:$0xff] %v8594_v54  ;;  %5469 = vmatprep.mubr.bf16.mxu1 %v7708_v50 }
 0x137   : > { %v1573_v24 = vrot.slane %v1572_v45, 4  ;;  %v2414_v60 = vrot.slane %v2412_v14, 4  ;;  %v2417_v61 = vrot.slane %v2415_v59, 5  ;;  %v2423_v4 = vrot.slane %v2421_v43, 5  ;;  %v2126_v58 = vld [vmem:[#allocation2 + $0xd4] sm:$0xf]  ;;  %5470 = vmatmul.mubr.bf16.gmra.mxu1 %v7714_v52 }
 0x138   : > { %v1568_v6 = vsel %vm8127_vm5, %v1563_v19, %v1567_v27  ;;  %v1689_v9 = vld [vmem:[#allocation2 + $0x148] sm:$0xf]  ;;  %v1690_v15 = vld [vmem:[#allocation2 + $0x14c] sm:$0xf]  ;;  %v2425_v12 = vshrl.u32 %v2196_v47, 16  ;;  %v2431_v25 = vshll.u32 %v2197_v48, 16 }
 0x139   : > { %2158 = vst [vmem:[#allocation3 + $0x2bc] sm:$0xf] %v2126_v58  ;;  %v1578_v42 = vsel %vm8127_vm5, %v1573_v24, %v1577_v33  ;;  %1641 = vst [vmem:[#allocation3 + $0x440] sm:$0xf] %v1568_v6  ;;  %v2027_v13 = vshrl.u32 %v1689_v9, 16  ;;  %v2030_v18 = vshll.u32 %v1689_v9, 16  ;;  %v2418_v8 = vor.u32 %v2417_v61, %v2414_v60  ;;  %v7093_v24 = vpop.f32.mrf.mxu1  ;;  %v7028_v60 = vpop.f32.mrf.mxu0 }
 0x13a   : > { %v2036_v11 = vshrl.u32 %v1690_v15, 16  ;;  %v2198_v23 = vld [vmem:[#allocation2 + $0xd0] sm:$0xf]  ;;  %1642 = vst [vmem:[#allocation3 + $0x464] sm:$0xf] %v1578_v42  ;;  %v2039_v26 = vshll.u32 %v1690_v15, 16 }
 0x13b   : > { %v2427_v1 = vrot.slane %v2425_v12, 4  ;;  %v2433_v28 = vrot.slane %v2431_v25, 5  ;;  %v2199_v0 = vld [vmem:[#allocation2 + $0xd4] sm:$0xf]  ;;  %9548 = vst [vmem:[#allocation7_spill] sm:$0xff] %v8602_v29  ;;  %v2029_v62 = vrot.slane %v2027_v13, 7 }
 0x13c   : > { %v7710_v27 = vld [vmem:[#allocation3 + $0x20c] ss:$36 sps:$4 sm:$0xff]   ;;  %v2038_v34 = vrot.slane %v2036_v11, 7  ;;  %v2419_v35 = vrot.slane %v2418_v8, 4  ;;  %v2436_v56 = vshrl.u32 %v2198_v23, 16  ;;  %v2439_v47 = vshll.u32 %v2198_v23, 16 }
 0x13d   : > { %v7715_v21 = vld [vmem:[#allocation3 + $0x208] ss:$36 sps:$4 sm:$0xff]   ;;  %v2428_v33 = vor.u32 %v2427_v1, %v2423_v4  ;;  %v2200_v36 = vld [vmem:[#allocation2 + $0xd8] sm:$0x1]  ;;  %5574 = vmatprep.mubr.bf16.mxu0 %v7710_v27  ;;  %v2032_v45 = vor.u32 %v2030_v18, %v2029_v62  ;;  %v2034_v46 = vrot.slane %v2029_v62, 4  ;;  %v2445_v48 = vshll.u32 %v2199_v0, 16  ;;  %v7094_v18 = vpop.f32.mrf.mxu1  ;;  %v8613_v62 = vpop.f32.mrf.mxu0 }
 0x13e   : > { %v2668_v14 = vld [vmem:[#allocation2 + $0x2c] sm:$0x8]  ;;  %5575 = vmatmul.mubr.bf16.gmra.mxu0 %v7715_v21  ;;  %v2041_v59 = vor.u32 %v2039_v26, %v2038_v34  ;;  %v2424_v43 = vsel %vm8127_vm5, %v2419_v35, %v2423_v4  ;;  %v2438_v50 = vrot.slane %v2436_v56, 4  ;;  %v2669_v52 = vld [vmem:[#allocation2 + $0x30] sm:$0xf]  ;;  %v2441_v58 = vrot.slane %v2439_v47, 5 }
 0x13f   : > { %v2429_v51 = vrot.slane %v2428_v33, 4  ;;  %v2670_v19 = vld [vmem:[#allocation2 + $0x34] sm:$0xf]  ;;  %v2033_v61 = vsel %vm7924_vm2, %v8592_v10, %v2032_v45  ;;  %2651 = vst [vmem:[#allocation3 + $0x254] sm:$0xf] %v2424_v43  ;;  %v2447_v6 = vrot.slane %v2445_v48, 5  ;;  %v8617_v45 = vadd.f32 %v7028_v60, %v7027_v31 }
 0x140   : > { %v2449_v9 = vshrl.u32 %v2199_v0, 16  ;;  %v3132_v15 = vld [vmem:[#allocation2 + $0x30] sm:$0xf]  ;;  %v2042_v12 = vsel %vm7924_vm2, %v2034_v46, %v2041_v59  ;;  %2105 = vst [vmem:[#allocation3 + $0x444] sm:$0xf] %v2033_v61  ;;  %v2455_v25 = vshll.u32 %v2200_v36, 16  ;;  %v2442_v10 = vor.u32 %v2441_v58, %v2438_v50 }
 0x141   : > { %v2434_v4 = vsel %vm8127_vm5, %v2429_v51, %v2433_v28  ;;  %v2717_v42 = vshrl.u32 %v2668_v14, 16  ;;  %v3133_v13 = vld [vmem:[#allocation2 + $0x34] sm:$0xf]  ;;  %3164 = vst [vmem:[#allocation3 + $0x1c] sm:$0xf] %v3132_v15  ;;  %v2722_v23 = vshrl.u32 %v2669_v52, 16  ;;  %v8615_v28 = vpop.f32.mrf.mxu1  ;;  %v8619_v59 = vadd.f32 %v7094_v18, %v7093_v24 }
 0x142   : > { %2106 = vst [vmem:[#allocation3 + $0x468] sm:$0xf] %v2042_v12  ;;  %2652 = vst [vmem:[#allocation3 + $0x278] sm:$0xf] %v2434_v4  ;;  %v2451_v11 = vrot.slane %v2449_v9, 4  ;;  %v2725_v26 = vshll.u32 %v2669_v52, 16  ;;  %v8627_v4 = vpop.f32.mrf.mxu0 }
 0x143   : > { %3165 = vst [vmem:[#allocation3 + $0x40] sm:$0xf] %v3133_v13  ;;  %v2457_v8 = vrot.slane %v2455_v25, 5  ;;  %v6433_v1 = vrot.slane %v2717_v42, 11  ;;  %v2731_v0 = vshrl.u32 %v2670_v19, 16  ;;  %v2734_v27 = vshll.u32 %v2670_v19, 16  ;;  %v8621_v43 = vpop.f32.mrf.mxu1 }
 0x144   : > { %v2127_v21 = vld [vmem:[#allocation2 + $0xe4] sm:$0xf]  ;;  %9549 = vst [vmem:[#allocation8_spill] sm:$0xff] %v8615_v28  ;;  %v2443_v34 = vrot.slane %v2442_v10, 4  ;;  %v2452_v35 = vor.u32 %v2451_v11, %v2447_v6  ;;  %v2724_v33 = vrot.slane %v2722_v23, 7  ;;  %9550 = vst [vmem:[#allocation9_spill] sm:$0xff] %v8619_v59 }
 0x145   : > { %v2128_v36 = vld [vmem:[#allocation2 + $0xe8] sm:$0xf]  ;;  %2159 = vst [vmem:[#allocation3 + $0x2e0] sm:$0xf] %v2127_v21  ;;  %v2201_v56 = vld [vmem:[#allocation2 + $0xe4] sm:$0xf]  ;;  %v7115_v24 = vpop.f32.mrf.mxu1 }
 0x146   : > { %v2733_v46 = vrot.slane %v2731_v0, 7  ;;  %2160 = vst [vmem:[#allocation3 + $0x304] sm:$0xf] %v2128_v36  ;;  %v2202_v47 = vld [vmem:[#allocation2 + $0xe8] sm:$0xf]  ;;  %v2460_v14 = vshrl.u32 %v2201_v56, 16  ;;  %v2448_v51 = vsel %vm8127_vm5, %v2443_v34, %v2447_v6  ;;  %v2727_v52 = vor.u32 %v2725_v26, %v2724_v33 }
 0x147   : > { %v2203_v48 = vld [vmem:[#allocation2 + $0xec] sm:$0x1]  ;;  %9551 = vst [vmem:[#allocation10_spill] sm:$0xff] %v8621_v43  ;;  %v2453_v50 = vrot.slane %v2452_v35, 4  ;;  %v2729_v19 = vrot.slane %v2724_v33, 4  ;;  %v2463_v60 = vshll.u32 %v2201_v56, 16  ;;  %v7116_v0 = vpop.f32.mrf.mxu1 }
 0x148   : > { %v2671_v61 = vld [vmem:[#allocation2 + $0x40] sm:$0x8]  ;;  %2653 = vst [vmem:[#allocation3 + $0x29c] sm:$0xf] %v2448_v51  ;;  %v2736_v58 = vor.u32 %v2734_v27, %v2733_v46  ;;  %v2462_v31 = vrot.slane %v2460_v14, 4  ;;  %v2469_v9 = vshll.u32 %v2202_v47, 16  ;;  %v2728_v6 = vsel %vm7924_vm2, %v6433_v1, %v2727_v52  ;;  %v7033_v46 = vpop.f32.mrf.mxu0 }
 0x149   : > { %v2672_v15 = vld [vmem:[#allocation2 + $0x44] sm:$0xf]  ;;  %v8625_v12 = vld [vmem:[#allocation2 + $0x48] sm:$0xf]  ;;  %v2458_v25 = vsel %vm8127_vm5, %v2453_v50, %v2457_v8  ;;  %v2473_v42 = vshrl.u32 %v2202_v47, 16  ;;  %v2479_v13 = vshll.u32 %v2203_v48, 16  ;;  %v7117_v8 = vadd.f32 %v7116_v0, %v7115_v24  ;;  %v7118_v47 = vpop.f32.mrf.mxu1 }
 0x14a   : > { %v3134_v18 = vld [vmem:[#allocation2 + $0x44] sm:$0xf]  ;;  %v7717_v10 = vld [vmem:[#allocation3 + $0x444] ss:$36 sps:$4 sm:$0xff]   ;;  %2654 = vst [vmem:[#allocation3 + $0x2c0] sm:$0xf] %v2458_v25  ;;  %v2737_v11 = vsel %vm7924_vm2, %v2729_v19, %v2736_v58 }
 0x14b   : > { %3100 = vst [vmem:[#allocation3 + $0x18] sm:$0xf] %v2728_v6  ;;  %v2465_v23 = vrot.slane %v2463_v60, 5  ;;  %v2471_v26 = vrot.slane %v2469_v9, 5  ;;  %3166 = vst [vmem:[#allocation3 + $0x64] sm:$0xf] %v3134_v18  ;;  %5477 = vmatprep.mubr.bf16.mxu1 %v7717_v10  ;;  %v7034_v9 = vpop.f32.mrf.mxu0  ;;  %v8638_v24 = vadd.f32 %v7117_v8, %v8496_v22 }
 0x14c   : > { %v7719_v27 = vld [vmem:[#allocation3 + $0x254] ss:$36 sps:$4 sm:$0xff]   ;;  %v7721_v21 = vld [vmem:[#allocation3 + $0x440] ss:$36 sps:$4 sm:$0xff]   ;;  %3101 = vst [vmem:[#allocation3 + $0x3c] sm:$0xf] %v2737_v11 }
 0x14d   : > { %v7722_v34 = vld [vmem:[#allocation3 + $0x250] ss:$36 sps:$4 sm:$0xff]   ;;  %v2466_v1 = vor.u32 %v2465_v23, %v2462_v31  ;;  %v2475_v35 = vrot.slane %v2473_v42, 4  ;;  %v2481_v33 = vrot.slane %v2479_v13, 5  ;;  %v2739_v36 = vshrl.u32 %v2671_v61, 16  ;;  %5582 = vmatprep.mubr.bf16.mxu0 %v7719_v27  ;;  %5478 = vmatmul.mubr.bf16.gmra.mxu1 %v7721_v21 }
 0x14e   : > { %v3135_v56 = vld [vmem:[#allocation2 + $0x48] sm:$0xf]  ;;  %v2744_v48 = vshrl.u32 %v2672_v15, 16  ;;  %v2747_v14 = vshll.u32 %v2672_v15, 16  ;;  %v2753_v51 = vshrl.u32 %v8625_v12, 16  ;;  %v2756_v50 = vshll.u32 %v8625_v12, 16  ;;  %5583 = vmatmul.mubr.bf16.gmra.mxu0 %v7722_v34  ;;  %v7119_v12 = vpop.f32.mrf.mxu1 }
 0x14f   : > { %3167 = vst [vmem:[#allocation3 + $0x88] sm:$0xf] %v3135_v56  ;;  %v2129_v52 = vld [vmem:[#allocation2 + $0xf8] sm:$0xf]  ;;  %v2467_v19 = vrot.slane %v2466_v1, 4  ;;  %v2476_v58 = vor.u32 %v2475_v35, %v2471_v26  ;;  %v6434_v31 = vrot.slane %v2739_v36, 11  ;;  %v8640_v13 = vadd.f32 %v7034_v9, %v7033_v46  ;;  %v8652_v9 = vpop.f32.mrf.mxu0 }
 0x150   : > { %v2130_v60 = vld [vmem:[#allocation2 + $0xfc] sm:$0xf]  ;;  %2161 = vst [vmem:[#allocation3 + $0x328] sm:$0xf] %v2129_v52  ;;  %v2204_v61 = vld [vmem:[#allocation2 + $0xf8] sm:$0xf]  ;;  %v7120_v46 = vadd.f32 %v7119_v12, %v7118_v47 }
 0x151   : > { %v2746_v25 = vrot.slane %v2744_v48, 7  ;;  %v2755_v6 = vrot.slane %v2753_v51, 7  ;;  %2162 = vst [vmem:[#allocation3 + $0x34c] sm:$0xf] %v2130_v60  ;;  %v2205_v15 = vld [vmem:[#allocation2 + $0xfc] sm:$0xf]  ;;  %v2472_v18 = vsel %vm8127_vm5, %v2467_v19, %v2471_v26 }
 0x152   : > { %v2484_v42 = vshrl.u32 %v2204_v61, 16  ;;  %v2477_v10 = vrot.slane %v2476_v58, 4  ;;  %v2206_v11 = vld [vmem:[#allocation2 + $0x100] sm:$0x1]  ;;  %v2487_v23 = vshll.u32 %v2204_v61, 16  ;;  %v2493_v0 = vshll.u32 %v2205_v15, 16 }
 0x153   : > { %v7723_v27 = vld [vmem:[#allocation3 + $0x29c] ss:$36 sps:$4 sm:$0xff]   ;;  %2655 = vst [vmem:[#allocation3 + $0x2e4] sm:$0xf] %v2472_v18  ;;  %v2749_v21 = vor.u32 %v2747_v14, %v2746_v25  ;;  %v2751_v22 = vrot.slane %v2746_v25, 4  ;;  %v2758_v34 = vor.u32 %v2756_v50, %v2755_v6  ;;  %v2497_v52 = vshrl.u32 %v2205_v15, 16 }
 0x154   : > { %v2486_v8 = vrot.slane %v2484_v42, 4  ;;  %v7725_v1 = vld [vmem:[#allocation3 + $0x18] ss:$36 sps:$4 sm:$0xff]   ;;  %v2482_v36 = vsel %vm8127_vm5, %v2477_v10, %v2481_v33  ;;  %v2489_v56 = vrot.slane %v2487_v23, 5  ;;  %5590 = vmatprep.mubr.bf16.mxu0 %v7723_v27  ;;  %v2495_v14 = vrot.slane %v2493_v0, 5 }
 0x155   : > { %v7727_v35 = vld [vmem:[#allocation3 + $0x1c] ss:$36 sps:$4 sm:$0xff]   ;;  %2656 = vst [vmem:[#allocation3 + $0x308] sm:$0xf] %v2482_v36  ;;  %v2750_v26 = vsel %vm7924_vm2, %v6434_v31, %v2749_v21  ;;  %v2759_v51 = vsel %vm7924_vm2, %v2751_v22, %v2758_v34  ;;  %v2674_v50 = vld [vmem:[#allocation2 + $0x54] sm:$0x8]  ;;  %v7008_v61 = vadd.f32 %v8509_v49, %v8498_v40  ;;  %v7121_v31 = vpop.f32.mrf.mxu1 }
 0x156   : > { %v7729_v48 = vld [vmem:[#allocation3 + $0x298] ss:$36 sps:$4 sm:$0xff]   ;;  %5679 = vmatprep.mubr.bf16.mxu1 %v7727_v35  ;;  %3102 = vst [vmem:[#allocation3 + $0x60] sm:$0xf] %v2750_v26  ;;  %3103 = vst [vmem:[#allocation3 + $0x84] sm:$0xf] %v2759_v51  ;;  %v2490_v19 = vor.u32 %v2489_v56, %v2486_v8  ;;  %v8658_v35 = vpop.f32.mrf.mxu0 }
 0x157   : > { %v2503_v58 = vshll.u32 %v2206_v11, 16  ;;  %v2675_v33 = vld [vmem:[#allocation2 + $0x58] sm:$0xf]  ;;  %v2676_v60 = vld [vmem:[#allocation2 + $0x5c] sm:$0xf]  ;;  %v2761_v47 = vshrl.u32 %v2674_v50, 16  ;;  %5680 = vmatmul.mubr.bf16.vlgmr.msra.gmra.mxu1 %v7725_v1  ;;  %5591 = vmatmul.mubr.bf16.gmra.mxu0 %v7729_v48  ;;  %v7122_v27 = vpop.f32.mrf.mxu1  ;;  %v8654_v49 = vadd.f32 %v7120_v46, %v7008_v61 }
 0x158   : > { %v2499_v25 = vrot.slane %v2497_v52, 4  ;;  %v2766_v6 = vshrl.u32 %v2675_v33, 16  ;;  %v2769_v42 = vshll.u32 %v2675_v33, 16  ;;  %v2775_v15 = vshrl.u32 %v2676_v60, 16  ;;  %v3136_v12 = vld [vmem:[#allocation2 + $0x58] sm:$0xf] }
 0x159   : > { %v2491_v18 = vrot.slane %v2490_v19, 4  ;;  %v2505_v10 = vrot.slane %v2503_v58, 5  ;;  %v6435_v23 = vrot.slane %v2761_v47, 11  ;;  %v2778_v11 = vshll.u32 %v2676_v60, 16  ;;  %v3137_v0 = vld [vmem:[#allocation2 + $0x5c] sm:$0xf]  ;;  %v7124_v56 = vpop.f32.mrf.mxu1 }
 0x15a   : > { %3168 = vst [vmem:[#allocation3 + $0xac] sm:$0xf] %v3136_v12  ;;  %v2500_v21 = vor.u32 %v2499_v25, %v2495_v14  ;;  %v2768_v22 = vrot.slane %v2766_v6, 7  ;;  %v2777_v40 = vrot.slane %v2775_v15, 7  ;;  %3169 = vst [vmem:[#allocation3 + $0xd0] sm:$0xf] %v3137_v0  ;;  %v7123_v36 = vadd.f32 %v7122_v27, %v7121_v31 }
 0x15b   : > { %v2496_v34 = vsel %vm8127_vm5, %v2491_v18, %v2495_v14  ;;  %v2131_v8 = vld [vmem:[#allocation2 + $0x10c] sm:$0xf]  ;;  %v2132_v1 = vld [vmem:[#allocation2 + $0x110] sm:$0xf]  ;;  %v7125_v60 = vpop.f32.mrf.mxu1  ;;  %v2209_v15 = vld [vmem:[#allocation2 + $0x114] sm:$0x1]  ;;  %v7014_v18 = vadd.f32 %v8528_v55, %v8522_v41 }
 0x15c   : > { %v2501_v48 = vrot.slane %v2500_v21, 4  ;;  %2657 = vst [vmem:[#allocation3 + $0x32c] sm:$0xf] %v2496_v34  ;;  %v2771_v26 = vor.u32 %v2769_v42, %v2768_v22  ;;  %v2773_v51 = vrot.slane %v2768_v22, 4  ;;  %v2780_v52 = vor.u32 %v2778_v11, %v2777_v40  ;;  %2163 = vst [vmem:[#allocation3 + $0x370] sm:$0xf] %v2131_v8  ;;  %v7039_v11 = vpop.f32.mrf.mxu0 }
 0x15d   : > { %2164 = vst [vmem:[#allocation3 + $0x394] sm:$0xf] %v2132_v1  ;;  %v2207_v50 = vld [vmem:[#allocation2 + $0x10c] sm:$0xf]  ;;  %v2208_v19 = vld [vmem:[#allocation2 + $0x110] sm:$0xf]  ;;  %v8661_v14 = vadd.f32 %v7123_v36, %v8530_v63 }
 0x15e   : > { %v7730_v46 = vld [vmem:[#allocation3 + $0x2e4] ss:$36 sps:$4 sm:$0xff]   ;;  %v2508_v33 = vshrl.u32 %v2207_v50, 16  ;;  %v2506_v61 = vsel %vm8127_vm5, %v2501_v48, %v2505_v10  ;;  %v2772_v31 = vsel %vm7924_vm2, %v6435_v23, %v2771_v26  ;;  %v2781_v25 = vsel %vm7924_vm2, %v2773_v51, %v2780_v52  ;;  %v2677_v21 = vld [vmem:[#allocation2 + $0x68] sm:$0x8]  ;;  %v7040_v1 = vpop.f32.mrf.mxu0 }
 0x15f   : > { %v7734_v58 = vld [vmem:[#allocation3 + $0x2e0] ss:$36 sps:$4 sm:$0xff]   ;;  %v2511_v6 = vshll.u32 %v2207_v50, 16  ;;  %5598 = vmatprep.mubr.bf16.mxu0 %v7730_v46  ;;  %2658 = vst [vmem:[#allocation3 + $0x350] sm:$0xf] %v2506_v61  ;;  %v2517_v12 = vshll.u32 %v2208_v19, 16  ;;  %v7126_v10 = vadd.f32 %v7125_v60, %v7124_v56 }
 0x160   : > { %v7732_v47 = vld [vmem:[#allocation3 + $0x64] ss:$36 sps:$4 sm:$0xff]   ;;  %3104 = vst [vmem:[#allocation3 + $0xa8] sm:$0xf] %v2772_v31  ;;  %3105 = vst [vmem:[#allocation3 + $0xcc] sm:$0xf] %v2781_v25  ;;  %5599 = vmatmul.mubr.bf16.gmra.mxu0 %v7734_v58  ;;  %v8673_v46 = vpop.f32.mrf.mxu0  ;;  %v8675_v31 = vadd.f32 %v7040_v1, %v7039_v11 }
 0x161   : > { %v7735_v42 = vld [vmem:[#allocation3 + $0x60] ss:$36 sps:$4 sm:$0xff]   ;;  %v2510_v63 = vrot.slane %v2508_v33, 4  ;;  %5687 = vmatprep.mubr.bf16.mxu1 %v7732_v47  ;;  %v2513_v0 = vrot.slane %v2511_v6, 5  ;;  %v2521_v23 = vshrl.u32 %v2208_v19, 16  ;;  %v2527_v27 = vshll.u32 %v2209_v15, 16 }
 0x162   : > { %5688 = vmatmul.mubr.bf16.gmra.mxu1 %v7735_v42  ;;  %v2519_v22 = vrot.slane %v2517_v12, 5  ;;  %v2678_v40 = vld [vmem:[#allocation2 + $0x6c] sm:$0xf]  ;;  %v2679_v34 = vld [vmem:[#allocation2 + $0x70] sm:$0xf]  ;;  %v2783_v8 = vshrl.u32 %v2677_v21, 16  ;;  %v8671_v36 = vadd.f32 %v7126_v10, %v7014_v18  ;;  %v8677_v15 = vpop.f32.mrf.mxu0 }
 0x163   : > { %v2514_v48 = vor.u32 %v2513_v0, %v2510_v63  ;;  %v2523_v26 = vrot.slane %v2521_v23, 4  ;;  %v2529_v51 = vrot.slane %v2527_v27, 5  ;;  %v2788_v41 = vshrl.u32 %v2678_v40, 16  ;;  %v3138_v55 = vld [vmem:[#allocation2 + $0x6c] sm:$0xf] }
 0x164   : > { %v6436_v56 = vrot.slane %v2783_v8, 11  ;;  %v2791_v52 = vshll.u32 %v2678_v40, 16  ;;  %v2797_v50 = vshrl.u32 %v2679_v34, 16  ;;  %v2800_v19 = vshll.u32 %v2679_v34, 16  ;;  %3170 = vst [vmem:[#allocation3 + $0xf4] sm:$0xf] %v3138_v55  ;;  %v7045_v40 = vpop.f32.mrf.mxu0 }
 0x165   : > { %v2515_v58 = vrot.slane %v2514_v48, 4  ;;  %v2524_v33 = vor.u32 %v2523_v26, %v2519_v22  ;;  %v2790_v60 = vrot.slane %v2788_v41, 7  ;;  %v3139_v47 = vld [vmem:[#allocation2 + $0x70] sm:$0xf]  ;;  %v2133_v61 = vld [vmem:[#allocation2 + $0x120] sm:$0xf]  ;;  %v7127_v26 = vpop.f32.mrf.mxu1 }
 0x166   : > { %v2799_v25 = vrot.slane %v2797_v50, 7  ;;  %3171 = vst [vmem:[#allocation3 + $0x118] sm:$0xf] %v3139_v47  ;;  %v2134_v6 = vld [vmem:[#allocation2 + $0x124] sm:$0xf] }
 0x167   : > { %2165 = vst [vmem:[#allocation3 + $0x3b8] sm:$0xf] %v2133_v61  ;;  %v2210_v42 = vld [vmem:[#allocation2 + $0x120] sm:$0xf]  ;;  %v7736_v63 = vld [vmem:[#allocation3 + $0x32c] ss:$36 sps:$4 sm:$0xff]   ;;  %v2520_v12 = vsel %vm8127_vm5, %v2515_v58, %v2519_v22  ;;  %v2793_v10 = vor.u32 %v2791_v52, %v2790_v60  ;;  %v7046_v58 = vpop.f32.mrf.mxu0  ;;  %v7128_v61 = vpop.f32.mrf.mxu1 }
 0x168   : > { %v2525_v18 = vrot.slane %v2524_v33, 4  ;;  %v2795_v0 = vrot.slane %v2790_v60, 4  ;;  %2166 = vst [vmem:[#allocation3 + $0x3dc] sm:$0xf] %v2134_v6  ;;  %v7738_v23 = vld [vmem:[#allocation3 + $0xac] ss:$36 sps:$4 sm:$0xff]   ;;  %v2802_v11 = vor.u32 %v2800_v19, %v2799_v25  ;;  %5606 = vmatprep.mubr.bf16.mxu0 %v7736_v63  ;;  %v8687_v47 = vadd.f32 %v7046_v58, %v7045_v40 }
 0x169   : > { %v7741_v27 = vld [vmem:[#allocation3 + $0x328] ss:$36 sps:$4 sm:$0xff]   ;;  %2659 = vst [vmem:[#allocation3 + $0x374] sm:$0xf] %v2520_v12  ;;  %v2532_v21 = vshrl.u32 %v2210_v42, 16  ;;  %v2794_v1 = vsel %vm7924_vm2, %v6436_v56, %v2793_v10  ;;  %5695 = vmatprep.mubr.bf16.mxu1 %v7738_v23  ;;  %v2535_v52 = vshll.u32 %v2210_v42, 16 }
 0x16a   : > { %v7742_v34 = vld [vmem:[#allocation3 + $0xa8] ss:$36 sps:$4 sm:$0xff]   ;;  %v2530_v8 = vsel %vm8127_vm5, %v2525_v18, %v2529_v51  ;;  %v2211_v48 = vld [vmem:[#allocation2 + $0x124] sm:$0xf]  ;;  %v2212_v22 = vld [vmem:[#allocation2 + $0x128] sm:$0x1]  ;;  %5607 = vmatmul.mubr.bf16.gmra.mxu0 %v7741_v27  ;;  %v2803_v41 = vsel %vm7924_vm2, %v2795_v0, %v2802_v11  ;;  %v7130_v11 = vpop.f32.mrf.mxu1 }
 0x16b   : > { %2660 = vst [vmem:[#allocation3 + $0x398] sm:$0xf] %v2530_v8  ;;  %3106 = vst [vmem:[#allocation3 + $0xf0] sm:$0xf] %v2794_v1  ;;  %v2534_v55 = vrot.slane %v2532_v21, 4  ;;  %v2541_v50 = vshll.u32 %v2211_v48, 16  ;;  %5696 = vmatmul.mubr.bf16.gmra.mxu1 %v7742_v34 }
 0x16c   : > { %v2680_v19 = vld [vmem:[#allocation2 + $0x7c] sm:$0x8]  ;;  %3107 = vst [vmem:[#allocation3 + $0x114] sm:$0xf] %v2803_v41  ;;  %v2545_v51 = vshrl.u32 %v2211_v48, 16  ;;  %v2551_v33 = vshll.u32 %v2212_v22, 16  ;;  %v7020_v41 = vadd.f32 %v8566_v57, %v8558_v16 }
 0x16d   : > { %v2681_v56 = vld [vmem:[#allocation2 + $0x80] sm:$0xf]  ;;  %v2682_v60 = vld [vmem:[#allocation2 + $0x84] sm:$0xf]  ;;  %v2537_v25 = vrot.slane %v2535_v52, 5  ;;  %v2543_v6 = vrot.slane %v2541_v50, 5  ;;  %v7129_v52 = vadd.f32 %v7128_v61, %v7127_v26  ;;  %v7131_v50 = vpop.f32.mrf.mxu1 }
 0x16e   : > { %v2805_v63 = vshrl.u32 %v2680_v19, 16  ;;  %v2810_v12 = vshrl.u32 %v2681_v56, 16  ;;  %v3140_v18 = vld [vmem:[#allocation2 + $0x80] sm:$0xf]  ;;  %v2547_v10 = vrot.slane %v2545_v51, 4  ;;  %v2553_v0 = vrot.slane %v2551_v33, 5 }
 0x16f   : > { %v2813_v42 = vshll.u32 %v2681_v56, 16  ;;  %v2819_v23 = vshrl.u32 %v2682_v60, 16  ;;  %v3141_v27 = vld [vmem:[#allocation2 + $0x84] sm:$0xf]  ;;  %3172 = vst [vmem:[#allocation3 + $0x13c] sm:$0xf] %v3140_v18  ;;  %v2538_v21 = vor.u32 %v2537_v25, %v2534_v55  ;;  %v7132_v18 = vadd.f32 %v7131_v50, %v7130_v11 }
 0x170   : > { %v6437_v34 = vrot.slane %v2805_v63, 11  ;;  %v2812_v8 = vrot.slane %v2810_v12, 7  ;;  %v2822_v1 = vshll.u32 %v2682_v60, 16  ;;  %3173 = vst [vmem:[#allocation3 + $0x160] sm:$0xf] %v3141_v27  ;;  %v2548_v40 = vor.u32 %v2547_v10, %v2543_v6  ;;  %v8694_v10 = vpop.f32.mrf.mxu0  ;;  %v7133_v27 = vpop.f32.mrf.mxu1 }
 0x171   : > { %v2821_v48 = vrot.slane %v2819_v23, 7  ;;  %v2135_v22 = vld [vmem:[#allocation2 + $0x134] sm:$0xf]  ;;  %v2539_v19 = vrot.slane %v2538_v21, 4  ;;  %v2136_v33 = vld [vmem:[#allocation2 + $0x138] sm:$0xf]  ;;  %v8692_v12 = vadd.f32 %v7129_v52, %v8556_v44  ;;  %v8700_v23 = vadd.f32 %v7132_v18, %v7020_v41 }
 0x172   : > { %v2815_v58 = vor.u32 %v2813_v42, %v2812_v8  ;;  %v2817_v51 = vrot.slane %v2812_v8, 4  ;;  %2167 = vst [vmem:[#allocation3 + $0x400] sm:$0xf] %v2135_v22  ;;  %v2213_v56 = vld [vmem:[#allocation2 + $0x134] sm:$0xf]  ;;  %v2549_v25 = vrot.slane %v2548_v40, 4  ;;  %v7134_v41 = vpop.f32.mrf.mxu1 }
 0x173   : > { %v7743_v55 = vld [vmem:[#allocation3 + $0x374] ss:$36 sps:$4 sm:$0xff]   ;;  %v2824_v63 = vor.u32 %v2822_v1, %v2821_v48  ;;  %2168 = vst [vmem:[#allocation3 + $0x424] sm:$0xf] %v2136_v33  ;;  %v2556_v60 = vshrl.u32 %v2213_v56, 16  ;;  %v2544_v26 = vsel %vm8127_vm5, %v2539_v19, %v2543_v6  ;;  %v2559_v42 = vshll.u32 %v2213_v56, 16 }
 0x174   : > { %v7745_v16 = vld [vmem:[#allocation3 + $0xf4] ss:$36 sps:$4 sm:$0xff]   ;;  %v2816_v61 = vsel %vm7924_vm2, %v6437_v34, %v2815_v58  ;;  %5614 = vmatprep.mubr.bf16.mxu0 %v7743_v55  ;;  %v2554_v44 = vsel %vm8127_vm5, %v2549_v25, %v2553_v0  ;;  %2661 = vst [vmem:[#allocation3 + $0x3bc] sm:$0xf] %v2544_v26  ;;  %v2214_v8 = vld [vmem:[#allocation2 + $0x138] sm:$0xf]  ;;  %v8706_v58 = vpop.f32.mrf.mxu0 }
 0x175   : > { %v7747_v57 = vld [vmem:[#allocation3 + $0x370] ss:$36 sps:$4 sm:$0xff]   ;;  %v2825_v21 = vsel %vm7924_vm2, %v2817_v51, %v2824_v63  ;;  %3108 = vst [vmem:[#allocation3 + $0x138] sm:$0xf] %v2816_v61  ;;  %5703 = vmatprep.mubr.bf16.mxu1 %v7745_v16  ;;  %2662 = vst [vmem:[#allocation3 + $0x3e0] sm:$0xf] %v2554_v44  ;;  %v7135_v51 = vadd.f32 %v7134_v41, %v7133_v27  ;;  %v7136_v63 = vpop.f32.mrf.mxu1 }
 0x176   : > { %v7748_v11 = vld [vmem:[#allocation3 + $0xf0] ss:$36 sps:$4 sm:$0xff]   ;;  %5615 = vmatmul.mubr.bf16.gmra.mxu0 %v7747_v57  ;;  %3109 = vst [vmem:[#allocation3 + $0x15c] sm:$0xf] %v2825_v21  ;;  %v2558_v6 = vrot.slane %v2556_v60, 4  ;;  %v2561_v34 = vrot.slane %v2559_v42, 5 }
 0x177   : > { %v2215_v1 = vld [vmem:[#allocation2 + $0x13c] sm:$0x1]  ;;  %v2565_v40 = vshll.u32 %v2214_v8, 16  ;;  %v2569_v48 = vshrl.u32 %v2214_v8, 16  ;;  %v2683_v22 = vld [vmem:[#allocation2 + $0x90] sm:$0x8]  ;;  %5704 = vmatmul.mubr.bf16.gmra.mxu1 %v7748_v11 }
 0x178   : > { %v2575_v52 = vshll.u32 %v2215_v1, 16  ;;  %v2684_v0 = vld [vmem:[#allocation2 + $0x94] sm:$0xf]  ;;  %v2685_v50 = vld [vmem:[#allocation2 + $0x98] sm:$0xf]  ;;  %v2827_v19 = vshrl.u32 %v2683_v22, 16  ;;  %v2562_v33 = vor.u32 %v2561_v34, %v2558_v6  ;;  %v7137_v1 = vpop.f32.mrf.mxu1  ;;  %v8711_v22 = vadd.f32 %v7135_v51, %v8582_v17 }
 0x179   : > { %v2567_v56 = vrot.slane %v2565_v40, 5  ;;  %v2571_v18 = vrot.slane %v2569_v48, 4  ;;  %v2832_v55 = vshrl.u32 %v2684_v0, 16  ;;  %v3142_v25 = vld [vmem:[#allocation2 + $0x94] sm:$0xf]  ;;  %v2835_v57 = vshll.u32 %v2684_v0, 16  ;;  %v7051_v48 = vpop.f32.mrf.mxu0 }
 0x17a   : > { %v2577_v60 = vrot.slane %v2575_v52, 5  ;;  %v6438_v16 = vrot.slane %v2827_v19, 11  ;;  %v2841_v26 = vshrl.u32 %v2685_v50, 16  ;;  %v3143_v61 = vld [vmem:[#allocation2 + $0x98] sm:$0xf]  ;;  %v2563_v42 = vrot.slane %v2562_v33, 4 }
 0x17b   : > { %3174 = vst [vmem:[#allocation3 + $0x184] sm:$0xf] %v3142_v25  ;;  %v2572_v11 = vor.u32 %v2571_v18, %v2567_v56  ;;  %v2834_v44 = vrot.slane %v2832_v55, 7  ;;  %v2844_v21 = vshll.u32 %v2685_v50, 16  ;;  %3175 = vst [vmem:[#allocation3 + $0x1a8] sm:$0xf] %v3143_v61  ;;  %v7026_v40 = vadd.f32 %v8596_v7, %v8588_v39  ;;  %v7052_v61 = vpop.f32.mrf.mxu0 }
 0x17c   : > { %v2137_v8 = vld [vmem:[#allocation2 + $0x148] sm:$0xf]  ;;  %v2843_v27 = vrot.slane %v2841_v26, 7  ;;  %v2138_v6 = vld [vmem:[#allocation2 + $0x14c] sm:$0xf]  ;;  %v7138_v41 = vadd.f32 %v7137_v1, %v7136_v63  ;;  %v2568_v52 = vsel %vm8127_vm5, %v2563_v42, %v2567_v56 }
 0x17d   : > { %2169 = vst [vmem:[#allocation3 + $0x448] sm:$0xf] %v2137_v8  ;;  %v2216_v34 = vld [vmem:[#allocation2 + $0x148] sm:$0xf]  ;;  %v2573_v0 = vrot.slane %v2572_v11, 4  ;;  %v2837_v50 = vor.u32 %v2835_v57, %v2834_v44  ;;  %v2839_v19 = vrot.slane %v2834_v44, 4  ;;  %v8721_v57 = vadd.f32 %v7052_v61, %v7051_v48  ;;  %v7054_v1 = vpop.f32.mrf.mxu0 }
 0x17e   : > { %2170 = vst [vmem:[#allocation3 + $0x46c] sm:$0xf] %v2138_v6  ;;  %v2217_v33 = vld [vmem:[#allocation2 + $0x14c] sm:$0xf]  ;;  %v7749_v18 = vld [vmem:[#allocation3 + $0x3bc] ss:$36 sps:$4 sm:$0xff]   ;;  %v2846_v55 = vor.u32 %v2844_v21, %v2843_v27  ;;  %v8715_v39 = vadd.f32 %v7138_v41, %v7026_v40 }
 0x17f   : > { %2663 = vst [vmem:[#allocation3 + $0x404] sm:$0xf] %v2568_v52  ;;  %v2580_v25 = vshrl.u32 %v2216_v34, 16  ;;  %v2583_v26 = vshll.u32 %v2216_v34, 16  ;;  %v7751_v7 = vld [vmem:[#allocation3 + $0x13c] ss:$36 sps:$4 sm:$0xff]   ;;  %v2578_v63 = vsel %vm8127_vm5, %v2573_v0, %v2577_v60  ;;  %v2838_v56 = vsel %vm7924_vm2, %v6438_v16, %v2837_v50  ;;  %5622 = vmatprep.mubr.bf16.mxu0 %v7749_v18  ;;  %v7055_v0 = vpop.f32.mrf.mxu0 }
 0x180   : > { %v7754_v17 = vld [vmem:[#allocation3 + $0x3b8] ss:$36 sps:$4 sm:$0xff]   ;;  %2664 = vst [vmem:[#allocation3 + $0x428] sm:$0xf] %v2578_v63  ;;  %v2847_v42 = vsel %vm7924_vm2, %v2839_v19, %v2846_v55  ;;  %3110 = vst [vmem:[#allocation3 + $0x180] sm:$0xf] %v2838_v56  ;;  %5711 = vmatprep.mubr.bf16.mxu1 %v7751_v7 }
 0x181   : > { %v7755_v51 = vld [vmem:[#allocation3 + $0x138] ss:$36 sps:$4 sm:$0xff]   ;;  %v2218_v11 = vld [vmem:[#allocation2 + $0x150] sm:$0x1]  ;;  %v2582_v44 = vrot.slane %v2580_v25, 4  ;;  %v2585_v21 = vrot.slane %v2583_v26, 5  ;;  %5623 = vmatmul.mubr.bf16.gmra.mxu0 %v7754_v17  ;;  %v7057_v63 = vpop.f32.mrf.mxu0 }
 0x182   : > { %v2589_v8 = vshll.u32 %v2217_v33, 16  ;;  %3111 = vst [vmem:[#allocation3 + $0x1a4] sm:$0xf] %v2847_v42  ;;  %v2593_v60 = vshrl.u32 %v2217_v33, 16  ;;  %v2599_v27 = vshll.u32 %v2218_v11, 16  ;;  %5712 = vmatmul.mubr.bf16.gmra.mxu1 %v7755_v51  ;;  %v8725_v42 = vadd.f32 %v7055_v0, %v7054_v1  ;;  %v7139_v11 = vpop.f32.mrf.mxu1 }
 0x183   : > { %v2686_v6 = vld [vmem:[#allocation2 + $0xa4] sm:$0x8]  ;;  %v2687_v16 = vld [vmem:[#allocation2 + $0xa8] sm:$0xf]  ;;  %v2586_v34 = vor.u32 %v2585_v21, %v2582_v44  ;;  %v2688_v48 = vld [vmem:[#allocation2 + $0xac] sm:$0xf] }
 0x184   : > { %v2591_v40 = vrot.slane %v2589_v8, 5  ;;  %v2849_v41 = vshrl.u32 %v2686_v6, 16  ;;  %v2854_v52 = vshrl.u32 %v2687_v16, 16  ;;  %v2595_v50 = vrot.slane %v2593_v60, 4  ;;  %v3144_v25 = vld [vmem:[#allocation2 + $0xa8] sm:$0xf]  ;;  %v7058_v6 = vpop.f32.mrf.mxu0 }
 0x185   : > { %v2601_v19 = vrot.slane %v2599_v27, 5  ;;  %v2857_v18 = vshll.u32 %v2687_v16, 16  ;;  %v2863_v55 = vshrl.u32 %v2688_v48, 16  ;;  %v2587_v26 = vrot.slane %v2586_v34, 4  ;;  %v3145_v33 = vld [vmem:[#allocation2 + $0xac] sm:$0xf] }
 0x186   : > { %v6439_v61 = vrot.slane %v2849_v41, 11  ;;  %v2856_v7 = vrot.slane %v2854_v52, 7  ;;  %v2866_v17 = vshll.u32 %v2688_v48, 16  ;;  %3176 = vst [vmem:[#allocation3 + $0x1cc] sm:$0xf] %v3144_v25  ;;  %v2596_v56 = vor.u32 %v2595_v50, %v2591_v40  ;;  %v7140_v50 = vpop.f32.mrf.mxu1 }
 0x187   : > { %v2865_v51 = vrot.slane %v2863_v55, 7  ;;  %3177 = vst [vmem:[#allocation3 + $0x1f0] sm:$0xf] %v3145_v33  ;;  %v2592_v44 = vsel %vm8127_vm5, %v2587_v26, %v2591_v40  ;;  %v2689_v60 = vld [vmem:[#allocation2 + $0xb8] sm:$0x8]  ;;  %v8729_v52 = vadd.f32 %v7058_v6, %v7057_v63  ;;  %v7141_v40 = vadd.f32 %v7140_v50, %v7139_v11 }
 0x188   : > { %v2859_v21 = vor.u32 %v2857_v18, %v2856_v7  ;;  %v2861_v8 = vrot.slane %v2856_v7, 4  ;;  %v2690_v27 = vld [vmem:[#allocation2 + $0xbc] sm:$0xf]  ;;  %v7756_v16 = vld [vmem:[#allocation3 + $0x404] ss:$36 sps:$4 sm:$0xff]   ;;  %v2597_v34 = vrot.slane %v2596_v56, 4  ;;  %v7060_v18 = vpop.f32.mrf.mxu0 }
 0x189   : > { %2665 = vst [vmem:[#allocation3 + $0x44c] sm:$0xf] %v2592_v44  ;;  %v2868_v48 = vor.u32 %v2866_v17, %v2865_v51  ;;  %v2871_v41 = vshrl.u32 %v2689_v60, 16  ;;  %v7758_v55 = vld [vmem:[#allocation3 + $0x184] ss:$36 sps:$4 sm:$0xff]   ;;  %v2876_v25 = vshrl.u32 %v2690_v27, 16  ;;  %5630 = vmatprep.mubr.bf16.mxu0 %v7756_v16  ;;  %v7142_v51 = vpop.f32.mrf.mxu1  ;;  %v8738_v60 = vadd.f32 %v7141_v40, %v8617_v45 }
 0x18a   : > { %v7760_v1 = vld [vmem:[#allocation3 + $0x400] ss:$36 sps:$4 sm:$0xff]   ;;  %v2860_v0 = vsel %vm7924_vm2, %v6439_v61, %v2859_v21  ;;  %v2602_v7 = vsel %vm8127_vm5, %v2597_v34, %v2601_v19  ;;  %v2691_v33 = vld [vmem:[#allocation2 + $0xc0] sm:$0xf]  ;;  %v2879_v56 = vshll.u32 %v2690_v27, 16  ;;  %5719 = vmatprep.mubr.bf16.mxu1 %v7758_v55  ;;  %v7061_v19 = vpop.f32.mrf.mxu0  ;;  %v7032_v34 = vadd.f32 %v8627_v4, %v8613_v62 }
 0x18b   : > { %v7761_v26 = vld [vmem:[#allocation3 + $0x180] ss:$36 sps:$4 sm:$0xff]   ;;  %v2869_v17 = vsel %vm7924_vm2, %v2861_v8, %v2868_v48  ;;  %3112 = vst [vmem:[#allocation3 + $0x1c8] sm:$0xf] %v2860_v0  ;;  %v6440_v63 = vrot.slane %v2871_v41, 11  ;;  %5631 = vmatmul.mubr.bf16.gmra.mxu0 %v7760_v1  ;;  %v2878_v61 = vrot.slane %v2876_v25, 7  ;;  %v8742_v8 = vadd.f32 %v8543_v20, %v8534_v3  ;;  %v7143_v41 = vpop.f32.mrf.mxu1 }
 0x18c   : > { %2666 = vst [vmem:[#allocation3 + $0x470] sm:$0xf] %v2602_v7  ;;  %3113 = vst [vmem:[#allocation3 + $0x1ec] sm:$0xf] %v2869_v17  ;;  %v2885_v11 = vshrl.u32 %v2691_v33, 16  ;;  %v2888_v44 = vshll.u32 %v2691_v33, 16  ;;  %5720 = vmatmul.mubr.bf16.gmra.mxu1 %v7761_v26  ;;  %v8746_v48 = vadd.f32 %v7061_v19, %v7060_v18  ;;  %v7144_v18 = vadd.f32 %v7143_v41, %v7142_v51 }
 0x18d   : > { %v3146_v21 = vld [vmem:[#allocation2 + $0xbc] sm:$0xf]  ;;  %v3147_v6 = vld [vmem:[#allocation2 + $0xc0] sm:$0xf]  ;;  %v3196_v27 = vld [vmem:[#allocation2 + $0x30] sm:$0xf]  ;;  %v2881_v50 = vor.u32 %v2879_v56, %v2878_v61 }
 0x18e   : > { %3178 = vst [vmem:[#allocation3 + $0x214] sm:$0xf] %v3146_v21  ;;  %v3197_v16 = vld [vmem:[#allocation2 + $0x34] sm:$0xf]  ;;  %v2883_v55 = vrot.slane %v2878_v61, 4  ;;  %v2887_v45 = vrot.slane %v2885_v11, 7  ;;  %v7145_v21 = vpop.f32.mrf.mxu1 }
 0x18f   : > { %3179 = vst [vmem:[#allocation3 + $0x238] sm:$0xf] %v3147_v6  ;;  %v3198_v1 = vld [vmem:[#allocation2 + $0x38] sm:$0x1]  ;;  %v3245_v0 = vshrl.u32 %v3196_v27, 16  ;;  %v3248_v25 = vshll.u32 %v3196_v27, 16  ;;  %v2882_v7 = vsel %vm7924_vm2, %v6440_v63, %v2881_v50 }
 0x190   : > { %v3254_v3 = vshll.u32 %v3197_v16, 16  ;;  %v3258_v20 = vshrl.u32 %v3197_v16, 16  ;;  %v3264_v40 = vshll.u32 %v3198_v1, 16  ;;  %v3199_v26 = vld [vmem:[#allocation2 + $0x44] sm:$0xf]  ;;  %v2890_v17 = vor.u32 %v2888_v44, %v2887_v45  ;;  %v7146_v63 = vpop.f32.mrf.mxu1 }
 0x191   : > { %v3247_v33 = vrot.slane %v3245_v0, 4  ;;  %v3200_v62 = vld [vmem:[#allocation2 + $0x48] sm:$0xf]  ;;  %v3201_v4 = vld [vmem:[#allocation2 + $0x4c] sm:$0x1]  ;;  %v3250_v56 = vrot.slane %v3248_v25, 5 }
 0x192   : > { %3114 = vst [vmem:[#allocation3 + $0x210] sm:$0xf] %v2882_v7  ;;  %v3256_v61 = vrot.slane %v3254_v3, 5  ;;  %v3260_v11 = vrot.slane %v3258_v20, 4  ;;  %v3266_v19 = vrot.slane %v3264_v40, 5  ;;  %v2891_v27 = vsel %vm7924_vm2, %v2883_v55, %v2890_v17  ;;  %v7148_v7 = vpop.f32.mrf.mxu1 }
 0x193   : > { %v2692_v6 = vld [vmem:[#allocation2 + $0xcc] sm:$0x8]  ;;  %v3269_v16 = vshrl.u32 %v3199_v26, 16  ;;  %v3272_v1 = vshll.u32 %v3199_v26, 16  ;;  %v3278_v43 = vshll.u32 %v3200_v62, 16  ;;  %v3251_v50 = vor.u32 %v3250_v56, %v3247_v33 }
 0x194   : > { %v2693_v28 = vld [vmem:[#allocation2 + $0xd0] sm:$0xf]  ;;  %v7762_v44 = vld [vmem:[#allocation3 + $0x44c] ss:$36 sps:$4 sm:$0xff]   ;;  %3115 = vst [vmem:[#allocation3 + $0x234] sm:$0xf] %v2891_v27  ;;  %v3261_v45 = vor.u32 %v3260_v11, %v3256_v61  ;;  %v8754_v20 = vadd.f32 %v8658_v35, %v8652_v9  ;;  %v8758_v55 = vadd.f32 %v8677_v15, %v8673_v46  ;;  %v8760_v40 = vadd.f32 %v7144_v18, %v7032_v34 }
 0x195   : > { %v3282_v51 = vshrl.u32 %v3200_v62, 16  ;;  %v3288_v41 = vshll.u32 %v3201_v4, 16  ;;  %v7764_v0 = vld [vmem:[#allocation3 + $0x1cc] ss:$36 sps:$4 sm:$0xff]   ;;  %v7147_v26 = vadd.f32 %v7146_v63, %v7145_v21  ;;  %5638 = vmatprep.mubr.bf16.mxu0 %v7762_v44  ;;  %v3252_v17 = vrot.slane %v3251_v50, 4  ;;  %v7063_v50 = vpop.f32.mrf.mxu0 }
 0x196   : > { %v7767_v25 = vld [vmem:[#allocation3 + $0x448] ss:$36 sps:$4 sm:$0xff]   ;;  %v3262_v33 = vrot.slane %v3261_v45, 4  ;;  %v3271_v62 = vrot.slane %v3269_v16, 4  ;;  %v3274_v4 = vrot.slane %v3272_v1, 5  ;;  %5727 = vmatprep.mubr.bf16.mxu1 %v7764_v0  ;;  %v3280_v11 = vrot.slane %v3278_v43, 5  ;;  %v7149_v1 = vpop.f32.mrf.mxu1 }
 0x197   : > { %v7768_v3 = vld [vmem:[#allocation3 + $0x1c8] ss:$36 sps:$4 sm:$0xff]   ;;  %5639 = vmatmul.mubr.bf16.gmra.mxu0 %v7767_v25  ;;  %v3284_v27 = vrot.slane %v3282_v51, 4  ;;  %v3290_v9 = vrot.slane %v3288_v41, 5  ;;  %v2893_v35 = vshrl.u32 %v2692_v6, 16  ;;  %v3257_v46 = vsel %vm8127_vm5, %v3252_v17, %v3256_v61  ;;  %v7064_v17 = vpop.f32.mrf.mxu0 }
 0x198   : > { %v2694_v56 = vld [vmem:[#allocation2 + $0xd4] sm:$0xf]  ;;  %v3148_v59 = vld [vmem:[#allocation2 + $0xd0] sm:$0xf]  ;;  %5728 = vmatmul.mubr.bf16.gmra.mxu1 %v7768_v3  ;;  %v3267_v15 = vsel %vm8127_vm5, %v3262_v33, %v3266_v19  ;;  %v3275_v34 = vor.u32 %v3274_v4, %v3271_v62  ;;  %v2898_v18 = vshrl.u32 %v2693_v28, 16  ;;  %v2901_v44 = vshll.u32 %v2693_v28, 16 }
 0x199   : > { %v3149_v21 = vld [vmem:[#allocation2 + $0xd4] sm:$0xf]  ;;  %3180 = vst [vmem:[#allocation3 + $0x25c] sm:$0xf] %v3148_v59  ;;  %v3202_v16 = vld [vmem:[#allocation2 + $0x58] sm:$0xf]  ;;  %v3285_v43 = vor.u32 %v3284_v27, %v3280_v11  ;;  %v8768_v59 = vadd.f32 %v8706_v58, %v8694_v10  ;;  %v8771_v33 = vadd.f32 %v7147_v26, %v8640_v13  ;;  %v7150_v28 = vadd.f32 %v7149_v1, %v7148_v7  ;;  %v7066_v13 = vpop.f32.mrf.mxu0 }
 0x19a   : > { %3660 = vst [vmem:[#allocation3 + $0x20] sm:$0xf] %v3257_v46  ;;  %3661 = vst [vmem:[#allocation3 + $0x44] sm:$0xf] %v3267_v15  ;;  %v6441_v63 = vrot.slane %v2893_v35, 11  ;;  %v2907_v6 = vshrl.u32 %v2694_v56, 16 }
 0x19b   : > { %3181 = vst [vmem:[#allocation3 + $0x280] sm:$0xf] %v3149_v21  ;;  %v3276_v45 = vrot.slane %v3275_v34, 4  ;;  %v2900_v51 = vrot.slane %v2898_v18, 7  ;;  %v2910_v61 = vshll.u32 %v2694_v56, 16  ;;  %v3293_v0 = vshrl.u32 %v3202_v16, 16 }
 0x19c   : > { %v3203_v41 = vld [vmem:[#allocation2 + $0x5c] sm:$0xf]  ;;  %v3286_v25 = vrot.slane %v3285_v43, 4  ;;  %v3204_v3 = vld [vmem:[#allocation2 + $0x60] sm:$0x1]  ;;  %v2909_v35 = vrot.slane %v2907_v6, 7 }
 0x19d   : > { %v7769_v19 = vld [vmem:[#allocation3 + $0x214] ss:$36 sps:$4 sm:$0xff]   ;;  %v3281_v4 = vsel %vm8127_vm5, %v3276_v45, %v3280_v11  ;;  %v2903_v27 = vor.u32 %v2901_v44, %v2900_v51  ;;  %v2905_v56 = vrot.slane %v2900_v51, 4  ;;  %v3205_v46 = vld [vmem:[#allocation2 + $0x6c] sm:$0xf]  ;;  %v3295_v10 = vrot.slane %v3293_v0, 4  ;;  %v7067_v0 = vpop.f32.mrf.mxu0 }
 0x19e   : > { %v7772_v62 = vld [vmem:[#allocation3 + $0x210] ss:$36 sps:$4 sm:$0xff]   ;;  %5735 = vmatprep.mubr.bf16.mxu1 %v7769_v19  ;;  %v3291_v15 = vsel %vm8127_vm5, %v3286_v25, %v3290_v9  ;;  %3662 = vst [vmem:[#allocation3 + $0x68] sm:$0xf] %v3281_v4  ;;  %v3296_v58 = vshll.u32 %v3202_v16, 16  ;;  %v3302_v34 = vshll.u32 %v3203_v41, 16  ;;  %v2912_v7 = vor.u32 %v2910_v61, %v2909_v35 }
 0x19f   : > { %v3206_v18 = vld [vmem:[#allocation2 + $0x70] sm:$0xf]  ;;  %3663 = vst [vmem:[#allocation3 + $0x8c] sm:$0xf] %v3291_v15  ;;  %v2904_v26 = vsel %vm7924_vm2, %v6441_v63, %v2903_v27  ;;  %v3306_v11 = vshrl.u32 %v3203_v41, 16  ;;  %v3312_v21 = vshll.u32 %v3204_v3, 16  ;;  %v8781_v25 = vadd.f32 %v7064_v17, %v7063_v50  ;;  %v7151_v17 = vpop.f32.mrf.mxu1 }
 0x1a0   : > { %v3207_v1 = vld [vmem:[#allocation2 + $0x74] sm:$0x1]  ;;  %v2695_v43 = vld [vmem:[#allocation2 + $0xe0] sm:$0x8]  ;;  %3116 = vst [vmem:[#allocation3 + $0x258] sm:$0xf] %v2904_v26  ;;  %5736 = vmatmul.mubr.bf16.gmra.mxu1 %v7772_v62  ;;  %v2913_v19 = vsel %vm7924_vm2, %v2905_v56, %v2912_v7  ;;  %v8783_v63 = vadd.f32 %v7067_v0, %v7066_v13  ;;  %v8786_v61 = vadd.f32 %v7150_v28, %v8754_v20 }
 0x1a1   : > { %v3298_v44 = vrot.slane %v3296_v58, 5  ;;  %v3304_v6 = vrot.slane %v3302_v34, 5  ;;  %v3317_v45 = vshrl.u32 %v3205_v46, 16  ;;  %v3320_v9 = vshll.u32 %v3205_v46, 16  ;;  %v2696_v51 = vld [vmem:[#allocation2 + $0xe4] sm:$0xf]  ;;  %v7069_v46 = vpop.f32.mrf.mxu0  ;;  %v7152_v0 = vpop.f32.mrf.mxu1 }
 0x1a2   : > { %v7771_v16 = vld [vmem:[#allocation3 + $0x20] ss:$36 sps:$4 sm:$0xff]   ;;  %3117 = vst [vmem:[#allocation3 + $0x27c] sm:$0xf] %v2913_v19  ;;  %v3308_v3 = vrot.slane %v3306_v11, 4  ;;  %v3314_v4 = vrot.slane %v3312_v21, 5 }
 0x1a3   : > { %v3299_v41 = vor.u32 %v3298_v44, %v3295_v10  ;;  %v3319_v27 = vrot.slane %v3317_v45, 4  ;;  %v3150_v35 = vld [vmem:[#allocation2 + $0xe4] sm:$0xf]  ;;  %7475 = vmatprep.mubr.bf16.mxu0 %v7771_v16  ;;  %v3322_v15 = vrot.slane %v3320_v9, 5  ;;  %v3326_v62 = vshll.u32 %v3206_v18, 16  ;;  %v7070_v45 = vpop.f32.mrf.mxu0 }
 0x1a4   : > { %v3330_v58 = vshrl.u32 %v3206_v18, 16  ;;  %v3336_v34 = vshll.u32 %v3207_v1, 16  ;;  %v2697_v56 = vld [vmem:[#allocation2 + $0xe8] sm:$0xf]  ;;  %3182 = vst [vmem:[#allocation3 + $0x2a4] sm:$0xf] %v3150_v35  ;;  %v3309_v26 = vor.u32 %v3308_v3, %v3304_v6  ;;  %v8790_v19 = vadd.f32 %v7070_v45, %v7069_v46 }
 0x1a5   : > { %v3151_v50 = vld [vmem:[#allocation2 + $0xe8] sm:$0xf]  ;;  %v3300_v13 = vrot.slane %v3299_v41, 4  ;;  %v2915_v20 = vshrl.u32 %v2695_v43, 16  ;;  %v2920_v28 = vshrl.u32 %v2696_v51, 16  ;;  %v3323_v7 = vor.u32 %v3322_v15, %v3319_v27  ;;  %v8792_v27 = vpop.f32.mrf.mxu1 }
 0x1a6   : > { %3183 = vst [vmem:[#allocation3 + $0x2c8] sm:$0xf] %v3151_v50  ;;  %v3208_v10 = vld [vmem:[#allocation2 + $0x80] sm:$0xf]  ;;  %v3328_v11 = vrot.slane %v3326_v62, 5  ;;  %v3332_v21 = vrot.slane %v3330_v58, 4 }
 0x1a7   : > { %v3338_v44 = vrot.slane %v3336_v34, 5  ;;  %v7773_v9 = vld [vmem:[#allocation3 + $0x68] ss:$36 sps:$4 sm:$0xff]   ;;  %v3305_v18 = vsel %vm8127_vm5, %v3300_v13, %v3304_v6  ;;  %v3310_v1 = vrot.slane %v3309_v26, 4  ;;  %v6442_v16 = vrot.slane %v2915_v20, 11 }
 0x1a8   : > { %3664 = vst [vmem:[#allocation3 + $0xb0] sm:$0xf] %v3305_v18  ;;  %v3324_v41 = vrot.slane %v3323_v7, 4  ;;  %v3333_v43 = vor.u32 %v3332_v21, %v3328_v11  ;;  %v2922_v3 = vrot.slane %v2920_v28, 7  ;;  %v2923_v35 = vshll.u32 %v2696_v51, 16  ;;  %7476 = vmatmul.mubr.bf16.vlgmr.msra.gmra.mxu0 %v7773_v9  ;;  %v8798_v7 = vpop.f32.mrf.mxu1 }
 0x1a9   : > { %v3209_v50 = vld [vmem:[#allocation2 + $0x84] sm:$0xf]  ;;  %v3315_v15 = vsel %vm8127_vm5, %v3310_v1, %v3314_v4  ;;  %v2929_v62 = vshrl.u32 %v2697_v56, 16  ;;  %v2932_v58 = vshll.u32 %v2697_v56, 16  ;;  %v3210_v34 = vld [vmem:[#allocation2 + $0x88] sm:$0x1]  ;;  %v7153_v51 = vadd.f32 %v7152_v0, %v7151_v17  ;;  %v7072_v56 = vpop.f32.mrf.mxu0 }
 0x1aa   : > { %v3341_v6 = vshrl.u32 %v3208_v10, 16  ;;  %v7774_v13 = vld [vmem:[#allocation3 + $0x258] ss:$36 sps:$4 sm:$0xff]   ;;  %3665 = vst [vmem:[#allocation3 + $0xd4] sm:$0xf] %v3315_v15  ;;  %v3329_v46 = vsel %vm8127_vm5, %v3324_v41, %v3328_v11  ;;  %v3334_v20 = vrot.slane %v3333_v43, 4  ;;  %v2925_v28 = vor.u32 %v2923_v35, %v2922_v3  ;;  %v8804_v17 = vpop.f32.mrf.mxu1 }
 0x1ab   : > { %v7776_v26 = vld [vmem:[#allocation3 + $0x25c] ss:$36 sps:$4 sm:$0xff]   ;;  %3666 = vst [vmem:[#allocation3 + $0xf8] sm:$0xf] %v3329_v46  ;;  %v2927_v21 = vrot.slane %v2922_v3, 4  ;;  %v2931_v45 = vrot.slane %v2929_v62, 7  ;;  %v8811_v53 = vadd.f32 %v7153_v51, %v8675_v31 }
 0x1ac   : > { %v3343_v9 = vrot.slane %v3341_v6, 4  ;;  %v3344_v4 = vshll.u32 %v3208_v10, 16  ;;  %v3211_v18 = vld [vmem:[#allocation2 + $0x94] sm:$0xf]  ;;  %5743 = vmatprep.mubr.bf16.mxu1 %v7776_v26  ;;  %v3339_v1 = vsel %vm8127_vm5, %v3334_v20, %v3338_v44  ;;  %v2926_v15 = vsel %vm7924_vm2, %v6442_v16, %v2925_v28  ;;  %v3212_v43 = vld [vmem:[#allocation2 + $0x98] sm:$0xf]  ;;  %v7158_v29 = vpop.f32.mrf.mxu1 }
 0x1ad   : > { %v3350_v11 = vshll.u32 %v3209_v50, 16  ;;  %v3354_v41 = vshrl.u32 %v3209_v50, 16  ;;  %5744 = vmatmul.mubr.bf16.gmra.mxu1 %v7774_v13  ;;  %3667 = vst [vmem:[#allocation3 + $0x11c] sm:$0xf] %v3339_v1  ;;  %v2934_v0 = vor.u32 %v2932_v58, %v2931_v45  ;;  %3118 = vst [vmem:[#allocation3 + $0x2a0] sm:$0xf] %v2926_v15  ;;  %v7073_v1 = vpop.f32.mrf.mxu0 }
 0x1ae   : > { %v3346_v3 = vrot.slane %v3344_v4, 5  ;;  %v3360_v10 = vshll.u32 %v3210_v34, 16  ;;  %v3213_v35 = vld [vmem:[#allocation2 + $0x9c] sm:$0x1]  ;;  %v3365_v62 = vshrl.u32 %v3211_v18, 16  ;;  %v3368_v46 = vshll.u32 %v3211_v18, 16 }
 0x1af   : > { %v3352_v6 = vrot.slane %v3350_v11, 5  ;;  %v3356_v26 = vrot.slane %v3354_v41, 4  ;;  %v3374_v44 = vshll.u32 %v3212_v43, 16  ;;  %v2698_v20 = vld [vmem:[#allocation2 + $0xf4] sm:$0x8]  ;;  %v2935_v16 = vsel %vm7924_vm2, %v2927_v21, %v2934_v0  ;;  %9552 = vst [vmem:[#allocation11_spill] sm:$0xff] %v8811_v53 }
 0x1b0   : > { %v3347_v50 = vor.u32 %v3346_v3, %v3343_v9  ;;  %v3362_v28 = vrot.slane %v3360_v10, 5  ;;  %v3367_v54 = vrot.slane %v3365_v62, 4  ;;  %v2699_v13 = vld [vmem:[#allocation2 + $0xf8] sm:$0xf]  ;;  %3119 = vst [vmem:[#allocation3 + $0x2c4] sm:$0xf] %v2935_v16  ;;  %v8813_v21 = vadd.f32 %v7073_v1, %v7072_v56  ;;  %v8815_v9 = vpop.f32.mrf.mxu1  ;;  %v7227_v16 = vpop.f32.mrf.mxu0 }
 0x1b1   : > { %v3357_v58 = vor.u32 %v3356_v26, %v3352_v6  ;;  %v3370_v45 = vrot.slane %v3368_v46, 5  ;;  %v3376_v34 = vrot.slane %v3374_v44, 5  ;;  %v3378_v4 = vshrl.u32 %v3212_v43, 16  ;;  %v8808_v15 = vld [vmem:[#allocation2 + $0xfc] sm:$0xf] }
 0x1b2   : > { %v3152_v11 = vld [vmem:[#allocation2 + $0xf8] sm:$0xf]  ;;  %v3348_v41 = vrot.slane %v3347_v50, 4  ;;  %v3384_v32 = vshll.u32 %v3213_v35, 16  ;;  %v2937_v62 = vshrl.u32 %v2698_v20, 16  ;;  %v2942_v46 = vshrl.u32 %v2699_v13, 16 }
 0x1b3   : > { %v7777_v18 = vld [vmem:[#allocation3 + $0xb0] ss:$36 sps:$4 sm:$0xff]   ;;  %3184 = vst [vmem:[#allocation3 + $0x2ec] sm:$0xf] %v3152_v11  ;;  %v3358_v0 = vrot.slane %v3357_v58, 4  ;;  %v3371_v3 = vor.u32 %v3370_v45, %v3367_v54  ;;  %v3380_v10 = vrot.slane %v3378_v4, 4  ;;  %v7156_v54 = vadd.f32 %v8798_v7, %v8792_v27  ;;  %v7228_v58 = vpop.f32.mrf.mxu0  ;;  %v8825_v45 = vpop.f32.mrf.mxu1 }
 0x1b4   : > { %7479 = vmatprep.mubr.bf16.mxu0 %v7777_v18  ;;  %v3353_v43 = vsel %vm8127_vm5, %v3348_v41, %v3352_v6  ;;  %v3386_v26 = vrot.slane %v3384_v32, 5  ;;  %v2945_v44 = vshll.u32 %v2699_v13, 16  ;;  %v3153_v35 = vld [vmem:[#allocation2 + $0xfc] sm:$0xf]  ;;  %v7778_v50 = vld [vmem:[#allocation3 + $0xf8] ss:$36 sps:$4 sm:$0xff]  }
 0x1b5   : > { %v3363_v31 = vsel %vm8127_vm5, %v3358_v0, %v3362_v28  ;;  %3668 = vst [vmem:[#allocation3 + $0x140] sm:$0xf] %v3353_v43  ;;  %v3372_v51 = vrot.slane %v3371_v3, 4  ;;  %v3381_v56 = vor.u32 %v3380_v10, %v3376_v34  ;;  %3185 = vst [vmem:[#allocation3 + $0x310] sm:$0xf] %v3153_v35  ;;  %v6443_v20 = vrot.slane %v2937_v62, 11  ;;  %7480 = vmatmul.mubr.bf16.gmra.mxu0 %v7778_v50  ;;  %v8833_v43 = vpop.f32.mrf.mxu0 }
 0x1b6   : > { %3669 = vst [vmem:[#allocation3 + $0x164] sm:$0xf] %v3363_v31  ;;  %v2944_v1 = vrot.slane %v2942_v46, 7  ;;  %v2951_v32 = vshrl.u32 %v8808_v15, 16  ;;  %v2954_v6 = vshll.u32 %v8808_v15, 16  ;;  %v8830_v27 = vadd.f32 %v7156_v54, %v8758_v55 }
 0x1b7   : > { %v3214_v13 = vld [vmem:[#allocation2 + $0xa8] sm:$0xf]  ;;  %v3377_v28 = vsel %vm8127_vm5, %v3372_v51, %v3376_v34  ;;  %v3382_v4 = vrot.slane %v3381_v56, 4  ;;  %v3215_v11 = vld [vmem:[#allocation2 + $0xac] sm:$0xf]  ;;  %v7159_v10 = vadd.f32 %v7158_v29, %v8804_v17  ;;  %v7229_v62 = vadd.f32 %v7228_v58, %v7227_v16  ;;  %v8839_v29 = vpop.f32.mrf.mxu1 }
 0x1b8   : > { %v3216_v18 = vld [vmem:[#allocation2 + $0xb0] sm:$0x1]  ;;  %v3389_v41 = vshrl.u32 %v3214_v13, 16  ;;  %9553 = vst [vmem:[#allocation12_spill] sm:$0xff] %v8830_v27  ;;  %v7779_v7 = vld [vmem:[#allocation3 + $0x2a0] ss:$36 sps:$4 sm:$0xff]   ;;  %v2947_v3 = vor.u32 %v2945_v44, %v2944_v1 }
 0x1b9   : > { %v7781_v0 = vld [vmem:[#allocation3 + $0x2a4] ss:$36 sps:$4 sm:$0xff]   ;;  %3670 = vst [vmem:[#allocation3 + $0x188] sm:$0xf] %v3377_v28  ;;  %v2949_v15 = vrot.slane %v2944_v1, 4  ;;  %v3387_v34 = vsel %vm8127_vm5, %v3382_v4, %v3386_v26  ;;  %v2953_v46 = vrot.slane %v2951_v32, 7  ;;  %v8844_v27 = vadd.f32 %v7159_v10, %v8687_v47 }
 0x1ba   : > { %v3391_v35 = vrot.slane %v3389_v41, 4  ;;  %v3392_v50 = vshll.u32 %v3214_v13, 16  ;;  %v3217_v31 = vld [vmem:[#allocation2 + $0xbc] sm:$0xf]  ;;  %5751 = vmatprep.mubr.bf16.mxu1 %v7781_v0  ;;  %3671 = vst [vmem:[#allocation3 + $0x1ac] sm:$0xf] %v3387_v34  ;;  %v2948_v55 = vsel %vm7924_vm2, %v6443_v20, %v2947_v3  ;;  %v7231_v41 = vpop.f32.mrf.mxu0  ;;  %v7164_v0 = vpop.f32.mrf.mxu1 }
 0x1bb   : > { %v3398_v51 = vshll.u32 %v3215_v11, 16  ;;  %v3402_v44 = vshrl.u32 %v3215_v11, 16  ;;  %v3408_v56 = vshll.u32 %v3216_v18, 16  ;;  %v3218_v54 = vld [vmem:[#allocation2 + $0xc0] sm:$0xf]  ;;  %5752 = vmatmul.mubr.bf16.gmra.mxu1 %v7779_v7  ;;  %v2956_v17 = vor.u32 %v2954_v6, %v2953_v46 }
 0x1bc   : > { %3120 = vst [vmem:[#allocation3 + $0x2e8] sm:$0xf] %v2948_v55  ;;  %v3394_v16 = vrot.slane %v3392_v50, 5  ;;  %v3219_v26 = vld [vmem:[#allocation2 + $0xc4] sm:$0x1]  ;;  %v3413_v1 = vshrl.u32 %v3217_v31, 16  ;;  %v8846_v53 = vpop.f32.mrf.mxu1 }
 0x1bd   : > { %v3416_v32 = vshll.u32 %v3217_v31, 16  ;;  %v3400_v13 = vrot.slane %v3398_v51, 5  ;;  %v3404_v58 = vrot.slane %v3402_v44, 4  ;;  %v3410_v28 = vrot.slane %v3408_v56, 5  ;;  %v7782_v20 = vld [vmem:[#allocation3 + $0x140] ss:$36 sps:$4 sm:$0xff]  }
 0x1be   : > { %v3422_v4 = vshll.u32 %v3218_v54, 16  ;;  %v2957_v11 = vsel %vm7924_vm2, %v2949_v15, %v2956_v17  ;;  %v3395_v18 = vor.u32 %v3394_v16, %v3391_v35  ;;  %v3415_v3 = vrot.slane %v3413_v1, 4  ;;  %v2701_v55 = vld [vmem:[#allocation2 + $0x108] sm:$0x8]  ;;  %7483 = vmatprep.mubr.bf16.mxu0 %v7782_v20  ;;  %v2702_v44 = vld [vmem:[#allocation2 + $0x10c] sm:$0xf] }
 0x1bf   : > { %v3418_v34 = vrot.slane %v3416_v32, 5  ;;  %3121 = vst [vmem:[#allocation3 + $0x30c] sm:$0xf] %v2957_v11  ;;  %v3405_v6 = vor.u32 %v3404_v58, %v3400_v13  ;;  %v3426_v46 = vshrl.u32 %v3218_v54, 16  ;;  %v3432_v50 = vshll.u32 %v3219_v26, 16  ;;  %v7233_v32 = vpop.f32.mrf.mxu0 }
 0x1c0   : > { %v3424_v7 = vrot.slane %v3422_v4, 5  ;;  %v3396_v31 = vrot.slane %v3395_v18, 4  ;;  %v2959_v56 = vshrl.u32 %v2701_v55, 16  ;;  %v2703_v16 = vld [vmem:[#allocation2 + $0x110] sm:$0xf]  ;;  %v2964_v1 = vshrl.u32 %v2702_v44, 16 }
 0x1c1   : > { %v3419_v51 = vor.u32 %v3418_v34, %v3415_v3  ;;  %v3406_v15 = vrot.slane %v3405_v6, 4  ;;  %v3428_v35 = vrot.slane %v3426_v46, 4  ;;  %v3434_v17 = vrot.slane %v3432_v50, 5  ;;  %v7783_v58 = vld [vmem:[#allocation3 + $0x188] ss:$36 sps:$4 sm:$0xff]   ;;  %v7234_v34 = vpop.f32.mrf.mxu0 }
 0x1c2   : > { %v3401_v54 = vsel %vm8127_vm5, %v3396_v31, %v3400_v13  ;;  %v6444_v4 = vrot.slane %v2959_v56, 11  ;;  %v8851_v20 = vadd.f32 %v7229_v62, %v8638_v24  ;;  %v2966_v11 = vrot.slane %v2964_v1, 7  ;;  %v3154_v3 = vld [vmem:[#allocation2 + $0x10c] sm:$0xf]  ;;  %7484 = vmatmul.mubr.bf16.gmra.mxu0 %v7783_v58  ;;  %v3155_v50 = vld [vmem:[#allocation2 + $0x110] sm:$0xf] }
 0x1c3   : > { %v3420_v26 = vrot.slane %v3419_v51, 4  ;;  %v3411_v47 = vsel %vm8127_vm5, %v3406_v15, %v3410_v28  ;;  %3672 = vst [vmem:[#allocation3 + $0x1d0] sm:$0xf] %v3401_v54  ;;  %v3429_v10 = vor.u32 %v3428_v35, %v3424_v7  ;;  %v2967_v18 = vshll.u32 %v2702_v44, 16  ;;  %3186 = vst [vmem:[#allocation3 + $0x334] sm:$0xf] %v3154_v3  ;;  %v8859_v28 = vpop.f32.mrf.mxu1 }
 0x1c4   : > { %9554 = vst [vmem:[#allocation13_spill] sm:$0xff] %v8851_v20  ;;  %3673 = vst [vmem:[#allocation3 + $0x1f4] sm:$0xf] %v3411_v47  ;;  %v2973_v13 = vshrl.u32 %v2703_v16, 16  ;;  %v2976_v46 = vshll.u32 %v2703_v16, 16  ;;  %v7162_v62 = vadd.f32 %v8825_v45, %v8815_v9  ;;  %v2971_v51 = vrot.slane %v2966_v11, 4  ;;  %v8866_v45 = vpop.f32.mrf.mxu0 }
 0x1c5   : > { %v3425_v6 = vsel %vm8127_vm5, %v3420_v26, %v3424_v7  ;;  %v3220_v24 = vld [vmem:[#allocation2 + $0xd0] sm:$0xf]  ;;  %v3430_v55 = vrot.slane %v3429_v10, 4  ;;  %v2969_v31 = vor.u32 %v2967_v18, %v2966_v11  ;;  %3187 = vst [vmem:[#allocation3 + $0x358] sm:$0xf] %v3155_v50  ;;  %v7232_v15 = vadd.f32 %v7231_v41, %v8833_v43 }
 0x1c6   : > { %3674 = vst [vmem:[#allocation3 + $0x218] sm:$0xf] %v3425_v6  ;;  %v3221_v44 = vld [vmem:[#allocation2 + $0xd4] sm:$0xf]  ;;  %v3222_v56 = vld [vmem:[#allocation2 + $0xd8] sm:$0x1]  ;;  %v8863_v1 = vadd.f32 %v7162_v62, %v8768_v59  ;;  %v7165_v58 = vadd.f32 %v7164_v0, %v8839_v29  ;;  %v7235_v9 = vadd.f32 %v7234_v34, %v7233_v32  ;;  %v8872_v32 = vpop.f32.mrf.mxu1 }
 0x1c7   : > { %v7784_v7 = vld [vmem:[#allocation3 + $0x2e8] ss:$36 sps:$4 sm:$0xff]   ;;  %v2975_v16 = vrot.slane %v2973_v13, 7  ;;  %v3435_v54 = vsel %vm8127_vm5, %v3430_v55, %v3434_v17  ;;  %v2970_v26 = vsel %vm7924_vm2, %v6444_v4, %v2969_v31  ;;  %v3437_v47 = vshrl.u32 %v3220_v24, 16  ;;  %v3223_v43 = vld [vmem:[#allocation2 + $0xe4] sm:$0xf] }
 0x1c8   : > { %v7786_v35 = vld [vmem:[#allocation3 + $0x2ec] ss:$36 sps:$4 sm:$0xff]   ;;  %v3440_v10 = vshll.u32 %v3220_v24, 16  ;;  %v3224_v41 = vld [vmem:[#allocation2 + $0xe8] sm:$0xf]  ;;  %v3446_v59 = vshll.u32 %v3221_v44, 16  ;;  %v7170_v55 = vpop.f32.mrf.mxu1 }
 0x1c9   : > { %5759 = vmatprep.mubr.bf16.mxu1 %v7786_v35  ;;  %3675 = vst [vmem:[#allocation3 + $0x23c] sm:$0xf] %v3435_v54  ;;  %v2978_v11 = vor.u32 %v2976_v46, %v2975_v16  ;;  %3122 = vst [vmem:[#allocation3 + $0x330] sm:$0xf] %v2970_v26  ;;  %v3450_v18 = vshrl.u32 %v3221_v44, 16  ;;  %v3456_v29 = vshll.u32 %v3222_v56, 16  ;;  %v7237_v46 = vpop.f32.mrf.mxu0 }
 0x1ca   : > { %v3225_v0 = vld [vmem:[#allocation2 + $0xec] sm:$0x1]  ;;  %5760 = vmatmul.mubr.bf16.gmra.mxu1 %v7784_v7  ;;  %v3439_v3 = vrot.slane %v3437_v47, 4  ;;  %v3442_v17 = vrot.slane %v3440_v10, 5  ;;  %v3461_v34 = vshrl.u32 %v3223_v43, 16  ;;  %v3464_v6 = vshll.u32 %v3223_v43, 16 }
 0x1cb   : > { %v2704_v4 = vld [vmem:[#allocation2 + $0x11c] sm:$0x8]  ;;  %v2979_v13 = vsel %vm7924_vm2, %v2971_v51, %v2978_v11  ;;  %v3448_v50 = vrot.slane %v3446_v59, 5  ;;  %v3452_v24 = vrot.slane %v3450_v18, 4  ;;  %v3458_v62 = vrot.slane %v3456_v29, 5  ;;  %v8882_v29 = vpop.f32.mrf.mxu1 }
 0x1cc   : > { %v7787_v31 = vld [vmem:[#allocation3 + $0x1d0] ss:$36 sps:$4 sm:$0xff]   ;;  %3123 = vst [vmem:[#allocation3 + $0x354] sm:$0xf] %v2979_v13  ;;  %v3443_v44 = vor.u32 %v3442_v17, %v3439_v3  ;;  %v3463_v56 = vrot.slane %v3461_v34, 4  ;;  %v3466_v35 = vrot.slane %v3464_v6, 5  ;;  %v8877_v7 = vadd.f32 %v7232_v15, %v8654_v49  ;;  %v8884_v6 = vpop.f32.mrf.mxu0 }
 0x1cd   : > { %v3453_v16 = vor.u32 %v3452_v24, %v3448_v50  ;;  %v3470_v54 = vshll.u32 %v3224_v41, 16  ;;  %v3474_v26 = vshrl.u32 %v3224_v41, 16  ;;  %v3480_v47 = vshll.u32 %v3225_v0, 16  ;;  %7487 = vmatprep.mubr.bf16.mxu0 %v7787_v31  ;;  %v2705_v43 = vld [vmem:[#allocation2 + $0x120] sm:$0xf] }
 0x1ce   : > { %9555 = vst [vmem:[#allocation14_spill] sm:$0xff] %v8877_v7  ;;  %v3444_v10 = vrot.slane %v3443_v44, 4  ;;  %v3467_v51 = vor.u32 %v3466_v35, %v3463_v56  ;;  %v2706_v11 = vld [vmem:[#allocation2 + $0x124] sm:$0xf]  ;;  %v2981_v59 = vshrl.u32 %v2704_v4, 16  ;;  %v8880_v18 = vadd.f32 %v7165_v58, %v8721_v57 }
 0x1cf   : > { %v3454_v3 = vrot.slane %v3453_v16, 4  ;;  %v3472_v17 = vrot.slane %v3470_v54, 5  ;;  %v3476_v34 = vrot.slane %v3474_v26, 4  ;;  %v3482_v49 = vrot.slane %v3480_v47, 5  ;;  %v3156_v15 = vld [vmem:[#allocation2 + $0x120] sm:$0xf]  ;;  %v8895_v16 = vpop.f32.mrf.mxu0 }
 0x1d0   : > { %v7788_v41 = vld [vmem:[#allocation3 + $0x218] ss:$36 sps:$4 sm:$0xff]   ;;  %v3449_v0 = vsel %vm8127_vm5, %v3444_v10, %v3448_v50  ;;  %v3468_v13 = vrot.slane %v3467_v51, 4  ;;  %3188 = vst [vmem:[#allocation3 + $0x37c] sm:$0xf] %v3156_v15  ;;  %v8889_v4 = vadd.f32 %v7235_v9, %v8661_v14  ;;  %v7168_v57 = vadd.f32 %v8859_v28, %v8846_v53  ;;  %v8899_v28 = vpop.f32.mrf.mxu1 }
 0x1d1   : > { %v3459_v58 = vsel %vm8127_vm5, %v3454_v3, %v3458_v62  ;;  %3676 = vst [vmem:[#allocation3 + $0x260] sm:$0xf] %v3449_v0  ;;  %v3477_v24 = vor.u32 %v3476_v34, %v3472_v17  ;;  %v6445_v31 = vrot.slane %v2981_v59, 11  ;;  %v2986_v44 = vshrl.u32 %v2705_v43, 16  ;;  %v3157_v56 = vld [vmem:[#allocation2 + $0x124] sm:$0xf]  ;;  %7488 = vmatmul.mubr.bf16.gmra.mxu0 %v7788_v41 }
 0x1d2   : > { %9556 = vst [vmem:[#allocation15_spill] sm:$0xff] %v8889_v4  ;;  %v3226_v35 = vld [vmem:[#allocation2 + $0xf8] sm:$0xf]  ;;  %3677 = vst [vmem:[#allocation3 + $0x284] sm:$0xf] %v3459_v58  ;;  %v3473_v14 = vsel %vm8127_vm5, %v3468_v13, %v3472_v17  ;;  %v2989_v9 = vshll.u32 %v2705_v43, 16  ;;  %v8902_v10 = vadd.f32 %v7168_v57, %v8725_v42  ;;  %v8905_v51 = vadd.f32 %v7237_v46, %v8866_v45  ;;  %v8910_v43 = vpop.f32.mrf.mxu0 }
 0x1d3   : > { %v2995_v50 = vshrl.u32 %v2706_v11, 16  ;;  %v2998_v54 = vshll.u32 %v2706_v11, 16  ;;  %3189 = vst [vmem:[#allocation3 + $0x3a0] sm:$0xf] %v3157_v56  ;;  %v3227_v53 = vld [vmem:[#allocation2 + $0xfc] sm:$0xf]  ;;  %v8908_v59 = vadd.f32 %v7170_v55, %v8872_v32 }
 0x1d4   : > { %v7789_v62 = vld [vmem:[#allocation3 + $0x330] ss:$36 sps:$4 sm:$0xff]   ;;  %v3478_v47 = vrot.slane %v3477_v24, 4  ;;  %3678 = vst [vmem:[#allocation3 + $0x2a8] sm:$0xf] %v3473_v14  ;;  %v2988_v11 = vrot.slane %v2986_v44, 7  ;;  %v8914_v44 = vpop.f32.mrf.mxu1 }
 0x1d5   : > { %v7791_v26 = vld [vmem:[#allocation3 + $0x334] ss:$36 sps:$4 sm:$0xff]   ;;  %v2997_v3 = vrot.slane %v2995_v50, 7  ;;  %v3485_v34 = vshrl.u32 %v3226_v35, 16  ;;  %v3488_v15 = vshll.u32 %v3226_v35, 16  ;;  %v3494_v0 = vshll.u32 %v3227_v53, 16 }
 0x1d6   : > { %v3228_v17 = vld [vmem:[#allocation2 + $0x100] sm:$0x1]  ;;  %5767 = vmatprep.mubr.bf16.mxu1 %v7791_v26  ;;  %v3483_v41 = vsel %vm8127_vm5, %v3478_v47, %v3482_v49  ;;  %v3498_v42 = vshrl.u32 %v3227_v53, 16  ;;  %v3229_v57 = vld [vmem:[#allocation2 + $0x10c] sm:$0xf]  ;;  %v2991_v45 = vor.u32 %v2989_v9, %v2988_v11  ;;  %v2993_v32 = vrot.slane %v2988_v11, 4  ;;  %v8916_v49 = vpop.f32.mrf.mxu0  ;;  %v8922_v11 = vpop.f32.mrf.mxu1 }
 0x1d7   : > { %v3504_v13 = vshll.u32 %v3228_v17, 16  ;;  %5768 = vmatmul.mubr.bf16.gmra.mxu1 %v7789_v62  ;;  %3679 = vst [vmem:[#allocation3 + $0x2cc] sm:$0xf] %v3483_v41  ;;  %v3000_v46 = vor.u32 %v2998_v54, %v2997_v3  ;;  %v3487_v55 = vrot.slane %v3485_v34, 4  ;;  %v3230_v58 = vld [vmem:[#allocation2 + $0x110] sm:$0xf] }
 0x1d8   : > { %v3231_v24 = vld [vmem:[#allocation2 + $0x114] sm:$0x1]  ;;  %v3490_v56 = vrot.slane %v3488_v15, 5  ;;  %v3496_v35 = vrot.slane %v3494_v0, 5  ;;  %v3500_v14 = vrot.slane %v3498_v42, 4  ;;  %v2992_v53 = vsel %vm7924_vm2, %v6445_v31, %v2991_v45  ;;  %v8924_v20 = vpop.f32.mrf.mxu0  ;;  %v8926_v4 = vpop.f32.mrf.mxu1 }
 0x1d9   : > { %v3506_v50 = vrot.slane %v3504_v13, 5  ;;  %v2707_v26 = vld [vmem:[#allocation2 + $0x130] sm:$0x8]  ;;  %v3001_v9 = vsel %vm7924_vm2, %v2993_v32, %v3000_v46  ;;  %v3509_v62 = vshrl.u32 %v3229_v57, 16  ;;  %v3512_v54 = vshll.u32 %v3229_v57, 16 }
 0x1da   : > { %v2708_v47 = vld [vmem:[#allocation2 + $0x134] sm:$0xf]  ;;  %v7792_v3 = vld [vmem:[#allocation3 + $0x260] ss:$36 sps:$4 sm:$0xff]   ;;  %3124 = vst [vmem:[#allocation3 + $0x378] sm:$0xf] %v2992_v53  ;;  %v3491_v17 = vor.u32 %v3490_v56, %v3487_v55  ;;  %v3501_v34 = vor.u32 %v3500_v14, %v3496_v35 }
 0x1db   : > { %3125 = vst [vmem:[#allocation3 + $0x39c] sm:$0xf] %v3001_v9  ;;  %v3518_v15 = vshll.u32 %v3230_v58, 16  ;;  %v3522_v41 = vshrl.u32 %v3230_v58, 16  ;;  %v3511_v0 = vrot.slane %v3509_v62, 4  ;;  %v3514_v42 = vrot.slane %v3512_v54, 5  ;;  %7491 = vmatprep.mubr.bf16.mxu0 %v7792_v3  ;;  %v8932_v3 = vpop.f32.mrf.mxu0 }
 0x1dc   : > { %v3528_v13 = vshll.u32 %v3231_v24, 16  ;;  %v3003_v7 = vshrl.u32 %v2707_v26, 16  ;;  %v3492_v31 = vrot.slane %v3491_v17, 4  ;;  %v3502_v45 = vrot.slane %v3501_v34, 4  ;;  %v2709_v57 = vld [vmem:[#allocation2 + $0x138] sm:$0xf] }
 0x1dd   : > { %v3520_v32 = vrot.slane %v3518_v15, 5  ;;  %v3524_v46 = vrot.slane %v3522_v41, 4  ;;  %v3515_v53 = vor.u32 %v3514_v42, %v3511_v0  ;;  %v3008_v56 = vshrl.u32 %v2708_v47, 16  ;;  %v3158_v14 = vld [vmem:[#allocation2 + $0x134] sm:$0xf] }
 0x1de   : > { %v3530_v9 = vrot.slane %v3528_v13, 5  ;;  %v6446_v55 = vrot.slane %v3003_v7, 11  ;;  %v7793_v58 = vld [vmem:[#allocation3 + $0x2a8] ss:$36 sps:$4 sm:$0xff]   ;;  %v3497_v24 = vsel %vm8127_vm5, %v3492_v31, %v3496_v35  ;;  %v3507_v26 = vsel %vm8127_vm5, %v3502_v45, %v3506_v50  ;;  %3190 = vst [vmem:[#allocation3 + $0x3c4] sm:$0xf] %v3158_v14  ;;  %v8944_v31 = vpop.f32.mrf.mxu1 }
 0x1df   : > { %v3525_v62 = vor.u32 %v3524_v46, %v3520_v32  ;;  %v3011_v54 = vshll.u32 %v2708_v47, 16  ;;  %3680 = vst [vmem:[#allocation3 + $0x2f0] sm:$0xf] %v3497_v24  ;;  %3681 = vst [vmem:[#allocation3 + $0x314] sm:$0xf] %v3507_v26  ;;  %v3516_v17 = vrot.slane %v3515_v53, 4  ;;  %7492 = vmatmul.mubr.bf16.gmra.mxu0 %v7793_v58  ;;  %v8936_v50 = vadd.f32 %v8905_v51, %v8671_v36 }
 0x1e0   : > { %v3010_v34 = vrot.slane %v3008_v56, 7  ;;  %v3017_v15 = vshrl.u32 %v2709_v57, 16  ;;  %v3020_v7 = vshll.u32 %v2709_v57, 16  ;;  %v3159_v41 = vld [vmem:[#allocation2 + $0x138] sm:$0xf]  ;;  %v8940_v47 = vadd.f32 %v8908_v59, %v8729_v52 }
 0x1e1   : > { %v3526_v0 = vrot.slane %v3525_v62, 4  ;;  %3191 = vst [vmem:[#allocation3 + $0x3e8] sm:$0xf] %v3159_v41  ;;  %v3232_v42 = vld [vmem:[#allocation2 + $0x120] sm:$0xf]  ;;  %v7241_v13 = vadd.f32 %v8895_v16, %v8884_v6  ;;  %v3521_v46 = vsel %vm8127_vm5, %v3516_v17, %v3520_v32  ;;  %v8953_v6 = vpop.f32.mrf.mxu0 }
 0x1e2   : > { %v3233_v35 = vld [vmem:[#allocation2 + $0x124] sm:$0xf]  ;;  %v3013_v57 = vor.u32 %v3011_v54, %v3010_v34  ;;  %v3015_v53 = vrot.slane %v3010_v34, 4  ;;  %v3019_v56 = vrot.slane %v3017_v15, 7  ;;  %3682 = vst [vmem:[#allocation3 + $0x338] sm:$0xf] %v3521_v46 }
 0x1e3   : > { %v7794_v45 = vld [vmem:[#allocation3 + $0x378] ss:$36 sps:$4 sm:$0xff]   ;;  %v3531_v36 = vsel %vm8127_vm5, %v3526_v0, %v3530_v9  ;;  %v3234_v51 = vld [vmem:[#allocation2 + $0x128] sm:$0x1]  ;;  %v3533_v52 = vshrl.u32 %v3232_v42, 16  ;;  %v3536_v59 = vshll.u32 %v3232_v42, 16  ;;  %v8951_v58 = vadd.f32 %v7241_v13, %v8692_v12  ;;  %v8957_v12 = vpop.f32.mrf.mxu1 }
 0x1e4   : > { %v7796_v14 = vld [vmem:[#allocation3 + $0x37c] ss:$36 sps:$4 sm:$0xff]   ;;  %3683 = vst [vmem:[#allocation3 + $0x35c] sm:$0xf] %v3531_v36  ;;  %v3014_v16 = vsel %vm7924_vm2, %v6446_v55, %v3013_v57  ;;  %v3022_v32 = vor.u32 %v3020_v7, %v3019_v56  ;;  %v3542_v24 = vshll.u32 %v3233_v35, 16  ;;  %v3546_v26 = vshrl.u32 %v3233_v35, 16 }
 0x1e5   : > { %v3235_v62 = vld [vmem:[#allocation2 + $0x134] sm:$0xf]  ;;  %v3236_v54 = vld [vmem:[#allocation2 + $0x138] sm:$0xf]  ;;  %5775 = vmatprep.mubr.bf16.mxu1 %v7796_v14  ;;  %3126 = vst [vmem:[#allocation3 + $0x3c0] sm:$0xf] %v3014_v16  ;;  %v7174_v57 = vadd.f32 %v8899_v28, %v8882_v29  ;;  %v7244_v56 = vadd.f32 %v8916_v49, %v8910_v43  ;;  %v7177_v14 = vadd.f32 %v8922_v11, %v8914_v44  ;;  %v8969_v36 = vpop.f32.mrf.mxu1 }
 0x1e6   : > { %v3535_v9 = vrot.slane %v3533_v52, 4  ;;  %v3538_v17 = vrot.slane %v3536_v59, 5  ;;  %v3552_v34 = vshll.u32 %v3234_v51, 16  ;;  %v3237_v15 = vld [vmem:[#allocation2 + $0x13c] sm:$0x1]  ;;  %v3557_v41 = vshrl.u32 %v3235_v62, 16  ;;  %5776 = vmatmul.mubr.bf16.gmra.mxu1 %v7794_v45  ;;  %v8967_v45 = vpop.f32.mrf.mxu0 }
 0x1e7   : > { %v3023_v0 = vsel %vm7924_vm2, %v3015_v53, %v3022_v32  ;;  %v3544_v42 = vrot.slane %v3542_v24, 5  ;;  %v3548_v55 = vrot.slane %v3546_v26, 4  ;;  %v3560_v7 = vshll.u32 %v3235_v62, 16  ;;  %v2710_v13 = vld [vmem:[#allocation2 + $0x144] sm:$0x8]  ;;  %v8971_v44 = vpop.f32.mrf.mxu1 }
 0x1e8   : > { %v7797_v35 = vld [vmem:[#allocation3 + $0x2f0] ss:$36 sps:$4 sm:$0xff]   ;;  %3127 = vst [vmem:[#allocation3 + $0x3e4] sm:$0xf] %v3023_v0  ;;  %v3539_v46 = vor.u32 %v3538_v17, %v3535_v9  ;;  %v3554_v51 = vrot.slane %v3552_v34, 5  ;;  %v3559_v52 = vrot.slane %v3557_v41, 4  ;;  %v8976_v0 = vadd.f32 %v7174_v57, %v8746_v48 }
 0x1e9   : > { %v3549_v53 = vor.u32 %v3548_v55, %v3544_v42  ;;  %v3562_v59 = vrot.slane %v3560_v7, 5  ;;  %v2711_v16 = vld [vmem:[#allocation2 + $0x148] sm:$0xf]  ;;  %7495 = vmatprep.mubr.bf16.mxu0 %v7797_v35  ;;  %v3566_v24 = vshll.u32 %v3236_v54, 16  ;;  %v3570_v26 = vshrl.u32 %v3236_v54, 16  ;;  %v8978_v55 = vpop.f32.mrf.mxu0 }
 0x1ea   : > { %v3540_v32 = vrot.slane %v3539_v46, 4  ;;  %v3576_v29 = vshll.u32 %v3237_v15, 16  ;;  %v2712_v28 = vld [vmem:[#allocation2 + $0x14c] sm:$0xf]  ;;  %v3025_v49 = vshrl.u32 %v2710_v13, 16  ;;  %v3030_v9 = vshrl.u32 %v2711_v16, 16 }
 0x1eb   : > { %v3550_v62 = vrot.slane %v3549_v53, 4  ;;  %v3563_v43 = vor.u32 %v3562_v59, %v3559_v52  ;;  %v7798_v11 = vld [vmem:[#allocation3 + $0x338] ss:$36 sps:$4 sm:$0xff]   ;;  %v3568_v34 = vrot.slane %v3566_v24, 5  ;;  %v3572_v41 = vrot.slane %v3570_v26, 4  ;;  %v8982_v48 = vpop.f32.mrf.mxu0 }
 0x1ec   : > { %v3545_v17 = vsel %vm8127_vm5, %v3540_v32, %v3544_v42  ;;  %v3578_v7 = vrot.slane %v3576_v29, 5  ;;  %v6447_v13 = vrot.slane %v3025_v49, 11  ;;  %v3160_v35 = vld [vmem:[#allocation2 + $0x148] sm:$0xf]  ;;  %7496 = vmatmul.mubr.bf16.gmra.mxu0 %v7798_v11  ;;  %v3032_v53 = vrot.slane %v3030_v9, 7 }
 0x1ed   : > { %v3555_v54 = vsel %vm8127_vm5, %v3550_v62, %v3554_v51  ;;  %3684 = vst [vmem:[#allocation3 + $0x380] sm:$0xf] %v3545_v17  ;;  %v3564_v15 = vrot.slane %v3563_v43, 4  ;;  %v3573_v46 = vor.u32 %v3572_v41, %v3568_v34  ;;  %v3033_v42 = vshll.u32 %v2711_v16, 16  ;;  %v3161_v59 = vld [vmem:[#allocation2 + $0x14c] sm:$0xf]  ;;  %v8992_v62 = vpop.f32.mrf.mxu1  ;;  %v8994_v17 = vpop.f32.mrf.mxu0 }
 0x1ee   : > { %3685 = vst [vmem:[#allocation3 + $0x3a4] sm:$0xf] %v3555_v54  ;;  %v3039_v52 = vshrl.u32 %v2712_v28, 16  ;;  %3192 = vst [vmem:[#allocation3 + $0x40c] sm:$0xf] %v3160_v35  ;;  %v3042_v24 = vshll.u32 %v2712_v28, 16  ;;  %v8987_v26 = vadd.f32 %v7244_v56, %v8700_v23  ;;  %v8990_v29 = vadd.f32 %v7177_v14, %v8781_v25 }
 0x1ef   : > { %v7799_v57 = vld [vmem:[#allocation3 + $0x3c0] ss:$36 sps:$4 sm:$0xff]   ;;  %v3569_v51 = vsel %vm8127_vm5, %v3564_v15, %v3568_v34  ;;  %3193 = vst [vmem:[#allocation3 + $0x430] sm:$0xf] %v3161_v59  ;;  %v3574_v16 = vrot.slane %v3573_v46, 4  ;;  %v3035_v43 = vor.u32 %v3033_v42, %v3032_v53  ;;  %v3037_v49 = vrot.slane %v3032_v53, 4 }
 0x1f0   : > { %v7801_v32 = vld [vmem:[#allocation3 + $0x3c4] ss:$36 sps:$4 sm:$0xff]   ;;  %9557 = vst [vmem:[#allocation16_spill] sm:$0xff] %v8987_v26  ;;  %3686 = vst [vmem:[#allocation3 + $0x3c8] sm:$0xf] %v3569_v51  ;;  %v3041_v9 = vrot.slane %v3039_v52, 7  ;;  %v7247_v23 = vadd.f32 %v8932_v3, %v8924_v20  ;;  %v7180_v25 = vadd.f32 %v8944_v31, %v8926_v4 }
 0x1f1   : > { %v3238_v11 = vld [vmem:[#allocation2 + $0x148] sm:$0xf]  ;;  %5783 = vmatprep.mubr.bf16.mxu1 %v7801_v32  ;;  %v3239_v34 = vld [vmem:[#allocation2 + $0x14c] sm:$0xf]  ;;  %v3240_v28 = vld [vmem:[#allocation2 + $0x150] sm:$0x1]  ;;  %v3579_v56 = vsel %vm8127_vm5, %v3574_v16, %v3578_v7  ;;  %v3036_v14 = vsel %vm7924_vm2, %v6447_v13, %v3035_v43  ;;  %v9004_v32 = vpop.f32.mrf.mxu1  ;;  %v9008_v13 = vpop.f32.mrf.mxu0 }
 0x1f2   : > { %v3581_v41 = vshrl.u32 %v3238_v11, 16  ;;  %v3584_v54 = vshll.u32 %v3238_v11, 16  ;;  %5784 = vmatmul.mubr.bf16.gmra.mxu1 %v7799_v57  ;;  %v3044_v15 = vor.u32 %v3042_v24, %v3041_v9  ;;  %v3590_v35 = vshll.u32 %v3239_v34, 16  ;;  %v3241_v46 = vld [vmem:[#allocation2 + $0x15c] sm:$0xf] }
 0x1f3   : > { %v3242_v53 = vld [vmem:[#allocation2 + $0x160] sm:$0xf]  ;;  %3687 = vst [vmem:[#allocation3 + $0x3ec] sm:$0xf] %v3579_v56  ;;  %3128 = vst [vmem:[#allocation3 + $0x408] sm:$0xf] %v3036_v14  ;;  %v9011_v9 = vadd.f32 %v7247_v23, %v8711_v22  ;;  %v9013_v11 = vpop.f32.mrf.mxu1 }
 0x1f4   : > { %v3583_v42 = vrot.slane %v3581_v41, 4  ;;  %v3586_v52 = vrot.slane %v3584_v54, 5  ;;  %v3594_v59 = vshrl.u32 %v3239_v34, 16  ;;  %v3600_v20 = vshll.u32 %v3240_v28, 16  ;;  %v3243_v3 = vld [vmem:[#allocation2 + $0x164] sm:$0x1] }
 0x1f5   : > { %v3045_v4 = vsel %vm7924_vm2, %v3037_v49, %v3044_v15  ;;  %v3592_v31 = vrot.slane %v3590_v35, 5  ;;  %v3605_v7 = vshrl.u32 %v3241_v46, 16  ;;  %v3608_v57 = vshll.u32 %v3241_v46, 16  ;;  %v7802_v51 = vld [vmem:[#allocation3 + $0x380] ss:$36 sps:$4 sm:$0xff]  }
 0x1f6   : > { %3129 = vst [vmem:[#allocation3 + $0x42c] sm:$0xf] %v3045_v4  ;;  %v3587_v24 = vor.u32 %v3586_v52, %v3583_v42  ;;  %v3596_v16 = vrot.slane %v3594_v59, 4  ;;  %v3602_v43 = vrot.slane %v3600_v20, 5  ;;  %v3614_v41 = vshll.u32 %v3242_v53, 16  ;;  %7499 = vmatprep.mubr.bf16.mxu0 %v7802_v51  ;;  %v7257_v20 = vpop.f32.mrf.mxu0  ;;  %v7190_v4 = vpop.f32.mrf.mxu1 }
 0x1f7   : > { %v3607_v34 = vrot.slane %v3605_v7, 4  ;;  %v3610_v28 = vrot.slane %v3608_v57, 5  ;;  %v3618_v54 = vshrl.u32 %v3242_v53, 16  ;;  %v2713_v49 = vld [vmem:[#allocation2 + $0x158] sm:$0x8]  ;;  %v3624_v15 = vshll.u32 %v3243_v3, 16 }
 0x1f8   : > { %v3588_v56 = vrot.slane %v3587_v24, 4  ;;  %v3597_v14 = vor.u32 %v3596_v16, %v3592_v31  ;;  %v2714_v35 = vld [vmem:[#allocation2 + $0x15c] sm:$0xf]  ;;  %v9016_v46 = vadd.f32 %v7180_v25, %v8783_v63  ;;  %v3616_v52 = vrot.slane %v3614_v41, 5  ;;  %v2715_v22 = vld [vmem:[#allocation2 + $0x160] sm:$0xf] }
 0x1f9   : > { %v3611_v42 = vor.u32 %v3610_v28, %v3607_v34  ;;  %v3620_v59 = vrot.slane %v3618_v54, 4  ;;  %v3047_v23 = vshrl.u32 %v2713_v49, 16  ;;  %v3626_v57 = vrot.slane %v3624_v15, 5  ;;  %v3162_v24 = vld [vmem:[#allocation2 + $0x15c] sm:$0xf]  ;;  %v7258_v34 = vpop.f32.mrf.mxu0 }
 0x1fa   : > { %v3593_v7 = vsel %vm8127_vm5, %v3588_v56, %v3592_v31  ;;  %v3598_v53 = vrot.slane %v3597_v14, 4  ;;  %v3052_v51 = vshrl.u32 %v2714_v35, 16  ;;  %v7803_v16 = vld [vmem:[#allocation3 + $0x3c8] ss:$36 sps:$4 sm:$0xff]   ;;  %3194 = vst [vmem:[#allocation3 + $0x454] sm:$0xf] %v3162_v24  ;;  %v7250_v63 = vadd.f32 %v8967_v45, %v8953_v6 }
 0x1fb   : > { %3688 = vst [vmem:[#allocation3 + $0x410] sm:$0xf] %v3593_v7  ;;  %v3612_v3 = vrot.slane %v3611_v42, 4  ;;  %v3621_v26 = vor.u32 %v3620_v59, %v3616_v52  ;;  %v7183_v25 = vadd.f32 %v8969_v36, %v8957_v12  ;;  %v6448_v31 = vrot.slane %v3047_v23, 11  ;;  %v3163_v49 = vld [vmem:[#allocation2 + $0x160] sm:$0xf]  ;;  %7500 = vmatmul.mubr.bf16.gmra.mxu0 %v7803_v16  ;;  %v7260_v45 = vpop.f32.mrf.mxu0  ;;  %v7191_v36 = vpop.f32.mrf.mxu1 }
 0x1fc   : > { %v3603_v28 = vsel %vm8127_vm5, %v3598_v53, %v3602_v43  ;;  %v3054_v41 = vrot.slane %v3052_v51, 7  ;;  %v3055_v54 = vshll.u32 %v2714_v35, 16  ;;  %v7806_v14 = vld [vmem:[#allocation3 + $0x40c] ss:$36 sps:$4 sm:$0xff]   ;;  %3195 = vst [vmem:[#allocation3 + $0x478] sm:$0xf] %v3163_v49  ;;  %v9029_v6 = vadd.f32 %v7250_v63, %v8715_v39 }
 0x1fd   : > { %v7804_v56 = vld [vmem:[#allocation3 + $0x408] ss:$36 sps:$4 sm:$0xff]   ;;  %3689 = vst [vmem:[#allocation3 + $0x434] sm:$0xf] %v3603_v28  ;;  %v3617_v15 = vsel %vm8127_vm5, %v3612_v3, %v3616_v52  ;;  %v3622_v42 = vrot.slane %v3621_v26, 4  ;;  %v9032_v12 = vadd.f32 %v7183_v25, %v8790_v19  ;;  %v3061_v59 = vshrl.u32 %v2715_v22, 16  ;;  %5791 = vmatprep.mubr.bf16.mxu1 %v7806_v14  ;;  %v7261_v52 = vpop.f32.mrf.mxu0 }
 0x1fe   : > { %3690 = vst [vmem:[#allocation3 + $0x458] sm:$0xf] %v3617_v15  ;;  %v3057_v43 = vor.u32 %v3055_v54, %v3054_v41  ;;  %v3059_v35 = vrot.slane %v3054_v41, 4  ;;  %v3064_v23 = vshll.u32 %v2715_v22, 16  ;;  %v7253_v26 = vadd.f32 %v8982_v48, %v8978_v55  ;;  %5792 = vmatmul.mubr.bf16.gmra.mxu1 %v7804_v56  ;;  %v9559_v49 = vld [vmem:[#allocation11_spill] sm:$0xff] }
 0x1ff   : > { %v3627_v7 = vsel %vm8127_vm5, %v3622_v42, %v3626_v57  ;;  %v7186_v39 = vadd.f32 %v8992_v62, %v8971_v44  ;;  %v7256_v19 = vadd.f32 %v9008_v13, %v8994_v17  ;;  %v3063_v22 = vrot.slane %v3061_v59, 7  ;;  %v7193_v17 = vpop.f32.mrf.mxu1  ;;  %v7263_v3 = vpop.f32.mrf.mxu0  ;;  %v9560_v42 = vld [vmem:[#allocation12_spill] sm:$0xff]  ;;  %v9561_v59 = vld [vmem:[#allocation5_spill] sm:$0xff] }
 0x200   : > { %3691 = vst [vmem:[#allocation3 + $0x47c] sm:$0xf] %v3627_v7  ;;  %v3058_v53 = vsel %vm7924_vm2, %v6448_v31, %v3057_v43  ;;  %v7189_v5 = vadd.f32 %v9013_v11, %v9004_v32  ;;  %v7259_v57 = vadd.f32 %v7258_v34, %v7257_v20  ;;  %v9047_v55 = vadd.f32 %v7253_v26, %v8738_v60  ;;  %v9562_v26 = vld [vmem:[#allocation6_spill] sm:$0xff] }
 0x201   : > { %3130 = vst [vmem:[#allocation3 + $0x450] sm:$0xf] %v3058_v53  ;;  %v9050_v44 = vadd.f32 %v7186_v39, %v8813_v21  ;;  %v9053_v48 = vadd.f32 %v7256_v19, %v8760_v40  ;;  %v7192_v62 = vadd.f32 %v7191_v36, %v7190_v4  ;;  %v3066_v13 = vor.u32 %v3064_v23, %v3063_v22  ;;  %v7194_v60 = vpop.f32.mrf.mxu1  ;;  %v7264_v30 = vpop.f32.mrf.mxu0  ;;  %v9563_v39 = vld [vmem:[#allocation7_spill] sm:$0xff] }
 0x202   : > { %v9056_v51 = vadd.f32 %v7189_v5, %v8532_v2  ;;  %v9059_v24 = vadd.f32 %v7259_v57, %v8771_v33  ;;  %v7262_v32 = vadd.f32 %v7261_v52, %v7260_v45  ;;  %v7195_v4 = vadd.f32 %v7194_v60, %v7193_v17 }
 0x203   : > { %v9062_v11 = vadd.f32 %v7192_v62, %v8742_v8  ;;  %v3067_v21 = vsel %vm7924_vm2, %v3059_v35, %v3066_v13  ;;  %v7196_v16 = vpop.f32.mrf.mxu1  ;;  %v9558_v8 = vld [vmem:[#allocation4_spill] sm:$0xff]  ;;  %v7265_v28 = vadd.f32 %v7264_v30, %v7263_v3  ;;  %v7811_v54 = vld [vmem:[#allocation3 + $0x454] ss:$36 sps:$4 sm:$0xff]   ;;  %v7092_v19 = vadd.f32 %v9563_v39, %v9562_v26 }
 0x204   : > { %v7807_v20 = vld [vmem:[#allocation3 + $0x410] ss:$36 sps:$4 sm:$0xff]   ;;  %v9067_v40 = vadd.f32 %v7262_v32, %v8786_v61  ;;  %3131 = vst [vmem:[#allocation3 + $0x474] sm:$0xf] %v3067_v21  ;;  %v9070_v2 = vadd.f32 %v7195_v4, %v8569_v37  ;;  %v7086_v25 = vadd.f32 %v9558_v8, %v8571_v38  ;;  %v7266_v61 = vpop.f32.mrf.mxu0  ;;  %5799 = vmatprep.mubr.bf16.mxu1 %v7811_v54  ;;  %v9565_v30 = vld [vmem:[#allocation8_spill] sm:$0xff] }
 0x205   : > { %7503 = vmatprep.mubr.bf16.mxu0 %v7807_v20  ;;  %v7197_v63 = vpop.f32.mrf.mxu1  ;;  %v9077_v56 = vadd.f32 %v7265_v28, %v9559_v49  ;;  %v9566_v28 = vld [vmem:[#allocation10_spill] sm:$0xff] }
 0x206   : > { %v7198_v34 = vadd.f32 %v7197_v63, %v7196_v16  ;;  %v7267_v37 = vpop.f32.mrf.mxu0  ;;  %v9564_v63 = vld [vmem:[#allocation9_spill] sm:$0xff] }
 0x207   : > { %v7808_v33 = vld [vmem:[#allocation3 + $0x458] ss:$36 sps:$4 sm:$0xff]   ;;  %v7268_v14 = vadd.f32 %v7267_v37, %v7266_v61  ;;  %v7199_v15 = vpop.f32.mrf.mxu1  ;;  %v7098_v61 = vadd.f32 %v9566_v28, %v9565_v30 }
 0x208   : > { %7504 = vmatmul.mubr.bf16.gmra.mxu0 %v7808_v33  ;;  %v9074_v31 = vadd.f32 %v7198_v34, %v7086_v25  ;;  %v7269_v35 = vpop.f32.mrf.mxu0 }
 0x209   : > { %v9080_v45 = vadd.f32 %v7268_v14, %v9560_v42  ;;  %v7200_v38 = vpop.f32.mrf.mxu1 }
 0x20a   : > { %v7201_v36 = vadd.f32 %v7200_v38, %v7199_v15  ;;  %v7270_v52 = vpop.f32.mrf.mxu0 }
 0x20b   : > { %v7809_v41 = vld [vmem:[#allocation3 + $0x450] ss:$36 sps:$4 sm:$0xff]   ;;  %v7202_v43 = vpop.f32.mrf.mxu1  ;;  %v7271_v22 = vadd.f32 %v7270_v52, %v7269_v35 }
 0x20c   : > { %5800 = vmatmul.mubr.bf16.gmra.mxu1 %v7809_v41  ;;  %v9083_v23 = vadd.f32 %v7201_v36, %v9561_v59  ;;  %v7272_v5 = vpop.f32.mrf.mxu0 }
 0x20d   : > { %v7203_v7 = vpop.f32.mrf.mxu1  ;;  %v9090_v62 = vadd.f32 %v7271_v22, %v8844_v27 }
 0x20e   : > { %v7204_v53 = vadd.f32 %v7203_v7, %v7202_v43  ;;  %v7273_v17 = vpop.f32.mrf.mxu0 }
 0x20f   : > { %v7274_v13 = vadd.f32 %v7273_v17, %v7272_v5  ;;  %v7205_v60 = vpop.f32.mrf.mxu1 }
 0x210   : > { %v9087_v57 = vadd.f32 %v7204_v53, %v7092_v19  ;;  %v7275_v20 = vpop.f32.mrf.mxu0 }
 0x211   : > { %v9093_v32 = vadd.f32 %v7274_v13, %v8863_v1  ;;  %v7206_v21 = vpop.f32.mrf.mxu1 }
 0x212   : > { %v7207_v4 = vadd.f32 %v7206_v21, %v7205_v60  ;;  %v7276_v16 = vpop.f32.mrf.mxu0 }
 0x213   : > { %v7277_v33 = vadd.f32 %v7276_v16, %v7275_v20  ;;  %v7208_v3 = vpop.f32.mrf.mxu1 }
 0x214   : > { %v9096_v8 = vadd.f32 %v7207_v4, %v9564_v63  ;;  %v7278_v25 = vpop.f32.mrf.mxu0 }
 0x215   : > { %v9099_v34 = vadd.f32 %v7277_v33, %v8880_v18  ;;  %v7209_v27 = vpop.f32.mrf.mxu1 }
 0x216   : > { %v7210_v1 = vadd.f32 %v7209_v27, %v7208_v3  ;;  %v7279_v41 = vpop.f32.mrf.mxu0 }
 0x217   : > { %v7280_v54 = vadd.f32 %v7279_v41, %v7278_v25  ;;  %v9103_v49 = vpop.f32.mrf.mxu1 }
 0x218   : > { %v9105_v37 = vadd.f32 %v7210_v1, %v7098_v61  ;;  %v7281_v14 = vpop.f32.mrf.mxu0 }
 0x219   : > { %v9108_v15 = vadd.f32 %v7280_v54, %v8902_v10  ;;  %v9110_v42 = vpop.f32.mrf.mxu1 }
 0x21a   : > { %v7282_v38 = vpop.f32.mrf.mxu0 }
 0x21b   : > { %v7283_v18 = vadd.f32 %v7282_v38, %v7281_v14  ;;  %v9112_v36 = vpop.f32.mrf.mxu1 }
 0x21c   : > { %v7284_v43 = vpop.f32.mrf.mxu0 }
 0x21d   : > { %v9115_v35 = vadd.f32 %v7283_v18, %v8940_v47  ;;  %v9117_v59 = vpop.f32.mrf.mxu1 }
 0x21e   : > { %v7285_v7 = vpop.f32.mrf.mxu0 }
 0x21f   : > { %v7286_v26 = vadd.f32 %v7285_v7, %v7284_v43 }
 0x220   : > { %v7287_v39 = vpop.f32.mrf.mxu0 }
 0x221   : > { %v9122_v10 = vadd.f32 %v7286_v26, %v8976_v0 }
 0x222   : > { %v9119_v19 = vpop.f32.mrf.mxu1  ;;  %v7288_v52 = vpop.f32.mrf.mxu0 }
 0x223   : > { %v7289_v22 = vadd.f32 %v7288_v52, %v7287_v39 }
 0x224   : > { %v9124_v53 = vpop.f32.mrf.mxu1  ;;  %v7290_v5 = vpop.f32.mrf.mxu0 }
 0x225   : > { %v9129_v47 = vadd.f32 %v7289_v22, %v8990_v29 }
 0x226   : > { %v9126_v17 = vpop.f32.mrf.mxu1  ;;  %v7291_v13 = vpop.f32.mrf.mxu0 }
 0x227   : > { %v7292_v20 = vadd.f32 %v7291_v13, %v7290_v5 }
 0x228   : > { %v9131_v60 = vpop.f32.mrf.mxu1 }
 0x229   : > { %v9134_v4 = vadd.f32 %v7292_v20, %v9016_v46 }
 0x22a   : > { %v7293_v21 = vpop.f32.mrf.mxu0 }
 0x22b   : > { %9567 = vst [vmem:[#allocation4_spill] sm:$0xff] %v9134_v4  ;;  %v9136_v0 = vpop.f32.mrf.mxu1 }
 0x22c   : > { %v7294_v16 = vpop.f32.mrf.mxu0 }
 0x22d   : > { %v7295_v33 = vadd.f32 %v7294_v16, %v7293_v21  ;;  %v9138_v3 = vpop.f32.mrf.mxu1 }
 0x22e   : > { %v7296_v63 = vpop.f32.mrf.mxu0 }
 0x22f   : > { %v9141_v25 = vadd.f32 %v7295_v33, %v9032_v12  ;;  %v9143_v29 = vpop.f32.mrf.mxu1 }
 0x230   : > { %v7297_v27 = vpop.f32.mrf.mxu0 }
 0x231   : > { %v7298_v30 = vadd.f32 %v7297_v27, %v7296_v63  ;;  %v9145_v28 = vpop.f32.mrf.mxu1 }
 0x233   : > { %v9148_v61 = vadd.f32 %v7298_v30, %v9050_v44 }
 0x236   : > { %v7299_v46 = vpop.f32.mrf.mxu0 }
 0x237   : > { %v9150_v1 = vpop.f32.mrf.mxu1 }
 0x238   : > { %v7300_v41 = vpop.f32.mrf.mxu0 }
 0x239   : > { %v7301_v54 = vadd.f32 %v7300_v41, %v7299_v46  ;;  %v9152_v14 = vpop.f32.mrf.mxu1 }
 0x23a   : > { %v7302_v38 = vpop.f32.mrf.mxu0 }
 0x23b   : > { %v9155_v12 = vadd.f32 %v7301_v54, %v9056_v51  ;;  %v9157_v18 = vpop.f32.mrf.mxu1 }
 0x23c   : > { %v7303_v43 = vpop.f32.mrf.mxu0 }
 0x23d   : > { %9568 = vst [vmem:[#allocation11_spill] sm:$0xff] %v9155_v12  ;;  %v7304_v7 = vadd.f32 %v7303_v43, %v7302_v38  ;;  %v9159_v26 = vpop.f32.mrf.mxu1 }
 0x23f   : > { %v9162_v44 = vadd.f32 %v7304_v7, %v9062_v11 }
 0x241   : > { %9569 = vst [vmem:[#allocation12_spill] sm:$0xff] %v9162_v44  ;;  %v7305_v39 = vpop.f32.mrf.mxu0 }
 0x242   : > { %v9164_v52 = vpop.f32.mrf.mxu1 }
 0x243   : > { %v7306_v22 = vpop.f32.mrf.mxu0 }
 0x244   : > { %v7307_v5 = vadd.f32 %v7306_v22, %v7305_v39  ;;  %v9166_v13 = vpop.f32.mrf.mxu1 }
 0x245   : > { %v7308_v20 = vpop.f32.mrf.mxu0 }
 0x246   : > { %v9169_v51 = vadd.f32 %v7307_v5, %v9070_v2  ;;  %v9171_v21 = vpop.f32.mrf.mxu1 }
 0x247   : > { %v7309_v16 = vpop.f32.mrf.mxu0 }
 0x248   : > { %9570 = vst [vmem:[#allocation5_spill] sm:$0xff] %v9169_v51  ;;  %v7310_v33 = vadd.f32 %v7309_v16, %v7308_v20  ;;  %v9173_v63 = vpop.f32.mrf.mxu1  ;;  %v9578_v51 = vld [vmem:[#allocation14_spill] sm:$0xff] }
 0x24a   : > { %v9176_v11 = vadd.f32 %v7310_v33, %v9074_v31 }
 0x24b   : > { %v7311_v27 = vpop.f32.mrf.mxu0 }
 0x24c   : > { %9571 = vst [vmem:[#allocation6_spill] sm:$0xff] %v9176_v11  ;;  %v9178_v30 = vpop.f32.mrf.mxu1 }
 0x24d   : > { %v7312_v46 = vpop.f32.mrf.mxu0 }
 0x24e   : > { %v7313_v41 = vadd.f32 %v7312_v46, %v7311_v27  ;;  %v9180_v54 = vpop.f32.mrf.mxu1 }
 0x24f   : > { %v7314_v38 = vpop.f32.mrf.mxu0 }
 0x250   : > { %v9183_v2 = vadd.f32 %v7313_v41, %v9083_v23  ;;  %v9185_v43 = vpop.f32.mrf.mxu1 }
 0x251   : > { %v7315_v7 = vpop.f32.mrf.mxu0 }
 0x252   : > { %9572 = vst [vmem:[#allocation7_spill] sm:$0xff] %v9183_v2  ;;  %v7316_v39 = vadd.f32 %v7315_v7, %v7314_v38  ;;  %v9187_v22 = vpop.f32.mrf.mxu1 }
 0x254   : > { %v9190_v31 = vadd.f32 %v7316_v39, %v9087_v57 }
 0x256   : > { %9573 = vst [vmem:[#allocation9_spill] sm:$0xff] %v9190_v31 }
 0x257   : > { %v7317_v5 = vpop.f32.mrf.mxu0 }
 0x258   : > { %v9192_v20 = vpop.f32.mrf.mxu1 }
 0x259   : > { %v7318_v16 = vpop.f32.mrf.mxu0 }
 0x25a   : > { %v7319_v33 = vadd.f32 %v7318_v16, %v7317_v5  ;;  %v9194_v27 = vpop.f32.mrf.mxu1  ;;  %v7350_v16 = vadd.f32 %v9131_v60, %v9126_v17 }
 0x25b   : > { %v7320_v46 = vpop.f32.mrf.mxu0 }
 0x25c   : > { %v9197_v23 = vadd.f32 %v7319_v33, %v9096_v8  ;;  %v9199_v41 = vpop.f32.mrf.mxu1  ;;  %v7347_v8 = vadd.f32 %v9124_v53, %v9119_v19  ;;  %v5693_v44 = vadd.f32 %v7350_v16, %v8936_v50  ;;  %v9577_v53 = vld [vmem:[#allocation13_spill] sm:$0xff] }
 0x25d   : > { %v7321_v2 = vpop.f32.mrf.mxu0 }
 0x25e   : > { %9574 = vst [vmem:[#allocation8_spill] sm:$0xff] %v9197_v23  ;;  %v7322_v38 = vadd.f32 %v7321_v2, %v7320_v46  ;;  %v9201_v7 = vpop.f32.mrf.mxu1  ;;  %v7344_v46 = vadd.f32 %v9117_v59, %v9112_v36 }
 0x260   : > { %v9204_v57 = vadd.f32 %v7322_v38, %v9105_v37  ;;  %v9206_v39 = vpop.f32.mrf.mxu1  ;;  %v7341_v37 = vadd.f32 %v9110_v42, %v9103_v49  ;;  %v5685_v4 = vadd.f32 %v7344_v46, %v9578_v51 }
 0x262   : > { %9575 = vst [vmem:[#allocation10_spill] sm:$0xff] %v9204_v57  ;;  %v9208_v31 = vpop.f32.mrf.mxu1  ;;  %v9576_v57 = vld [vmem:[#allocation15_spill] sm:$0xff]  ;;  %v5682_v17 = vadd.f32 %v7341_v37, %v9577_v53  ;;  %v7356_v37 = vadd.f32 %v9145_v28, %v9143_v29 }
 0x263   : > { %v5690_v23 = vadd.f32 %v7347_v8, %v9576_v57  ;;  %v7359_v8 = vadd.f32 %v9152_v14, %v9150_v1 }
 0x264   : > { %v9210_v5 = vpop.f32.mrf.mxu1 }
 0x266   : > { %v9216_v2 = vpop.f32.mrf.mxu1 }
 0x268   : > { %v7477_v33 = vpop.f32.mrf.mxu0 }
 0x269   : > { %v9226_v19 = vadd.f32 %v7477_v33, %v5690_v23  ;;  %v7353_v23 = vadd.f32 %v9138_v3, %v9136_v0  ;;  %v5706_v3 = vadd.f32 %v7359_v8, %v9011_v9  ;;  %v7371_v8 = vadd.f32 %v9180_v54, %v9178_v30 }
 0x26a   : > { %v5842_v38 = vpop.f32.mrf.mxu0 }
 0x26b   : > { %v9241_v42 = vadd.f32 %v5842_v38, %v5682_v17  ;;  %v5698_v46 = vadd.f32 %v7353_v23, %v8951_v58  ;;  %v9579_v58 = vld [vmem:[#allocation16_spill] sm:$0xff] }
 0x26c   : > { %v7478_v11 = vpop.f32.mrf.mxu0  ;;  %v5701_v17 = vadd.f32 %v7356_v37, %v9579_v58 }
 0x26d   : > { %v9224_v12 = vpop.f32.mrf.mxu1  ;;  %v9229_v60 = vadd.f32 %v7478_v11, %v5693_v44 }
 0x26e   : > { %v5845_v50 = vpop.f32.mrf.mxu0 }
 0x26f   : > { %v9239_v49 = vpop.f32.mrf.mxu1  ;;  %v6877_v36 = vpack.c.bf16 %v9229_v60, %v9226_v19  ;;  %v9245_v59 = vadd.f32 %v5845_v50, %v5685_v4  ;;  %v7362_v4 = vadd.f32 %v9159_v26, %v9157_v18 }
 0x271   : > { %6972 = vst [vmem:[%s9237_s7 + $0x8] sm:$0xff] %v6877_v36   ;;  %v5969_v44 = vadd.f32 %v9245_v59, %v9241_v42  ;;  %v6872_v51 = vpack.c.bf16 %v9245_v59, %v9241_v42  ;;  %v9252_v11 = vpop.f32.mrf.mxu1  ;;  %v5709_v1 = vadd.f32 %v7362_v4, %v9029_v6  ;;  %v7365_v6 = vadd.f32 %v9166_v13, %v9164_v52 }
 0x272   : > { %v7374_v4 = vadd.f32 %v9187_v22, %v9185_v43  ;;  %v7368_v52 = vadd.f32 %v9173_v63, %v9171_v21 }
 0x273   : > { %v5970_v57 = vadd.f32 %v5969_v44, %v9226_v19  ;;  %6873 = vst [vmem:[%s9237_s7] sm:$0xff] %v6872_v51   ;;  %v9262_v33 = vpop.f32.mrf.mxu1  ;;  %v5714_v13 = vadd.f32 %v7365_v6, %v9047_v55  ;;  %v7383_v6 = vadd.f32 %v9208_v31, %v9206_v39 }
 0x274   : > { %v5725_v54 = vadd.f32 %v7374_v4, %v9067_v40  ;;  %v5717_v55 = vadd.f32 %v7368_v52, %v9053_v48  ;;  %v7380_v4 = vadd.f32 %v9201_v7, %v9199_v41 }
 0x275   : > { %v7481_v16 = vpop.f32.mrf.mxu0  ;;  %v5971_v38 = vadd.f32 %v5970_v57, %v9229_v60 }
 0x276   : > { %v9274_v26 = vadd.f32 %v7481_v16, %v5706_v3  ;;  %v5722_v3 = vadd.f32 %v7371_v8, %v9059_v24 }
 0x277   : > { %v5858_v0 = vpop.f32.mrf.mxu0 }
 0x278   : > { %v9269_v53 = vadd.f32 %v5858_v0, %v5698_v46 }
 0x279   : > { %v7482_v14 = vpop.f32.mrf.mxu0 }
 0x27a   : > { %v5972_v29 = vadd.f32 %v5971_v38, %v9269_v53  ;;  %v9277_v28 = vadd.f32 %v7482_v14, %v5709_v1 }
 0x27b   : > { %v9272_v18 = vpop.f32.mrf.mxu1  ;;  %v5861_v50 = vpop.f32.mrf.mxu0 }
 0x27c   : > { %v6887_v9 = vpack.c.bf16 %v9277_v28, %v9274_v26  ;;  %v9284_v44 = vadd.f32 %v5861_v50, %v5701_v17 }
 0x27d   : > { %v9280_v36 = vpop.f32.mrf.mxu1 }
 0x27e   : > { %6974 = vst [vmem:[%s9237_s7 + $0x18] sm:$0xff] %v6887_v9   ;;  %v5973_v51 = vadd.f32 %v5972_v29, %v9284_v44  ;;  %v6882_v23 = vpack.c.bf16 %v9284_v44, %v9269_v53  ;;  %v7377_v9 = vadd.f32 %v9194_v27, %v9192_v20  ;;  %v5738_v27 = vadd.f32 %v7383_v6, %v9090_v62 }
 0x27f   : > { %v7396_v57 = vpop.f32.mrf.mxu1 }
 0x280   : > { %v5974_v16 = vadd.f32 %v5973_v51, %v9274_v26  ;;  %6973 = vst [vmem:[%s9237_s7 + $0x10] sm:$0xff] %v6882_v23   ;;  %v7386_v51 = vadd.f32 %v9216_v2, %v9210_v5 }
 0x281   : > { %v7397_v38 = vpop.f32.mrf.mxu1 }
 0x282   : > { %v7485_v37 = vpop.f32.mrf.mxu0  ;;  %v5975_v46 = vadd.f32 %v5974_v16, %v9277_v28  ;;  %v5730_v16 = vadd.f32 %v7377_v9, %v9077_v56  ;;  %v5741_v31 = vadd.f32 %v7386_v51, %v9093_v32  ;;  %v5733_v56 = vadd.f32 %v7380_v4, %v9080_v45 }
 0x283   : > { %v9306_v22 = vadd.f32 %v7485_v37, %v5722_v3  ;;  %v7395_v45 = vadd.f32 %v9280_v36, %v9272_v18 }
 0x284   : > { %v5874_v0 = vpop.f32.mrf.mxu0 }
 0x285   : > { %v9303_v30 = vadd.f32 %v5874_v0, %v5714_v13 }
 0x286   : > { %v7486_v43 = vpop.f32.mrf.mxu0 }
 0x287   : > { %v5976_v1 = vadd.f32 %v5975_v46, %v9303_v30  ;;  %v9309_v21 = vadd.f32 %v7486_v43, %v5725_v54  ;;  %v7389_v54 = vadd.f32 %v9239_v49, %v9224_v12  ;;  %v5754_v12 = vadd.f32 %v7395_v45, %v9115_v35 }
 0x288   : > { %v5877_v14 = vpop.f32.mrf.mxu0 }
 0x289   : > { %v6897_v29 = vpack.c.bf16 %v9309_v21, %v9306_v22  ;;  %v9314_v24 = vadd.f32 %v5877_v14, %v5717_v55  ;;  %v7398_v55 = vadd.f32 %v7397_v38, %v7396_v57 }
 0x28a   : > { %v7399_v63 = vpop.f32.mrf.mxu1 }
 0x28b   : > { %6976 = vst [vmem:[%s9237_s7 + $0x28] sm:$0xff] %v6897_v29   ;;  %v5977_v40 = vadd.f32 %v5976_v1, %v9314_v24  ;;  %v6892_v17 = vpack.c.bf16 %v9314_v24, %v9303_v30  ;;  %v7392_v29 = vadd.f32 %v9262_v33, %v9252_v11  ;;  %v5757_v6 = vadd.f32 %v7398_v55, %v9122_v10 }
 0x28c   : > { %v7400_v58 = vpop.f32.mrf.mxu1 }
 0x28d   : > { %v5978_v48 = vadd.f32 %v5977_v40, %v9306_v22  ;;  %6975 = vst [vmem:[%s9237_s7 + $0x20] sm:$0xff] %v6892_v17   ;;  %v5746_v40 = vadd.f32 %v7389_v54, %v9099_v34  ;;  %v5749_v34 = vadd.f32 %v7392_v29, %v9108_v15  ;;  %v7401_v4 = vadd.f32 %v7400_v58, %v7399_v63 }
 0x28e   : > { %v9320_v50 = vpop.f32.mrf.mxu1 }
 0x28f   : > { %v5979_v37 = vadd.f32 %v5978_v48, %v9309_v21 }
 0x290   : > { %v7403_v8 = vpop.f32.mrf.mxu1 }
 0x291   : > { %v7489_v23 = vpop.f32.mrf.mxu0 }
 0x292   : > { %v9338_v2 = vadd.f32 %v7489_v23, %v5738_v27 }
 0x293   : > { %v5890_v20 = vpop.f32.mrf.mxu0 }
 0x294   : > { %v9335_v52 = vadd.f32 %v5890_v20, %v5730_v16 }
 0x295   : > { %v7490_v39 = vpop.f32.mrf.mxu0 }
 0x296   : > { %v5980_v13 = vadd.f32 %v5979_v37, %v9335_v52  ;;  %v9341_v41 = vadd.f32 %v7490_v39, %v5741_v31 }
 0x297   : > { %v7405_v5 = vpop.f32.mrf.mxu1  ;;  %v5893_v7 = vpop.f32.mrf.mxu0 }
 0x298   : > { %v6907_v62 = vpack.c.bf16 %v9341_v41, %v9338_v2  ;;  %v9346_v0 = vadd.f32 %v5893_v7, %v5733_v56  ;;  %v5762_v56 = vadd.f32 %v7401_v4, %v9129_v47  ;;  %v9580_v47 = vld [vmem:[#allocation4_spill] sm:$0xff]  ;;  %v9583_v4 = vld [vmem:[#allocation6_spill] sm:$0xff] }
 0x299   : > { %v7406_v46 = vpop.f32.mrf.mxu1 }
 0x29a   : > { %6978 = vst [vmem:[%s9237_s7 + $0x38] sm:$0xff] %v6907_v62   ;;  %v5981_v32 = vadd.f32 %v5980_v13, %v9346_v0  ;;  %v6902_v3 = vpack.c.bf16 %v9346_v0, %v9335_v52  ;;  %v7407_v20 = vadd.f32 %v7406_v46, %v7405_v5  ;;  %v7404_v13 = vadd.f32 %v7403_v8, %v9320_v50 }
 0x29b   : > { %v7408_v43 = vpop.f32.mrf.mxu1 }
 0x29c   : > { %v5982_v1 = vadd.f32 %v5981_v32, %v9338_v2  ;;  %6977 = vst [vmem:[%s9237_s7 + $0x30] sm:$0xff] %v6902_v3   ;;  %v5770_v7 = vadd.f32 %v7407_v20, %v9141_v25  ;;  %v5765_v8 = vadd.f32 %v7404_v13, %v9580_v47  ;;  %v9584_v13 = vld [vmem:[#allocation12_spill] sm:$0xff] }
 0x29d   : > { %v7409_v9 = vpop.f32.mrf.mxu1 }
 0x29e   : > { %v5983_v17 = vadd.f32 %v5982_v1, %v9341_v41  ;;  %v7410_v27 = vadd.f32 %v7409_v9, %v7408_v43 }
 0x29f   : > { %v7493_v14 = vpop.f32.mrf.mxu0 }
 0x2a0   : > { %v9366_v18 = vadd.f32 %v7493_v14, %v5754_v12  ;;  %v5773_v5 = vadd.f32 %v7410_v27, %v9148_v61 }
 0x2a1   : > { %v5906_v48 = vpop.f32.mrf.mxu0 }
 0x2a2   : > { %v9363_v49 = vadd.f32 %v5906_v48, %v5746_v40 }
 0x2a3   : > { %v7494_v51 = vpop.f32.mrf.mxu0 }
 0x2a4   : > { %v5984_v36 = vadd.f32 %v5983_v17, %v9363_v49  ;;  %v9369_v11 = vadd.f32 %v7494_v51, %v5757_v6 }
 0x2a5   : > { %v5909_v57 = vpop.f32.mrf.mxu0 }
 0x2a6   : > { %v7411_v33 = vpop.f32.mrf.mxu1  ;;  %v6917_v38 = vpack.c.bf16 %v9369_v11, %v9366_v18  ;;  %v9374_v35 = vadd.f32 %v5909_v57, %v5749_v34  ;;  %v9582_v57 = vld [vmem:[#allocation11_spill] sm:$0xff] }
 0x2a8   : > { %v7412_v23 = vpop.f32.mrf.mxu1  ;;  %6980 = vst [vmem:[%s9237_s7 + $0x48] sm:$0xff] %v6917_v38   ;;  %v5985_v10 = vadd.f32 %v5984_v36, %v9374_v35  ;;  %v6912_v16 = vpack.c.bf16 %v9374_v35, %v9363_v49  ;;  %v9581_v36 = vld [vmem:[#allocation5_spill] sm:$0xff] }
 0x2a9   : > { %v7413_v40 = vadd.f32 %v7412_v23, %v7411_v33 }
 0x2aa   : > { %v7414_v37 = vpop.f32.mrf.mxu1  ;;  %v5986_v15 = vadd.f32 %v5985_v10, %v9366_v18  ;;  %6979 = vst [vmem:[%s9237_s7 + $0x40] sm:$0xff] %v6912_v16  }
 0x2ab   : > { %v5778_v38 = vadd.f32 %v7413_v40, %v9582_v57 }
 0x2ac   : > { %v7497_v31 = vpop.f32.mrf.mxu0  ;;  %v7415_v39 = vpop.f32.mrf.mxu1  ;;  %v5987_v63 = vadd.f32 %v5986_v15, %v9369_v11 }
 0x2ad   : > { %v9389_v3 = vadd.f32 %v7497_v31, %v5770_v7  ;;  %v7416_v51 = vadd.f32 %v7415_v39, %v7414_v37 }
 0x2ae   : > { %v5922_v58 = vpop.f32.mrf.mxu0 }
 0x2af   : > { %v9386_v62 = vadd.f32 %v5922_v58, %v5762_v56  ;;  %v5781_v56 = vadd.f32 %v7416_v51, %v9584_v13  ;;  %v9588_v13 = vld [vmem:[#allocation10_spill] sm:$0xff] }
 0x2b0   : > { %v7498_v46 = vpop.f32.mrf.mxu0 }
 0x2b1   : > { %v5988_v54 = vadd.f32 %v5987_v63, %v9386_v62  ;;  %v9392_v50 = vadd.f32 %v7498_v46, %v5773_v5 }
 0x2b2   : > { %v7417_v32 = vpop.f32.mrf.mxu1  ;;  %v5925_v43 = vpop.f32.mrf.mxu0 }
 0x2b3   : > { %v6927_v25 = vpack.c.bf16 %v9392_v50, %v9389_v3  ;;  %v9397_v45 = vadd.f32 %v5925_v43, %v5765_v8  ;;  %v9585_v8 = vld [vmem:[#allocation7_spill] sm:$0xff] }
 0x2b4   : > { %v7418_v1 = vpop.f32.mrf.mxu1 }
 0x2b5   : > { %6982 = vst [vmem:[%s9237_s7 + $0x58] sm:$0xff] %v6927_v25   ;;  %v5989_v61 = vadd.f32 %v5988_v54, %v9397_v45  ;;  %v6922_v14 = vpack.c.bf16 %v9397_v45, %v9386_v62  ;;  %v7419_v9 = vadd.f32 %v7418_v1, %v7417_v32 }
 0x2b6   : > { %v7420_v55 = vpop.f32.mrf.mxu1 }
 0x2b7   : > { %v5990_v17 = vadd.f32 %v5989_v61, %v9389_v3  ;;  %6981 = vst [vmem:[%s9237_s7 + $0x50] sm:$0xff] %v6922_v14   ;;  %v5786_v34 = vadd.f32 %v7419_v9, %v9581_v36 }
 0x2b8   : > { %v7421_v29 = vpop.f32.mrf.mxu1 }
 0x2b9   : > { %v7422_v48 = vadd.f32 %v7421_v29, %v7420_v55  ;;  %v5991_v12 = vadd.f32 %v5990_v17, %v9392_v50  ;;  %v9586_v29 = vld [vmem:[#allocation9_spill] sm:$0xff] }
 0x2bb   : > { %v7501_v6 = vpop.f32.mrf.mxu0  ;;  %v5789_v10 = vadd.f32 %v7422_v48, %v9583_v4  ;;  %v9587_v4 = vld [vmem:[#allocation8_spill] sm:$0xff] }
 0x2bc   : > { %v5947_v23 = vadd.f32 %v7501_v6, %v5786_v34 }
 0x2bd   : > { %v5938_v16 = vpop.f32.mrf.mxu0 }
 0x2be   : > { %v5939_v20 = vadd.f32 %v5938_v16, %v5778_v38  ;;  %v7423_v27 = vpop.f32.mrf.mxu1 }
 0x2bf   : > { %v7502_v33 = vpop.f32.mrf.mxu0 }
 0x2c0   : > { %v5992_v15 = vadd.f32 %v5991_v12, %v5939_v20  ;;  %v5950_v31 = vadd.f32 %v7502_v33, %v5789_v10  ;;  %v7424_v63 = vpop.f32.mrf.mxu1 }
 0x2c1   : > { %v5941_v58 = vpop.f32.mrf.mxu0  ;;  %v7425_v7 = vadd.f32 %v7424_v63, %v7423_v27 }
 0x2c2   : > { %v6937_v37 = vpack.c.bf16 %v5950_v31, %v5947_v23  ;;  %v5942_v39 = vadd.f32 %v5941_v58, %v5781_v56  ;;  %v7426_v5 = vpop.f32.mrf.mxu1 }
 0x2c3   : > { %v5794_v43 = vadd.f32 %v7425_v7, %v9585_v8 }
 0x2c4   : > { %6984 = vst [vmem:[%s9237_s7 + $0x68] sm:$0xff] %v6937_v37   ;;  %v5993_v46 = vadd.f32 %v5992_v15, %v5942_v39  ;;  %v6932_v32 = vpack.c.bf16 %v5942_v39, %v5939_v20  ;;  %v7427_v54 = vpop.f32.mrf.mxu1 }
 0x2c5   : > { %v7428_v1 = vadd.f32 %v7427_v54, %v7426_v5 }
 0x2c6   : > { %v5994_v47 = vadd.f32 %v5993_v46, %v5947_v23  ;;  %6983 = vst [vmem:[%s9237_s7 + $0x60] sm:$0xff] %v6932_v32  }
 0x2c7   : > { %v5797_v40 = vadd.f32 %v7428_v1, %v9586_v29 }
 0x2c8   : > { %v7505_v25 = vpop.f32.mrf.mxu0  ;;  %v5995_v55 = vadd.f32 %v5994_v47, %v5950_v31 }
 0x2ca   : > { %v5954_v61 = vpop.f32.mrf.mxu0 }
 0x2cb   : > { %v5955_v14 = vadd.f32 %v5954_v61, %v5794_v43 }
 0x2cc   : > { %v7506_v17 = vpop.f32.mrf.mxu0  ;;  %v7429_v48 = vpop.f32.mrf.mxu1 }
 0x2cd   : > { %v5996_v9 = vadd.f32 %v5995_v55, %v5955_v14 }
 0x2ce   : > { %v5957_v12 = vpop.f32.mrf.mxu0  ;;  %v7430_v51 = vpop.f32.mrf.mxu1 }
 0x2cf   : > { %v5958_v6 = vadd.f32 %v5957_v12, %v5797_v40  ;;  %v7431_v57 = vadd.f32 %v7430_v51, %v7429_v48 }
 0x2d0   : > { %v7432_v38 = vpop.f32.mrf.mxu1 }
 0x2d1   : > { %v5997_v36 = vadd.f32 %v5996_v9, %v5958_v6  ;;  %v6942_v34 = vpack.c.bf16 %v5958_v6, %v5955_v14  ;;  %v5802_v10 = vadd.f32 %v7431_v57, %v9587_v4 }
 0x2d2   : > { %v7433_v16 = vpop.f32.mrf.mxu1 }
 0x2d3   : > { %6985 = vst [vmem:[%s9237_s7 + $0x70] sm:$0xff] %v6942_v34   ;;  %v5963_v27 = vadd.f32 %v7505_v25, %v5802_v10  ;;  %v7434_v33 = vadd.f32 %v7433_v16, %v7432_v38 }
 0x2d5   : > { %v5998_v15 = vadd.f32 %v5997_v36, %v5963_v27  ;;  %v5805_v56 = vadd.f32 %v7434_v33, %v9588_v13 }
 0x2d7   : > { %v5966_v63 = vadd.f32 %v7506_v17, %v5805_v56 }
 0x2d9   : > { %v5999_v58 = vadd.f32 %v5998_v15, %v5966_v63  ;;  %v6947_v37 = vpack.c.bf16 %v5966_v63, %v5963_v27 }
 0x2db   : > { %v6000_v7 = vrot.slane %v5999_v58, 4  ;;  %6986 = vst [vmem:[%s9237_s7 + $0x78] sm:$0xff] %v6947_v37  }
 0x2dd   : > { %v6001_v5 = vadd.f32 %v6000_v7, %v5999_v58 }
 0x2df   : > { %v6002_v46 = vrot.slane %v6001_v5, 2 }
 0x2e1   : > { %v6003_v32 = vadd.f32 %v6002_v46, %v6001_v5 }
 0x2e3   : > { %v6004_v54 = vrot.slane %v6003_v32, 1 }
 0x2e5   : > { %v6005_v47 = vadd.f32 %v6004_v54, %v6003_v32 }
 0x2e7   : > { %6109 = vst [vmem:[%s9422_s10] sm:$0x1] %v6005_v47  ;;  %v9425_v8 = vmul.f32 0.00390625, %v6005_v47 }
 0x2e9   : > { %v9429_v43 = vsub.f32 %v9386_v62, %v9425_v8  ;;  %v9433_v1 = vsub.f32 %v9397_v45, %v9425_v8  ;;  %v9437_v25 = vsub.f32 %v9389_v3, %v9425_v8  ;;  %v9441_v55 = vsub.f32 %v9392_v50, %v9425_v8 }
 0x2ea   : > { %v9444_v61 = vsub.f32 %v5939_v20, %v9425_v8  ;;  %v9447_v29 = vsub.f32 %v5942_v39, %v9425_v8  ;;  %v9450_v62 = vsub.f32 %v5947_v23, %v9425_v8  ;;  %v9453_v45 = vsub.f32 %v5950_v31, %v9425_v8 }
 0x2eb   : > { %v9456_v40 = vsub.f32 %v5955_v14, %v9425_v8  ;;  %v9459_v3 = vsub.f32 %v5958_v6, %v9425_v8  ;;  %v9462_v50 = vsub.f32 %v5963_v27, %v9425_v8  ;;  %v9465_v20 = vsub.f32 %v5966_v63, %v9425_v8 }
 0x2ec   : > { %v6008_v39 = vsub.f32 %v9241_v42, %v9425_v8  ;;  %v6009_v23 = vsub.f32 %v9245_v59, %v9425_v8  ;;  %v6010_v31 = vsub.f32 %v9226_v19, %v9425_v8  ;;  %v6011_v9 = vsub.f32 %v9229_v60, %v9425_v8 }
 0x2ed   : > { %v6012_v48 = vsub.f32 %v9269_v53, %v9425_v8  ;;  %v6013_v51 = vsub.f32 %v9284_v44, %v9425_v8  ;;  %v6014_v59 = vsub.f32 %v9274_v26, %v9425_v8  ;;  %v6015_v57 = vsub.f32 %v9277_v28, %v9425_v8 }
 0x2ee   : > { %v6040_v14 = vmul.f32 %v6008_v39, %v6008_v39  ;;  %v6041_v17 = vmul.f32 %v6009_v23, %v6009_v23  ;;  %v6042_v12 = vmul.f32 %v6010_v31, %v6010_v31  ;;  %v6043_v42 = vmul.f32 %v6011_v9, %v6011_v9 }
 0x2ef   : > { %v6044_v34 = vmul.f32 %v6012_v48, %v6012_v48  ;;  %v6045_v38 = vmul.f32 %v6013_v51, %v6013_v51  ;;  %v6016_v53 = vsub.f32 %v9303_v30, %v9425_v8  ;;  %v6046_v4 = vmul.f32 %v6014_v59, %v6014_v59 }
 0x2f0   : > { %v6072_v6 = vadd.f32 %v6041_v17, %v6040_v14  ;;  %v6017_v44 = vsub.f32 %v9314_v24, %v9425_v8  ;;  %v6047_v16 = vmul.f32 %v6015_v57, %v6015_v57  ;;  %v6018_v26 = vsub.f32 %v9306_v22, %v9425_v8 }
 0x2f1   : > { %v6048_v33 = vmul.f32 %v6016_v53, %v6016_v53  ;;  %v6019_v28 = vsub.f32 %v9309_v21, %v9425_v8  ;;  %v6020_v30 = vsub.f32 %v9335_v52, %v9425_v8  ;;  %v6021_v24 = vsub.f32 %v9346_v0, %v9425_v8 }
 0x2f2   : > { %v6073_v36 = vadd.f32 %v6072_v6, %v6042_v12  ;;  %v6049_v13 = vmul.f32 %v6017_v44, %v6017_v44  ;;  %v6050_v63 = vmul.f32 %v6018_v26, %v6018_v26  ;;  %v6022_v22 = vsub.f32 %v9338_v2, %v9425_v8 }
 0x2f3   : > { %v6051_v37 = vmul.f32 %v6019_v28, %v6019_v28  ;;  %v6052_v5 = vmul.f32 %v6020_v30, %v6020_v30  ;;  %v6023_v21 = vsub.f32 %v9341_v41, %v9425_v8  ;;  %v6053_v32 = vmul.f32 %v6021_v24, %v6021_v24 }
 0x2f4   : > { %v6074_v19 = vadd.f32 %v6073_v36, %v6043_v42  ;;  %v6024_v52 = vsub.f32 %v9363_v49, %v9425_v8  ;;  %v6054_v47 = vmul.f32 %v6022_v22, %v6022_v22  ;;  %v6025_v0 = vsub.f32 %v9374_v35, %v9425_v8 }
 0x2f5   : > { %v6055_v23 = vmul.f32 %v6023_v21, %v6023_v21  ;;  %v6026_v2 = vsub.f32 %v9366_v18, %v9425_v8  ;;  %v6027_v41 = vsub.f32 %v9369_v11, %v9425_v8  ;;  %v6060_v42 = vmul.f32 %v9429_v43, %v9429_v43 }
 0x2f6   : > { %v6075_v60 = vadd.f32 %v6074_v19, %v6044_v34  ;;  %v6056_v14 = vmul.f32 %v6024_v52, %v6024_v52  ;;  %v6057_v9 = vmul.f32 %v6025_v0, %v6025_v0  ;;  %v6061_v36 = vmul.f32 %v9433_v1, %v9433_v1 }
 0x2f7   : > { %v6058_v12 = vmul.f32 %v6026_v2, %v6026_v2  ;;  %v6059_v49 = vmul.f32 %v6027_v41, %v6027_v41  ;;  %v6062_v18 = vmul.f32 %v9437_v25, %v9437_v25  ;;  %v6063_v11 = vmul.f32 %v9441_v55, %v9441_v55 }
 0x2f8   : > { %v6076_v10 = vadd.f32 %v6075_v60, %v6045_v38  ;;  %v6064_v19 = vmul.f32 %v9444_v61, %v9444_v61  ;;  %v6065_v43 = vmul.f32 %v9447_v29, %v9447_v29  ;;  %v6066_v1 = vmul.f32 %v9450_v62, %v9450_v62 }
 0x2f9   : > { %v6067_v25 = vmul.f32 %v9453_v45, %v9453_v45  ;;  %v6068_v55 = vmul.f32 %v9456_v40, %v9456_v40  ;;  %v6069_v61 = vmul.f32 %v9459_v3, %v9459_v3  ;;  %v6070_v29 = vmul.f32 %v9462_v50, %v9462_v50 }
 0x2fa   : > { %v6077_v27 = vadd.f32 %v6076_v10, %v6046_v4  ;;  %v6071_v62 = vmul.f32 %v9465_v20, %v9465_v20 }
 0x2fc   : > { %v6078_v15 = vadd.f32 %v6077_v27, %v6047_v16 }
 0x2fe   : > { %v6079_v56 = vadd.f32 %v6078_v15, %v6048_v33 }
 0x300   : > { %v6080_v58 = vadd.f32 %v6079_v56, %v6049_v13 }
 0x302   : > { %v6081_v7 = vadd.f32 %v6080_v58, %v6050_v63 }
 0x304   : > { %v6082_v46 = vadd.f32 %v6081_v7, %v6051_v37 }
 0x306   : > { %v6083_v54 = vadd.f32 %v6082_v46, %v6052_v5 }
 0x308   : > { %v6084_v39 = vadd.f32 %v6083_v54, %v6053_v32 }
 0x30a   : > { %v6085_v31 = vadd.f32 %v6084_v39, %v6054_v47 }
 0x30c   : > { %v6086_v17 = vadd.f32 %v6085_v31, %v6055_v23 }
 0x30e   : > { %v6087_v48 = vadd.f32 %v6086_v17, %v6056_v14 }
 0x310   : > { %v6088_v6 = vadd.f32 %v6087_v48, %v6057_v9 }
 0x312   : > { %v6089_v51 = vadd.f32 %v6088_v6, %v6058_v12 }
 0x314   : > { %v6090_v35 = vadd.f32 %v6089_v51, %v6059_v49 }
 0x316   : > { %v6091_v59 = vadd.f32 %v6090_v35, %v6060_v42 }
 0x318   : > { %v6092_v34 = vadd.f32 %v6091_v59, %v6061_v36 }
 0x31a   : > { %v6093_v8 = vadd.f32 %v6092_v34, %v6062_v18 }
 0x31c   : > { %v6094_v57 = vadd.f32 %v6093_v8, %v6063_v11 }
 0x31e   : > { %v6095_v38 = vadd.f32 %v6094_v57, %v6064_v19 }
 0x320   : > { %v6096_v60 = vadd.f32 %v6095_v38, %v6065_v43 }
 0x322   : > { %v6097_v53 = vadd.f32 %v6096_v60, %v6066_v1 }
 0x324   : > { %v6098_v4 = vadd.f32 %v6097_v53, %v6067_v25 }
 0x326   : > { %v6099_v10 = vadd.f32 %v6098_v4, %v6068_v55 }
 0x328   : > { %v6100_v44 = vadd.f32 %v6099_v10, %v6069_v61 }
 0x32a   : > { %v6101_v16 = vadd.f32 %v6100_v44, %v6070_v29 }
 0x32c   : > { %v6102_v27 = vadd.f32 %v6101_v16, %v6071_v62 }
 0x32e   : > { %v6103_v45 = vrot.slane %v6102_v27, 4 }
 0x330   : > { %v6104_v26 = vadd.f32 %v6103_v45, %v6102_v27 }
 0x332   : > { %v6105_v33 = vrot.slane %v6104_v26, 2 }
 0x334   : > { %v6106_v15 = vadd.f32 %v6105_v33, %v6104_v26 }
 0x336   : > { %v6107_v28 = vrot.slane %v6106_v15, 1 }
 0x338   : > { %v6108_v40 = vadd.f32 %v6107_v28, %v6106_v15 }
 0x33a   : > { %6110 = vst [vmem:[%s9422_s10 + $0x1] sm:$0x1] %v6108_v40 }
 0x33b PF: > { %s16_s18 = sadd.s32 1, %s7822_s18  }
 0x33c   : > { %p13_p4 = scmp.ge.s32.totalorder %s16_s18, 4  }
 0x33e   :  { %15 = sbr.rel (!%p13_p4) target bundleno = 1 (0x1), region = 81 }

</bundles_post_ra>
